<compile_context>
chip_gen: v6e
topology: v6e:2x2x1
jax: 0.10.0
libtpu: 0.0.40
codegen_flags: <defaults>
</compile_context>

<pallas_src>
import functools
import math

import jax
import jax.numpy as jnp
from jax.experimental import pallas as pl
from jax.experimental.pallas import tpu as pltpu


def _digitcaps_kernel(x_ref, w_ref, b_ref, out_ref, *, num_iters, C, M, Cout):
    # x_ref:   (C*Cin, Bt)        -- batch tile on lanes, bf16 MXU operand
    # w_ref:   (C*M*Cout, C*Cin)  -- block-diagonal weight, bf16 MXU operand
    # b_ref:   (M, Cout, 1)       -- f32
    # out_ref: (M, Cout, Bt)      -- f32, lane-dense
    x2 = x_ref[...]
    w_bd = w_ref[...]
    Bt = x2.shape[-1]
    MC = M * Cout

    # Single block-diagonal MXU matmul (bf16 operands, f32 accumulation)
    # replaces C tiny K=Cin sub-matmuls: u_hat[c*MC + m*Cout + o, b].
    u_hat = jnp.dot(w_bd, x2, preferred_element_type=jnp.float32)   # (C*MC, Bt)
    u4 = u_hat.reshape(C, M, Cout, Bt)                              # (C, M, Cout, Bt)

    # Hoisted bias broadcast (JAX does not CSE broadcast_in_dim inside the
    # statically-unrolled routing loop).
    bias_b = jnp.broadcast_to(b_ref[...], (M, Cout, Bt))            # (M, Cout, Bt)

    bij = jnp.zeros((C, M, Bt), jnp.float32)
    cij = jnp.full((C, M, Bt), 1.0 / M, jnp.float32)

    vj = jnp.zeros((M, Cout, Bt), jnp.float32)
    for it in range(num_iters):  # static unroll; `iter` is a Python int
        # sj[m,o,b] = sum_c cij[c,m,b] * u_hat[c,m,o,b] + bias[m,o]
        sj = jnp.sum(cij[:, :, None, :] * u4, axis=0) + bias_b      # (M, Cout, Bt)
        # squash along Cout (PyTorch dim=3): v = (|s|^2/(1+|s|^2)) * s/|s|,
        # fused into one per-(m,b) coefficient so only a single full-size
        # (M,Cout,Bt) multiply remains in the VALU slot.
        norm_sq = jnp.sum(sj * sj, axis=1, keepdims=True)           # (M, 1, Bt)
        coef = (norm_sq * pl.reciprocal(1.0 + norm_sq, approx=True)
                * jax.lax.rsqrt(norm_sq + 1e-8))                    # (M, 1, Bt)
        vj = coef * sj                                              # (M, Cout, Bt)
        if it < num_iters - 1:
            # agreement[c,m,b] = <u_hat[c,m,:,b], vj[m,:,b]>  (sublane reduce)
            agree = jnp.sum(u4 * vj[None, :, :, :], axis=2)         # (C, M, Bt)
            bij = bij + agree
            # softmax over M; exact divide on the tiny (C,1,Bt) denominator
            # keeps routing weights closer to the reference than approx recip.
            bmax = jnp.max(bij, axis=1, keepdims=True)              # (C, 1, Bt)
            e = jnp.exp(bij - bmax)
            cij = e / jnp.sum(e, axis=1, keepdims=True)

    out_ref[...] = vj.astype(out_ref.dtype)                         # lane-dense store


def _pick_batch_tile(bs, block_b, max_block):
    """Generation-aware batch tile selection (lanes per grid step)."""
    bs128 = max(128, ((bs + 127) // 128) * 128)
    if block_b is not None:
        Bt = max(128, ((int(block_b) + 127) // 128) * 128)
    else:
        dual_tc = False
        try:
            kind = jax.devices()[0].device_kind.lower()
            dual_tc = ("v7" in kind) or ("7x" in kind)
        except Exception:
            pass
        if dual_tc and bs128 >= 256:
            # v7x: keep an even step count so megacore splits the batch axis.
            n_pairs = max(1, (bs128 + 2 * max_block - 1) // (2 * max_block))
            Bt = (((bs128 + 2 * n_pairs - 1) // (2 * n_pairs)) + 127) // 128 * 128
            Bt = max(128, min(Bt, max_block))
        else:
            # v5e/v6e: single TensorCore -> one big lane-dense tile amortizes
            # the ~0.35 us/step grid cost; cap keeps working set well inside
            # the default scoped VMEM on every generation.
            Bt = min(max_block, bs128)
    n_steps = (bs128 + Bt - 1) // Bt
    bs_pad = n_steps * Bt
    return Bt, n_steps, bs_pad


def digitcaps_forward(x, weight, bias, *, shared_weights, num_iters,
                      block_b=None, max_block=1024,
                      matmul_dtype=jnp.bfloat16):
    """x: (bs, C, Cin); weight: (1, C//shared, M, Cout, Cin); bias: (1,1,M,Cout,1)."""
    bs, C, Cin = x.shape
    M, Cout = weight.shape[2], weight.shape[3]
    MC = M * Cout

    # torch .repeat(1, shared_weights, 1, 1, 1) == tile along the capsule axis.
    w_full = jnp.tile(weight, (1, shared_weights, 1, 1, 1))[0]       # (C, M, Cout, Cin)
    w2 = w_full.reshape(C, MC, Cin).astype(jnp.float32)
    # Block-diagonal weight for a single MXU matmul:
    #   W_bd[c*MC + mo, d*Cin + i] = w2[c, mo, i] if c == d else 0
    eye_c = jnp.eye(C, dtype=jnp.float32)
    w_bd = jnp.einsum("cmi,cd->cmdi", w2, eye_c).reshape(C * MC, C * Cin)
    w_bd = w_bd.astype(matmul_dtype)                                 # (C*MC, C*Cin)
    b3 = bias[0, 0].astype(jnp.float32)                              # (M, Cout, 1)

    Bt, n_steps, bs_pad = _pick_batch_tile(bs, block_b, max_block)

    # Batch on lanes: one bf16 transpose+pad on the wrapper side (halves HBM
    # traffic for the dominant input); row index = c*Cin + i matches w_bd cols.
    xT = jnp.transpose(x.reshape(bs, C * Cin).astype(matmul_dtype))  # (C*Cin, bs)
    if bs_pad != bs:
        xT = jnp.pad(xT, ((0, 0), (0, bs_pad - bs)))

    kernel = functools.partial(_digitcaps_kernel, num_iters=num_iters,
                               C=C, M=M, Cout=Cout)
    out_t = pl.pallas_call(
        kernel,
        out_shape=jax.ShapeDtypeStruct((M, Cout, bs_pad), jnp.float32),
        grid_spec=pltpu.PrefetchScalarGridSpec(
            num_scalar_prefetch=0,
            grid=(n_steps,),
            in_specs=[
                pl.BlockSpec((C * Cin, Bt), lambda b: (0, b)),
                # Constant index maps: weight/bias are not re-fetched per step.
                pl.BlockSpec((C * MC, C * Cin), lambda b: (0, 0)),
                pl.BlockSpec((M, Cout, 1), lambda b: (0, 0, 0)),
            ],
            out_specs=pl.BlockSpec((M, Cout, Bt), lambda b: (0, 0, b)),
        ),
        compiler_params=pltpu.CompilerParams(
            dimension_semantics=("parallel",)),
    )(xT, w_bd, b3)

    # (M, Cout, bs_pad) -> (bs, M, Cout)
    return jnp.transpose(out_t[:, :, :bs], (2, 0, 1))


def digitcaps_reference(x, weight, bias, *, shared_weights, num_iters):
    """Pure-JAX f32 reference mirroring the PyTorch forward exactly."""
    bs, C, Cin = x.shape
    w_full = jnp.tile(weight, (1, shared_weights, 1, 1, 1))          # (1, C, M, Cout, Cin)
    M, Cout = w_full.shape[2], w_full.shape[3]
    xe = x[:, :, None, :, None]                                      # (bs, C, 1, Cin, 1)
    u_hat = jnp.matmul(w_full, xe)                                   # (bs, C, M, Cout, 1)
    bij = jnp.zeros((bs, C, M, 1), jnp.float32)
    cij = jnp.full((bs, C, M, 1, 1), 1.0 / M, jnp.float32)
    vj = None
    for it in range(num_iters):
        sj = jnp.sum(cij * u_hat, axis=1, keepdims=True) + bias      # (bs, 1, M, Cout, 1)
        norm_sq = jnp.sum(sj * sj, axis=3, keepdims=True)
        vj = (norm_sq / (1.0 + norm_sq)) * sj * jax.lax.rsqrt(norm_sq + 1e-8)
        if it < num_iters - 1:
            agree = jnp.matmul(jnp.swapaxes(u_hat, 3, 4), vj)[..., 0]  # (bs, C, M, 1)
            bij = bij + agree
            cij = jax.nn.softmax(bij, axis=2)[..., None]
    return vj[:, 0, :, :, 0]


if __name__ == "__main__":
    # Shapes consistent with DigitCaps(in_dim=8, out_dim=4, in_caps_dim=8,
    # out_caps_dim=16, iter=3, shared_weights=2). Batch of 256 gives one
    # 256-lane step on v5e/v6e and two 128-lane "parallel" steps on v7x.
    bs, C, M, Cin, Cout = 256, 8, 4, 8, 16
    shared_weights = 2
    num_iters = 3

    key = jax.random.PRNGKey(0)
    kx, kw, kb = jax.random.split(key, 3)

    # Deterministic parameter init matching nn.init.uniform_(-b, b), b = sqrt(1/Cin)
    bnd = math.sqrt(1.0 / Cin)
    weight = jax.random.uniform(kw, (1, C // shared_weights, M, Cout, Cin),
                                jnp.float32, minval=-bnd, maxval=bnd)
    bias = jax.random.uniform(kb, (1, 1, M, Cout, 1),
                              jnp.float32, minval=-bnd, maxval=bnd)
    x = jax.random.normal(kx, (bs, C, Cin), jnp.float32)

    out = digitcaps_forward(x, weight, bias,
                            shared_weights=shared_weights, num_iters=num_iters)
    out = jax.block_until_ready(out)

    ref = digitcaps_reference(x, weight, bias,
                              shared_weights=shared_weights, num_iters=num_iters)
    assert out.shape == (bs, M, Cout)
    # bf16 MXU operands (f32 accumulation) + approx EUP reciprocal in the
    # squash compound through the routing iterations -> compare at 3e-2.
    assert jnp.allclose(out, ref, atol=3e-2, rtol=3e-2), "mismatch vs reference"

    print("KERNEL_OK")
</pallas_src>

<mosaic_0001>
module attributes {stable_mosaic.version = 11 : i64} {
  func.func @_digitcaps_kernel(%arg0: i32, %arg1: memref<64x256xbf16, #tpu.memory_space<vmem>>, %arg2: memref<512x64xbf16, #tpu.memory_space<vmem>>, %arg3: memref<4x16x1xf32, #tpu.memory_space<vmem>>, %arg4: memref<4x16x256xf32, #tpu.memory_space<vmem>>) attributes {dimension_semantics = [#tpu.dimension_semantics<parallel>], iteration_bounds = array<i64: 1>, scalar_prefetch = 0 : i64, scratch_operands = 0 : i64, tpu.core_type = #tpu.core_type<tc>, window_params = [{transform_indices = @transform_0, window_bounds = array<i64: 64, 256>}, {pipeline_mode = #tpu.pipeline_mode<synchronous>, transform_indices = @transform_1, window_bounds = array<i64: 512, 64>}, {pipeline_mode = #tpu.pipeline_mode<synchronous>, transform_indices = @transform_2, window_bounds = array<i64: 4, 16, 1>}, {transform_indices = @transform_3, window_bounds = array<i64: 4, 16, 256>}]} {
    %c0 = arith.constant 0 : index
    %c0_0 = arith.constant 0 : index
    %0 = vector.load %arg1[%c0, %c0_0] : memref<64x256xbf16, #tpu.memory_space<vmem>>, vector<64x256xbf16>
    %c0_1 = arith.constant 0 : index
    %c0_2 = arith.constant 0 : index
    %1 = vector.load %arg2[%c0_1, %c0_2] : memref<512x64xbf16, #tpu.memory_space<vmem>>, vector<512x64xbf16>
    %cst = arith.constant dense<0.000000e+00> : vector<512x256xf32>
    %2 = tpu.matmul %1, %0, %cst {dimension_numbers = #tpu.dot_dimension_numbers<[1], [0], [0], [1], [0, 0, 1, 1], [], []>} : vector<512x64xbf16>, vector<64x256xbf16>, vector<512x256xf32> -> vector<512x256xf32>
    %3 = vector.shape_cast %2 : vector<512x256xf32> to vector<8x4x16x256xf32>
    %c0_3 = arith.constant 0 : index
    %c0_4 = arith.constant 0 : index
    %c0_5 = arith.constant 0 : index
    %4 = vector.load %arg3[%c0_3, %c0_4, %c0_5] : memref<4x16x1xf32, #tpu.memory_space<vmem>>, vector<4x16x1xf32>
    %5 = vector.shape_cast %4 : vector<4x16x1xf32> to vector<4x16x1xf32>
    %6 = vector.broadcast %5 : vector<4x16x1xf32> to vector<4x16x256xf32>
    %cst_6 = arith.constant 0.000000e+00 : f32
    %7 = vector.broadcast %cst_6 : f32 to vector<8x4x256xf32>
    %cst_7 = arith.constant 2.500000e-01 : f32
    %8 = vector.broadcast %cst_7 : f32 to vector<8x4x256xf32>
    %9 = vector.shape_cast %8 : vector<8x4x256xf32> to vector<8x4x1x256xf32>
    %10 = vector.broadcast %9 : vector<8x4x1x256xf32> to vector<8x4x16x256xf32>
    %11 = arith.mulf %10, %3 : vector<8x4x16x256xf32>
    %cst_8 = arith.constant dense<0.000000e+00> : vector<4x16x256xf32>
    %12 = vector.multi_reduction <add>, %11, %cst_8 [0] : vector<8x4x16x256xf32> to vector<4x16x256xf32>
    %13 = arith.addf %12, %6 : vector<4x16x256xf32>
    %14 = arith.mulf %13, %13 : vector<4x16x256xf32>
    %cst_9 = arith.constant dense<0.000000e+00> : vector<4x256xf32>
    %15 = vector.multi_reduction <add>, %14, %cst_9 [1] : vector<4x16x256xf32> to vector<4x256xf32>
    %16 = vector.shape_cast %15 : vector<4x256xf32> to vector<4x1x256xf32>
    %cst_10 = arith.constant 1.000000e+00 : f32
    %17 = vector.broadcast %cst_10 : f32 to vector<4x1x256xf32>
    %18 = arith.addf %17, %16 : vector<4x1x256xf32>
    %19 = tpu.reciprocal %18 {approx = true} : vector<4x1x256xf32> -> vector<4x1x256xf32>
    %20 = arith.mulf %16, %19 : vector<4x1x256xf32>
    %cst_11 = arith.constant 9.99999993E-9 : f32
    %21 = vector.broadcast %cst_11 : f32 to vector<4x1x256xf32>
    %22 = arith.addf %16, %21 : vector<4x1x256xf32>
    %23 = math.rsqrt %22 : vector<4x1x256xf32>
    %24 = arith.mulf %20, %23 : vector<4x1x256xf32>
    %25 = vector.broadcast %24 : vector<4x1x256xf32> to vector<4x16x256xf32>
    %26 = arith.mulf %25, %13 : vector<4x16x256xf32>
    %27 = vector.shape_cast %26 : vector<4x16x256xf32> to vector<1x4x16x256xf32>
    %28 = vector.broadcast %27 : vector<1x4x16x256xf32> to vector<8x4x16x256xf32>
    %29 = arith.mulf %3, %28 : vector<8x4x16x256xf32>
    %cst_12 = arith.constant dense<0.000000e+00> : vector<8x4x256xf32>
    %30 = vector.multi_reduction <add>, %29, %cst_12 [2] : vector<8x4x16x256xf32> to vector<8x4x256xf32>
    %31 = arith.addf %7, %30 : vector<8x4x256xf32>
    %cst_13 = arith.constant dense<0xFF800000> : vector<8x256xf32>
    %32 = vector.multi_reduction <maximumf>, %31, %cst_13 [1] : vector<8x4x256xf32> to vector<8x256xf32>
    %33 = vector.shape_cast %32 : vector<8x256xf32> to vector<8x1x256xf32>
    %34 = vector.broadcast %33 : vector<8x1x256xf32> to vector<8x4x256xf32>
    %35 = arith.subf %31, %34 : vector<8x4x256xf32>
    %36 = math.exp %35 : vector<8x4x256xf32>
    %cst_14 = arith.constant dense<0.000000e+00> : vector<8x256xf32>
    %37 = vector.multi_reduction <add>, %36, %cst_14 [1] : vector<8x4x256xf32> to vector<8x256xf32>
    %38 = vector.shape_cast %37 : vector<8x256xf32> to vector<8x1x256xf32>
    %39 = vector.broadcast %38 : vector<8x1x256xf32> to vector<8x4x256xf32>
    %40 = arith.divf %36, %39 : vector<8x4x256xf32>
    %41 = vector.shape_cast %40 : vector<8x4x256xf32> to vector<8x4x1x256xf32>
    %42 = vector.broadcast %41 : vector<8x4x1x256xf32> to vector<8x4x16x256xf32>
    %43 = arith.mulf %42, %3 : vector<8x4x16x256xf32>
    %cst_15 = arith.constant dense<0.000000e+00> : vector<4x16x256xf32>
    %44 = vector.multi_reduction <add>, %43, %cst_15 [0] : vector<8x4x16x256xf32> to vector<4x16x256xf32>
    %45 = arith.addf %44, %6 : vector<4x16x256xf32>
    %46 = arith.mulf %45, %45 : vector<4x16x256xf32>
    %cst_16 = arith.constant dense<0.000000e+00> : vector<4x256xf32>
    %47 = vector.multi_reduction <add>, %46, %cst_16 [1] : vector<4x16x256xf32> to vector<4x256xf32>
    %48 = vector.shape_cast %47 : vector<4x256xf32> to vector<4x1x256xf32>
    %cst_17 = arith.constant 1.000000e+00 : f32
    %49 = vector.broadcast %cst_17 : f32 to vector<4x1x256xf32>
    %50 = arith.addf %49, %48 : vector<4x1x256xf32>
    %51 = tpu.reciprocal %50 {approx = true} : vector<4x1x256xf32> -> vector<4x1x256xf32>
    %52 = arith.mulf %48, %51 : vector<4x1x256xf32>
    %cst_18 = arith.constant 9.99999993E-9 : f32
    %53 = vector.broadcast %cst_18 : f32 to vector<4x1x256xf32>
    %54 = arith.addf %48, %53 : vector<4x1x256xf32>
    %55 = math.rsqrt %54 : vector<4x1x256xf32>
    %56 = arith.mulf %52, %55 : vector<4x1x256xf32>
    %57 = vector.broadcast %56 : vector<4x1x256xf32> to vector<4x16x256xf32>
    %58 = arith.mulf %57, %45 : vector<4x16x256xf32>
    %59 = vector.shape_cast %58 : vector<4x16x256xf32> to vector<1x4x16x256xf32>
    %60 = vector.broadcast %59 : vector<1x4x16x256xf32> to vector<8x4x16x256xf32>
    %61 = arith.mulf %3, %60 : vector<8x4x16x256xf32>
    %cst_19 = arith.constant dense<0.000000e+00> : vector<8x4x256xf32>
    %62 = vector.multi_reduction <add>, %61, %cst_19 [2] : vector<8x4x16x256xf32> to vector<8x4x256xf32>
    %63 = arith.addf %31, %62 : vector<8x4x256xf32>
    %cst_20 = arith.constant dense<0xFF800000> : vector<8x256xf32>
    %64 = vector.multi_reduction <maximumf>, %63, %cst_20 [1] : vector<8x4x256xf32> to vector<8x256xf32>
    %65 = vector.shape_cast %64 : vector<8x256xf32> to vector<8x1x256xf32>
    %66 = vector.broadcast %65 : vector<8x1x256xf32> to vector<8x4x256xf32>
    %67 = arith.subf %63, %66 : vector<8x4x256xf32>
    %68 = math.exp %67 : vector<8x4x256xf32>
    %cst_21 = arith.constant dense<0.000000e+00> : vector<8x256xf32>
    %69 = vector.multi_reduction <add>, %68, %cst_21 [1] : vector<8x4x256xf32> to vector<8x256xf32>
    %70 = vector.shape_cast %69 : vector<8x256xf32> to vector<8x1x256xf32>
    %71 = vector.broadcast %70 : vector<8x1x256xf32> to vector<8x4x256xf32>
    %72 = arith.divf %68, %71 : vector<8x4x256xf32>
    %73 = vector.shape_cast %72 : vector<8x4x256xf32> to vector<8x4x1x256xf32>
    %74 = vector.broadcast %73 : vector<8x4x1x256xf32> to vector<8x4x16x256xf32>
    %75 = arith.mulf %74, %3 : vector<8x4x16x256xf32>
    %cst_22 = arith.constant dense<0.000000e+00> : vector<4x16x256xf32>
    %76 = vector.multi_reduction <add>, %75, %cst_22 [0] : vector<8x4x16x256xf32> to vector<4x16x256xf32>
    %77 = arith.addf %76, %6 : vector<4x16x256xf32>
    %78 = arith.mulf %77, %77 : vector<4x16x256xf32>
    %cst_23 = arith.constant dense<0.000000e+00> : vector<4x256xf32>
    %79 = vector.multi_reduction <add>, %78, %cst_23 [1] : vector<4x16x256xf32> to vector<4x256xf32>
    %80 = vector.shape_cast %79 : vector<4x256xf32> to vector<4x1x256xf32>
    %cst_24 = arith.constant 1.000000e+00 : f32
    %81 = vector.broadcast %cst_24 : f32 to vector<4x1x256xf32>
    %82 = arith.addf %81, %80 : vector<4x1x256xf32>
    %83 = tpu.reciprocal %82 {approx = true} : vector<4x1x256xf32> -> vector<4x1x256xf32>
    %84 = arith.mulf %80, %83 : vector<4x1x256xf32>
    %cst_25 = arith.constant 9.99999993E-9 : f32
    %85 = vector.broadcast %cst_25 : f32 to vector<4x1x256xf32>
    %86 = arith.addf %80, %85 : vector<4x1x256xf32>
    %87 = math.rsqrt %86 : vector<4x1x256xf32>
    %88 = arith.mulf %84, %87 : vector<4x1x256xf32>
    %89 = vector.broadcast %88 : vector<4x1x256xf32> to vector<4x16x256xf32>
    %90 = arith.mulf %89, %77 : vector<4x16x256xf32>
    %c0_26 = arith.constant 0 : index
    %c0_27 = arith.constant 0 : index
    %c0_28 = arith.constant 0 : index
    %91 = vector.load %arg4[%c0_26, %c0_27, %c0_28] : memref<4x16x256xf32, #tpu.memory_space<vmem>>, vector<4x16x256xf32>
    tpu.vector_store %arg4[%c0_26, %c0_27, %c0_28], %90 {strides = array<i32>} : memref<4x16x256xf32, #tpu.memory_space<vmem>>, vector<4x16x256xf32>,
    return
  }
  func.func @transform_0(%arg0: i32) -> (i32, i32) {
    %c0_i32 = arith.constant 0 : i32
    %c0_i32_0 = arith.constant 0 : i32
    return %c0_i32, %arg0 : i32, i32
  }
  func.func @transform_1(%arg0: i32) -> (i32, i32) {
    %c0_i32 = arith.constant 0 : i32
    %c0_i32_0 = arith.constant 0 : i32
    %c0_i32_1 = arith.constant 0 : i32
    return %c0_i32, %c0_i32_0 : i32, i32
  }
  func.func @transform_2(%arg0: i32) -> (i32, i32, i32) {
    %c0_i32 = arith.constant 0 : i32
    %c0_i32_0 = arith.constant 0 : i32
    %c0_i32_1 = arith.constant 0 : i32
    %c0_i32_2 = arith.constant 0 : i32
    return %c0_i32, %c0_i32_0, %c0_i32_1 : i32, i32, i32
  }
  func.func @transform_3(%arg0: i32) -> (i32, i32, i32) {
    %c0_i32 = arith.constant 0 : i32
    %c0_i32_0 = arith.constant 0 : i32
    %c0_i32_1 = arith.constant 0 : i32
    return %c0_i32, %c0_i32_0, %arg0 : i32, i32, i32
  }
}

</mosaic_0001>

<bundles_post_ra>
// kernel: tpu_custom_call.1
= control target key start
LH: loop header
LB: loop body
LE: loop exit
PB: predicated region body
PF: predicated region fallthrough
CT: control target
= control target key end

     0   :  { %v5702_v2 = vmov 0   ;;  %vm288_vm0 = vcmask 523264   ;;  %s10286_s0 = inlined_call_operand.vmem [shape: bf16[64,256], index: 0, kind: input, shape index: {}]   ;;  %s10287_s1 = inlined_call_operand.vmem [shape: bf16[512,64], index: 1, kind: input, shape index: {}]   ;;  %s10288_s2 = inlined_call_operand.vmem [shape: f32[4,16,1], index: 2, kind: input, shape index: {}]   ;;  %s10289_s3 = inlined_call_operand.hbm [shape: f32[4,16,256], index: 3, kind: output, shape index: {}]  }
   0x1   :  { %v5220_v0 = vld [vmem:[%s10286_s0 + $0x34] ss:$8 sps:$4 sm:$0xff]   ;;  %v5222_v1 = vld [vmem:[%s10286_s0 + $0x30] ss:$8 sps:$4 sm:$0xff]   ;;  %417 = vmatprep.mubr.bf16.mxu0 %v5702_v2  ;;  %577 = vmatprep.mubr.bf16.mxu1 %v5702_v2  ;;  %v5223_v3 = vld [vmem:[%s10286_s0 + $0x24] ss:$8 sps:$4 sm:$0xff]  }
   0x2   :  { %393 = vmatprep.subr.bf16.mxu0 %v5220_v0  ;;  %5206 = vmatprep.subr.bf16.mxu1 %v5220_v0  ;;  %v5225_v4 = vld [vmem:[%s10286_s0 + $0x20] ss:$8 sps:$4 sm:$0xff]   ;;  %v5226_v5 = vld [vmem:[%s10286_s0 + $0x14] ss:$8 sps:$4 sm:$0xff]   ;;  %v5228_v6 = vld [vmem:[%s10286_s0 + $0x10] ss:$8 sps:$4 sm:$0xff]  }
   0x3   :  { %394 = vmatpush1.bf16.msra.mxu0 %v5222_v1  ;;  %5210 = vmatpush1.bf16.msra.mxu1 %v5222_v1  ;;  %v5229_v7 = vld [vmem:[%s10286_s0 + $0x4] ss:$8 sps:$4 sm:$0xff]   ;;  %v5231_v8 = vld [vmem:[%s10286_s0] ss:$8 sps:$4 sm:$0xff]   ;;  %v5236_v13 = vld [vmem:[%s10287_s1 + $0x10] sm:$0xff]  }
   0x4   :  { %395 = vmatprep.subr.bf16.mxu0 %v5223_v3  ;;  %5207 = vmatprep.subr.bf16.mxu1 %v5223_v3  ;;  %v5232_v9 = vld [vmem:[%s10287_s1] sm:$0xff]   ;;  %v5234_v11 = vld [vmem:[%s10287_s1 + $0x8] sm:$0xff]   ;;  %v5237_v14 = vld [vmem:[%s10287_s1 + $0x90] sm:$0xff]  }
   0x5   :  { %5218 = vset.pattern.permute.xlu0 %v5702_v2  ;;  %5219 = vset.pattern.permute.xlu1 %v5702_v2  ;;  %v5233_v10 = vld [vmem:[%s10287_s1 + $0x80] sm:$0xff]   ;;  %v5235_v12 = vld [vmem:[%s10287_s1 + $0x88] sm:$0xff]   ;;  %v5238_v16 = vld [vmem:[%s10287_s1 + $0x18] sm:$0xff]  }
   0x6   :  { %v738_v15 = vld [vmem:[%s10288_s2] sm:$0xff]  ;;  %v5239_v17 = vld [vmem:[%s10287_s1 + $0x98] sm:$0xff]   ;;  %v740_v18 = vld [vmem:[%s10288_s2 + $0x10] sm:$0xff] }
   0x7   :  { %396 = vmatpush1.bf16.msra.mxu0 %v5225_v4  ;;  %5211 = vmatpush1.bf16.msra.mxu1 %v5225_v4 }
   0x8   :  { %397 = vmatprep.subr.bf16.mxu0 %v5226_v5  ;;  %5208 = vmatprep.subr.bf16.mxu1 %v5226_v5 }
   0x9   :  { %748 = vperm.xlu0 %5218, %v738_v15   ;;  %758 = vperm.xlu1 %5219, %v740_v18  }
   0xb   :  { %398 = vmatpush1.bf16.msra.mxu0 %v5228_v6  ;;  %5212 = vmatpush1.bf16.msra.mxu1 %v5228_v6 }
   0xc   :  { %399 = vmatprep.subr.bf16.mxu0 %v5229_v7  ;;  %5209 = vmatprep.subr.bf16.mxu1 %v5229_v7 }
   0xf   :  { %400 = vmatpush1.bf16.msra.mxu0 %v5231_v8  ;;  %5213 = vmatpush1.bf16.msra.mxu1 %v5231_v8 }
  0x12   :  { %5174 = vmatmul.mubr.msk.bf16.vlgmr.msra.gmra.mxu0 %vm288_vm0, %v5232_v9  ;;  %5190 = vmatmul.mubr.msk.bf16.vlgmr.msra.gmra.mxu1 %vm288_vm0, %v5233_v10 }
  0x13   :  { %427 = vmatprep.mubr.bf16.mxu0 %v5702_v2  ;;  %587 = vmatprep.mubr.bf16.mxu1 %v5702_v2 }
  0x1a   :  { %5175 = vmatmul.mubr.msk.bf16.gmra.mxu0 %vm288_vm0, %v5234_v11  ;;  %5191 = vmatmul.mubr.msk.bf16.gmra.mxu1 %vm288_vm0, %v5235_v12 }
  0x1b   :  { %437 = vmatprep.mubr.bf16.mxu0 %v5702_v2  ;;  %597 = vmatprep.mubr.bf16.mxu1 %v5702_v2 }
  0x22   :  { %5176 = vmatmul.mubr.msk.bf16.gmra.mxu0 %vm288_vm0, %v5236_v13  ;;  %5192 = vmatmul.mubr.msk.bf16.gmra.mxu1 %vm288_vm0, %v5237_v14 }
  0x23   :  { %447 = vmatprep.mubr.bf16.mxu0 %v5702_v2  ;;  %607 = vmatprep.mubr.bf16.mxu1 %v5702_v2 }
  0x24   :  { %8 = vsyncpa [#allocation3], 0  ;;  %v739_v19 = vld [vmem:[%s10288_s2 + $0x8] sm:$0xff]  ;;  %v741_v20 = vld [vmem:[%s10288_s2 + $0x18] sm:$0xff]  ;;  %vm2123_vm1 = vcmask 1041409   ;;  %vm2126_vm2 = vcmask 1042434  }
  0x25   :  { %753 = vperm.xlu0 %5218, %v739_v19   ;;  %763 = vperm.xlu1 %5219, %v741_v20   ;;  %v743_v21 = vld [vmem:[%s10288_s2 + $0x28] sm:$0xff]  ;;  %v742_v22 = vld [vmem:[%s10288_s2 + $0x20] sm:$0xff]  ;;  %v5244_v27 = vld [vmem:[%s10287_s1 + $0x30] sm:$0xff]   ;;  %vm2129_vm3 = vcmask 1043459   ;;  %vm2237_vm4 = vcmask 1043456  }
  0x26   :  { %v5240_v23 = vld [vmem:[%s10287_s1 + $0x20] sm:$0xff]   ;;  %v5242_v25 = vld [vmem:[%s10287_s1 + $0x28] sm:$0xff]   ;;  %v5245_v28 = vld [vmem:[%s10287_s1 + $0xb0] sm:$0xff]  }
  0x27   :  { %v5241_v24 = vld [vmem:[%s10287_s1 + $0xa0] sm:$0xff]   ;;  %v5243_v26 = vld [vmem:[%s10287_s1 + $0xa8] sm:$0xff]   ;;  %v5246_v29 = vld [vmem:[%s10287_s1 + $0x38] sm:$0xff]  }
  0x28   :  { %v5247_v30 = vld [vmem:[%s10287_s1 + $0xb8] sm:$0xff]   ;;  %v5248_v31 = vld [vmem:[%s10287_s1 + $0x40] sm:$0xff]   ;;  %v744_v34 = vld [vmem:[%s10288_s2 + $0x30] sm:$0xff] }
  0x29   :  { %773 = vperm.xlu1 %5219, %v743_v21   ;;  %768 = vperm.xlu0 %5218, %v742_v22   ;;  %v5249_v32 = vld [vmem:[%s10287_s1 + $0xc0] sm:$0xff]   ;;  %v745_v33 = vld [vmem:[%s10288_s2 + $0x38] sm:$0xff]  ;;  %v5250_v35 = vld [vmem:[%s10287_s1 + $0x48] sm:$0xff]  }
  0x2a   :  { %5177 = vmatmul.mubr.msk.bf16.gmra.mxu0 %vm288_vm0, %v5238_v16  ;;  %5193 = vmatmul.mubr.msk.bf16.gmra.mxu1 %vm288_vm0, %v5239_v17  ;;  %v5251_v36 = vld [vmem:[%s10287_s1 + $0xc8] sm:$0xff]   ;;  %v5252_v37 = vld [vmem:[%s10287_s1 + $0x50] sm:$0xff]   ;;  %v5254_v39 = vld [vmem:[%s10287_s1 + $0x58] sm:$0xff]  }
  0x2b   :  { %457 = vmatprep.mubr.bf16.mxu0 %v5702_v2  ;;  %617 = vmatprep.mubr.bf16.mxu1 %v5702_v2  ;;  %v5253_v38 = vld [vmem:[%s10287_s1 + $0xd0] sm:$0xff]   ;;  %v5255_v40 = vld [vmem:[%s10287_s1 + $0xd8] sm:$0xff]   ;;  %v5256_v41 = vld [vmem:[%s10287_s1 + $0x60] sm:$0xff]  }
  0x2c   :  { %v5257_v42 = vld [vmem:[%s10287_s1 + $0xe0] sm:$0xff]   ;;  %v5258_v43 = vld [vmem:[%s10287_s1 + $0x68] sm:$0xff]   ;;  %v5260_v45 = vld [vmem:[%s10287_s1 + $0x70] sm:$0xff]  }
  0x2d   :  { %783 = vperm.xlu1 %5219, %v745_v33   ;;  %778 = vperm.xlu0 %5218, %v744_v34   ;;  %v5259_v44 = vld [vmem:[%s10287_s1 + $0xe8] sm:$0xff]   ;;  %v5261_v46 = vld [vmem:[%s10287_s1 + $0xf0] sm:$0xff]   ;;  %v5262_v47 = vld [vmem:[%s10287_s1 + $0x78] sm:$0xff]  }
  0x2e   :  { %v5263_v48 = vld [vmem:[%s10287_s1 + $0xf8] sm:$0xff]   ;;  %s5703_s1 = smov [#allocation2]  }
  0x2f   :  { %s5123_s23 = sshll.u32 %s5703_s1, 4  ;;  %s5124_s23 = int_to_ptr.vmem [resolvable:$true] %s5123_s23 }
  0x30   :  { %s5680_s24 = scalar_lea.vmem %s5124_s23, 2048  ;;  %p5685_p1 = scmp.lt.s32.totalorder %s5124_s23, %s5124_s23 }
  0x31   :  { %p5681_p0 = scmp.ne.s32.totalorder %s5124_s23, %s5680_s24  ;;  %p5686_p2 = scmp.lt.s32.totalorder %s5680_s24, %s5680_s24 }
  0x32   :  { %5178 = vmatmul.mubr.msk.bf16.gmra.mxu0 %vm288_vm0, %v5240_v23  ;;  %5194 = vmatmul.mubr.msk.bf16.gmra.mxu1 %vm288_vm0, %v5241_v24 }
  0x33   :  { %467 = vmatprep.mubr.bf16.mxu0 %v5702_v2  ;;  %627 = vmatprep.mubr.bf16.mxu1 %v5702_v2  ;;  %p5687_p3 = por %p5686_p2, %p5685_p1 }
  0x35   :  { %p5688_p4 = pnand %p5687_p3, %p5681_p0 }
  0x3a   :  { %5179 = vmatmul.mubr.msk.bf16.gmra.mxu0 %vm288_vm0, %v5242_v25  ;;  %5195 = vmatmul.mubr.msk.bf16.gmra.mxu1 %vm288_vm0, %v5243_v26 }
  0x3b   :  { %477 = vmatprep.mubr.bf16.mxu0 %v5702_v2  ;;  %637 = vmatprep.mubr.bf16.mxu1 %v5702_v2 }
  0x42   :  { %5180 = vmatmul.mubr.msk.bf16.gmra.mxu0 %vm288_vm0, %v5244_v27  ;;  %5196 = vmatmul.mubr.msk.bf16.gmra.mxu1 %vm288_vm0, %v5245_v28 }
  0x43   :  { %487 = vmatprep.mubr.bf16.mxu0 %v5702_v2  ;;  %647 = vmatprep.mubr.bf16.mxu1 %v5702_v2 }
  0x4a   :  { %5181 = vmatmul.mubr.msk.bf16.gmra.mxu0 %vm288_vm0, %v5246_v29  ;;  %5197 = vmatmul.mubr.msk.bf16.gmra.mxu1 %vm288_vm0, %v5247_v30 }
  0x4b   :  { %497 = vmatprep.mubr.bf16.mxu0 %v5702_v2  ;;  %657 = vmatprep.mubr.bf16.mxu1 %v5702_v2 }
  0x52   :  { %5182 = vmatmul.mubr.msk.bf16.gmra.mxu0 %vm288_vm0, %v5248_v31  ;;  %5198 = vmatmul.mubr.msk.bf16.gmra.mxu1 %vm288_vm0, %v5249_v32 }
  0x53   :  { %507 = vmatprep.mubr.bf16.mxu0 %v5702_v2  ;;  %667 = vmatprep.mubr.bf16.mxu1 %v5702_v2 }
  0x5a   :  { %5183 = vmatmul.mubr.msk.bf16.gmra.mxu0 %vm288_vm0, %v5250_v35  ;;  %5199 = vmatmul.mubr.msk.bf16.gmra.mxu1 %vm288_vm0, %v5251_v36 }
  0x5b   :  { %517 = vmatprep.mubr.bf16.mxu0 %v5702_v2  ;;  %677 = vmatprep.mubr.bf16.mxu1 %v5702_v2 }
  0x62   :  { %5184 = vmatmul.mubr.msk.bf16.gmra.mxu0 %vm288_vm0, %v5252_v37  ;;  %5200 = vmatmul.mubr.msk.bf16.gmra.mxu1 %vm288_vm0, %v5253_v38 }
  0x63   :  { %527 = vmatprep.mubr.bf16.mxu0 %v5702_v2  ;;  %687 = vmatprep.mubr.bf16.mxu1 %v5702_v2 }
  0x6a   :  { %5185 = vmatmul.mubr.msk.bf16.gmra.mxu0 %vm288_vm0, %v5254_v39  ;;  %5201 = vmatmul.mubr.msk.bf16.gmra.mxu1 %vm288_vm0, %v5255_v40 }
  0x6b   :  { %537 = vmatprep.mubr.bf16.mxu0 %v5702_v2  ;;  %697 = vmatprep.mubr.bf16.mxu1 %v5702_v2 }
  0x72   :  { %5186 = vmatmul.mubr.msk.bf16.gmra.mxu0 %vm288_vm0, %v5256_v41  ;;  %5202 = vmatmul.mubr.msk.bf16.gmra.mxu1 %vm288_vm0, %v5257_v42 }
  0x73   :  { %547 = vmatprep.mubr.bf16.mxu0 %v5702_v2  ;;  %707 = vmatprep.mubr.bf16.mxu1 %v5702_v2 }
  0x7a   :  { %5187 = vmatmul.mubr.msk.bf16.gmra.mxu0 %vm288_vm0, %v5258_v43  ;;  %5203 = vmatmul.mubr.msk.bf16.gmra.mxu1 %vm288_vm0, %v5259_v44 }
  0x7b   :  { %557 = vmatprep.mubr.bf16.mxu0 %v5702_v2  ;;  %717 = vmatprep.mubr.bf16.mxu1 %v5702_v2 }
  0x82   :  { %5188 = vmatmul.mubr.msk.bf16.gmra.mxu0 %vm288_vm0, %v5260_v45  ;;  %5204 = vmatmul.mubr.msk.bf16.gmra.mxu1 %vm288_vm0, %v5261_v46 }
  0x83   :  { %567 = vmatprep.mubr.bf16.mxu0 %v5702_v2  ;;  %727 = vmatprep.mubr.bf16.mxu1 %v5702_v2 }
  0x8a   :  { %5189 = vmatmul.mubr.msk.bf16.gmra.mxu0 %vm288_vm0, %v5262_v47  ;;  %5205 = vmatmul.mubr.msk.bf16.gmra.mxu1 %vm288_vm0, %v5263_v48 }
  0xd2   :  { %v5936_v49 = vpop.f32.mrf.mxu0  ;;  %v5938_v50 = vpop.f32.mrf.mxu1 }
  0xd3   :  { %10694 = vst [vmem:[#allocation5_spill] sm:$0xff] %v5936_v49  ;;  %10695 = vst [vmem:[#allocation6_spill] sm:$0xff] %v5938_v50 }
  0xd4   :  { %v5940_v51 = vpop.f32.mrf.mxu0  ;;  %v5942_v52 = vpop.f32.mrf.mxu1 }
  0xd5   :  { %10696 = vst [vmem:[#allocation7_spill] sm:$0xff] %v5940_v51  ;;  %10697 = vst [vmem:[#allocation8_spill] sm:$0xff] %v5942_v52 }
  0xd6   :  { %v5944_v53 = vpop.f32.mrf.mxu0  ;;  %v5946_v54 = vpop.f32.mrf.mxu1 }
  0xd7   :  { %10698 = vst [vmem:[#allocation9_spill] sm:$0xff] %v5944_v53  ;;  %10699 = vst [vmem:[#allocation10_spill] sm:$0xff] %v5946_v54 }
  0xd8   :  { %v5948_v55 = vpop.f32.mrf.mxu0  ;;  %v5950_v56 = vpop.f32.mrf.mxu1 }
  0xd9   :  { %10700 = vst [vmem:[#allocation11_spill] sm:$0xff] %v5948_v55  ;;  %10701 = vst [vmem:[#allocation12_spill] sm:$0xff] %v5950_v56 }
  0xda   :  { %v5952_v57 = vpop.f32.mrf.mxu0  ;;  %v5954_v58 = vpop.f32.mrf.mxu1 }
  0xdb   :  { %10702 = vst [vmem:[#allocation13_spill] sm:$0xff] %v5952_v57  ;;  %10703 = vst [vmem:[#allocation14_spill] sm:$0xff] %v5954_v58 }
  0xdc   :  { %v5956_v59 = vpop.f32.mrf.mxu0  ;;  %v5958_v60 = vpop.f32.mrf.mxu1 }
  0xdd   :  { %10704 = vst [vmem:[#allocation15_spill] sm:$0xff] %v5956_v59  ;;  %10705 = vst [vmem:[#allocation16_spill] sm:$0xff] %v5958_v60 }
  0xde   :  { %v5960_v61 = vpop.f32.mrf.mxu0  ;;  %v5962_v62 = vpop.f32.mrf.mxu1 }
  0xdf   :  { %10706 = vst [vmem:[#allocation17_spill] sm:$0xff] %v5960_v61  ;;  %10707 = vst [vmem:[#allocation18_spill] sm:$0xff] %v5962_v62 }
  0xe0   :  { %v5964_v63 = vpop.f32.mrf.mxu0  ;;  %v5966_v0 = vpop.f32.mrf.mxu1 }
  0xe1   :  { %10708 = vst [vmem:[#allocation19_spill] sm:$0xff] %v5964_v63  ;;  %10709 = vst [vmem:[#allocation20_spill] sm:$0xff] %v5966_v0 }
  0xe2   :  { %v5968_v1 = vpop.f32.mrf.mxu0  ;;  %v5970_v2 = vpop.f32.mrf.mxu1 }
  0xe3   :  { %10710 = vst [vmem:[#allocation21_spill] sm:$0xff] %v5968_v1  ;;  %10711 = vst [vmem:[#allocation22_spill] sm:$0xff] %v5970_v2 }
  0xe4   :  { %v5972_v3 = vpop.f32.mrf.mxu0  ;;  %v5974_v4 = vpop.f32.mrf.mxu1 }
  0xe5   :  { %10712 = vst [vmem:[#allocation23_spill] sm:$0xff] %v5972_v3  ;;  %10713 = vst [vmem:[#allocation24_spill] sm:$0xff] %v5974_v4 }
  0xe6   :  { %v5976_v5 = vpop.f32.mrf.mxu0  ;;  %v5978_v6 = vpop.f32.mrf.mxu1 }
  0xe7   :  { %10714 = vst [vmem:[#allocation25_spill] sm:$0xff] %v5976_v5  ;;  %10715 = vst [vmem:[#allocation26_spill] sm:$0xff] %v5978_v6 }
  0xe8   :  { %v5980_v7 = vpop.f32.mrf.mxu0  ;;  %v5982_v8 = vpop.f32.mrf.mxu1 }
  0xe9   :  { %10716 = vst [vmem:[#allocation27_spill] sm:$0xff] %v5980_v7  ;;  %10717 = vst [vmem:[#allocation28_spill] sm:$0xff] %v5982_v8 }
  0xea   :  { %v5984_v9 = vpop.f32.mrf.mxu0  ;;  %v5986_v10 = vpop.f32.mrf.mxu1 }
  0xeb   :  { %10718 = vst [vmem:[#allocation29_spill] sm:$0xff] %v5984_v9  ;;  %10719 = vst [vmem:[#allocation30_spill] sm:$0xff] %v5986_v10 }
  0xec   :  { %v5988_v11 = vpop.f32.mrf.mxu0  ;;  %v5990_v12 = vpop.f32.mrf.mxu1 }
  0xed   :  { %10720 = vst [vmem:[#allocation31_spill] sm:$0xff] %v5988_v11  ;;  %10721 = vst [vmem:[#allocation32_spill] sm:$0xff] %v5990_v12 }
  0xee   :  { %v5992_v13 = vpop.f32.mrf.mxu0  ;;  %v5994_v14 = vpop.f32.mrf.mxu1 }
  0xef   :  { %10722 = vst [vmem:[#allocation33_spill] sm:$0xff] %v5992_v13  ;;  %10723 = vst [vmem:[#allocation34_spill] sm:$0xff] %v5994_v14 }
  0xf0   :  { %v5996_v15 = vpop.f32.mrf.mxu0  ;;  %v5998_v16 = vpop.f32.mrf.mxu1 }
  0xf1   :  { %10724 = vst [vmem:[#allocation35_spill] sm:$0xff] %v5996_v15  ;;  %10725 = vst [vmem:[#allocation36_spill] sm:$0xff] %v5998_v16 }
  0xf2   :  { %v6000_v17 = vpop.f32.mrf.mxu0  ;;  %v6002_v18 = vpop.f32.mrf.mxu1 }
  0xf3   :  { %10726 = vst [vmem:[#allocation37_spill] sm:$0xff] %v6000_v17  ;;  %10727 = vst [vmem:[#allocation38_spill] sm:$0xff] %v6002_v18 }
  0xf4   :  { %v6004_v19 = vpop.f32.mrf.mxu0  ;;  %v6006_v20 = vpop.f32.mrf.mxu1 }
  0xf5   :  { %10728 = vst [vmem:[#allocation39_spill] sm:$0xff] %v6004_v19  ;;  %10729 = vst [vmem:[#allocation40_spill] sm:$0xff] %v6006_v20 }
  0xf6   :  { %v6008_v21 = vpop.f32.mrf.mxu0  ;;  %v6010_v22 = vpop.f32.mrf.mxu1 }
  0xf7   :  { %10730 = vst [vmem:[#allocation41_spill] sm:$0xff] %v6008_v21  ;;  %10731 = vst [vmem:[#allocation42_spill] sm:$0xff] %v6010_v22 }
  0xf8   :  { %v6012_v23 = vpop.f32.mrf.mxu0  ;;  %v6014_v24 = vpop.f32.mrf.mxu1 }
  0xf9   :  { %10732 = vst [vmem:[#allocation43_spill] sm:$0xff] %v6012_v23  ;;  %10733 = vst [vmem:[#allocation44_spill] sm:$0xff] %v6014_v24 }
  0xfa   :  { %v6016_v25 = vpop.f32.mrf.mxu0  ;;  %v6018_v26 = vpop.f32.mrf.mxu1 }
  0xfb   :  { %10734 = vst [vmem:[#allocation45_spill] sm:$0xff] %v6016_v25  ;;  %10735 = vst [vmem:[#allocation46_spill] sm:$0xff] %v6018_v26 }
  0xfc   :  { %v6020_v27 = vpop.f32.mrf.mxu0  ;;  %v6022_v28 = vpop.f32.mrf.mxu1 }
  0xfd   :  { %10736 = vst [vmem:[#allocation47_spill] sm:$0xff] %v6020_v27  ;;  %10737 = vst [vmem:[#allocation48_spill] sm:$0xff] %v6022_v28 }
  0xfe   :  { %v6024_v29 = vpop.f32.mrf.mxu0  ;;  %v6026_v30 = vpop.f32.mrf.mxu1 }
  0xff   :  { %10738 = vst [vmem:[#allocation49_spill] sm:$0xff] %v6024_v29  ;;  %10739 = vst [vmem:[#allocation50_spill] sm:$0xff] %v6026_v30 }
 0x100   :  { %v6028_v31 = vpop.f32.mrf.mxu0  ;;  %v6030_v32 = vpop.f32.mrf.mxu1 }
 0x101   :  { %10740 = vst [vmem:[#allocation51_spill] sm:$0xff] %v6028_v31  ;;  %10741 = vst [vmem:[#allocation52_spill] sm:$0xff] %v6030_v32 }
 0x102   :  { %v6032_v33 = vpop.f32.mrf.mxu0  ;;  %v6034_v34 = vpop.f32.mrf.mxu1 }
 0x103   :  { %10742 = vst [vmem:[#allocation53_spill] sm:$0xff] %v6032_v33  ;;  %10743 = vst [vmem:[#allocation54_spill] sm:$0xff] %v6034_v34  ;;  %v786_v34 = vmul.f32 0.25, %v5936_v49  ;;  %v790_v49 = vmul.f32 0.25, %v5952_v57  ;;  %v6135_v57 = vmul.f32 0.25, %v5962_v62  ;;  %v795_v62 = vmul.f32 0.25, %v5972_v3 }
 0x104   :  { %v6036_v35 = vpop.f32.mrf.mxu0  ;;  %v6038_v36 = vpop.f32.mrf.mxu1  ;;  %v805_v3 = vmul.f32 0.25, %v6012_v23  ;;  %v809_v23 = vmul.f32 0.25, %v6028_v31 }
 0x105   :  { %10744 = vst [vmem:[#allocation55_spill] sm:$0xff] %v6036_v35  ;;  %10745 = vst [vmem:[#allocation56_spill] sm:$0xff] %v6038_v36 }
 0x106   :  { %v6040_v37 = vpop.f32.mrf.mxu0  ;;  %v6042_v38 = vpop.f32.mrf.mxu1  ;;  %10780 = vst [vmem:[#allocation91_spill] sm:$0xff] %v6135_v57  ;;  %v6157_v57 = vmul.f32 0.25, %v5978_v6  ;;  %v807_v6 = vmul.f32 0.25, %v6020_v27 }
 0x107   :  { %10746 = vst [vmem:[#allocation57_spill] sm:$0xff] %v6040_v37  ;;  %10747 = vst [vmem:[#allocation58_spill] sm:$0xff] %v6042_v38 }
 0x108   :  { %v6044_v39 = vpop.f32.mrf.mxu0  ;;  %v6046_v40 = vpop.f32.mrf.mxu1 }
 0x109   :  { %10748 = vst [vmem:[#allocation59_spill] sm:$0xff] %v6044_v39  ;;  %10749 = vst [vmem:[#allocation60_spill] sm:$0xff] %v6046_v40 }
 0x10a   :  { %v6048_v41 = vpop.f32.mrf.mxu0  ;;  %v6050_v42 = vpop.f32.mrf.mxu1 }
 0x10b   :  { %10750 = vst [vmem:[#allocation61_spill] sm:$0xff] %v6048_v41  ;;  %10751 = vst [vmem:[#allocation62_spill] sm:$0xff] %v6050_v42 }
 0x10c   :  { %v6052_v43 = vpop.f32.mrf.mxu0  ;;  %v6054_v44 = vpop.f32.mrf.mxu1 }
 0x10d   :  { %10752 = vst [vmem:[#allocation63_spill] sm:$0xff] %v6052_v43  ;;  %10753 = vst [vmem:[#allocation64_spill] sm:$0xff] %v6054_v44 }
 0x10e   :  { %v6056_v45 = vpop.f32.mrf.mxu0  ;;  %v6058_v46 = vpop.f32.mrf.mxu1 }
 0x10f   :  { %10754 = vst [vmem:[#allocation65_spill] sm:$0xff] %v6056_v45  ;;  %10755 = vst [vmem:[#allocation66_spill] sm:$0xff] %v6058_v46 }
 0x110   :  { %v6060_v47 = vpop.f32.mrf.mxu0  ;;  %v6062_v48 = vpop.f32.mrf.mxu1 }
 0x111   :  { %10756 = vst [vmem:[#allocation67_spill] sm:$0xff] %v6060_v47  ;;  %10757 = vst [vmem:[#allocation68_spill] sm:$0xff] %v6062_v48 }
 0x112   :  { %v6064_v16 = vpop.f32.mrf.mxu0  ;;  %v6066_v14 = vpop.f32.mrf.mxu1 }
 0x113   :  { %10758 = vst [vmem:[#allocation69_spill] sm:$0xff] %v6064_v16  ;;  %10759 = vst [vmem:[#allocation70_spill] sm:$0xff] %v6066_v14  ;;  %v818_v31 = vmul.f32 0.25, %v6064_v16  ;;  %v6223_v16 = vmul.f32 0.25, %v6044_v39 }
 0x114   :  { %v6068_v15 = vpop.f32.mrf.mxu0  ;;  %v6070_v13 = vpop.f32.mrf.mxu1 }
 0x115   :  { %10760 = vst [vmem:[#allocation71_spill] sm:$0xff] %v6068_v15  ;;  %10761 = vst [vmem:[#allocation72_spill] sm:$0xff] %v6070_v13 }
 0x116   :  { %v6072_v42 = vpop.f32.mrf.mxu0  ;;  %v6074_v12 = vpop.f32.mrf.mxu1 }
 0x117   :  { %10762 = vst [vmem:[#allocation73_spill] sm:$0xff] %v6072_v42  ;;  %10763 = vst [vmem:[#allocation74_spill] sm:$0xff] %v6074_v12 }
 0x118   :  { %v6076_v44 = vpop.f32.mrf.mxu0  ;;  %v6078_v45 = vpop.f32.mrf.mxu1 }
 0x119   :  { %10764 = vst [vmem:[#allocation75_spill] sm:$0xff] %v6076_v44  ;;  %10765 = vst [vmem:[#allocation76_spill] sm:$0xff] %v6078_v45  ;;  %v885_v39 = vmul.f32 0.25, %v6078_v45 }
 0x11a   :  { %v6080_v46 = vpop.f32.mrf.mxu0  ;;  %v6082_v47 = vpop.f32.mrf.mxu1 }
 0x11b   :  { %10766 = vst [vmem:[#allocation77_spill] sm:$0xff] %v6080_v46  ;;  %10767 = vst [vmem:[#allocation78_spill] sm:$0xff] %v6082_v47 }
 0x11c   :  { %v6084_v48 = vpop.f32.mrf.mxu0  ;;  %v6086_v10 = vpop.f32.mrf.mxu1 }
 0x11d   :  { %10768 = vst [vmem:[#allocation79_spill] sm:$0xff] %v6084_v48  ;;  %10769 = vst [vmem:[#allocation80_spill] sm:$0xff] %v6086_v10  ;;  %v787_v10 = vmul.f32 0.25, %v5940_v51 }
 0x11e   :  { %v6088_v11 = vpop.f32.mrf.mxu0  ;;  %v6090_v43 = vpop.f32.mrf.mxu1 }
 0x11f   :  { %10770 = vst [vmem:[#allocation81_spill] sm:$0xff] %v6088_v11  ;;  %10771 = vst [vmem:[#allocation82_spill] sm:$0xff] %v6090_v43  ;;  %v6107_v11 = vmul.f32 0.25, %v5938_v50  ;;  %v788_v43 = vmul.f32 0.25, %v5944_v53  ;;  %v791_v50 = vmul.f32 0.25, %v5956_v59  ;;  %v6127_v53 = vmul.f32 0.25, %v5954_v58 }
 0x120   :  { %v6092_v41 = vpop.f32.mrf.mxu0  ;;  %v6094_v9 = vpop.f32.mrf.mxu1  ;;  %v794_v58 = vmul.f32 0.25, %v5968_v1 }
 0x121   :  { %10772 = vst [vmem:[#allocation83_spill] sm:$0xff] %v6092_v41  ;;  %10773 = vst [vmem:[#allocation84_spill] sm:$0xff] %v6094_v9  ;;  %v6111_v41 = vmul.f32 0.25, %v5942_v52  ;;  %v789_v9 = vmul.f32 0.25, %v5948_v55  ;;  %v792_v52 = vmul.f32 0.25, %v5960_v61  ;;  %v6131_v55 = vmul.f32 0.25, %v5958_v60 }
 0x122   :  { %v6096_v36 = vpop.f32.mrf.mxu0  ;;  %v6098_v40 = vpop.f32.mrf.mxu1  ;;  %v6145_v61 = vmul.f32 0.25, %v5966_v0  ;;  %v6148_v60 = vmul.f32 0.25, %v5970_v2  ;;  %v6164_v0 = vmul.f32 0.25, %v5982_v8  ;;  %v6167_v2 = vmul.f32 0.25, %v6002_v18 }
 0x123   :  { %10774 = vst [vmem:[#allocation85_spill] sm:$0xff] %v6096_v36  ;;  %10775 = vst [vmem:[#allocation86_spill] sm:$0xff] %v6098_v40  ;;  %v6115_v40 = vmul.f32 0.25, %v5946_v54  ;;  %v793_v54 = vmul.f32 0.25, %v5964_v63  ;;  %v804_v63 = vmul.f32 0.25, %v6008_v21  ;;  %v808_v18 = vmul.f32 0.25, %v6024_v29 }
 0x124   :  { %v6101_v4 = vpop.f32.mrf.mxu0  ;;  %v6103_v38 = vpop.f32.mrf.mxu1  ;;  %10783 = vst [vmem:[#allocation94_spill] sm:$0xff] %v6148_v60  ;;  %10786 = vst [vmem:[#allocation97_spill] sm:$0xff] %v6164_v0  ;;  %v6172_v60 = vmul.f32 0.25, %v6006_v20  ;;  %v6180_v0 = vmul.f32 0.25, %v6010_v22  ;;  %v6195_v20 = vmul.f32 0.25, %v6018_v26  ;;  %v949_v29 = vadd.f32 %v807_v6, %v791_v50 }
 0x125   :  { %10776 = vst [vmem:[#allocation87_spill] sm:$0xff] %v6101_v4  ;;  %10777 = vst [vmem:[#allocation88_spill] sm:$0xff] %v6103_v38  ;;  %v6119_v4 = vmul.f32 0.25, %v5950_v56  ;;  %v802_v56 = vmul.f32 0.25, %v6000_v17  ;;  %v796_v17 = vmul.f32 0.25, %v5976_v5  ;;  %v806_v5 = vmul.f32 0.25, %v6016_v25 }
 0x126   :  { %v6121_v38 = vpop.f32.mrf.mxu0  ;;  %v6123_v51 = vpop.f32.mrf.mxu1  ;;  %v928_v8 = vadd.f32 %v804_v63, %v788_v43  ;;  %v935_v63 = vadd.f32 %v805_v3, %v789_v9  ;;  %v956_v3 = vadd.f32 %v808_v18, %v792_v52  ;;  %v820_v9 = vmul.f32 0.25, %v6072_v42 }
 0x127   :  { %10778 = vst [vmem:[#allocation89_spill] sm:$0xff] %v6121_v38  ;;  %10779 = vst [vmem:[#allocation90_spill] sm:$0xff] %v6123_v51  ;;  %v803_v38 = vmul.f32 0.25, %v6004_v19  ;;  %v6154_v19 = vmul.f32 0.25, %v5980_v7  ;;  %v914_v21 = vadd.f32 %v802_v56, %v786_v34  ;;  %v6185_v56 = vmul.f32 0.25, %v6014_v24 }
 0x128   :  { %v6139_v51 = vpop.f32.mrf.mxu0  ;;  %v6141_v59 = vpop.f32.mrf.mxu1  ;;  %v811_v34 = vmul.f32 0.25, %v6036_v35  ;;  %v942_v43 = vadd.f32 %v806_v5, %v790_v49  ;;  %v6199_v24 = vmul.f32 0.25, %v6022_v28  ;;  %v819_v35 = vmul.f32 0.25, %v6068_v15 }
 0x129   :  { %10781 = vst [vmem:[#allocation92_spill] sm:$0xff] %v6139_v51  ;;  %10782 = vst [vmem:[#allocation93_spill] sm:$0xff] %v6141_v59  ;;  %v921_v7 = vadd.f32 %v803_v38, %v787_v10  ;;  %v810_v10 = vmul.f32 0.25, %v6032_v33  ;;  %v812_v38 = vmul.f32 0.25, %v6040_v37  ;;  %v6202_v33 = vmul.f32 0.25, %v6026_v30 }
 0x12a   :  { %v6159_v59 = vpop.f32.mrf.mxu0  ;;  %v6161_v1 = vpop.f32.mrf.mxu1  ;;  %v963_v49 = vadd.f32 %v809_v23, %v793_v54  ;;  %v6210_v5 = vmul.f32 0.25, %v6030_v32  ;;  %v6213_v6 = vadd.f32 %v811_v34, %v795_v62  ;;  %v821_v30 = vmul.f32 0.25, %v6076_v44 }
 0x12b   :  { %10784 = vst [vmem:[#allocation95_spill] sm:$0xff] %v6159_v59  ;;  %10785 = vst [vmem:[#allocation96_spill] sm:$0xff] %v6161_v1  ;;  %v970_v50 = vadd.f32 %v810_v10, %v794_v58  ;;  %v6215_v28 = vadd.f32 %v812_v38, %v796_v17  ;;  %v915_v52 = vadd.f32 %v914_v21, %v818_v31  ;;  %v822_v54 = vmul.f32 0.25, %v6080_v46  ;;  %v6268_v44 = vpop.permute.xlu0 %748 }
 0x12c   :  { %v6175_v59 = vpop.f32.mrf.mxu0  ;;  %v6177_v1 = vpop.f32.mrf.mxu1  ;;  %v922_v23 = vadd.f32 %v921_v7, %v819_v35  ;;  %v882_v58 = vmul.f32 0.25, %v6066_v14  ;;  %v883_v62 = vmul.f32 0.25, %v6070_v13  ;;  %v884_v17 = vmul.f32 0.25, %v6074_v12  ;;  %v10797_v35 = vld [vmem:[#allocation81_spill] sm:$0xff]  ;;  %10807 = vst [vmem:[#allocation113_spill] sm:$0xff] %v6268_v44 }
 0x12d   :  { %10787 = vst [vmem:[#allocation98_spill] sm:$0xff] %v6175_v59  ;;  %10788 = vst [vmem:[#allocation99_spill] sm:$0xff] %v6177_v1  ;;  %v929_v38 = vadd.f32 %v928_v8, %v820_v9  ;;  %v936_v31 = vadd.f32 %v935_v63, %v821_v30  ;;  %v823_v46 = vmul.f32 0.25, %v6084_v48  ;;  %v6238_v7 = vmul.f32 0.25, %v6082_v47  ;;  %v10801_v30 = vld [vmem:[#allocation83_spill] sm:$0xff] }
 0x12e   :  { %v6190_v27 = vpop.f32.mrf.mxu0  ;;  %v6192_v25 = vpop.f32.mrf.mxu1  ;;  %v824_v13 = vmul.f32 0.25, %v10797_v35  ;;  %v825_v63 = vmul.f32 0.25, %v10801_v30  ;;  %v826_v47 = vmul.f32 0.25, %v6096_v36  ;;  %v10805_v30 = vld [vmem:[#allocation84_spill] sm:$0xff] }
 0x12f   :  { %10789 = vst [vmem:[#allocation100_spill] sm:$0xff] %v6190_v27  ;;  %10790 = vst [vmem:[#allocation101_spill] sm:$0xff] %v6192_v25  ;;  %v6264_v36 = vmul.f32 0.25, %v10805_v30 }
 0x130   :  { %v6205_v37 = vpop.f32.mrf.mxu0  ;;  %v6207_v22 = vpop.f32.mrf.mxu1 }
 0x131   :  { %10791 = vst [vmem:[#allocation102_spill] sm:$0xff] %v6205_v37  ;;  %10792 = vst [vmem:[#allocation103_spill] sm:$0xff] %v6207_v22 }
 0x132   :  { %v6218_v26 = vpop.f32.mrf.mxu0  ;;  %v6220_v15 = vpop.f32.mrf.mxu1 }
 0x133   :  { %10793 = vst [vmem:[#allocation104_spill] sm:$0xff] %v6218_v26  ;;  %10794 = vst [vmem:[#allocation105_spill] sm:$0xff] %v6220_v15  ;;  %v834_v18 = vmul.f32 0.25, %v6218_v26  ;;  %v943_v26 = vadd.f32 %v942_v43, %v822_v54  ;;  %v898_v48 = vmul.f32 0.25, %v6220_v15 }
 0x134   :  { %v6230_v10 = vpop.f32.mrf.mxu0  ;;  %v6232_v34 = vpop.f32.mrf.mxu1 }
 0x135   :  { %10795 = vst [vmem:[#allocation106_spill] sm:$0xff] %v6230_v10  ;;  %10796 = vst [vmem:[#allocation107_spill] sm:$0xff] %v6232_v34  ;;  %v916_v32 = vadd.f32 %v915_v52, %v834_v18  ;;  %v835_v21 = vmul.f32 0.25, %v6230_v10  ;;  %v10800_v18 = vld [vmem:[#allocation80_spill] sm:$0xff] }
 0x136   :  { %v6241_v14 = vpop.f32.mrf.mxu0  ;;  %v6243_v12 = vpop.f32.mrf.mxu1  ;;  %v6248_v45 = vmul.f32 0.25, %v10800_v18  ;;  %v10804_v18 = vld [vmem:[#allocation82_spill] sm:$0xff] }
 0x137   :  { %10798 = vst [vmem:[#allocation108_spill] sm:$0xff] %v6241_v14  ;;  %10799 = vst [vmem:[#allocation109_spill] sm:$0xff] %v6243_v12  ;;  %v917_v8 = vadd.f32 %v916_v32, %v6107_v11  ;;  %v923_v9 = vadd.f32 %v922_v23, %v835_v21  ;;  %v836_v52 = vmul.f32 0.25, %v6241_v14  ;;  %v950_v23 = vadd.f32 %v949_v29, %v823_v46 }
 0x138   :  { %v6253_v35 = vpop.f32.mrf.mxu0  ;;  %v6255_v10 = vpop.f32.mrf.mxu1  ;;  %v957_v21 = vadd.f32 %v956_v3, %v824_v13  ;;  %v6261_v14 = vmul.f32 0.25, %v10804_v18  ;;  %v964_v29 = vadd.f32 %v963_v49, %v825_v63  ;;  %v6274_v13 = vadd.f32 %v970_v50, %v826_v47 }
 0x139   :  { %10802 = vst [vmem:[#allocation110_spill] sm:$0xff] %v6253_v35  ;;  %10803 = vst [vmem:[#allocation111_spill] sm:$0xff] %v6255_v10  ;;  %v924_v43 = vadd.f32 %v923_v9, %v6111_v41  ;;  %v918_v11 = vadd.f32 %v917_v8, %v6167_v2  ;;  %v930_v32 = vadd.f32 %v929_v38, %v836_v52  ;;  %v837_v54 = vmul.f32 0.25, %v6253_v35 }
 0x13a   :  { %v6266_v15 = vpop.f32.mrf.mxu0  ;;  %v6272_v8 = vpop.f32.mrf.mxu1  ;;  %v899_v46 = vmul.f32 0.25, %v6232_v34  ;;  %v10833_v34 = vld [vmem:[#allocation90_spill] sm:$0xff] }
 0x13b   :  { %10806 = vst [vmem:[#allocation112_spill] sm:$0xff] %v6266_v15  ;;  %v919_v42 = vadd.f32 %v918_v11, %v882_v58  ;;  %v931_v41 = vadd.f32 %v930_v32, %v6115_v40  ;;  %v925_v2 = vadd.f32 %v924_v43, %v6172_v60  ;;  %v937_v38 = vadd.f32 %v936_v31, %v837_v54  ;;  %v10810_v11 = vld [vmem:[#allocation87_spill] sm:$0xff]  ;;  %v10811_v31 = vld [vmem:[#allocation89_spill] sm:$0xff] }
 0x13c   :  { %10808 = vst [vmem:[#allocation114_spill] sm:$0xff] %v6272_v8  ;;  %v838_v3 = vmul.f32 0.25, %v6266_v15  ;;  %v6278_v9 = vpop.f32.mrf.mxu0  ;;  %v827_v60 = vmul.f32 0.25, %v10810_v11  ;;  %v6284_v43 = vmul.f32 0.25, %v10811_v31  ;;  %v900_v32 = vmul.f32 0.25, %v6243_v12  ;;  %v10868_v31 = vld [vmem:[#allocation96_spill] sm:$0xff] }
 0x13d   :  { %10809 = vst [vmem:[#allocation115_spill] sm:$0xff] %v6278_v9  ;;  %v920_v52 = vadd.f32 %v919_v42, %v898_v48  ;;  %v926_v30 = vadd.f32 %v925_v2, %v883_v62  ;;  %v938_v58 = vadd.f32 %v937_v38, %v6119_v4  ;;  %v932_v40 = vadd.f32 %v931_v41, %v6180_v0  ;;  %v6291_v48 = vpop.f32.mrf.mxu1  ;;  %v6298_v2 = vpop.permute.xlu0 %753 }
 0x13e   :  { %v944_v49 = vadd.f32 %v943_v26, %v838_v3  ;;  %v839_v47 = vmul.f32 0.25, %v6278_v9  ;;  %v6287_v50 = vpop.f32.mrf.mxu0  ;;  %10813 = vst [vmem:[#allocation117_spill] sm:$0xff] %v6291_v48  ;;  %v829_v0 = vmul.f32 0.25, %v6139_v51  ;;  %10815 = vst [vmem:[#allocation119_spill] sm:$0xff] %v6298_v2 }
 0x13f   :  { %10812 = vst [vmem:[#allocation116_spill] sm:$0xff] %v6287_v50  ;;  %v927_v63 = vadd.f32 %v926_v30, %v899_v46  ;;  %v933_v54 = vadd.f32 %v932_v40, %v884_v17  ;;  %v939_v42 = vadd.f32 %v938_v58, %v6185_v56  ;;  %v840_v41 = vmul.f32 0.25, %v6287_v50 }
 0x140   :  { %v945_v4 = vadd.f32 %v944_v49, %v6127_v53  ;;  %v951_v62 = vadd.f32 %v950_v23, %v839_v47  ;;  %v6296_v26 = vpop.f32.mrf.mxu0  ;;  %v901_v30 = vmul.f32 0.25, %v6255_v10  ;;  %v6302_v17 = vadd.f32 %v920_v52, %v6268_v44  ;;  %v10818_v52 = vld [vmem:[#allocation91_spill] sm:$0xff] }
 0x141   :  { %10814 = vst [vmem:[#allocation118_spill] sm:$0xff] %v6296_v26  ;;  %v934_v38 = vadd.f32 %v933_v54, %v900_v32  ;;  %v940_v46 = vadd.f32 %v939_v42, %v885_v39  ;;  %v958_v58 = vadd.f32 %v957_v21, %v840_v41  ;;  %v841_v53 = vmul.f32 0.25, %v6296_v26  ;;  %v6313_v32 = vpop.f32.mrf.mxu1 }
 0x142   :  { %v952_v56 = vadd.f32 %v951_v62, %v6131_v55  ;;  %v946_v3 = vadd.f32 %v945_v4, %v6195_v20  ;;  %v6307_v23 = vpop.f32.mrf.mxu0  ;;  %v902_v49 = vmul.f32 0.25, %v6272_v8  ;;  %v6311_v47 = vadd.f32 %v927_v63, %v6268_v44  ;;  %10817 = vst [vmem:[#allocation121_spill] sm:$0xff] %v6313_v32  ;;  %v10831_v44 = vld [vmem:[#allocation97_spill] sm:$0xff] }
 0x143   :  { %10816 = vst [vmem:[#allocation120_spill] sm:$0xff] %v6307_v23  ;;  %v941_v40 = vadd.f32 %v940_v46, %v901_v30  ;;  %v6316_v39 = vadd.f32 %v934_v38, %v6298_v2  ;;  %v959_v20 = vadd.f32 %v958_v58, %v10818_v52  ;;  %v965_v54 = vadd.f32 %v964_v29, %v841_v53  ;;  %v6335_v30 = vpop.permute.xlu1 %758  ;;  %v6341_v53 = vpop.f32.mrf.mxu1 }
 0x144   :  { %v947_v55 = vadd.f32 %v946_v3, %v6238_v7  ;;  %v953_v21 = vadd.f32 %v952_v56, %v6199_v24  ;;  %v6321_v42 = vpop.f32.mrf.mxu0  ;;  %v1042_v4 = vmul.f32 %v6302_v17, %v6302_v17  ;;  %v842_v41 = vmul.f32 0.25, %v6307_v23  ;;  %10820 = vst [vmem:[#allocation122_spill] sm:$0xff] %v6335_v30  ;;  %10821 = vst [vmem:[#allocation123_spill] sm:$0xff] %v6341_v53 }
 0x145   :  { %10819 = vst [vmem:[#allocation91_spill] sm:$0xff] %v6321_v42  ;;  %v6326_v63 = vadd.f32 %v941_v40, %v6298_v2  ;;  %v1044_v62 = vmul.f32 %v6316_v39, %v6316_v39  ;;  %v903_v7 = vmul.f32 0.25, %v6291_v48  ;;  %v966_v24 = vadd.f32 %v965_v54, %v6145_v61 }
 0x146   :  { %v954_v38 = vadd.f32 %v953_v21, %v6248_v45  ;;  %v960_v29 = vadd.f32 %v959_v20, %v6202_v33  ;;  %v948_v46 = vadd.f32 %v947_v55, %v902_v49  ;;  %v1043_v56 = vmul.f32 %v6311_v47, %v6311_v47  ;;  %v6343_v40 = vpop.f32.mrf.mxu0 }
 0x147   :  { %v1045_v3 = vmul.f32 %v6326_v63, %v6326_v63  ;;  %v1058_v58 = vadd.f32 %v1044_v62, %v1042_v4  ;;  %10822 = vst [vmem:[#allocation124_spill] sm:$0xff] %v6343_v40  ;;  %v904_v45 = vmul.f32 0.25, %v6313_v32  ;;  %v967_v33 = vadd.f32 %v966_v24, %v6210_v5 }
 0x148   :  { %v955_v52 = vadd.f32 %v954_v38, %v903_v7  ;;  %v961_v61 = vadd.f32 %v960_v29, %v6261_v14  ;;  %v991_v49 = vadd.f32 %v6223_v16, %v6154_v19  ;;  %v972_v21 = vadd.f32 %v6274_v13, %v842_v41  ;;  %v6360_v16 = vpop.f32.mrf.mxu0 }
 0x149   :  { %v1059_v55 = vrot.slane %v1058_v58, 4  ;;  %v1065_v20 = vadd.f32 %v1045_v3, %v1043_v56  ;;  %v978_v54 = vadd.f32 %v6213_v6, %v827_v60  ;;  %v905_v62 = vmul.f32 0.25, %v6341_v53  ;;  %10823 = vst [vmem:[#allocation125_spill] sm:$0xff] %v6360_v16  ;;  %v6369_v3 = vpop.f32.mrf.mxu1 }
 0x14a   :  { %v962_v4 = vadd.f32 %v961_v61, %v904_v45  ;;  %v968_v7 = vadd.f32 %v967_v33, %v6264_v36  ;;  %v6355_v14 = vadd.f32 %v948_v46, %v6335_v30  ;;  %v6358_v5 = vadd.f32 %v955_v52, %v6335_v30  ;;  %v10824_v36 = vld [vmem:[#allocation94_spill] sm:$0xff]  ;;  %v6367_v46 = vpop.permute.xlu1 %763  ;;  %10826 = vst [vmem:[#allocation126_spill] sm:$0xff] %v6369_v3 }
 0x14b   :  { %v1060_v38 = vadd.f32 %v1059_v55, %v1058_v58  ;;  %v1066_v2 = vrot.slane %v1065_v20, 4  ;;  %v985_v19 = vadd.f32 %v6215_v28, %v6284_v43  ;;  %v992_v13 = vadd.f32 %v991_v49, %v829_v0  ;;  %10825 = vst [vmem:[#allocation94_spill] sm:$0xff] %v6367_v46 }
 0x14c   :  { %v969_v6 = vadd.f32 %v968_v7, %v905_v62  ;;  %v844_v60 = vmul.f32 0.25, %v6343_v40  ;;  %v973_v29 = vadd.f32 %v972_v21, %v10824_v36  ;;  %v843_v56 = vmul.f32 0.25, %v6321_v42  ;;  %v10827_v21 = vld [vmem:[#allocation58_spill] sm:$0xff]  ;;  %v6390_v36 = vpop.f32.mrf.mxu1 }
 0x14d   :  { %v1061_v41 = vrot.slane %v1060_v38, 2  ;;  %v1067_v24 = vadd.f32 %v1066_v2, %v1065_v20  ;;  %v6372_v52 = vadd.f32 %v962_v4, %v6367_v46  ;;  %v845_v43 = vmul.f32 0.25, %v6360_v16  ;;  %10830 = vst [vmem:[#allocation127_spill] sm:$0xff] %v6390_v36  ;;  %v10855_v16 = vld [vmem:[#allocation35_spill] sm:$0xff] }
 0x14e   :  { %v986_v58 = vadd.f32 %v985_v19, %v844_v60  ;;  %v6375_v28 = vadd.f32 %v969_v6, %v6367_v46  ;;  %v1046_v2 = vmul.f32 %v6355_v14, %v6355_v14  ;;  %v1047_v61 = vmul.f32 %v6358_v5, %v6358_v5  ;;  %v10828_v19 = vld [vmem:[#allocation24_spill] sm:$0xff]  ;;  %v10829_v60 = vld [vmem:[#allocation54_spill] sm:$0xff] }
 0x14f   :  { %v1062_v0 = vadd.f32 %v1061_v41, %v1060_v38  ;;  %v1068_v45 = vrot.slane %v1067_v24, 2  ;;  %v1048_v49 = vmul.f32 %v6372_v52, %v6372_v52  ;;  %v993_v20 = vadd.f32 %v992_v13, %v845_v43  ;;  %v10832_v13 = vld [vmem:[#allocation60_spill] sm:$0xff] }
 0x150   :  { %v987_v33 = vadd.f32 %v986_v58, %v6157_v57  ;;  %v1049_v55 = vmul.f32 %v6375_v28, %v6375_v28  ;;  %v876_v4 = vmul.f32 0.25, %v10827_v21  ;;  %v979_v38 = vadd.f32 %v978_v54, %v843_v56 }
 0x151   :  { %v1063_v62 = vrot.slane %v1062_v0, 1  ;;  %v1069_v7 = vadd.f32 %v1068_v45, %v1067_v24  ;;  %v859_v6 = vmul.f32 0.25, %v10828_v19  ;;  %v874_v41 = vmul.f32 0.25, %v10829_v60  ;;  %v10834_v19 = vld [vmem:[#allocation56_spill] sm:$0xff] }
 0x152   :  { %v1072_v46 = vadd.f32 %v1048_v49, %v1046_v2  ;;  %v1079_v57 = vadd.f32 %v1049_v55, %v1047_v61  ;;  %v994_v53 = vadd.f32 %v993_v20, %v10831_v44  ;;  %v988_v48 = vadd.f32 %v987_v33, %v876_v4  ;;  %v10835_v2 = vld [vmem:[#allocation86_spill] sm:$0xff]  ;;  %v6402_v49 = vpop.f32.mrf.mxu1 }
 0x153   :  { %v6392_v58 = vadd.f32 %v1063_v62, %v1062_v0  ;;  %v1070_v30 = vrot.slane %v1069_v7, 1  ;;  %v877_v43 = vmul.f32 0.25, %v10832_v13  ;;  %v974_v10 = vadd.f32 %v973_v29, %v874_v41  ;;  %10836 = vst [vmem:[#allocation97_spill] sm:$0xff] %v6402_v49  ;;  %v10837_v29 = vld [vmem:[#allocation93_spill] sm:$0xff] }
 0x154   :  { %v892_v24 = vmul.f32 0.25, %v10833_v34  ;;  %v980_v45 = vadd.f32 %v979_v38, %v859_v6  ;;  %v875_v21 = vmul.f32 0.25, %v10834_v19  ;;  %v890_v61 = vmul.f32 0.25, %v10835_v2  ;;  %v6410_v19 = vpop.f32.mrf.mxu1  ;;  %v10839_v34 = vld [vmem:[#allocation88_spill] sm:$0xff]  ;;  %v6419_v2 = vpop.permute.xlu1 %773 }
 0x155   :  { %v6397_v54 = vadd.f32 %v1070_v30, %v1069_v7  ;;  %v1114_v56 = vadd.f32 1.0, %v6392_v58  ;;  %v1073_v0 = vrot.slane %v1072_v46, 4  ;;  %v1080_v33 = vrot.slane %v1079_v57, 4  ;;  %10838 = vst [vmem:[#allocation128_spill] sm:$0xff] %v6410_v19  ;;  %10844 = vst [vmem:[#allocation130_spill] sm:$0xff] %v6419_v2 }
 0x156   :  { %v989_v55 = vadd.f32 %v988_v48, %v892_v24  ;;  %v995_v20 = vadd.f32 %v994_v53, %v877_v43  ;;  %v893_v4 = vmul.f32 0.25, %v10837_v29  ;;  %v906_v30 = vmul.f32 0.25, %v6369_v3  ;;  %v6414_v3 = vpop.f32.mrf.mxu0  ;;  %v6482_v23 = vpop.f32.mrf.mxu1 }
 0x157   :  { %v1115_v44 = vadd.f32 1.0, %v6397_v54  ;;  %5264 = vrcp.f32 %v1114_v56  ;;  %v975_v62 = vadd.f32 %v974_v10, %v890_v61  ;;  %v1138_v7 = vadd.f32 1e-08, %v6392_v58  ;;  %v10840_v56 = vld [vmem:[#allocation29_spill] sm:$0xff]  ;;  %10841 = vst [vmem:[#allocation129_spill] sm:$0xff] %v6414_v3  ;;  %10867 = vst [vmem:[#allocation139_spill] sm:$0xff] %v6482_v23 }
 0x158   :  { %v981_v38 = vadd.f32 %v980_v45, %v875_v21  ;;  %v908_v6 = vmul.f32 0.25, %v6402_v49  ;;  %v1139_v41 = vadd.f32 1e-08, %v6397_v54  ;;  %v1074_v13 = vadd.f32 %v1073_v0, %v1072_v46  ;;  %v10842_v45 = vld [vmem:[#allocation61_spill] sm:$0xff]  ;;  %v10843_v49 = vld [vmem:[#allocation63_spill] sm:$0xff] }
 0x159   :  { %5266 = vrcp.f32 %v1115_v44  ;;  %v891_v48 = vmul.f32 0.25, %v10839_v34  ;;  %v1081_v53 = vadd.f32 %v1080_v33, %v1079_v57  ;;  %v996_v24 = vadd.f32 %v995_v20, %v893_v4  ;;  %v10846_v4 = vld [vmem:[#allocation31_spill] sm:$0xff] }
 0x15a   :  { %v990_v43 = vadd.f32 %v989_v55, %v908_v6  ;;  %v798_v29 = vmul.f32 0.25, %v10840_v56  ;;  %5268 = vrsqrt.f32 %v1138_v7  ;;  %v976_v10 = vadd.f32 %v975_v62, %v906_v30  ;;  %v10847_v62 = vld [vmem:[#allocation30_spill] sm:$0xff] }
 0x15b   :  { %v982_v61 = vadd.f32 %v981_v38, %v891_v48  ;;  %v909_v21 = vmul.f32 0.25, %v6410_v19  ;;  %v814_v44 = vmul.f32 0.25, %v10842_v45  ;;  %v815_v46 = vmul.f32 0.25, %v10843_v49  ;;  %v10848_v38 = vld [vmem:[#allocation32_spill] sm:$0xff]  ;;  %v10849_v48 = vld [vmem:[#allocation95_spill] sm:$0xff]  ;;  %v6429_v49 = vpop.permute.xlu0 %768  ;;  %v10852_v45 = vld [vmem:[#allocation33_spill] sm:$0xff] }
 0x15c   :  { %5270 = vrsqrt.f32 %v1139_v41  ;;  %v1075_v0 = vrot.slane %v1074_v13, 2  ;;  %v907_v57 = vmul.f32 0.25, %v6390_v36  ;;  %v1082_v33 = vrot.slane %v1081_v53, 2  ;;  %10850 = vst [vmem:[#allocation132_spill] sm:$0xff] %v6429_v49  ;;  %v6431_v41 = vpop.f32.mrf.mxu0 }
 0x15d   :  { %v997_v55 = vadd.f32 %v996_v24, %v909_v21  ;;  %v6423_v20 = vadd.f32 %v990_v43, %v6419_v2  ;;  %v799_v30 = vmul.f32 0.25, %v10846_v4  ;;  %v862_v7 = vmul.f32 0.25, %v10847_v62  ;;  %10851 = vst [vmem:[#allocation133_spill] sm:$0xff] %v6431_v41 }
 0x15e   :  { %v863_v6 = vmul.f32 0.25, %v10848_v38  ;;  %v830_v19 = vmul.f32 0.25, %v10849_v48  ;;  %v800_v56 = vmul.f32 0.25, %v10852_v45  ;;  %v831_v36 = vmul.f32 0.25, %v6175_v59 }
 0x15f   :  { %10845 = vst [vmem:[#allocation131_spill] sm:$0xff] %v6423_v20  ;;  %v983_v24 = vadd.f32 %v982_v61, %v907_v57  ;;  %v6436_v43 = vadd.f32 %v976_v10, %v6429_v49  ;;  %v998_v21 = vadd.f32 %v814_v44, %v798_v29  ;;  %v1005_v4 = vadd.f32 %v815_v46, %v799_v30  ;;  %v10856_v61 = vld [vmem:[#allocation34_spill] sm:$0xff]  ;;  %v10857_v10 = vld [vmem:[#allocation36_spill] sm:$0xff]  ;;  %v10858_v46 = vld [vmem:[#allocation65_spill] sm:$0xff] }
 0x160   :  { %v1076_v34 = vadd.f32 %v1075_v0, %v1074_v13  ;;  %v846_v62 = vmul.f32 0.25, %v6414_v3  ;;  %v1083_v38 = vadd.f32 %v1082_v33, %v1081_v53  ;;  %v6440_v48 = vadd.f32 %v997_v55, %v6419_v2  ;;  %v10861_v2 = vld [vmem:[#allocation64_spill] sm:$0xff] }
 0x161   :  { %10853 = vst [vmem:[#allocation134_spill] sm:$0xff] %v6436_v43  ;;  %v1052_v60 = vmul.f32 %v6423_v20, %v6423_v20  ;;  %v847_v45 = vmul.f32 0.25, %v6431_v41  ;;  %v801_v59 = vmul.f32 0.25, %v10855_v16  ;;  %v6447_v57 = vmul.f32 0.25, %v10856_v61  ;;  %v10860_v41 = vld [vmem:[#allocation62_spill] sm:$0xff] }
 0x162   :  { %10854 = vst [vmem:[#allocation135_spill] sm:$0xff] %v6440_v48  ;;  %v6450_v29 = vmul.f32 0.25, %v10857_v10  ;;  %v999_v13 = vadd.f32 %v998_v21, %v830_v19  ;;  %v816_v53 = vmul.f32 0.25, %v10858_v46  ;;  %v1006_v0 = vadd.f32 %v1005_v4, %v831_v36  ;;  %v6462_v36 = vpop.f32.mrf.mxu0  ;;  %v10863_v4 = vld [vmem:[#allocation67_spill] sm:$0xff] }
 0x163   :  { %v6454_v33 = vadd.f32 %v983_v24, %v6429_v49  ;;  %v1050_v55 = vmul.f32 %v6436_v43, %v6436_v43  ;;  %v878_v16 = vmul.f32 0.25, %v10860_v41  ;;  %v879_v61 = vmul.f32 0.25, %v10861_v2  ;;  %10862 = vst [vmem:[#allocation137_spill] sm:$0xff] %v6462_v36  ;;  %v10864_v2 = vld [vmem:[#allocation66_spill] sm:$0xff]  ;;  %v10907_v43 = vld [vmem:[#allocation76_spill] sm:$0xff] }
 0x164   :  { %v5265_v44 = vpop.eup %5264  ;;  %v1077_v3 = vrot.slane %v1076_v34, 1  ;;  %v1000_v42 = vadd.f32 %v999_v13, %v846_v62  ;;  %v1084_v10 = vrot.slane %v1083_v38, 1  ;;  %v1053_v19 = vmul.f32 %v6440_v48, %v6440_v48  ;;  %v10865_v62 = vld [vmem:[#allocation68_spill] sm:$0xff] }
 0x165   :  { %10859 = vst [vmem:[#allocation136_spill] sm:$0xff] %v6454_v33  ;;  %v1086_v21 = vadd.f32 %v1052_v60, %v1050_v55  ;;  %v1007_v46 = vadd.f32 %v1006_v0, %v847_v45  ;;  %v817_v24 = vmul.f32 0.25, %v10863_v4  ;;  %v832_v49 = vmul.f32 0.25, %v6190_v27 }
 0x166   :  { %v5267_v30 = vpop.eup %5266  ;;  %v1130_v51 = vmul.f32 %v5265_v44, %v6392_v58  ;;  %v1012_v11 = vadd.f32 %v816_v53, %v800_v56  ;;  %v6469_v40 = vmul.f32 0.25, %v10864_v2  ;;  %v6472_v13 = vmul.f32 0.25, %v10865_v62 }
 0x167   :  { %v1131_v41 = vmul.f32 %v5267_v30, %v6397_v54  ;;  %v1051_v60 = vmul.f32 %v6454_v33, %v6454_v33  ;;  %v5269_v45 = vpop.eup %5268  ;;  %v833_v0 = vmul.f32 0.25, %v6205_v37  ;;  %v6477_v55 = vadd.f32 %v1077_v3, %v1076_v34 }
 0x168   :  { %10866 = vst [vmem:[#allocation138_spill] sm:$0xff] %v6472_v13  ;;  %v1001_v4 = vadd.f32 %v1000_v42, %v862_v7  ;;  %v848_v58 = vmul.f32 0.25, %v6462_v36  ;;  %v6480_v54 = vadd.f32 %v1084_v10, %v1083_v38  ;;  %v1087_v56 = vrot.slane %v1086_v21, 4 }
 0x169   :  { %v5271_v44 = vpop.eup %5270  ;;  %v1093_v53 = vadd.f32 %v1053_v19, %v1051_v60  ;;  %v1008_v30 = vadd.f32 %v1007_v46, %v863_v6  ;;  %v1019_v2 = vadd.f32 %v817_v24, %v801_v59  ;;  %v1013_v62 = vadd.f32 %v1012_v11, %v832_v49  ;;  %v6491_v6 = vpop.f32.mrf.mxu0  ;;  %v10873_v60 = vld [vmem:[#allocation5_spill] sm:$0xff] }
 0x16a   :  { %v1154_v27 = vmul.f32 %v5269_v45, %v1130_v51  ;;  %v1155_v13 = vmul.f32 %v5271_v44, %v1131_v41  ;;  %v894_v48 = vmul.f32 0.25, %v10868_v31  ;;  %v895_v34 = vmul.f32 0.25, %v6177_v1  ;;  %10870 = vst [vmem:[#allocation141_spill] sm:$0xff] %v6491_v6  ;;  %v10875_v44 = vld [vmem:[#allocation9_spill] sm:$0xff] }
 0x16b   :  { %v896_v42 = vmul.f32 0.25, %v6192_v25  ;;  %v6488_v3 = vmul.f32 0.25, %v6207_v22  ;;  %v1116_v7 = vadd.f32 1.0, %v6477_v55  ;;  %v1014_v38 = vadd.f32 %v1013_v62, %v848_v58  ;;  %v10883_v1 = vld [vmem:[#allocation73_spill] sm:$0xff] }
 0x16c   :  { %v1002_v10 = vadd.f32 %v1001_v4, %v878_v16  ;;  %v1020_v59 = vadd.f32 %v1019_v2, %v833_v0  ;;  %v1117_v51 = vadd.f32 1.0, %v6480_v54  ;;  %v1088_v11 = vadd.f32 %v1087_v56, %v1086_v21  ;;  %v6506_v16 = vpop.f32.mrf.mxu1  ;;  %v10874_v0 = vld [vmem:[#allocation7_spill] sm:$0xff] }
 0x16d   :  { %10869 = vst [vmem:[#allocation140_spill] sm:$0xff] %v6488_v3  ;;  %v1094_v49 = vrot.slane %v1093_v53, 4  ;;  %v1009_v41 = vadd.f32 %v1008_v30, %v879_v61  ;;  %v6495_v46 = vmul.f32 %v1154_v27, %v6302_v17  ;;  %v6498_v19 = vmul.f32 %v1155_v13, %v6311_v47  ;;  %10872 = vst [vmem:[#allocation143_spill] sm:$0xff] %v6506_v16  ;;  %v10876_v30 = vld [vmem:[#allocation11_spill] sm:$0xff] }
 0x16e   :  { %v6501_v24 = vmul.f32 %v1154_v27, %v6316_v39  ;;  %v6504_v62 = vmul.f32 %v1155_v13, %v6326_v63  ;;  %v1140_v2 = vadd.f32 1e-08, %v6477_v55  ;;  %v910_v21 = vmul.f32 0.25, %v6482_v23 }
 0x16f   :  { %v911_v61 = vmul.f32 0.25, %v6506_v16  ;;  %v849_v17 = vmul.f32 0.25, %v6491_v6  ;;  %5272 = vrcp.f32 %v1116_v7  ;;  %v1141_v47 = vadd.f32 1e-08, %v6480_v54  ;;  %v10877_v16 = vld [vmem:[#allocation37_spill] sm:$0xff]  ;;  %v10884_v6 = vld [vmem:[#allocation75_spill] sm:$0xff] }
 0x170   :  { %10871 = vst [vmem:[#allocation142_spill] sm:$0xff] %v6504_v62  ;;  %v1015_v4 = vadd.f32 %v1014_v38, %v6447_v57  ;;  %v1003_v27 = vadd.f32 %v1002_v10, %v894_v48  ;;  %5274 = vrcp.f32 %v1117_v51  ;;  %v1089_v39 = vrot.slane %v1088_v11, 2  ;;  %v10878_v48 = vld [vmem:[#allocation39_spill] sm:$0xff] }
 0x171   :  { %v1095_v63 = vadd.f32 %v1094_v49, %v1093_v53  ;;  %v1010_v13 = vadd.f32 %v1009_v41, %v895_v34  ;;  %v1178_v45 = vmul.f32 %v6495_v46, %v10873_v60  ;;  %v1179_v58 = vmul.f32 %v6498_v19, %v10874_v0  ;;  %v10879_v53 = vld [vmem:[#allocation41_spill] sm:$0xff]  ;;  %v10880_v10 = vld [vmem:[#allocation43_spill] sm:$0xff]  ;;  %v10886_v60 = vld [vmem:[#allocation108_spill] sm:$0xff] }
 0x172   :  { %v1180_v56 = vmul.f32 %v6501_v24, %v10875_v44  ;;  %v1181_v7 = vmul.f32 %v6504_v62, %v10876_v30  ;;  %v1194_v57 = vmul.f32 %v6495_v46, %v10877_v16  ;;  %v1195_v38 = vmul.f32 %v6498_v19, %v10878_v48  ;;  %v10881_v49 = vld [vmem:[#allocation69_spill] sm:$0xff]  ;;  %v10882_v0 = vld [vmem:[#allocation71_spill] sm:$0xff]  ;;  %v10885_v44 = vld [vmem:[#allocation104_spill] sm:$0xff] }
 0x173   :  { %v1196_v34 = vmul.f32 %v6501_v24, %v10879_v53  ;;  %v1197_v51 = vmul.f32 %v6504_v62, %v10880_v10  ;;  %v1210_v41 = vmul.f32 %v6495_v46, %v10881_v49  ;;  %v1211_v22 = vmul.f32 %v6498_v19, %v10882_v0  ;;  %v10887_v0 = vld [vmem:[#allocation106_spill] sm:$0xff] }
 0x174   :  { %v1212_v30 = vmul.f32 %v6501_v24, %v10883_v1  ;;  %v1213_v37 = vmul.f32 %v6504_v62, %v10884_v6  ;;  %5276 = vrsqrt.f32 %v1140_v2  ;;  %v1090_v48 = vadd.f32 %v1089_v39, %v1088_v11  ;;  %v6549_v39 = vpop.permute.xlu0 %778 }
 0x175   :  { %v1004_v16 = vadd.f32 %v1003_v27, %v910_v21  ;;  %v1016_v53 = vadd.f32 %v1015_v4, %v6469_v40  ;;  %v1226_v10 = vmul.f32 %v6495_v46, %v10885_v44  ;;  %v1228_v49 = vmul.f32 %v6501_v24, %v10886_v60  ;;  %v6547_v4 = vpop.f32.mrf.mxu1  ;;  %10889 = vst [vmem:[#allocation145_spill] sm:$0xff] %v6549_v39 }
 0x176   :  { %v1306_v23 = vadd.f32 %v1180_v56, %v1178_v45  ;;  %v1313_v25 = vadd.f32 %v1181_v7, %v1179_v58  ;;  %v1227_v31 = vmul.f32 %v6498_v19, %v10887_v0  ;;  %v1229_v1 = vmul.f32 %v6504_v62, %v6253_v35  ;;  %10888 = vst [vmem:[#allocation144_spill] sm:$0xff] %v6547_v4 }
 0x177   :  { %v1362_v6 = vadd.f32 %v1196_v34, %v1194_v57  ;;  %v1369_v2 = vadd.f32 %v1197_v51, %v1195_v38  ;;  %v1418_v11 = vadd.f32 %v1212_v30, %v1210_v41  ;;  %v1425_v21 = vadd.f32 %v1213_v37, %v1211_v22 }
 0x178   :  { %v1096_v27 = vrot.slane %v1095_v63, 2  ;;  %v1011_v40 = vadd.f32 %v1010_v13, %v911_v61  ;;  %5278 = vrsqrt.f32 %v1141_v47  ;;  %v1021_v60 = vadd.f32 %v1020_v59, %v849_v17  ;;  %v10892_v17 = vld [vmem:[#allocation6_spill] sm:$0xff] }
 0x179   :  { %v912_v45 = vmul.f32 0.25, %v6547_v4  ;;  %v1017_v58 = vadd.f32 %v1016_v53, %v896_v42  ;;  %v1307_v56 = vrot.slane %v1306_v23, 4  ;;  %v1314_v7 = vrot.slane %v1313_v25, 4  ;;  %v10893_v53 = vld [vmem:[#allocation10_spill] sm:$0xff] }
 0x17a   :  { %v1474_v0 = vadd.f32 %v1228_v49, %v1226_v10  ;;  %v6553_v35 = vadd.f32 %v1004_v16, %v6549_v39  ;;  %v1363_v57 = vrot.slane %v1362_v6, 4  ;;  %v1370_v30 = vrot.slane %v1369_v2, 4 }
 0x17b   :  { %v1481_v22 = vadd.f32 %v1229_v1, %v1227_v31  ;;  %v1091_v37 = vrot.slane %v1090_v48, 1  ;;  %v1419_v61 = vrot.slane %v1418_v11, 4  ;;  %v1426_v13 = vrot.slane %v1425_v21, 4 }
 0x17c   :  { %10890 = vst [vmem:[#allocation146_spill] sm:$0xff] %v6553_v35  ;;  %v6555_v38 = vadd.f32 %v1096_v27, %v1095_v63  ;;  %v6558_v47 = vadd.f32 %v1011_v40, %v6549_v39  ;;  %v5273_v59 = vpop.eup %5272  ;;  %v1242_v42 = vmul.f32 %v6495_v46, %v10892_v17  ;;  %v1244_v34 = vmul.f32 %v6501_v24, %v10893_v53 }
 0x17d   :  { %v6565_v16 = vadd.f32 %v1021_v60, %v6450_v29  ;;  %v1018_v10 = vadd.f32 %v1017_v58, %v912_v45  ;;  %v5275_v1 = vpop.eup %5274  ;;  %v1308_v31 = vadd.f32 %v1307_v56, %v1306_v23  ;;  %v1315_v51 = vadd.f32 %v1314_v7, %v1313_v25  ;;  %v6574_v29 = vpop.permute.xlu1 %783  ;;  %v10897_v25 = vld [vmem:[#allocation8_spill] sm:$0xff] }
 0x17e   :  { %10891 = vst [vmem:[#allocation147_spill] sm:$0xff] %v6558_v47  ;;  %v1475_v49 = vrot.slane %v1474_v0, 4  ;;  %v6569_v63 = vmul.f32 %v6553_v35, %v6553_v35  ;;  %v1364_v41 = vadd.f32 %v1363_v57, %v1362_v6  ;;  %v1371_v27 = vadd.f32 %v1370_v30, %v1369_v2  ;;  %10895 = vst [vmem:[#allocation149_spill] sm:$0xff] %v6574_v29  ;;  %v10898_v45 = vld [vmem:[#allocation12_spill] sm:$0xff]  ;;  %v10900_v30 = vld [vmem:[#allocation42_spill] sm:$0xff] }
 0x17f   :  { %10894 = vst [vmem:[#allocation148_spill] sm:$0xff] %v6565_v16  ;;  %v1482_v40 = vrot.slane %v1481_v22, 4  ;;  %v6571_v39 = vadd.f32 %v1091_v37, %v1090_v48  ;;  %v1420_v17 = vadd.f32 %v1419_v61, %v1418_v11  ;;  %v1427_v44 = vadd.f32 %v1426_v13, %v1425_v21  ;;  %v10899_v21 = vld [vmem:[#allocation38_spill] sm:$0xff] }
 0x180   :  { %v6578_v23 = vmul.f32 %v6558_v47, %v6558_v47  ;;  %v1243_v60 = vmul.f32 %v6498_v19, %v10897_v25  ;;  %v1245_v6 = vmul.f32 %v6504_v62, %v10898_v45  ;;  %v1530_v2 = vadd.f32 %v1244_v34, %v1242_v42  ;;  %v10901_v25 = vld [vmem:[#allocation40_spill] sm:$0xff] }
 0x181   :  { %v6585_v48 = vadd.f32 %v1018_v10, %v6574_v29  ;;  %v5277_v11 = vpop.eup %5276  ;;  %v1258_v58 = vmul.f32 %v6495_v46, %v10899_v21  ;;  %v1309_v56 = vrot.slane %v1308_v31, 2  ;;  %v1316_v7 = vrot.slane %v1315_v51, 2  ;;  %v10902_v47 = vld [vmem:[#allocation44_spill] sm:$0xff]  ;;  %v10903_v21 = vld [vmem:[#allocation70_spill] sm:$0xff] }
 0x182   :  { %10896 = vst [vmem:[#allocation150_spill] sm:$0xff] %v6578_v23  ;;  %v1476_v57 = vadd.f32 %v1475_v49, %v1474_v0  ;;  %v1260_v37 = vmul.f32 %v6501_v24, %v10900_v30  ;;  %v1365_v61 = vrot.slane %v1364_v41, 2  ;;  %v1372_v13 = vrot.slane %v1371_v27, 2  ;;  %v10904_v0 = vld [vmem:[#allocation74_spill] sm:$0xff] }
 0x183   :  { %v1483_v53 = vadd.f32 %v1482_v40, %v1481_v22  ;;  %v1259_v45 = vmul.f32 %v6498_v19, %v10901_v25  ;;  %v1421_v42 = vrot.slane %v1420_v17, 2  ;;  %v1428_v34 = vrot.slane %v1427_v44, 2 }
 0x184   :  { %v1132_v10 = vmul.f32 %v5273_v59, %v6477_v55  ;;  %v1261_v23 = vmul.f32 %v6504_v62, %v10902_v47  ;;  %v1274_v4 = vmul.f32 %v6495_v46, %v10903_v21  ;;  %v1276_v49 = vmul.f32 %v6501_v24, %v10904_v0  ;;  %v10905_v59 = vld [vmem:[#allocation72_spill] sm:$0xff] }
 0x185   :  { %v1531_v30 = vrot.slane %v1530_v2, 4  ;;  %v5279_v36 = vpop.eup %5278  ;;  %v1310_v29 = vadd.f32 %v1309_v56, %v1308_v31  ;;  %v1317_v22 = vadd.f32 %v1316_v7, %v1315_v51  ;;  %v1477_v40 = vrot.slane %v1476_v57, 2 }
 0x186   :  { %v1133_v25 = vmul.f32 %v5275_v1, %v6480_v54  ;;  %v1366_v35 = vadd.f32 %v1365_v61, %v1364_v41  ;;  %v1373_v3 = vadd.f32 %v1372_v13, %v1371_v27  ;;  %v1484_v16 = vrot.slane %v1483_v53, 2  ;;  %v10918_v13 = vld [vmem:[#allocation17_spill] sm:$0xff] }
 0x187   :  { %v1586_v55 = vadd.f32 %v1260_v37, %v1258_v58  ;;  %v1275_v47 = vmul.f32 %v6498_v19, %v10905_v59  ;;  %v1422_v33 = vadd.f32 %v1421_v42, %v1420_v17  ;;  %v6603_v20 = vadd.f32 %v1428_v34, %v1427_v44 }
 0x188   :  { %v1156_v21 = vmul.f32 %v5277_v11, %v1132_v10  ;;  %v1277_v0 = vmul.f32 %v6504_v62, %v10907_v43  ;;  %v1532_v32 = vadd.f32 %v1531_v30, %v1530_v2  ;;  %v1537_v31 = vadd.f32 %v1245_v6, %v1243_v60 }
 0x189   :  { %10906 = vst [vmem:[#allocation151_spill] sm:$0xff] %v6603_v20  ;;  %v1642_v51 = vadd.f32 %v1276_v49, %v1274_v4  ;;  %v1311_v56 = vrot.slane %v1310_v29, 1  ;;  %v1318_v7 = vrot.slane %v1317_v22, 1  ;;  %v1478_v54 = vadd.f32 %v1477_v40, %v1476_v57  ;;  %v11003_v20 = vld [vmem:[#allocation148_spill] sm:$0xff] }
 0x18a   :  { %v1157_v1 = vmul.f32 %v5279_v36, %v1133_v25  ;;  %v1367_v41 = vrot.slane %v1366_v35, 1  ;;  %v1374_v27 = vrot.slane %v1373_v3, 1  ;;  %v6607_v58 = vadd.f32 %v1484_v16, %v1483_v53 }
 0x18b   :  { %v1587_v37 = vrot.slane %v1586_v55, 4  ;;  %v1423_v61 = vrot.slane %v1422_v33, 1  ;;  %v6611_v17 = vmul.f32 %v1156_v21, %v6355_v14  ;;  %v6614_v11 = vmul.f32 %v1156_v21, %v6372_v52 }
 0x18c   :  { %10908 = vst [vmem:[#allocation152_spill] sm:$0xff] %v6607_v58  ;;  %v1533_v60 = vrot.slane %v1532_v32, 2  ;;  %v1538_v4 = vrot.slane %v1537_v31, 4  ;;  %v1593_v6 = vadd.f32 %v1261_v23, %v1259_v45  ;;  %v1643_v2 = vrot.slane %v1642_v51, 4 }
 0x18d   :  { %v6616_v57 = vadd.f32 %v1311_v56, %v1310_v29  ;;  %v6618_v36 = vadd.f32 %v1318_v7, %v1317_v22  ;;  %v6621_v53 = vmul.f32 %v1157_v1, %v6358_v5  ;;  %v6624_v16 = vmul.f32 %v1157_v1, %v6375_v28  ;;  %v10917_v29 = vld [vmem:[#allocation13_spill] sm:$0xff]  ;;  %v10925_v56 = vld [vmem:[#allocation51_spill] sm:$0xff] }
 0x18e   :  { %v6626_v25 = vadd.f32 %v1367_v41, %v1366_v35  ;;  %v6628_v14 = vadd.f32 %v1374_v27, %v1373_v3  ;;  %v1479_v52 = vrot.slane %v1478_v54, 1  ;;  %v1588_v21 = vadd.f32 %v1587_v37, %v1586_v55  ;;  %v10920_v3 = vld [vmem:[#allocation15_spill] sm:$0xff]  ;;  %v10923_v22 = vld [vmem:[#allocation49_spill] sm:$0xff] }
 0x18f   :  { %10909 = vst [vmem:[#allocation153_spill] sm:$0xff] %v6616_v57  ;;  %10910 = vst [vmem:[#allocation154_spill] sm:$0xff] %v6618_v36  ;;  %v6630_v30 = vadd.f32 %v1423_v61, %v1422_v33  ;;  %v6632_v23 = vadd.f32 %v1277_v0, %v1275_v47  ;;  %v1182_v45 = vmul.f32 %v6611_v17, %v10917_v29  ;;  %v1594_v35 = vrot.slane %v1593_v6, 4  ;;  %v10921_v33 = vld [vmem:[#allocation19_spill] sm:$0xff]  ;;  %v10922_v0 = vld [vmem:[#allocation45_spill] sm:$0xff] }
 0x190   :  { %10911 = vst [vmem:[#allocation155_spill] sm:$0xff] %v6621_v53  ;;  %10912 = vst [vmem:[#allocation156_spill] sm:$0xff] %v6624_v16  ;;  %v1184_v5 = vmul.f32 %v6614_v11, %v10918_v13  ;;  %v6638_v42 = vadd.f32 %v1533_v60, %v1532_v32  ;;  %v6640_v28 = vadd.f32 %v1538_v4, %v1537_v31  ;;  %v1589_v55 = vrot.slane %v1588_v21, 2  ;;  %v10924_v32 = vld [vmem:[#allocation47_spill] sm:$0xff]  ;;  %v10926_v7 = vld [vmem:[#allocation77_spill] sm:$0xff] }
 0x191   :  { %10913 = vst [vmem:[#allocation157_spill] sm:$0xff] %v6626_v25  ;;  %10914 = vst [vmem:[#allocation158_spill] sm:$0xff] %v6628_v14  ;;  %v6642_v34 = vadd.f32 %v1643_v2, %v1642_v51  ;;  %v1183_v10 = vmul.f32 %v6621_v53, %v10920_v3  ;;  %v1185_v47 = vmul.f32 %v6624_v16, %v10921_v33  ;;  %v10927_v41 = vld [vmem:[#allocation79_spill] sm:$0xff]  ;;  %v10928_v37 = vld [vmem:[#allocation81_spill] sm:$0xff] }
 0x192   :  { %10915 = vst [vmem:[#allocation159_spill] sm:$0xff] %v6630_v30  ;;  %10916 = vst [vmem:[#allocation160_spill] sm:$0xff] %v6632_v23  ;;  %v1198_v49 = vmul.f32 %v6611_v17, %v10922_v0  ;;  %v1200_v40 = vmul.f32 %v6614_v11, %v10923_v22  ;;  %v1199_v31 = vmul.f32 %v6621_v53, %v10924_v32  ;;  %v10929_v60 = vld [vmem:[#allocation83_spill] sm:$0xff]  ;;  %v10939_v23 = vld [vmem:[#allocation78_spill] sm:$0xff] }
 0x193   :  { %10919 = vst [vmem:[#allocation161_spill] sm:$0xff] %v6640_v28  ;;  %v1201_v51 = vmul.f32 %v6624_v16, %v10925_v56  ;;  %v1214_v1 = vmul.f32 %v6611_v17, %v10926_v7  ;;  %v1215_v27 = vmul.f32 %v6621_v53, %v10927_v41  ;;  %v1216_v61 = vmul.f32 %v6614_v11, %v10928_v37 }
 0x194   :  { %v1217_v4 = vmul.f32 %v6624_v16, %v10929_v60  ;;  %v1320_v2 = vadd.f32 %v1184_v5, %v1182_v45  ;;  %v1230_v44 = vmul.f32 %v6611_v17, %v6266_v15  ;;  %v1231_v43 = vmul.f32 %v6621_v53, %v6278_v9 }
 0x195   :  { %v1232_v59 = vmul.f32 %v6614_v11, %v6287_v50  ;;  %v1233_v56 = vmul.f32 %v6624_v16, %v6296_v26  ;;  %v6672_v41 = vadd.f32 %v1479_v52, %v1478_v54  ;;  %v1327_v33 = vadd.f32 %v1185_v47, %v1183_v10  ;;  %v10932_v26 = vld [vmem:[#allocation14_spill] sm:$0xff]  ;;  %v10933_v47 = vld [vmem:[#allocation16_spill] sm:$0xff] }
 0x196   :  { %v1376_v3 = vadd.f32 %v1200_v40, %v1198_v49  ;;  %v6676_v5 = vadd.f32 %v1594_v35, %v1593_v6  ;;  %v1383_v14 = vadd.f32 %v1201_v51, %v1199_v31  ;;  %v6680_v36 = vadd.f32 %v1589_v55, %v1588_v21  ;;  %v10934_v6 = vld [vmem:[#allocation18_spill] sm:$0xff]  ;;  %v10935_v51 = vld [vmem:[#allocation20_spill] sm:$0xff] }
 0x197   :  { %10930 = vst [vmem:[#allocation162_spill] sm:$0xff] %v6672_v41  ;;  %v1321_v50 = vrot.slane %v1320_v2, 4  ;;  %v1432_v15 = vadd.f32 %v1216_v61, %v1214_v1  ;;  %v1246_v54 = vmul.f32 %v6611_v17, %v10932_v26  ;;  %v1439_v52 = vadd.f32 %v1217_v4, %v1215_v27  ;;  %v10936_v55 = vld [vmem:[#allocation46_spill] sm:$0xff] }
 0x198   :  { %10931 = vst [vmem:[#allocation163_spill] sm:$0xff] %v6676_v5  ;;  %v1488_v32 = vadd.f32 %v1232_v59, %v1230_v44  ;;  %v1495_v10 = vadd.f32 %v1233_v56, %v1231_v43  ;;  %v6686_v49 = vmul.f32 %v6621_v53, %v10933_v47  ;;  %v1248_v35 = vmul.f32 %v6614_v11, %v10934_v6  ;;  %v10938_v44 = vld [vmem:[#allocation50_spill] sm:$0xff] }
 0x199   :  { %v1328_v40 = vrot.slane %v1327_v33, 4  ;;  %v1377_v31 = vrot.slane %v1376_v3, 4  ;;  %v1249_v21 = vmul.f32 %v6624_v16, %v10935_v51  ;;  %v1262_v1 = vmul.f32 %v6611_v17, %v10936_v55 }
 0x19a   :  { %v1384_v61 = vrot.slane %v1383_v14, 4  ;;  %v10937_v59 = vrot.slane %v6555_v38, 1  ;;  %v1264_v56 = vmul.f32 %v6614_v11, %v10938_v44  ;;  %v1322_v27 = vadd.f32 %v1321_v50, %v1320_v2 }
 0x19b   :  { %v1433_v4 = vrot.slane %v1432_v15, 4  ;;  %v1118_v45 = vadd.f32 1.0, %v6571_v39  ;;  %v1440_v9 = vrot.slane %v1439_v52, 4  ;;  %v1489_v60 = vrot.slane %v1488_v32, 4 }
 0x19c   :  { %v6697_v43 = vadd.f32 %v10937_v59, %v6555_v38  ;;  %v1496_v47 = vrot.slane %v1495_v10, 4  ;;  %v1278_v5 = vmul.f32 %v6611_v17, %v10939_v23  ;;  %v1329_v28 = vadd.f32 %v1328_v40, %v1327_v33  ;;  %v10940_v23 = vld [vmem:[#allocation48_spill] sm:$0xff] }
 0x19d   :  { %v1378_v55 = vadd.f32 %v1377_v31, %v1376_v3  ;;  %5280 = vrcp.f32 %v1118_v45  ;;  %v1385_v38 = vadd.f32 %v1384_v61, %v1383_v14  ;;  %v1544_v59 = vadd.f32 %v1248_v35, %v1246_v54  ;;  %v10941_v33 = vld [vmem:[#allocation52_spill] sm:$0xff] }
 0x19e   :  { %v1119_v51 = vadd.f32 1.0, %v6697_v43  ;;  %v1142_v44 = vadd.f32 1e-08, %v6571_v39  ;;  %v1280_v50 = vmul.f32 %v6614_v11, %v10804_v18  ;;  %v1323_v2 = vrot.slane %v1322_v27, 2  ;;  %v10943_v61 = vld [vmem:[#allocation84_spill] sm:$0xff] }
 0x19f   :  { %v1434_v6 = vadd.f32 %v1433_v4, %v1432_v15  ;;  %v1600_v26 = vadd.f32 %v1264_v56, %v1262_v1  ;;  %v1441_v37 = vadd.f32 %v1440_v9, %v1439_v52  ;;  %v1490_v7 = vadd.f32 %v1489_v60, %v1488_v32 }
 0x1a0   :  { %5282 = vrcp.f32 %v1119_v51  ;;  %v1497_v22 = vadd.f32 %v1496_v47, %v1495_v10  ;;  %v1143_v0 = vadd.f32 1e-08, %v6697_v43  ;;  %v1263_v3 = vmul.f32 %v6621_v53, %v10940_v23  ;;  %v10942_v51 = vld [vmem:[#allocation80_spill] sm:$0xff] }
 0x1a1   :  { %v1265_v14 = vmul.f32 %v6624_v16, %v10941_v33  ;;  %v1330_v45 = vrot.slane %v1329_v28, 2  ;;  %v1056_v54 = vmul.f32 %v6585_v48, %v6585_v48  ;;  %v1379_v35 = vrot.slane %v1378_v55, 2 }
 0x1a2   :  { %v1386_v40 = vrot.slane %v1385_v38, 2  ;;  %v1545_v31 = vrot.slane %v1544_v59, 4  ;;  %5284 = vrsqrt.f32 %v1142_v44  ;;  %v1324_v15 = vadd.f32 %v1323_v2, %v1322_v27  ;;  %v10944_v44 = vld [vmem:[#allocation105_spill] sm:$0xff] }
 0x1a3   :  { %v1435_v9 = vrot.slane %v1434_v6, 2  ;;  %v1601_v32 = vrot.slane %v1600_v26, 4  ;;  %v1656_v60 = vadd.f32 %v1280_v50, %v1278_v5  ;;  %v1442_v52 = vrot.slane %v1441_v37, 2 }
 0x1a4   :  { %v1491_v10 = vrot.slane %v1490_v7, 2  ;;  %v1498_v47 = vrot.slane %v1497_v22, 2  ;;  %5286 = vrsqrt.f32 %v1143_v0  ;;  %v1279_v1 = vmul.f32 %v6621_v53, %v10942_v51 }
 0x1a5   :  { %v1281_v56 = vmul.f32 %v6624_v16, %v10943_v61  ;;  %v1331_v4 = vadd.f32 %v1330_v45, %v1329_v28  ;;  %v1100_v33 = vadd.f32 %v1056_v54, %v6569_v63  ;;  %v1380_v23 = vadd.f32 %v1379_v35, %v1378_v55 }
 0x1a6   :  { %v1546_v18 = vadd.f32 %v1545_v31, %v1544_v59  ;;  %v1290_v27 = vmul.f32 %v6495_v46, %v10944_v44  ;;  %v1292_v5 = vmul.f32 %v6501_v24, %v6243_v12  ;;  %v1387_v50 = vadd.f32 %v1386_v40, %v1385_v38  ;;  %v10947_v46 = vld [vmem:[#allocation121_spill] sm:$0xff]  ;;  %v10985_v12 = vld [vmem:[#allocation91_spill] sm:$0xff] }
 0x1a7   :  { %v1436_v2 = vadd.f32 %v1435_v9, %v1434_v6  ;;  %v1602_v0 = vadd.f32 %v1601_v32, %v1600_v26  ;;  %v1657_v13 = vrot.slane %v1656_v60, 4  ;;  %v1325_v29 = vrot.slane %v1324_v15, 1 }
 0x1a8   :  { %v6724_v51 = vadd.f32 %v1442_v52, %v1441_v37  ;;  %v1492_v58 = vadd.f32 %v1491_v10, %v1490_v7  ;;  %v6726_v61 = vadd.f32 %v1498_v47, %v1497_v22  ;;  %v1551_v63 = vadd.f32 %v1249_v21, %v6686_v49 }
 0x1a9   :  { %v1101_v28 = vrot.slane %v1100_v33, 4  ;;  %v1294_v55 = vmul.f32 %v6611_v17, %v6272_v8  ;;  %v1296_v59 = vmul.f32 %v6614_v11, %v10947_v46  ;;  %v1332_v38 = vrot.slane %v1331_v4, 1 }
 0x1aa   :  { %10945 = vst [vmem:[#allocation164_spill] sm:$0xff] %v6724_v51  ;;  %10946 = vst [vmem:[#allocation165_spill] sm:$0xff] %v6726_v61  ;;  %v5281_v24 = vpop.eup %5280  ;;  %v1381_v6 = vrot.slane %v1380_v23, 1  ;;  %v1547_v26 = vrot.slane %v1546_v18, 2  ;;  %v1698_v45 = vadd.f32 %v1292_v5, %v1290_v27  ;;  %v1388_v37 = vrot.slane %v1387_v50, 1  ;;  %v10996_v61 = vld [vmem:[#allocation97_spill] sm:$0xff] }
 0x1ab   :  { %v1437_v35 = vrot.slane %v1436_v2, 1  ;;  %v1603_v7 = vrot.slane %v1602_v0, 2  ;;  %v1658_v22 = vadd.f32 %v1657_v13, %v1656_v60  ;;  %v6733_v40 = vadd.f32 %v1325_v29, %v1324_v15 }
 0x1ac   :  { %v1607_v21 = vadd.f32 %v1265_v14, %v1263_v3  ;;  %v1134_v17 = vmul.f32 %v5281_v24, %v6571_v39  ;;  %v1493_v31 = vrot.slane %v1492_v58, 1  ;;  %v1552_v9 = vrot.slane %v1551_v63, 4 }
 0x1ad   :  { %v5283_v54 = vpop.eup %5282  ;;  %10948 = vst [vmem:[#allocation166_spill] sm:$0xff] %v6733_v40  ;;  %v1102_v11 = vadd.f32 %v1101_v28, %v1100_v33  ;;  %v1712_v32 = vadd.f32 %v1296_v59, %v1294_v55  ;;  %v6737_v52 = vadd.f32 %v1332_v38, %v1331_v4  ;;  %v1548_v10 = vadd.f32 %v1547_v26, %v1546_v18 }
 0x1ae   :  { %v1135_v47 = vmul.f32 %v5283_v54, %v6697_v43  ;;  %v1699_v27 = vrot.slane %v1698_v45, 4  ;;  %v6740_v46 = vadd.f32 %v1381_v6, %v1380_v23  ;;  %v1604_v29 = vadd.f32 %v1603_v7, %v1602_v0 }
 0x1af   :  { %10949 = vst [vmem:[#allocation167_spill] sm:$0xff] %v6737_v52  ;;  %v5285_v5 = vpop.eup %5284  ;;  %v1659_v13 = vrot.slane %v1658_v22, 2  ;;  %v6742_v15 = vadd.f32 %v1281_v56, %v1279_v1  ;;  %v6744_v3 = vadd.f32 %v1388_v37, %v1387_v50  ;;  %v1608_v39 = vrot.slane %v1607_v21, 4  ;;  %v10978_v37 = vld [vmem:[#allocation89_spill] sm:$0xff] }
 0x1b0   :  { %10950 = vst [vmem:[#allocation168_spill] sm:$0xff] %v6740_v46  ;;  %v1158_v14 = vmul.f32 %v5285_v5, %v1134_v17  ;;  %v10953_v33 = vrot.slane %v6642_v34, 2  ;;  %v6749_v18 = vadd.f32 %v1437_v35, %v1436_v2  ;;  %v6751_v43 = vadd.f32 %v1552_v9, %v1551_v63  ;;  %v10959_v63 = vld [vmem:[#allocation131_spill] sm:$0xff]  ;;  %v10962_v17 = vld [vmem:[#allocation136_spill] sm:$0xff] }
 0x1b1   :  { %10951 = vst [vmem:[#allocation169_spill] sm:$0xff] %v6742_v15  ;;  %10952 = vst [vmem:[#allocation170_spill] sm:$0xff] %v6744_v3  ;;  %v5287_v4 = vpop.eup %5286  ;;  %v1103_v28 = vrot.slane %v1102_v11, 2  ;;  %v1713_v23 = vrot.slane %v1712_v32, 4  ;;  %v1549_v55 = vrot.slane %v1548_v10, 1  ;;  %v1591_v1 = vrot.slane %v6680_v36, 1 }
 0x1b2   :  { %v1646_v60 = vadd.f32 %v10953_v33, %v6642_v34  ;;  %10954 = vst [vmem:[#allocation171_spill] sm:$0xff] %v6749_v18  ;;  %10955 = vst [vmem:[#allocation172_spill] sm:$0xff] %v6751_v43  ;;  %v1159_v0 = vmul.f32 %v5287_v4, %v1135_v47  ;;  %v1700_v56 = vadd.f32 %v1699_v27, %v1698_v45  ;;  %v1605_v24 = vrot.slane %v1604_v29, 1  ;;  %v10958_v34 = vld [vmem:[#allocation134_spill] sm:$0xff]  ;;  %v10966_v47 = vld [vmem:[#allocation135_spill] sm:$0xff] }
 0x1b3   :  { %v6754_v50 = vadd.f32 %v1493_v31, %v1492_v58  ;;  %v1660_v38 = vadd.f32 %v1659_v13, %v1658_v22  ;;  %v6757_v6 = vadd.f32 %v1608_v39, %v1607_v21  ;;  %v6760_v2 = vmul.f32 %v1158_v14, %v10958_v34  ;;  %v10969_v13 = vld [vmem:[#allocation21_spill] sm:$0xff]  ;;  %v10983_v15 = vld [vmem:[#allocation87_spill] sm:$0xff] }
 0x1b4   :  { %v6763_v26 = vmul.f32 %v1158_v14, %v10959_v63  ;;  %v1647_v54 = vrot.slane %v1646_v60, 1  ;;  %v1104_v35 = vadd.f32 %v1103_v28, %v1102_v11  ;;  %v10960_v58 = vrot.slane %v6638_v42, 1  ;;  %v10970_v39 = vld [vmem:[#allocation25_spill] sm:$0xff]  ;;  %v10975_v63 = vld [vmem:[#allocation27_spill] sm:$0xff] }
 0x1b5   :  { %10956 = vst [vmem:[#allocation173_spill] sm:$0xff] %v6754_v50  ;;  %10957 = vst [vmem:[#allocation174_spill] sm:$0xff] %v6757_v6  ;;  %v1714_v7 = vadd.f32 %v1713_v23, %v1712_v32  ;;  %v6772_v22 = vmul.f32 %v1159_v0, %v10962_v17  ;;  %v6774_v21 = vadd.f32 %v1549_v55, %v1548_v10  ;;  %v1701_v9 = vrot.slane %v1700_v56, 2  ;;  %v10972_v23 = vld [vmem:[#allocation23_spill] sm:$0xff] }
 0x1b6   :  { %v6769_v45 = vadd.f32 %v10960_v58, %v6638_v42  ;;  %v6777_v31 = vadd.f32 %v1591_v1, %v6680_v36  ;;  %v6780_v27 = vmul.f32 %v1159_v0, %v10966_v47  ;;  %v6782_v5 = vadd.f32 %v1605_v24, %v1604_v29  ;;  %v10973_v0 = vld [vmem:[#allocation53_spill] sm:$0xff]  ;;  %v10976_v58 = vld [vmem:[#allocation55_spill] sm:$0xff]  ;;  %v10980_v36 = vld [vmem:[#allocation120_spill] sm:$0xff] }
 0x1b7   :  { %10963 = vst [vmem:[#allocation131_spill] sm:$0xff] %v6772_v22  ;;  %10964 = vst [vmem:[#allocation136_spill] sm:$0xff] %v6774_v21  ;;  %v1661_v11 = vrot.slane %v1660_v38, 1  ;;  %v1186_v32 = vmul.f32 %v6760_v2, %v10969_v13  ;;  %v1188_v10 = vmul.f32 %v6763_v26, %v10970_v39  ;;  %v6790_v14 = vadd.f32 %v1647_v54, %v1646_v60  ;;  %v10974_v24 = vld [vmem:[#allocation57_spill] sm:$0xff]  ;;  %v10979_v28 = vld [vmem:[#allocation59_spill] sm:$0xff] }
 0x1b8   :  { %10961 = vst [vmem:[#allocation134_spill] sm:$0xff] %v6769_v45  ;;  %10965 = vst [vmem:[#allocation175_spill] sm:$0xff] %v6777_v31  ;;  %v1105_v33 = vrot.slane %v1104_v35, 1  ;;  %v1715_v4 = vrot.slane %v1714_v7, 2  ;;  %v1187_v55 = vmul.f32 %v6772_v22, %v10972_v23  ;;  %v1202_v1 = vmul.f32 %v6760_v2, %v10973_v0  ;;  %v10977_v47 = vld [vmem:[#allocation85_spill] sm:$0xff]  ;;  %v10981_v23 = vld [vmem:[#allocation124_spill] sm:$0xff] }
 0x1b9   :  { %10967 = vst [vmem:[#allocation135_spill] sm:$0xff] %v6780_v27  ;;  %10968 = vst [vmem:[#allocation176_spill] sm:$0xff] %v6782_v5  ;;  %v1204_v60 = vmul.f32 %v6763_v26, %v10974_v24  ;;  %v1702_v34 = vadd.f32 %v1701_v9, %v1700_v56  ;;  %v1189_v54 = vmul.f32 %v6780_v27, %v10975_v63 }
 0x1ba   :  { %10971 = vst [vmem:[#allocation177_spill] sm:$0xff] %v6790_v14  ;;  %v1203_v17 = vmul.f32 %v6772_v22, %v10976_v58  ;;  %v1218_v59 = vmul.f32 %v6760_v2, %v10977_v47  ;;  %v1220_v49 = vmul.f32 %v6763_v26, %v10978_v37  ;;  %v1205_v29 = vmul.f32 %v6780_v27, %v10979_v28  ;;  %v10984_v28 = vld [vmem:[#allocation92_spill] sm:$0xff] }
 0x1bb   :  { %v1234_v42 = vmul.f32 %v6760_v2, %v10980_v36  ;;  %v1236_v56 = vmul.f32 %v6763_v26, %v10981_v23  ;;  %v1334_v9 = vadd.f32 %v1188_v10, %v1186_v32  ;;  %v6818_v63 = vadd.f32 %v1661_v11, %v1660_v38  ;;  %v10986_v11 = vld [vmem:[#allocation125_spill] sm:$0xff]  ;;  %v10987_v23 = vld [vmem:[#allocation22_spill] sm:$0xff] }
 0x1bc   :  { %v1716_v3 = vadd.f32 %v1715_v4, %v1714_v7  ;;  %v1219_v6 = vmul.f32 %v6772_v22, %v10983_v15  ;;  %v1221_v43 = vmul.f32 %v6780_v27, %v10984_v28  ;;  %v6828_v51 = vadd.f32 %v1105_v33, %v1104_v35  ;;  %v10988_v36 = vld [vmem:[#allocation26_spill] sm:$0xff] }
 0x1bd   :  { %10982 = vst [vmem:[#allocation178_spill] sm:$0xff] %v6818_v63  ;;  %v1703_v8 = vrot.slane %v1702_v34, 1  ;;  %v1235_v38 = vmul.f32 %v6772_v22, %v10985_v12  ;;  %v1237_v7 = vmul.f32 %v6780_v27, %v10986_v11  ;;  %v1390_v32 = vadd.f32 %v1204_v60, %v1202_v1  ;;  %v10989_v33 = vld [vmem:[#allocation54_spill] sm:$0xff] }
 0x1be   :  { %v1446_v10 = vadd.f32 %v1220_v49, %v1218_v59  ;;  %v1335_v4 = vrot.slane %v1334_v9, 4  ;;  %v1341_v58 = vadd.f32 %v1189_v54, %v1187_v55  ;;  %v1397_v52 = vadd.f32 %v1205_v29, %v1203_v17  ;;  %v10990_v12 = vld [vmem:[#allocation58_spill] sm:$0xff] }
 0x1bf   :  { %v1502_v44 = vadd.f32 %v1236_v56, %v1234_v42  ;;  %v1250_v15 = vmul.f32 %v6760_v2, %v10987_v23  ;;  %v1252_v35 = vmul.f32 %v6763_v26, %v10988_v36  ;;  %v1266_v28 = vmul.f32 %v6760_v2, %v10989_v33  ;;  %v10991_v11 = vld [vmem:[#allocation86_spill] sm:$0xff] }
 0x1c0   :  { %v1717_v37 = vrot.slane %v1716_v3, 1  ;;  %v1268_v47 = vmul.f32 %v6763_v26, %v10990_v12  ;;  %v1282_v49 = vmul.f32 %v6760_v2, %v10991_v11  ;;  %v10992_v59 = vld [vmem:[#allocation90_spill] sm:$0xff]  ;;  %v1453_v42 = vadd.f32 %v1221_v43, %v1219_v6 }
 0x1c1   :  { %v1284_v29 = vmul.f32 %v6763_v26, %v10992_v59  ;;  %v1391_v55 = vrot.slane %v1390_v32, 4  ;;  %v1447_v1 = vrot.slane %v1446_v10, 4  ;;  %v1509_v60 = vadd.f32 %v1237_v7, %v1235_v38 }
 0x1c2   :  { %v1120_v54 = vadd.f32 1.0, %v6828_v51  ;;  %v1336_v17 = vadd.f32 %v1335_v4, %v1334_v9  ;;  %v1342_v56 = vrot.slane %v1341_v58, 4  ;;  %v1398_v36 = vrot.slane %v1397_v52, 4 }
 0x1c3   :  { %v1503_v33 = vrot.slane %v1502_v44, 4  ;;  %v1558_v23 = vadd.f32 %v1252_v35, %v1250_v15  ;;  %v1144_v24 = vadd.f32 1e-08, %v6828_v51  ;;  %v6848_v12 = vadd.f32 %v1703_v8, %v1702_v34  ;;  %v10995_v8 = vld [vmem:[#allocation126_spill] sm:$0xff] }
 0x1c4   :  { %v1454_v0 = vrot.slane %v1453_v42, 4  ;;  %v1614_v59 = vadd.f32 %v1268_v47, %v1266_v28  ;;  %v1670_v43 = vadd.f32 %v1284_v29, %v1282_v49  ;;  %v6852_v6 = vadd.f32 %v1717_v37, %v1716_v3  ;;  %v10997_v28 = vld [vmem:[#allocation24_spill] sm:$0xff] }
 0x1c5   :  { %10993 = vst [vmem:[#allocation179_spill] sm:$0xff] %v6848_v12  ;;  %v1392_v38 = vadd.f32 %v1391_v55, %v1390_v32  ;;  %v1448_v7 = vadd.f32 %v1447_v1, %v1446_v10  ;;  %v1510_v39 = vrot.slane %v1509_v60, 4  ;;  %5288 = vrcp.f32 %v1120_v54  ;;  %v10998_v37 = vld [vmem:[#allocation28_spill] sm:$0xff] }
 0x1c6   :  { %10994 = vst [vmem:[#allocation180_spill] sm:$0xff] %v6852_v6  ;;  %v1337_v9 = vrot.slane %v1336_v17, 2  ;;  %v1343_v4 = vadd.f32 %v1342_v56, %v1341_v58  ;;  %v1399_v13 = vadd.f32 %v1398_v36, %v1397_v52  ;;  %v1504_v15 = vadd.f32 %v1503_v33, %v1502_v44  ;;  %v10999_v36 = vld [vmem:[#allocation56_spill] sm:$0xff] }
 0x1c7   :  { %v1559_v35 = vrot.slane %v1558_v23, 4  ;;  %5290 = vrsqrt.f32 %v1144_v24  ;;  %v1298_v34 = vmul.f32 %v6760_v2, %v10995_v8  ;;  %v1300_v11 = vmul.f32 %v6763_v26, %v10996_v61  ;;  %v11000_v33 = vld [vmem:[#allocation60_spill] sm:$0xff]  ;;  %v11002_v8 = vld [vmem:[#allocation138_spill] sm:$0xff] }
 0x1c8   :  { %v1251_v3 = vmul.f32 %v6772_v22, %v10997_v28  ;;  %v1253_v47 = vmul.f32 %v6780_v27, %v10998_v37  ;;  %v1615_v32 = vrot.slane %v1614_v59, 4  ;;  %v1671_v10 = vrot.slane %v1670_v43, 4 }
 0x1c9   :  { %v1393_v49 = vrot.slane %v1392_v38, 2  ;;  %v1449_v58 = vrot.slane %v1448_v7, 2  ;;  %v1455_v52 = vadd.f32 %v1454_v0, %v1453_v42  ;;  %v1726_v44 = vadd.f32 %v1300_v11, %v1298_v34  ;;  %v11004_v11 = vld [vmem:[#allocation88_spill] sm:$0xff] }
 0x1ca   :  { %v1267_v24 = vmul.f32 %v6772_v22, %v10999_v36  ;;  %v1269_v2 = vmul.f32 %v6780_v27, %v11000_v33  ;;  %v1338_v29 = vadd.f32 %v1337_v9, %v1336_v17  ;;  %v1505_v26 = vrot.slane %v1504_v15, 2  ;;  %v11005_v33 = vld [vmem:[#allocation93_spill] sm:$0xff] }
 0x1cb   :  { %v1344_v55 = vrot.slane %v1343_v4, 2  ;;  %v1400_v1 = vrot.slane %v1399_v13, 2  ;;  %v6866_v54 = vadd.f32 %v1510_v39, %v1509_v60  ;;  %v1560_v56 = vadd.f32 %v1559_v35, %v1558_v23 }
 0x1cc   :  { %v1616_v37 = vadd.f32 %v1615_v32, %v1614_v59  ;;  %v1672_v28 = vadd.f32 %v1671_v10, %v1670_v43  ;;  %v1727_v61 = vrot.slane %v1726_v44, 4  ;;  %v1023_v0 = vadd.f32 %v11003_v20, %v11002_v8  ;;  %v6879_v20 = vpop.f32.mrf.mxu1 }
 0x1cd   :  { %11001 = vst [vmem:[#allocation181_spill] sm:$0xff] %v6866_v54  ;;  %v1283_v42 = vmul.f32 %v6772_v22, %v11004_v11  ;;  %v1394_v34 = vadd.f32 %v1393_v49, %v1392_v38  ;;  %v1450_v36 = vadd.f32 %v1449_v58, %v1448_v7  ;;  %v1456_v16 = vrot.slane %v1455_v52, 2  ;;  %11008 = vst [vmem:[#allocation182_spill] sm:$0xff] %v6879_v20  ;;  %v11009_v7 = vld [vmem:[#allocation140_spill] sm:$0xff]  ;;  %v11033_v11 = vld [vmem:[#allocation66_spill] sm:$0xff] }
 0x1ce   :  { %v1285_v17 = vmul.f32 %v6780_v27, %v11005_v33  ;;  %v1339_v9 = vrot.slane %v1338_v29, 1  ;;  %v1506_v53 = vadd.f32 %v1505_v26, %v1504_v15  ;;  %v1565_v39 = vadd.f32 %v1253_v47, %v1251_v3 }
 0x1cf   :  { %v6874_v60 = vadd.f32 %v1344_v55, %v1343_v4  ;;  %v6876_v23 = vadd.f32 %v1400_v1, %v1399_v13  ;;  %v1561_v43 = vrot.slane %v1560_v56, 2  ;;  %v1617_v35 = vrot.slane %v1616_v37, 2 }
 0x1d0   :  { %v1673_v8 = vrot.slane %v1672_v28, 2  ;;  %v1728_v38 = vadd.f32 %v1727_v61, %v1726_v44  ;;  %v1024_v32 = vadd.f32 %v1023_v0, %v11009_v7  ;;  %v1395_v10 = vrot.slane %v1394_v34, 1  ;;  %v11028_v7 = vld [vmem:[#allocation129_spill] sm:$0xff] }
 0x1d1   :  { %11006 = vst [vmem:[#allocation138_spill] sm:$0xff] %v6874_v60  ;;  %11007 = vst [vmem:[#allocation148_spill] sm:$0xff] %v6876_v23  ;;  %v1451_v49 = vrot.slane %v1450_v36, 1  ;;  %v6882_v58 = vadd.f32 %v1456_v16, %v1455_v52  ;;  %v6884_v15 = vadd.f32 %v1269_v2, %v1267_v24  ;;  %v6886_v3 = vadd.f32 %v1339_v9, %v1338_v29 }
 0x1d2   :  { %v5289_v4 = vpop.eup %5288  ;;  %v1507_v13 = vrot.slane %v1506_v53, 1  ;;  %v1566_v47 = vrot.slane %v1565_v39, 4  ;;  %v913_v26 = vmul.f32 0.25, %v6879_v20  ;;  %v6891_v61 = vadd.f32 %v1561_v43, %v1560_v56  ;;  %v11034_v20 = vld [vmem:[#allocation96_spill] sm:$0xff] }
 0x1d3   :  { %11010 = vst [vmem:[#allocation140_spill] sm:$0xff] %v6882_v58  ;;  %11011 = vst [vmem:[#allocation183_spill] sm:$0xff] %v6884_v15  ;;  %v1136_v44 = vmul.f32 %v5289_v4, %v6828_v51  ;;  %v6894_v16 = vadd.f32 %v1617_v35, %v1616_v37  ;;  %v6896_v52 = vadd.f32 %v1673_v8, %v1672_v28  ;;  %v1729_v24 = vrot.slane %v1728_v38, 2  ;;  %v11019_v37 = vld [vmem:[#allocation146_spill] sm:$0xff]  ;;  %v11023_v4 = vld [vmem:[#allocation33_spill] sm:$0xff] }
 0x1d4   :  { %11012 = vst [vmem:[#allocation184_spill] sm:$0xff] %v6886_v3  ;;  %v5291_v0 = vpop.eup %5290  ;;  %v1025_v2 = vadd.f32 %v1024_v32, %v913_v26  ;;  %v6898_v29 = vadd.f32 %v1395_v10, %v1394_v34  ;;  %v6900_v9 = vadd.f32 %v1451_v49, %v1450_v36  ;;  %v6903_v55 = vadd.f32 %v1566_v47, %v1565_v39  ;;  %v11022_v10 = vld [vmem:[#allocation29_spill] sm:$0xff]  ;;  %v11032_v35 = vld [vmem:[#allocation62_spill] sm:$0xff] }
 0x1d5   :  { %v1160_v59 = vmul.f32 %v5291_v0, %v1136_v44  ;;  %v6905_v56 = vadd.f32 %v1285_v17, %v1283_v42  ;;  %v6907_v43 = vadd.f32 %v1507_v13, %v1506_v53  ;;  %v11018_v51 = vmax.f32 %v6616_v57, %v6733_v40  ;;  %v11020_v53 = vld [vmem:[#allocation149_spill] sm:$0xff] }
 0x1d6   :  { %11013 = vst [vmem:[#allocation185_spill] sm:$0xff] %v6898_v29  ;;  %11014 = vst [vmem:[#allocation186_spill] sm:$0xff] %v6900_v9  ;;  %v6920_v17 = vadd.f32 %v1729_v24, %v1728_v38  ;;  %v6923_v32 = vadd.f32 %v1025_v2, %v11020_v53  ;;  %v11024_v47 = vld [vmem:[#allocation61_spill] sm:$0xff]  ;;  %v11030_v24 = vld [vmem:[#allocation30_spill] sm:$0xff] }
 0x1d7   :  { %11015 = vst [vmem:[#allocation187_spill] sm:$0xff] %v6903_v55  ;;  %11016 = vst [vmem:[#allocation188_spill] sm:$0xff] %v6905_v56  ;;  %v6913_v28 = vmax.f32 %v11018_v51, %v6886_v3  ;;  %v1174_v34 = vmul.f32 %v1160_v59, %v11019_v37  ;;  %v1176_v36 = vmul.f32 %v1160_v59, %v6585_v48  ;;  %v11025_v44 = vld [vmem:[#allocation65_spill] sm:$0xff]  ;;  %v11026_v59 = vld [vmem:[#allocation95_spill] sm:$0xff] }
 0x1d8   :  { %11017 = vst [vmem:[#allocation189_spill] sm:$0xff] %v6907_v43  ;;  %11021 = vst [vmem:[#allocation146_spill] sm:$0xff] %v6923_v32  ;;  %v11027_v51 = vld [vmem:[#allocation100_spill] sm:$0xff]  ;;  %v11029_v8 = vld [vmem:[#allocation137_spill] sm:$0xff] }
 0x1d9   :  { %v1190_v49 = vmul.f32 %v1174_v34, %v11022_v10  ;;  %v1192_v13 = vmul.f32 %v1176_v36, %v11023_v4  ;;  %v1206_v26 = vmul.f32 %v1174_v34, %v11024_v47  ;;  %v1208_v48 = vmul.f32 %v1176_v36, %v11025_v44  ;;  %v11031_v2 = vld [vmem:[#allocation34_spill] sm:$0xff]  ;;  %v11035_v55 = vld [vmem:[#allocation101_spill] sm:$0xff]  ;;  %v11036_v53 = vld [vmem:[#allocation139_spill] sm:$0xff] }
 0x1da   :  { %v1222_v0 = vmul.f32 %v1174_v34, %v11026_v59  ;;  %v1224_v37 = vmul.f32 %v1176_v36, %v11027_v51  ;;  %v1238_v1 = vmul.f32 %v1174_v34, %v11028_v7  ;;  %v1240_v38 = vmul.f32 %v1176_v36, %v11029_v8  ;;  %v11037_v44 = vld [vmem:[#allocation144_spill] sm:$0xff] }
 0x1db   :  { %v1254_v42 = vmul.f32 %v1174_v34, %v11030_v24  ;;  %v1256_v39 = vmul.f32 %v1176_v36, %v11031_v2  ;;  %v1270_v33 = vmul.f32 %v1174_v34, %v11032_v35  ;;  %v1272_v56 = vmul.f32 %v1176_v36, %v11033_v11 }
 0x1dc   :  { %v1286_v15 = vmul.f32 %v1174_v34, %v11034_v20  ;;  %v1288_v54 = vmul.f32 %v1176_v36, %v11035_v55  ;;  %v1302_v59 = vmul.f32 %v1174_v34, %v11036_v53  ;;  %v1304_v51 = vmul.f32 %v1176_v36, %v11037_v44 }
 0x1dd   :  { %v1348_v47 = vadd.f32 %v1192_v13, %v1190_v49  ;;  %v1404_v7 = vadd.f32 %v1208_v48, %v1206_v26  ;;  %v1460_v4 = vadd.f32 %v1224_v37, %v1222_v0  ;;  %v1516_v8 = vadd.f32 %v1240_v38, %v1238_v1 }
 0x1de   :  { %v1572_v10 = vadd.f32 %v1256_v39, %v1254_v42  ;;  %v1628_v24 = vadd.f32 %v1272_v56, %v1270_v33  ;;  %v1684_v58 = vadd.f32 %v1288_v54, %v1286_v15  ;;  %v1740_v2 = vadd.f32 %v1304_v51, %v1302_v59 }
 0x1df   :  { %v1349_v23 = vrot.slane %v1348_v47, 4  ;;  %v1405_v35 = vrot.slane %v1404_v7, 4  ;;  %v1461_v60 = vrot.slane %v1460_v4, 4  ;;  %v1517_v11 = vrot.slane %v1516_v8, 4 }
 0x1e0   :  { %v1573_v27 = vrot.slane %v1572_v10, 4  ;;  %v1629_v20 = vrot.slane %v1628_v24, 4  ;;  %v1685_v22 = vrot.slane %v1684_v58, 4  ;;  %v1741_v55 = vrot.slane %v1740_v2, 4 }
 0x1e1   :  { %v1350_v62 = vadd.f32 %v1349_v23, %v1348_v47  ;;  %v1406_v34 = vadd.f32 %v1405_v35, %v1404_v7  ;;  %v1462_v53 = vadd.f32 %v1461_v60, %v1460_v4  ;;  %v1518_v36 = vadd.f32 %v1517_v11, %v1516_v8 }
 0x1e2   :  { %v1574_v49 = vadd.f32 %v1573_v27, %v1572_v10  ;;  %v1630_v13 = vadd.f32 %v1629_v20, %v1628_v24  ;;  %v1686_v26 = vadd.f32 %v1685_v22, %v1684_v58  ;;  %v1742_v1 = vadd.f32 %v1741_v55, %v1740_v2 }
 0x1e3   :  { %v1351_v39 = vrot.slane %v1350_v62, 2  ;;  %v1407_v33 = vrot.slane %v1406_v34, 2  ;;  %v1463_v54 = vrot.slane %v1462_v53, 2  ;;  %v1519_v15 = vrot.slane %v1518_v36, 2 }
 0x1e4   :  { %v1575_v56 = vrot.slane %v1574_v49, 2  ;;  %v1631_v42 = vrot.slane %v1630_v13, 2  ;;  %v1687_v48 = vrot.slane %v1686_v26, 2  ;;  %v1743_v59 = vrot.slane %v1742_v1, 2 }
 0x1e5   :  { %v1352_v0 = vadd.f32 %v1351_v39, %v1350_v62  ;;  %v1408_v51 = vadd.f32 %v1407_v33, %v1406_v34  ;;  %v1464_v37 = vadd.f32 %v1463_v54, %v1462_v53  ;;  %v1520_v38 = vadd.f32 %v1519_v15, %v1518_v36 }
 0x1e6   :  { %v1576_v23 = vadd.f32 %v1575_v56, %v1574_v49  ;;  %v1632_v7 = vadd.f32 %v1631_v42, %v1630_v13  ;;  %v1688_v60 = vadd.f32 %v1687_v48, %v1686_v26  ;;  %v1744_v11 = vadd.f32 %v1743_v59, %v1742_v1 }
 0x1e7   :  { %v1353_v27 = vrot.slane %v1352_v0, 1  ;;  %v1409_v20 = vrot.slane %v1408_v51, 1  ;;  %v1465_v22 = vrot.slane %v1464_v37, 1  ;;  %v1731_v58 = vrot.slane %v6920_v17, 1 }
 0x1e8   :  { %v1521_v55 = vrot.slane %v1520_v38, 1  ;;  %v1577_v35 = vrot.slane %v1576_v23, 1  ;;  %v1633_v8 = vrot.slane %v1632_v7, 1  ;;  %v1057_v10 = vmul.f32 %v6923_v32, %v6923_v32 }
 0x1e9   :  { %v6944_v4 = vadd.f32 %v1353_v27, %v1352_v0  ;;  %v1689_v62 = vrot.slane %v1688_v60, 1  ;;  %v11039_v53 = vmax.f32 %v6626_v25, %v6740_v46  ;;  %v11040_v24 = vmax.f32 %v6630_v30, %v6749_v18 }
 0x1ea   :  { %v6954_v34 = vadd.f32 %v1409_v20, %v1408_v51  ;;  %v11042_v36 = vrot.slane %v6891_v61, 1  ;;  %v11044_v13 = vrot.slane %v6894_v16, 1  ;;  %v1745_v1 = vrot.slane %v1744_v11, 1 }
 0x1eb   :  { %11038 = vst [vmem:[#allocation190_spill] sm:$0xff] %v6944_v4  ;;  %v1825_v47 = vmax.f32 %v11039_v53, %v6898_v29  ;;  %v1831_v2 = vmax.f32 %v11040_v24, %v6900_v9  ;;  %v6966_v39 = vadd.f32 %v1465_v22, %v1464_v37  ;;  %v11047_v33 = vrot.slane %v6896_v52, 1 }
 0x1ec   :  { %11041 = vst [vmem:[#allocation191_spill] sm:$0xff] %v6954_v34  ;;  %v6959_v49 = vadd.f32 %v11042_v36, %v6891_v61  ;;  %v6964_v26 = vadd.f32 %v11044_v13, %v6894_v16  ;;  %v6974_v15 = vadd.f32 %v1731_v58, %v6920_v17  ;;  %v11050_v56 = vlaneseq  ;;  %v11054_v16 = vld [vmem:[#allocation150_spill] sm:$0xff] }
 0x1ed   :  { %11046 = vst [vmem:[#allocation194_spill] sm:$0xff] %v6966_v39  ;;  %v6971_v54 = vadd.f32 %v11047_v33, %v6896_v52  ;;  %v6977_v61 = vadd.f32 %v1521_v55, %v1520_v38  ;;  %v6979_v48 = vadd.f32 %v1577_v35, %v1576_v23  ;;  %v6981_v59 = vadd.f32 %v1633_v8, %v1632_v7 }
 0x1ee   :  { %11043 = vst [vmem:[#allocation192_spill] sm:$0xff] %v6959_v49  ;;  %11045 = vst [vmem:[#allocation193_spill] sm:$0xff] %v6964_v26  ;;  %v2351_v42 = vshrl.u32 %v11050_v56, 7  ;;  %v6984_v0 = vadd.f32 %v1057_v10, %v11054_v16  ;;  %v6986_v51 = vadd.f32 %v1689_v62, %v1688_v60  ;;  %v1820_v52 = vmax.f32 %v6913_v28, %v6944_v4 }
 0x1ef   :  { %11048 = vst [vmem:[#allocation195_spill] sm:$0xff] %v6971_v54  ;;  %11049 = vst [vmem:[#allocation196_spill] sm:$0xff] %v6974_v15  ;;  %v11056_v17 = vmax.f32 %v6672_v41, %v6754_v50  ;;  %v1860_v38 = vmax.f32 %v6848_v12, %v6852_v6  ;;  %v6996_v23 = vadd.f32 %v1745_v1, %v1744_v11 }
 0x1f0   :  { %11051 = vst [vmem:[#allocation197_spill] sm:$0xff] %v6977_v61  ;;  %11052 = vst [vmem:[#allocation198_spill] sm:$0xff] %v6979_v48  ;;  %v1826_v7 = vmax.f32 %v1825_v47, %v6954_v34  ;;  %v11058_v60 = vmax.f32 %v6769_v45, %v6774_v21  ;;  %v11059_v28 = vmax.f32 %v6777_v31, %v6782_v5  ;;  %v7015_v35 = vsub.s32 0, %v2351_v42 }
 0x1f1   :  { %11053 = vst [vmem:[#allocation199_spill] sm:$0xff] %v6981_v59  ;;  %11055 = vst [vmem:[#allocation150_spill] sm:$0xff] %v6986_v51  ;;  %v1837_v37 = vmax.f32 %v11056_v17, %v6907_v43  ;;  %v7008_v22 = vmax.f32 %v1831_v2, %v6966_v39  ;;  %v11060_v11 = vmax.f32 %v6790_v14, %v6818_v63  ;;  %v1108_v53 = vrot.slane %v6984_v0, 4 }
 0x1f2   :  { %11057 = vst [vmem:[#allocation200_spill] sm:$0xff] %v6996_v23  ;;  %v1843_v27 = vmax.f32 %v11058_v60, %v6959_v49  ;;  %v1849_v20 = vmax.f32 %v11059_v28, %v6964_v26  ;;  %v1861_v55 = vmax.f32 %v1860_v38, %v6974_v15  ;;  %11061 = vst [vmem:[#allocation201_spill] sm:$0xff] %v7015_v35 }
 0x1f3   :  { %v1855_v58 = vmax.f32 %v11060_v11, %v6971_v54  ;;  %v7018_v8 = vmax.f32 %v1837_v37, %v6977_v61  ;;  %v1866_v24 = vsub.f32 %v6616_v57, %v1820_v52  ;;  %v1868_v2 = vsub.f32 %v6733_v40, %v1820_v52 }
 0x1f4   :  { %v7021_v10 = vmax.f32 %v1843_v27, %v6979_v48  ;;  %v7024_v62 = vmax.f32 %v1849_v20, %v6981_v59  ;;  %v1870_v36 = vsub.f32 %v6886_v3, %v1820_v52  ;;  %v7034_v13 = vmax.f32 %v1861_v55, %v6996_v23 }
 0x1f5   :  { %v7028_v47 = vmax.f32 %v1855_v58, %v6986_v51  ;;  %v1872_v1 = vsub.f32 %v6944_v4, %v1820_v52  ;;  %v1874_v33 = vsub.f32 %v6626_v25, %v1826_v7  ;;  %v1876_v56 = vsub.f32 %v6740_v46, %v1826_v7 }
 0x1f6   :  { %v1878_v42 = vsub.f32 %v6898_v29, %v1826_v7  ;;  %v1880_v16 = vsub.f32 %v6954_v34, %v1826_v7  ;;  %v1882_v17 = vsub.f32 %v6630_v30, %v7008_v22  ;;  %v1884_v37 = vsub.f32 %v6749_v18, %v7008_v22 }
 0x1f7   :  { %v1886_v38 = vsub.f32 %v6900_v9, %v7008_v22  ;;  %v1888_v52 = vsub.f32 %v6966_v39, %v7008_v22  ;;  %v1890_v60 = vsub.f32 %v6672_v41, %v7018_v8  ;;  %v1892_v27 = vsub.f32 %v6754_v50, %v7018_v8 }
 0x1f8   :  { %v1894_v7 = vsub.f32 %v6907_v43, %v7018_v8  ;;  %v1930_v28 = vmul.f32 1.442695, %v1866_v24  ;;  %v1934_v20 = vmul.f32 1.442695, %v1868_v2  ;;  %v1938_v11 = vmul.f32 1.442695, %v1870_v36 }
 0x1f9   :  { %v1896_v58 = vsub.f32 %v6977_v61, %v7018_v8  ;;  %v1898_v55 = vsub.f32 %v6769_v45, %v7021_v10  ;;  %v1900_v22 = vsub.f32 %v6774_v21, %v7021_v10  ;;  %v1942_v39 = vmul.f32 1.442695, %v1872_v1 }
 0x1fa   :  { %v1902_v34 = vsub.f32 %v6959_v49, %v7021_v10  ;;  %v1904_v4 = vsub.f32 %v6979_v48, %v7021_v10  ;;  %5292 = vpow2.f32 %v1930_v28  ;;  %v1946_v24 = vmul.f32 1.442695, %v1874_v33 }
 0x1fb   :  { %v1906_v2 = vsub.f32 %v6777_v31, %v7024_v62  ;;  %v1908_v8 = vsub.f32 %v6782_v5, %v7024_v62  ;;  %5294 = vpow2.f32 %v1934_v20  ;;  %v1950_v36 = vmul.f32 1.442695, %v1876_v56 }
 0x1fc   :  { %v1910_v61 = vsub.f32 %v6964_v26, %v7024_v62  ;;  %v1912_v1 = vsub.f32 %v6981_v59, %v7024_v62  ;;  %5296 = vpow2.f32 %v1938_v11  ;;  %v1954_v49 = vmul.f32 1.442695, %v1878_v42 }
 0x1fd   :  { %v1914_v10 = vsub.f32 %v6790_v14, %v7028_v47  ;;  %v1916_v33 = vsub.f32 %v6818_v63, %v7028_v47  ;;  %5298 = vpow2.f32 %v1942_v39  ;;  %v1958_v28 = vmul.f32 1.442695, %v1880_v16 }
 0x1fe   :  { %v1918_v20 = vsub.f32 %v6971_v54, %v7028_v47  ;;  %v1920_v56 = vsub.f32 %v6986_v51, %v7028_v47  ;;  %5300 = vpow2.f32 %v1946_v24  ;;  %v1962_v48 = vmul.f32 1.442695, %v1882_v17  ;;  %v11062_v24 = vld [vmem:[#allocation107_spill] sm:$0xff] }
 0x1ff   :  { %v1922_v62 = vsub.f32 %v6848_v12, %v7034_v13  ;;  %v1924_v42 = vsub.f32 %v6852_v6, %v7034_v13  ;;  %5302 = vpow2.f32 %v1950_v36  ;;  %v1966_v11 = vmul.f32 1.442695, %v1884_v37 }
 0x200   :  { %v1926_v39 = vsub.f32 %v6974_v15, %v7034_v13  ;;  %5304 = vpow2.f32 %v1954_v49  ;;  %v1970_v16 = vmul.f32 1.442695, %v1886_v38  ;;  %v1109_v59 = vadd.f32 %v1108_v53, %v6984_v0 }
 0x201   :  { %v1928_v47 = vsub.f32 %v6996_v23, %v7034_v13  ;;  %5306 = vpow2.f32 %v1958_v28  ;;  %v1974_v17 = vmul.f32 1.442695, %v1888_v52  ;;  %v7092_v51 = vmul.f32 %v6498_v19, %v11062_v24  ;;  %v11079_v24 = vld [vmem:[#allocation138_spill] sm:$0xff] }
 0x202   :  { %5308 = vpow2.f32 %v1962_v48  ;;  %v1978_v37 = vmul.f32 1.442695, %v1890_v60  ;;  %v1982_v36 = vmul.f32 1.442695, %v1892_v27  ;;  %v1986_v54 = vmul.f32 1.442695, %v1894_v7 }
 0x203   :  { %11063 = vst [vmem:[#allocation202_spill] sm:$0xff] %v7092_v51  ;;  %5310 = vpow2.f32 %v1966_v11  ;;  %v1990_v49 = vmul.f32 1.442695, %v1896_v58  ;;  %v1994_v38 = vmul.f32 1.442695, %v1898_v55  ;;  %v1110_v13 = vrot.slane %v1109_v59, 2 }
 0x204   :  { %v1998_v15 = vmul.f32 1.442695, %v1900_v22  ;;  %5312 = vpow2.f32 %v1970_v16  ;;  %v2002_v0 = vmul.f32 1.442695, %v1902_v34  ;;  %v2006_v53 = vmul.f32 1.442695, %v1904_v4 }
 0x205   :  { %5314 = vpow2.f32 %v1974_v17  ;;  %v2010_v52 = vmul.f32 1.442695, %v1906_v2  ;;  %v2014_v28 = vmul.f32 1.442695, %v1908_v8  ;;  %v2018_v23 = vmul.f32 1.442695, %v1910_v61 }
 0x206   :  { %5316 = vpow2.f32 %v1978_v37  ;;  %v2022_v19 = vmul.f32 1.442695, %v1912_v1  ;;  %v2026_v48 = vmul.f32 1.442695, %v1914_v10  ;;  %v2030_v60 = vmul.f32 1.442695, %v1916_v33 }
 0x207   :  { %v7094_v27 = vpop.eup %5292  ;;  %5318 = vpow2.f32 %v1982_v36  ;;  %v7096_v7 = vmul.f32 1.442695, %v1918_v20  ;;  %v7098_v58 = vmul.f32 1.442695, %v1920_v56  ;;  %v7100_v55 = vmul.f32 1.442695, %v1922_v62 }
 0x208   :  { %v7102_v34 = vpop.eup %5294  ;;  %5320 = vpow2.f32 %v1986_v54  ;;  %v7104_v4 = vmul.f32 1.442695, %v1924_v42  ;;  %v7106_v22 = vmul.f32 1.442695, %v1926_v39  ;;  %v1111_v61 = vadd.f32 %v1110_v13, %v1109_v59  ;;  %v11064_v10 = vld [vmem:[#allocation111_spill] sm:$0xff]  ;;  %v11065_v33 = vld [vmem:[#allocation142_spill] sm:$0xff] }
 0x209   :  { %v7108_v2 = vpop.eup %5296  ;;  %5322 = vpow2.f32 %v1990_v49  ;;  %v7110_v8 = vmul.f32 1.442695, %v1928_v47  ;;  %v2122_v1 = vrot.slane %v7102_v34, 7  ;;  %v7115_v20 = vmul.f32 %v11065_v33, %v11064_v10  ;;  %v11067_v62 = vld [vmem:[#allocation117_spill] sm:$0xff]  ;;  %v11068_v42 = vld [vmem:[#allocation155_spill] sm:$0xff]  ;;  %v11071_v39 = vld [vmem:[#allocation156_spill] sm:$0xff] }
 0x20a   :  { %v7117_v56 = vpop.eup %5298  ;;  %5324 = vpow2.f32 %v1994_v38  ;;  %v2125_v54 = vrot.slane %v7108_v2, 6  ;;  %v7122_v11 = vmul.f32 %v11068_v42, %v11067_v62  ;;  %v11070_v59 = vld [vmem:[#allocation123_spill] sm:$0xff]  ;;  %v1112_v42 = vrot.slane %v1111_v61, 1 }
 0x20b   :  { %11066 = vst [vmem:[#allocation142_spill] sm:$0xff] %v7115_v20  ;;  %v7126_v16 = vmul.f32 %v11071_v39, %v11070_v59  ;;  %v7128_v47 = vpop.eup %5300  ;;  %5326 = vpow2.f32 %v1998_v15  ;;  %v2124_v17 = vsel %vm2123_vm1, %v2122_v1, %v7094_v27  ;;  %v2128_v37 = vrot.slane %v7117_v56, 5  ;;  %v11073_v36 = vld [vmem:[#allocation127_spill] sm:$0xff]  ;;  %v11076_v39 = vld [vmem:[#allocation128_spill] sm:$0xff] }
 0x20c   :  { %11069 = vst [vmem:[#allocation155_spill] sm:$0xff] %v7122_v11  ;;  %v11074_v49 = vld [vmem:[#allocation131_spill] sm:$0xff]  ;;  %v7137_v13 = vpop.eup %5302  ;;  %5328 = vpow2.f32 %v2002_v0  ;;  %v2127_v33 = vsel %vm2126_vm2, %v2125_v54, %v2124_v17  ;;  %v11082_v17 = vld [vmem:[#allocation148_spill] sm:$0xff] }
 0x20d   :  { %11072 = vst [vmem:[#allocation156_spill] sm:$0xff] %v7126_v16  ;;  %v7135_v38 = vmul.f32 %v11074_v49, %v11073_v36  ;;  %v11077_v59 = vld [vmem:[#allocation135_spill] sm:$0xff]  ;;  %v7144_v15 = vpop.eup %5304  ;;  %5330 = vpow2.f32 %v2006_v53  ;;  %v2130_v1 = vsel %vm2129_vm3, %v2128_v37, %v2127_v33  ;;  %v2137_v10 = vrot.slane %v7137_v13, 7 }
 0x20e   :  { %v7142_v62 = vmul.f32 %v11077_v59, %v11076_v39  ;;  %v11080_v49 = vrot.slane %v11079_v24, 1  ;;  %v7153_v0 = vpop.eup %5306  ;;  %5332 = vpow2.f32 %v2010_v52  ;;  %v2139_v54 = vrot.slane %v7144_v15, 6 }
 0x20f   :  { %11075 = vst [vmem:[#allocation131_spill] sm:$0xff] %v7135_v38  ;;  %v2238_v59 = vsel %vm2237_vm4, %v2130_v1, 0.0  ;;  %v11083_v39 = vrot.slane %v11082_v17, 1  ;;  %v7162_v37 = vpop.eup %5308  ;;  %5334 = vpow2.f32 %v2014_v28  ;;  %v2138_v33 = vsel %vm2123_vm1, %v2137_v10, %v7128_v47 }
 0x210   :  { %11078 = vst [vmem:[#allocation135_spill] sm:$0xff] %v7142_v62  ;;  %v7151_v36 = vadd.f32 %v11080_v49, %v11079_v24  ;;  %v2141_v24 = vrot.slane %v7153_v0, 5  ;;  %v2239_v49 = vrot.slane %v2238_v59, 4  ;;  %5336 = vpow2.f32 %v2018_v23  ;;  %v11085_v62 = vld [vmem:[#allocation151_spill] sm:$0xff] }
 0x211   :  { %v7160_v53 = vadd.f32 %v11083_v39, %v11082_v17  ;;  %v2140_v52 = vsel %vm2126_vm2, %v2139_v54, %v2138_v33  ;;  %v7170_v1 = vadd.f32 %v1112_v42, %v1111_v61  ;;  %v11086_v39 = vrot.slane %v11085_v62, 1 }
 0x212   :  { %11081 = vst [vmem:[#allocation138_spill] sm:$0xff] %v7151_v36  ;;  %v7167_v36 = vpop.eup %5310  ;;  %5338 = vpow2.f32 %v2022_v19  ;;  %v2142_v28 = vsel %vm2129_vm3, %v2141_v24, %v2140_v52  ;;  %v2240_v38 = vadd.f32 %v2239_v49, %v2238_v59 }
 0x213   :  { %11084 = vst [vmem:[#allocation148_spill] sm:$0xff] %v7160_v53  ;;  %v7175_v17 = vadd.f32 %v11086_v39, %v11085_v62  ;;  %v7177_v53 = vpop.eup %5312  ;;  %v2149_v10 = vrot.slane %v7167_v36, 7  ;;  %5340 = vpow2.f32 %v2026_v48  ;;  %v2252_v61 = vsel %vm2237_vm4, %v2142_v28, 0.0 }
 0x214   :  { %v7181_v26 = vpop.eup %5314  ;;  %v2151_v23 = vrot.slane %v7177_v53, 6  ;;  %5342 = vpow2.f32 %v2030_v60  ;;  %v2241_v24 = vrot.slane %v2240_v38, 2  ;;  %v2253_v59 = vrot.slane %v2252_v61, 4 }
 0x215   :  { %11087 = vst [vmem:[#allocation151_spill] sm:$0xff] %v7175_v17  ;;  %v7186_v33 = vpop.eup %5316  ;;  %v2150_v19 = vsel %vm2123_vm1, %v2149_v10, %v7162_v37  ;;  %v2153_v62 = vrot.slane %v7181_v26, 5  ;;  %5344 = vpow2.f32 %v7096_v7  ;;  %v1121_v49 = vadd.f32 1.0, %v7170_v1 }
 0x216   :  { %v7191_v52 = vpop.eup %5318  ;;  %v2152_v48 = vsel %vm2126_vm2, %v2151_v23, %v2150_v19  ;;  %5346 = vpow2.f32 %v7098_v58  ;;  %v2242_v10 = vadd.f32 %v2241_v24, %v2240_v38  ;;  %v2254_v17 = vadd.f32 %v2253_v59, %v2252_v61 }
 0x217   :  { %v7196_v39 = vpop.eup %5320  ;;  %v2154_v60 = vsel %vm2129_vm3, %v2153_v62, %v2152_v48  ;;  %v2161_v28 = vrot.slane %v7191_v52, 7  ;;  %5348 = vpow2.f32 %v7100_v55 }
 0x218   :  { %v7201_v54 = vpop.eup %5322  ;;  %v2163_v7 = vrot.slane %v7196_v39, 6  ;;  %v2266_v23 = vsel %vm2237_vm4, %v2154_v60, 0.0  ;;  %5350 = vpow2.f32 %v7104_v4  ;;  %v2243_v48 = vrot.slane %v2242_v10, 1 }
 0x219   :  { %v7206_v19 = vpop.eup %5324  ;;  %v2162_v58 = vsel %vm2123_vm1, %v2161_v28, %v7186_v33  ;;  %v2165_v62 = vrot.slane %v7201_v54, 5  ;;  %5352 = vpow2.f32 %v7106_v22  ;;  %v2255_v24 = vrot.slane %v2254_v17, 2 }
 0x21a   :  { %v7212_v38 = vpop.eup %5326  ;;  %v2164_v55 = vsel %vm2126_vm2, %v2163_v7, %v2162_v58  ;;  %v2267_v61 = vrot.slane %v2266_v23, 4  ;;  %5354 = vpow2.f32 %v7110_v8  ;;  %v2244_v28 = vadd.f32 %v2243_v48, %v2242_v10 }
 0x21b   :  { %v7216_v59 = vpop.eup %5328  ;;  %v2166_v4 = vsel %vm2129_vm3, %v2165_v62, %v2164_v55  ;;  %v2173_v60 = vrot.slane %v7212_v38, 7  ;;  %v2256_v29 = vadd.f32 %v2255_v24, %v2254_v17  ;;  %5356 = vrcp.f32 %v1121_v49 }
 0x21c   :  { %v7221_v43 = vpop.eup %5330  ;;  %v2175_v9 = vrot.slane %v7216_v59, 6  ;;  %v2268_v3 = vadd.f32 %v2267_v61, %v2266_v23  ;;  %v2280_v22 = vsel %vm2237_vm4, %v2166_v4, 0.0  ;;  %v2353_v62 = vrot.slane %v2244_v28, %v7015_v35 }
 0x21d   :  { %v7225_v7 = vpop.eup %5332  ;;  %v2174_v58 = vsel %vm2123_vm1, %v2173_v60, %v7206_v19  ;;  %v2177_v8 = vrot.slane %v7221_v43, 5  ;;  %v2281_v6 = vrot.slane %v2280_v22, 4  ;;  %v2257_v48 = vrot.slane %v2256_v29, 1 }
 0x21e   :  { %v7231_v55 = vpop.eup %5334  ;;  %v2176_v10 = vsel %vm2126_vm2, %v2175_v9, %v2174_v58  ;;  %v2269_v12 = vrot.slane %v2268_v3, 2  ;;  %5358 = vrcp.f32 %v2353_v62 }
 0x21f   :  { %v7234_v17 = vpop.eup %5336  ;;  %v2178_v23 = vsel %vm2129_vm3, %v2177_v8, %v2176_v10  ;;  %v2185_v24 = vrot.slane %v7231_v55, 7  ;;  %v2282_v61 = vadd.f32 %v2281_v6, %v2280_v22  ;;  %v2258_v28 = vadd.f32 %v2257_v48, %v2256_v29  ;;  %v11127_v29 = vld [vmem:[#allocation116_spill] sm:$0xff] }
 0x220   :  { %v7238_v4 = vpop.eup %5338  ;;  %v2187_v60 = vrot.slane %v7234_v17, 6  ;;  %v2270_v63 = vadd.f32 %v2269_v12, %v2268_v3  ;;  %v2294_v14 = vsel %vm2237_vm4, %v2178_v23, 0.0 }
 0x221   :  { %v7242_v9 = vpop.eup %5340  ;;  %v2186_v49 = vsel %vm2123_vm1, %v2185_v24, %v7225_v7  ;;  %v2189_v58 = vrot.slane %v7238_v4, 5  ;;  %v2283_v8 = vrot.slane %v2282_v61, 2  ;;  %v2295_v10 = vrot.slane %v2294_v14, 4 }
 0x222   :  { %v7247_v5 = vpop.eup %5342  ;;  %v2188_v6 = vsel %vm2126_vm2, %v2187_v60, %v2186_v49  ;;  %v2271_v22 = vrot.slane %v2270_v63, 1  ;;  %v2361_v62 = vrot.slane %v2258_v28, %v7015_v35 }
 0x223   :  { %v7252_v3 = vpop.eup %5344  ;;  %v2190_v48 = vsel %vm2129_vm3, %v2189_v58, %v2188_v6  ;;  %v2197_v23 = vrot.slane %v7247_v5, 7  ;;  %v2284_v24 = vadd.f32 %v2283_v8, %v2282_v61  ;;  %v2296_v31 = vadd.f32 %v2295_v10, %v2294_v14 }
 0x224   :  { %v7256_v21 = vpop.eup %5346  ;;  %v2199_v45 = vrot.slane %v7252_v3, 6  ;;  %v2272_v50 = vadd.f32 %v2271_v22, %v2270_v63  ;;  %v2308_v60 = vsel %vm2237_vm4, %v2190_v48, 0.0  ;;  %5360 = vrcp.f32 %v2361_v62 }
 0x225   :  { %v7260_v49 = vpop.eup %5348  ;;  %v2198_v28 = vsel %vm2123_vm1, %v2197_v23, %v7242_v9  ;;  %v2201_v12 = vrot.slane %v7256_v21, 5  ;;  %v2285_v58 = vrot.slane %v2284_v24, 1  ;;  %v2297_v6 = vrot.slane %v2296_v31, 2 }
 0x226   :  { %v7265_v41 = vpop.eup %5350  ;;  %v2200_v14 = vsel %vm2126_vm2, %v2199_v45, %v2198_v28  ;;  %v2309_v61 = vrot.slane %v2308_v60, 4  ;;  %v2369_v8 = vrot.slane %v2272_v50, %v7015_v35  ;;  %v1145_v63 = vadd.f32 1e-08, %v7170_v1 }
 0x227   :  { %v7270_v10 = vpop.eup %5352  ;;  %v2202_v22 = vsel %vm2129_vm3, %v2201_v12, %v2200_v14  ;;  %v2209_v62 = vrot.slane %v7265_v41, 7  ;;  %v2286_v48 = vadd.f32 %v2285_v58, %v2284_v24  ;;  %v2298_v23 = vadd.f32 %v2297_v6, %v2296_v31  ;;  %v11123_v24 = vld [vmem:[#allocation108_spill] sm:$0xff] }
 0x228   :  { %v7274_v18 = vpop.eup %5354  ;;  %v2211_v30 = vrot.slane %v7270_v10, 6  ;;  %v2310_v46 = vadd.f32 %v2309_v61, %v2308_v60  ;;  %v2322_v45 = vsel %vm2237_vm4, %v2202_v22, 0.0  ;;  %5362 = vrcp.f32 %v2369_v8 }
 0x229   :  { %v2210_v50 = vsel %vm2123_vm1, %v2209_v62, %v7260_v49  ;;  %v2213_v28 = vrot.slane %v7274_v18, 5  ;;  %v2299_v25 = vrot.slane %v2298_v23, 1  ;;  %v2323_v40 = vrot.slane %v2322_v45, 4  ;;  %v5357_v6 = vpop.eup %5356 }
 0x22a   :  { %v2212_v12 = vsel %vm2126_vm2, %v2211_v30, %v2210_v50  ;;  %v2311_v14 = vrot.slane %v2310_v46, 2  ;;  %v2377_v31 = vrot.slane %v2286_v48, %v7015_v35  ;;  %5364 = vrsqrt.f32 %v1145_v63 }
 0x22b   :  { %v2214_v60 = vsel %vm2129_vm3, %v2213_v28, %v2212_v12  ;;  %v2300_v61 = vadd.f32 %v2299_v25, %v2298_v23  ;;  %v2324_v22 = vadd.f32 %v2323_v40, %v2322_v45  ;;  %v5359_v8 = vpop.eup %5358  ;;  %v7287_v16 = vmul.f32 %v5357_v6, %v7170_v1 }
 0x22c   :  { %v2312_v57 = vadd.f32 %v2311_v14, %v2310_v46  ;;  %v2336_v62 = vsel %vm2237_vm4, %v2214_v60, 0.0  ;;  %5366 = vrcp.f32 %v2377_v31  ;;  %v2415_v58 = vmul.f32 %v5359_v8, %v7094_v27 }
 0x22d   :  { %11091 = vst [vmem:[#allocation203_spill] sm:$0xff] %v7287_v16  ;;  %v2325_v30 = vrot.slane %v2324_v22, 2  ;;  %v2337_v50 = vrot.slane %v2336_v62, 4  ;;  %v2385_v48 = vrot.slane %v2300_v61, %v7015_v35  ;;  %v2418_v28 = vmul.f32 %v5359_v8, %v7102_v34  ;;  %v11092_v34 = vld [vmem:[#allocation5_spill] sm:$0xff]  ;;  %v11145_v16 = vld [vmem:[#allocation22_spill] sm:$0xff] }
 0x22e   :  { %v2313_v11 = vrot.slane %v2312_v57, 1  ;;  %v2420_v25 = vmul.f32 %v5359_v8, %v7108_v2  ;;  %v2422_v40 = vmul.f32 %v5359_v8, %v7117_v56  ;;  %v2497_v23 = vrot.slane %v2415_v58, %v7015_v35  ;;  %v11093_v2 = vld [vmem:[#allocation9_spill] sm:$0xff] }
 0x22f   :  { %v2326_v46 = vadd.f32 %v2325_v30, %v2324_v22  ;;  %v2338_v63 = vadd.f32 %v2337_v50, %v2336_v62  ;;  %5368 = vrcp.f32 %v2385_v48  ;;  %v2505_v45 = vrot.slane %v2418_v28, %v7015_v35  ;;  %v11094_v30 = vld [vmem:[#allocation13_spill] sm:$0xff] }
 0x230   :  { %v2314_v1 = vadd.f32 %v2313_v11, %v2312_v57  ;;  %v2513_v12 = vrot.slane %v2420_v25, %v7015_v35  ;;  %v2521_v14 = vrot.slane %v2422_v40, %v7015_v35  ;;  %v7299_v60 = vmul.f32 %v2497_v23, %v11092_v34 }
 0x231   :  { %v5361_v27 = vpop.eup %5360  ;;  %v2327_v31 = vrot.slane %v2326_v46, 1  ;;  %v2339_v6 = vrot.slane %v2338_v63, 2  ;;  %v7302_v56 = vmul.f32 %v2497_v23, %v11093_v2  ;;  %v7310_v50 = vmul.f32 %v2505_v45, %v11094_v30  ;;  %v11112_v2 = vld [vmem:[#allocation81_spill] sm:$0xff] }
 0x232   :  { %v2393_v61 = vrot.slane %v2314_v1, %v7015_v35  ;;  %v2425_v58 = vmul.f32 %v5361_v27, %v7128_v47  ;;  %v2428_v57 = vmul.f32 %v5361_v27, %v7137_v13  ;;  %v2430_v11 = vmul.f32 %v5361_v27, %v7144_v15 }
 0x233   :  { %v2328_v22 = vadd.f32 %v2327_v31, %v2326_v46  ;;  %v2340_v8 = vadd.f32 %v2339_v6, %v2338_v63  ;;  %v2432_v62 = vmul.f32 %v5361_v27, %v7153_v0  ;;  %v11095_v46 = vld [vmem:[#allocation17_spill] sm:$0xff] }
 0x234   :  { %5370 = vrcp.f32 %v2393_v61  ;;  %v2529_v48 = vrot.slane %v2425_v58, %v7015_v35  ;;  %v2537_v28 = vrot.slane %v2428_v57, %v7015_v35  ;;  %v2545_v25 = vrot.slane %v2430_v11, %v7015_v35  ;;  %v11096_v6 = vld [vmem:[#allocation21_spill] sm:$0xff] }
 0x235   :  { %v5363_v40 = vpop.eup %5362  ;;  %v2341_v47 = vrot.slane %v2340_v8, 1  ;;  %v2401_v13 = vrot.slane %v2328_v22, %v7015_v35  ;;  %v2553_v15 = vrot.slane %v2432_v62, %v7015_v35  ;;  %v7318_v63 = vmul.f32 %v2505_v45, %v11095_v46  ;;  %v11097_v58 = vld [vmem:[#allocation25_spill] sm:$0xff] }
 0x236   :  { %v2435_v0 = vmul.f32 %v5363_v40, %v7162_v37  ;;  %v2438_v23 = vmul.f32 %v5363_v40, %v7167_v36  ;;  %v2440_v1 = vmul.f32 %v5363_v40, %v7177_v53  ;;  %v2442_v27 = vmul.f32 %v5363_v40, %v7181_v26  ;;  %v11100_v40 = vld [vmem:[#allocation33_spill] sm:$0xff] }
 0x237   :  { %v2342_v31 = vadd.f32 %v2341_v47, %v2340_v8  ;;  %5372 = vrcp.f32 %v2401_v13  ;;  %v7325_v61 = vmul.f32 %v2513_v12, %v11096_v6  ;;  %v7328_v57 = vmul.f32 %v2513_v12, %v11097_v58  ;;  %v7330_v11 = vpop.eup %5364  ;;  %v11099_v8 = vld [vmem:[#allocation29_spill] sm:$0xff] }
 0x238   :  { %11098 = vst [vmem:[#allocation204_spill] sm:$0xff] %v7330_v11  ;;  %v2561_v45 = vrot.slane %v2435_v0, %v7015_v35  ;;  %v2569_v37 = vrot.slane %v2438_v23, %v7015_v35  ;;  %v2577_v36 = vrot.slane %v2440_v1, %v7015_v35  ;;  %v2585_v53 = vrot.slane %v2442_v27, %v7015_v35  ;;  %v11101_v12 = vld [vmem:[#allocation37_spill] sm:$0xff] }
 0x239   :  { %v5367_v22 = vpop.eup %5366  ;;  %v2409_v26 = vrot.slane %v2342_v31, %v7015_v35  ;;  %v7338_v62 = vmul.f32 %v2521_v14, %v11099_v8  ;;  %v7341_v47 = vmul.f32 %v2521_v14, %v11100_v40  ;;  %v7344_v13 = vmul.f32 %v2529_v48, %v11101_v12  ;;  %v11102_v58 = vld [vmem:[#allocation41_spill] sm:$0xff] }
 0x23a   :  { %v2445_v0 = vmul.f32 %v5367_v22, %v7186_v33  ;;  %v2448_v23 = vmul.f32 %v5367_v22, %v7191_v52  ;;  %v2450_v1 = vmul.f32 %v5367_v22, %v7196_v39  ;;  %v2452_v27 = vmul.f32 %v5367_v22, %v7201_v54  ;;  %v11103_v8 = vld [vmem:[#allocation45_spill] sm:$0xff] }
 0x23b   :  { %5374 = vrcp.f32 %v2409_v26  ;;  %v7351_v31 = vmul.f32 %v2529_v48, %v11102_v58  ;;  %v7354_v6 = vmul.f32 %v2537_v28, %v11103_v8  ;;  %v11104_v14 = vld [vmem:[#allocation49_spill] sm:$0xff] }
 0x23c   :  { %v7357_v40 = vmul.f32 %v2537_v28, %v11104_v14  ;;  %v5369_v12 = vpop.eup %5368  ;;  %v2593_v46 = vrot.slane %v2445_v0, %v7015_v35  ;;  %v2601_v33 = vrot.slane %v2448_v23, %v7015_v35  ;;  %v2609_v52 = vrot.slane %v2450_v1, %v7015_v35  ;;  %v11105_v8 = vld [vmem:[#allocation53_spill] sm:$0xff] }
 0x23d   :  { %v2617_v39 = vrot.slane %v2452_v27, %v7015_v35  ;;  %v2455_v54 = vmul.f32 %v5369_v12, %v7206_v19  ;;  %v2458_v48 = vmul.f32 %v5369_v12, %v7212_v38  ;;  %v2460_v22 = vmul.f32 %v5369_v12, %v7216_v59  ;;  %v11106_v14 = vld [vmem:[#allocation57_spill] sm:$0xff] }
 0x23e   :  { %v2462_v26 = vmul.f32 %v5369_v12, %v7221_v43  ;;  %v7368_v28 = vmul.f32 %v2545_v25, %v11105_v8  ;;  %v7371_v58 = vmul.f32 %v2545_v25, %v11106_v14  ;;  %v11107_v0 = vld [vmem:[#allocation61_spill] sm:$0xff] }
 0x23f   :  { %v7374_v23 = vmul.f32 %v2553_v15, %v11107_v0  ;;  %v11108_v1 = vld [vmem:[#allocation65_spill] sm:$0xff]  ;;  %v2625_v19 = vrot.slane %v2455_v54, %v7015_v35  ;;  %v2633_v38 = vrot.slane %v2458_v48, %v7015_v35  ;;  %v2641_v59 = vrot.slane %v2460_v22, %v7015_v35 }
 0x240   :  { %v7377_v30 = vmul.f32 %v2553_v15, %v11108_v1  ;;  %v2649_v43 = vrot.slane %v2462_v26, %v7015_v35  ;;  %v11109_v12 = vld [vmem:[#allocation69_spill] sm:$0xff]  ;;  %v7393_v15 = vmul.f32 %v2569_v37, %v11112_v2  ;;  %v11117_v26 = vld [vmem:[#allocation95_spill] sm:$0xff] }
 0x241   :  { %v7384_v27 = vmul.f32 %v2561_v45, %v11109_v12  ;;  %v11110_v8 = vld [vmem:[#allocation73_spill] sm:$0xff]  ;;  %v5371_v1 = vpop.eup %5370  ;;  %v7402_v20 = vmul.f32 %v2585_v53, %v11117_v26  ;;  %v11119_v12 = vld [vmem:[#allocation100_spill] sm:$0xff] }
 0x242   :  { %v7387_v25 = vmul.f32 %v2561_v45, %v11110_v8  ;;  %v11111_v14 = vld [vmem:[#allocation77_spill] sm:$0xff]  ;;  %v7405_v51 = vmul.f32 %v2585_v53, %v11119_v12  ;;  %v2465_v45 = vmul.f32 %v5371_v1, %v7225_v7  ;;  %v2472_v2 = vmul.f32 %v5371_v1, %v7238_v4  ;;  %v11121_v8 = vld [vmem:[#allocation104_spill] sm:$0xff] }
 0x243   :  { %v7390_v0 = vmul.f32 %v2569_v37, %v11111_v14  ;;  %v11113_v54 = vld [vmem:[#allocation85_spill] sm:$0xff]  ;;  %11118 = vst [vmem:[#allocation207_spill] sm:$0xff] %v7402_v20  ;;  %v2468_v14 = vmul.f32 %v5371_v1, %v7231_v55  ;;  %v2470_v37 = vmul.f32 %v5371_v1, %v7234_v17  ;;  %v7421_v53 = vmul.f32 %v2601_v33, %v11127_v29  ;;  %v11131_v29 = vld [vmem:[#allocation124_spill] sm:$0xff] }
 0x244   :  { %v7396_v34 = vmul.f32 %v2577_v36, %v11113_v54  ;;  %v11115_v48 = vld [vmem:[#allocation89_spill] sm:$0xff]  ;;  %11120 = vst [vmem:[#allocation208_spill] sm:$0xff] %v7405_v51  ;;  %v7412_v54 = vmul.f32 %v2593_v46, %v11121_v8  ;;  %v5373_v12 = vpop.eup %5372  ;;  %v2657_v7 = vrot.slane %v2465_v45, %v7015_v35  ;;  %v2681_v4 = vrot.slane %v2472_v2, %v7015_v35  ;;  %v11129_v8 = vld [vmem:[#allocation120_spill] sm:$0xff] }
 0x245   :  { %v7399_v22 = vmul.f32 %v2577_v36, %v11115_v48  ;;  %v7415_v36 = vmul.f32 %v2593_v46, %v11123_v24  ;;  %v11125_v48 = vld [vmem:[#allocation112_spill] sm:$0xff]  ;;  %11128 = vst [vmem:[#allocation212_spill] sm:$0xff] %v7421_v53  ;;  %v2665_v55 = vrot.slane %v2468_v14, %v7015_v35  ;;  %v2673_v17 = vrot.slane %v2470_v37, %v7015_v35  ;;  %v11133_v45 = vld [vmem:[#allocation129_spill] sm:$0xff]  ;;  %v11157_v53 = vld [vmem:[#allocation70_spill] sm:$0xff] }
 0x246   :  { %11114 = vst [vmem:[#allocation205_spill] sm:$0xff] %v7396_v34  ;;  %11122 = vst [vmem:[#allocation209_spill] sm:$0xff] %v7412_v54  ;;  %v7418_v26 = vmul.f32 %v2601_v33, %v11125_v48  ;;  %v2475_v1 = vmul.f32 %v5373_v12, %v7242_v9  ;;  %v2478_v46 = vmul.f32 %v5373_v12, %v7247_v5  ;;  %v11135_v37 = vld [vmem:[#allocation137_spill] sm:$0xff]  ;;  %v11162_v54 = vld [vmem:[#allocation90_spill] sm:$0xff] }
 0x247   :  { %11116 = vst [vmem:[#allocation206_spill] sm:$0xff] %v7399_v22  ;;  %11124 = vst [vmem:[#allocation210_spill] sm:$0xff] %v7415_v36  ;;  %v2480_v24 = vmul.f32 %v5373_v12, %v7252_v3  ;;  %v2482_v48 = vmul.f32 %v5373_v12, %v7256_v21  ;;  %v7432_v33 = vmul.f32 %v2609_v52, %v11129_v8  ;;  %v11137_v12 = vld [vmem:[#allocation6_spill] sm:$0xff]  ;;  %v11164_v51 = vld [vmem:[#allocation101_spill] sm:$0xff] }
 0x248   :  { %11126 = vst [vmem:[#allocation211_spill] sm:$0xff] %v7418_v26  ;;  %v7435_v42 = vmul.f32 %v2609_v52, %v11131_v29  ;;  %v7438_v14 = vmul.f32 %v2617_v39, %v11133_v45  ;;  %v7441_v32 = vmul.f32 %v2617_v39, %v11135_v37  ;;  %v2689_v9 = vrot.slane %v2475_v1, %v7015_v35  ;;  %v5375_v2 = vpop.eup %5374  ;;  %v11139_v52 = vld [vmem:[#allocation10_spill] sm:$0xff]  ;;  %v11166_v20 = vld [vmem:[#allocation109_spill] sm:$0xff] }
 0x249   :  { %11130 = vst [vmem:[#allocation213_spill] sm:$0xff] %v7432_v33  ;;  %v2697_v5 = vrot.slane %v2478_v46, %v7015_v35  ;;  %v2705_v3 = vrot.slane %v2480_v24, %v7015_v35  ;;  %v2713_v21 = vrot.slane %v2482_v48, %v7015_v35  ;;  %v7448_v8 = vmul.f32 %v2625_v19, %v11137_v12  ;;  %v11141_v45 = vld [vmem:[#allocation14_spill] sm:$0xff]  ;;  %v11168_v22 = vld [vmem:[#allocation121_spill] sm:$0xff] }
 0x24a   :  { %11132 = vst [vmem:[#allocation214_spill] sm:$0xff] %v7435_v42  ;;  %11134 = vst [vmem:[#allocation215_spill] sm:$0xff] %v7438_v14  ;;  %v7451_v29 = vmul.f32 %v2625_v19, %v11139_v52  ;;  %v7454_v11 = vmul.f32 %v2633_v38, %v11141_v45  ;;  %v11143_v39 = vld [vmem:[#allocation18_spill] sm:$0xff]  ;;  %v2485_v1 = vmul.f32 %v5375_v2, %v7260_v49  ;;  %v11170_v34 = vld [vmem:[#allocation97_spill] sm:$0xff] }
 0x24b   :  { %11136 = vst [vmem:[#allocation216_spill] sm:$0xff] %v7441_v32  ;;  %11138 = vst [vmem:[#allocation217_spill] sm:$0xff] %v7448_v8  ;;  %v7457_v37 = vmul.f32 %v2633_v38, %v11143_v39  ;;  %v2488_v46 = vmul.f32 %v5375_v2, %v7265_v41  ;;  %v2490_v24 = vmul.f32 %v5375_v2, %v7270_v10  ;;  %v11146_v8 = vld [vmem:[#allocation26_spill] sm:$0xff] }
 0x24c   :  { %11140 = vst [vmem:[#allocation218_spill] sm:$0xff] %v7451_v29  ;;  %11142 = vst [vmem:[#allocation219_spill] sm:$0xff] %v7454_v11  ;;  %v2492_v48 = vmul.f32 %v5375_v2, %v7274_v18  ;;  %v2822_v12 = vmul.f32 %v2641_v59, %v11145_v16  ;;  %v2824_v32 = vmul.f32 %v2641_v59, %v11146_v8  ;;  %v11147_v19 = vld [vmem:[#allocation30_spill] sm:$0xff] }
 0x24d   :  { %11144 = vst [vmem:[#allocation220_spill] sm:$0xff] %v7457_v37  ;;  %v2826_v52 = vmul.f32 %v2649_v43, %v11147_v19  ;;  %v11148_v29 = vld [vmem:[#allocation34_spill] sm:$0xff]  ;;  %v2721_v11 = vrot.slane %v2485_v1, %v7015_v35  ;;  %v2729_v38 = vrot.slane %v2488_v46, %v7015_v35  ;;  %v2737_v49 = vrot.slane %v2490_v24, %v7015_v35 }
 0x24e   :  { %v2828_v45 = vmul.f32 %v2649_v43, %v11148_v29  ;;  %v2745_v41 = vrot.slane %v2492_v48, %v7015_v35  ;;  %v11149_v39 = vld [vmem:[#allocation38_spill] sm:$0xff]  ;;  %v2846_v24 = vmul.f32 %v2689_v9, %v11157_v53 }
 0x24f   :  { %v2830_v10 = vmul.f32 %v2657_v7, %v11149_v39  ;;  %v11150_v37 = vld [vmem:[#allocation42_spill] sm:$0xff] }
 0x250   :  { %v2832_v18 = vmul.f32 %v2657_v7, %v11150_v37  ;;  %v11151_v2 = vld [vmem:[#allocation46_spill] sm:$0xff] }
 0x251   :  { %v2834_v16 = vmul.f32 %v2665_v55, %v11151_v2  ;;  %v11152_v14 = vld [vmem:[#allocation50_spill] sm:$0xff] }
 0x252   :  { %v2836_v59 = vmul.f32 %v2665_v55, %v11152_v14  ;;  %v11153_v8 = vld [vmem:[#allocation54_spill] sm:$0xff]  ;;  %v2856_v55 = vmul.f32 %v2705_v3, %v11162_v54  ;;  %v11163_v14 = vld [vmem:[#allocation96_spill] sm:$0xff] }
 0x253   :  { %v2838_v19 = vmul.f32 %v2673_v17, %v11153_v8  ;;  %v11154_v42 = vld [vmem:[#allocation58_spill] sm:$0xff]  ;;  %v2858_v8 = vmul.f32 %v2713_v21, %v11163_v14  ;;  %v2878_v14 = vadd.f32 %v7344_v13, %v7299_v60  ;;  %v2976_v60 = vadd.f32 %v7377_v30, %v7341_v47  ;;  %v11178_v47 = vld [vmem:[#allocation211_spill] sm:$0xff] }
 0x254   :  { %v2840_v43 = vmul.f32 %v2673_v17, %v11154_v42  ;;  %v11155_v29 = vld [vmem:[#allocation62_spill] sm:$0xff]  ;;  %v2860_v17 = vmul.f32 %v2713_v21, %v11164_v51  ;;  %v11165_v42 = vld [vmem:[#allocation105_spill] sm:$0xff]  ;;  %v2892_v21 = vadd.f32 %v7351_v31, %v7302_v56 }
 0x255   :  { %v2842_v1 = vmul.f32 %v2681_v4, %v11155_v29  ;;  %v11156_v33 = vld [vmem:[#allocation66_spill] sm:$0xff]  ;;  %v2862_v29 = vmul.f32 %v2721_v11, %v11165_v42  ;;  %v2879_v56 = vadd.f32 %v2878_v14, %v7384_v27  ;;  %v11179_v14 = vld [vmem:[#allocation212_spill] sm:$0xff] }
 0x256   :  { %v2844_v46 = vmul.f32 %v2681_v4, %v11156_v33  ;;  %v11158_v26 = vld [vmem:[#allocation74_spill] sm:$0xff]  ;;  %v2864_v4 = vmul.f32 %v2721_v11, %v11166_v20  ;;  %v2906_v11 = vadd.f32 %v7354_v6, %v7310_v50  ;;  %v2893_v13 = vadd.f32 %v2892_v21, %v7387_v25  ;;  %v11172_v6 = vld [vmem:[#allocation205_spill] sm:$0xff] }
 0x257   :  { %v2848_v48 = vmul.f32 %v2689_v9, %v11158_v26  ;;  %v11159_v35 = vld [vmem:[#allocation78_spill] sm:$0xff]  ;;  %v2868_v9 = vmul.f32 %v2729_v38, %v11168_v22  ;;  %v11180_v21 = vld [vmem:[#allocation213_spill] sm:$0xff] }
 0x258   :  { %v2850_v39 = vmul.f32 %v2697_v5, %v11159_v35  ;;  %v11160_v36 = vld [vmem:[#allocation82_spill] sm:$0xff]  ;;  %v2907_v50 = vadd.f32 %v2906_v11, %v7390_v0 }
 0x259   :  { %v2852_v7 = vmul.f32 %v2697_v5, %v11160_v36  ;;  %v11161_v37 = vld [vmem:[#allocation86_spill] sm:$0xff]  ;;  %v2872_v5 = vmul.f32 %v2737_v49, %v11170_v34  ;;  %v11171_v36 = vld [vmem:[#allocation139_spill] sm:$0xff] }
 0x25a   :  { %v2854_v2 = vmul.f32 %v2705_v3, %v11161_v37  ;;  %v11167_v33 = vld [vmem:[#allocation114_spill] sm:$0xff]  ;;  %v2874_v37 = vmul.f32 %v2745_v41, %v11171_v36  ;;  %v2876_v3 = vmul.f32 %v2745_v41, %v11037_v44  ;;  %v2962_v41 = vadd.f32 %v7374_v23, %v7338_v62  ;;  %v11176_v62 = vld [vmem:[#allocation209_spill] sm:$0xff] }
 0x25b   :  { %v2866_v53 = vmul.f32 %v2729_v38, %v11167_v33  ;;  %v11169_v26 = vld [vmem:[#allocation126_spill] sm:$0xff]  ;;  %v2920_v38 = vadd.f32 %v7357_v40, %v7318_v63  ;;  %v2880_v23 = vadd.f32 %v2879_v56, %v11176_v62  ;;  %v2908_v27 = vadd.f32 %v2907_v50, %v11178_v47  ;;  %v11187_v62 = vld [vmem:[#allocation220_spill] sm:$0xff] }
 0x25c   :  { %v2870_v35 = vmul.f32 %v2737_v49, %v11169_v26  ;;  %v2934_v26 = vadd.f32 %v7368_v28, %v7325_v61  ;;  %v2948_v49 = vadd.f32 %v7371_v58, %v7328_v57  ;;  %v11173_v61 = vld [vmem:[#allocation206_spill] sm:$0xff]  ;;  %v11174_v28 = vld [vmem:[#allocation207_spill] sm:$0xff]  ;;  %v11175_v57 = vld [vmem:[#allocation208_spill] sm:$0xff] }
 0x25d   :  { %v2921_v63 = vadd.f32 %v2920_v38, %v7393_v15  ;;  %v2963_v58 = vadd.f32 %v2962_v41, %v11174_v28  ;;  %v2977_v44 = vadd.f32 %v2976_v60, %v11175_v57  ;;  %v11177_v36 = vld [vmem:[#allocation210_spill] sm:$0xff]  ;;  %v11182_v38 = vld [vmem:[#allocation215_spill] sm:$0xff] }
 0x25e   :  { %v2935_v40 = vadd.f32 %v2934_v26, %v11172_v6  ;;  %v2949_v31 = vadd.f32 %v2948_v49, %v11173_v61  ;;  %v2894_v30 = vadd.f32 %v2893_v13, %v11177_v36  ;;  %v11181_v11 = vld [vmem:[#allocation214_spill] sm:$0xff]  ;;  %v11183_v6 = vld [vmem:[#allocation216_spill] sm:$0xff]  ;;  %v11184_v61 = vld [vmem:[#allocation217_spill] sm:$0xff] }
 0x25f   :  { %v2922_v25 = vadd.f32 %v2921_v63, %v11179_v14  ;;  %v2964_v26 = vadd.f32 %v2963_v58, %v11182_v38  ;;  %v2978_v49 = vadd.f32 %v2977_v44, %v11183_v6  ;;  %v2881_v41 = vadd.f32 %v2880_v23, %v11184_v61  ;;  %v11185_v28 = vld [vmem:[#allocation218_spill] sm:$0xff]  ;;  %v11186_v57 = vld [vmem:[#allocation219_spill] sm:$0xff] }
 0x260   :  { %v2936_v0 = vadd.f32 %v2935_v40, %v11180_v21  ;;  %v2950_v15 = vadd.f32 %v2949_v31, %v11181_v11  ;;  %v2895_v60 = vadd.f32 %v2894_v30, %v11185_v28  ;;  %v2909_v56 = vadd.f32 %v2908_v27, %v11186_v57 }
 0x261   :  { %v2923_v36 = vadd.f32 %v2922_v25, %v11187_v62  ;;  %v2965_v47 = vadd.f32 %v2964_v26, %v2826_v52  ;;  %v2979_v63 = vadd.f32 %v2978_v49, %v2828_v45  ;;  %v2882_v14 = vadd.f32 %v2881_v41, %v2830_v10  ;;  %v11197_v62 = vld [vmem:[#allocation204_spill] sm:$0xff] }
 0x262   :  { %v2937_v13 = vadd.f32 %v2936_v0, %v2822_v12  ;;  %v2951_v50 = vadd.f32 %v2950_v15, %v2824_v32  ;;  %v2896_v40 = vadd.f32 %v2895_v60, %v2832_v18  ;;  %v2910_v21 = vadd.f32 %v2909_v56, %v2834_v16  ;;  %v11196_v56 = vld [vmem:[#allocation203_spill] sm:$0xff] }
 0x263   :  { %v2924_v31 = vadd.f32 %v2923_v36, %v2836_v59  ;;  %v2966_v38 = vadd.f32 %v2965_v47, %v2842_v1  ;;  %v2980_v44 = vadd.f32 %v2979_v63, %v2844_v46  ;;  %v2883_v6 = vadd.f32 %v2882_v14, %v2846_v24  ;;  %v11189_v1 = vld [vmem:[#allocation119_spill] sm:$0xff] }
 0x264   :  { %v2938_v11 = vadd.f32 %v2937_v13, %v2838_v19  ;;  %v2952_v58 = vadd.f32 %v2951_v50, %v2840_v43  ;;  %v2897_v23 = vadd.f32 %v2896_v40, %v2848_v48  ;;  %v2911_v61 = vadd.f32 %v2910_v21, %v2850_v39  ;;  %v11188_v19 = vld [vmem:[#allocation113_spill] sm:$0xff]  ;;  %v11190_v39 = vld [vmem:[#allocation122_spill] sm:$0xff]  ;;  %v11200_v40 = vld [vmem:[#allocation164_spill] sm:$0xff] }
 0x265   :  { %v2925_v30 = vadd.f32 %v2924_v31, %v2852_v7  ;;  %v2967_v57 = vadd.f32 %v2966_v38, %v2858_v8  ;;  %v2981_v25 = vadd.f32 %v2980_v44, %v2860_v17  ;;  %v2884_v12 = vadd.f32 %v2883_v6, %v2862_v29  ;;  %v11192_v29 = vld [vmem:[#allocation132_spill] sm:$0xff]  ;;  %v11198_v13 = vld [vmem:[#allocation181_spill] sm:$0xff] }
 0x266   :  { %v2939_v28 = vadd.f32 %v2938_v11, %v2854_v2  ;;  %v2953_v27 = vadd.f32 %v2952_v58, %v2856_v55  ;;  %v2898_v32 = vadd.f32 %v2897_v23, %v2864_v4  ;;  %v2912_v52 = vadd.f32 %v2911_v61, %v2866_v53  ;;  %v11191_v2 = vld [vmem:[#allocation94_spill] sm:$0xff]  ;;  %v11195_v55 = vld [vmem:[#allocation149_spill] sm:$0xff]  ;;  %v11205_v23 = vld [vmem:[#allocation147_spill] sm:$0xff] }
 0x267   :  { %v2926_v45 = vadd.f32 %v2925_v30, %v2868_v9  ;;  %v2968_v16 = vadd.f32 %v2967_v57, %v2874_v37  ;;  %v2982_v59 = vadd.f32 %v2981_v25, %v2876_v3  ;;  %v7532_v43 = vadd.f32 %v2884_v12, %v11188_v19  ;;  %v11193_v53 = vld [vmem:[#allocation130_spill] sm:$0xff]  ;;  %v11194_v37 = vld [vmem:[#allocation145_spill] sm:$0xff]  ;;  %v11207_v25 = vld [vmem:[#allocation140_spill] sm:$0xff] }
 0x268   :  { %v2940_v10 = vadd.f32 %v2939_v28, %v2870_v35  ;;  %v2954_v18 = vadd.f32 %v2953_v27, %v2872_v5  ;;  %v7535_v46 = vadd.f32 %v2898_v32, %v11189_v1  ;;  %v7538_v24 = vadd.f32 %v2912_v52, %v11190_v39  ;;  %v11203_v11 = vld [vmem:[#allocation161_spill] sm:$0xff]  ;;  %v11206_v30 = vld [vmem:[#allocation146_spill] sm:$0xff]  ;;  %v11210_v52 = vld [vmem:[#allocation152_spill] sm:$0xff] }
 0x269   :  { %v7541_v8 = vadd.f32 %v2926_v45, %v11191_v2  ;;  %v7550_v7 = vadd.f32 %v2968_v16, %v11194_v37  ;;  %v7553_v17 = vadd.f32 %v2982_v59, %v11195_v55  ;;  %v3006_v4 = vmul.f32 %v7532_v43, %v7532_v43  ;;  %v11213_v59 = vld [vmem:[#allocation165_spill] sm:$0xff] }
 0x26a   :  { %v7544_v48 = vadd.f32 %v2940_v10, %v11192_v29  ;;  %v7547_v35 = vadd.f32 %v2954_v18, %v11193_v53  ;;  %v3008_v9 = vmul.f32 %v7535_v46, %v7535_v46  ;;  %v3010_v5 = vmul.f32 %v7538_v24, %v7538_v24  ;;  %v11289_v29 = vld [vmem:[#allocation77_spill] sm:$0xff] }
 0x26b   :  { %v3012_v3 = vmul.f32 %v7541_v8, %v7541_v8  ;;  %v3018_v26 = vmul.f32 %v7550_v7, %v7550_v7  ;;  %v3020_v49 = vmul.f32 %v7553_v17, %v7553_v17  ;;  %v1161_v36 = vmul.f32 %v11197_v62, %v11196_v56  ;;  %v11290_v39 = vld [vmem:[#allocation81_spill] sm:$0xff] }
 0x26c   :  { %v3014_v0 = vmul.f32 %v7544_v48, %v7544_v48  ;;  %v3016_v15 = vmul.f32 %v7547_v35, %v7547_v35  ;;  %v3022_v41 = vadd.f32 %v3008_v9, %v3006_v4  ;;  %v11199_v50 = vrot.slane %v11198_v13, 2  ;;  %v11291_v19 = vld [vmem:[#allocation85_spill] sm:$0xff] }
 0x26d   :  { %v3036_v60 = vadd.f32 %v3012_v3, %v3010_v5  ;;  %v3064_v14 = vadd.f32 %v3020_v49, %v3018_v26  ;;  %v11201_v21 = vrot.slane %v11200_v40, 1  ;;  %v11204_v58 = vrot.slane %v11203_v11, 2  ;;  %v11216_v26 = vld [vmem:[#allocation172_spill] sm:$0xff] }
 0x26e   :  { %v7576_v47 = vadd.f32 %v11199_v50, %v11198_v13  ;;  %v3050_v63 = vadd.f32 %v3016_v15, %v3014_v0  ;;  %v3023_v44 = vrot.slane %v3022_v41, 4  ;;  %v7589_v61 = vmul.f32 %v1161_v36, %v11205_v23  ;;  %v11219_v13 = vld [vmem:[#allocation35_spill] sm:$0xff]  ;;  %v11222_v23 = vld [vmem:[#allocation98_spill] sm:$0xff]  ;;  %v11227_v5 = vld [vmem:[#allocation32_spill] sm:$0xff] }
 0x26f   :  { %v7581_v31 = vadd.f32 %v11201_v21, %v11200_v40  ;;  %v7586_v38 = vadd.f32 %v11204_v58, %v11203_v11  ;;  %v3037_v6 = vrot.slane %v3036_v60, 4  ;;  %v7592_v28 = vmul.f32 %v1161_v36, %v11206_v30  ;;  %v11220_v11 = vld [vmem:[#allocation63_spill] sm:$0xff] }
 0x270   :  { %v3051_v27 = vrot.slane %v3050_v63, 4  ;;  %v3065_v57 = vrot.slane %v3064_v14, 4  ;;  %v11208_v12 = vrot.slane %v11207_v25, 1  ;;  %v11211_v45 = vrot.slane %v11210_v52, 1 }
 0x271   :  { %11202 = vst [vmem:[#allocation205_spill] sm:$0xff] %v7581_v31  ;;  %v3024_v18 = vadd.f32 %v3023_v44, %v3022_v41  ;;  %v3038_v16 = vadd.f32 %v3037_v6, %v3036_v60  ;;  %v11214_v4 = vrot.slane %v11213_v59, 1  ;;  %v11217_v49 = vrot.slane %v11216_v26, 2  ;;  %v11218_v41 = vld [vmem:[#allocation31_spill] sm:$0xff] }
 0x272   :  { %v7597_v32 = vadd.f32 %v11208_v12, %v11207_v25  ;;  %v7602_v10 = vadd.f32 %v11211_v45, %v11210_v52  ;;  %v3052_v3 = vadd.f32 %v3051_v27, %v3050_v63  ;;  %v3066_v0 = vadd.f32 %v3065_v57, %v3064_v14  ;;  %v11221_v14 = vld [vmem:[#allocation67_spill] sm:$0xff]  ;;  %v11223_v27 = vld [vmem:[#allocation102_spill] sm:$0xff]  ;;  %v11224_v52 = vld [vmem:[#allocation133_spill] sm:$0xff] }
 0x273   :  { %v7607_v9 = vadd.f32 %v11214_v4, %v11213_v59  ;;  %v7614_v56 = vadd.f32 %v11217_v49, %v11216_v26  ;;  %v3025_v62 = vrot.slane %v3024_v18, 2  ;;  %v3039_v36 = vrot.slane %v3038_v16, 2  ;;  %v11225_v59 = vld [vmem:[#allocation141_spill] sm:$0xff] }
 0x274   :  { %11209 = vst [vmem:[#allocation206_spill] sm:$0xff] %v7597_v32  ;;  %11212 = vst [vmem:[#allocation207_spill] sm:$0xff] %v7602_v10  ;;  %v1191_v60 = vmul.f32 %v7589_v61, %v11218_v41  ;;  %v1193_v50 = vmul.f32 %v7592_v28, %v11219_v13  ;;  %v3053_v40 = vrot.slane %v3052_v3, 2  ;;  %v3067_v21 = vrot.slane %v3066_v0, 2  ;;  %v11229_v10 = vld [vmem:[#allocation163_spill] sm:$0xff] }
 0x275   :  { %11215 = vst [vmem:[#allocation208_spill] sm:$0xff] %v7607_v9  ;;  %v1207_v63 = vmul.f32 %v7589_v61, %v11220_v11  ;;  %v1209_v58 = vmul.f32 %v7592_v28, %v11221_v14  ;;  %v3026_v44 = vadd.f32 %v3025_v62, %v3024_v18  ;;  %v3040_v6 = vadd.f32 %v3039_v36, %v3038_v16  ;;  %v11226_v18 = vld [vmem:[#allocation187_spill] sm:$0xff] }
 0x276   :  { %v1223_v30 = vmul.f32 %v7589_v61, %v11222_v23  ;;  %v1225_v57 = vmul.f32 %v7592_v28, %v11223_v27  ;;  %v3054_v25 = vadd.f32 %v3053_v40, %v3052_v3  ;;  %v3068_v12 = vadd.f32 %v3067_v21, %v3066_v0  ;;  %v11228_v27 = vld [vmem:[#allocation36_spill] sm:$0xff] }
 0x277   :  { %v1239_v45 = vmul.f32 %v7589_v61, %v11224_v52  ;;  %v1241_v4 = vmul.f32 %v7592_v28, %v11225_v59  ;;  %v3027_v26 = vrot.slane %v3026_v44, 1  ;;  %v3041_v49 = vrot.slane %v3040_v6, 1 }
 0x278   :  { %v1556_v15 = vrot.slane %v7614_v56, 1  ;;  %v1568_v16 = vrot.slane %v11226_v18, 2  ;;  %v3055_v62 = vrot.slane %v3054_v25, 1  ;;  %v3069_v36 = vrot.slane %v3068_v12, 1 }
 0x279   :  { %v1255_v23 = vmul.f32 %v7589_v61, %v11227_v5  ;;  %v1257_v3 = vmul.f32 %v7592_v28, %v11228_v27  ;;  %v7638_v0 = vadd.f32 %v3027_v26, %v3026_v44  ;;  %v7640_v40 = vadd.f32 %v3041_v49, %v3040_v6 }
 0x27a   :  { %v1355_v21 = vadd.f32 %v1193_v50, %v1191_v60  ;;  %v1411_v59 = vadd.f32 %v1209_v58, %v1207_v63  ;;  %v7642_v52 = vadd.f32 %v3055_v62, %v3054_v25  ;;  %v7644_v14 = vadd.f32 %v3069_v36, %v3068_v12  ;;  %v11230_v50 = vld [vmem:[#allocation174_spill] sm:$0xff] }
 0x27b   :  { %v1467_v11 = vadd.f32 %v1225_v57, %v1223_v30  ;;  %v1523_v13 = vadd.f32 %v1241_v4, %v1239_v45  ;;  %v3078_v41 = vadd.f32 1.0, %v7638_v0  ;;  %v3080_v32 = vadd.f32 1.0, %v7640_v40 }
 0x27c   :  { %v1569_v5 = vadd.f32 %v1568_v16, %v11226_v18  ;;  %v1596_v27 = vrot.slane %v11229_v10, 2  ;;  %v3082_v44 = vadd.f32 1.0, %v7642_v52  ;;  %v3084_v6 = vadd.f32 1.0, %v7644_v14 }
 0x27d   :  { %v3102_v60 = vadd.f32 1e-08, %v7638_v0  ;;  %v1610_v63 = vrot.slane %v11230_v50, 2  ;;  %5376 = vrcp.f32 %v3078_v41  ;;  %v1356_v58 = vrot.slane %v1355_v21, 4  ;;  %v11231_v41 = vld [vmem:[#allocation64_spill] sm:$0xff] }
 0x27e   :  { %v1412_v30 = vrot.slane %v1411_v59, 4  ;;  %v1468_v57 = vrot.slane %v1467_v11, 4  ;;  %5378 = vrcp.f32 %v3080_v32  ;;  %v3104_v25 = vadd.f32 1e-08, %v7640_v40  ;;  %v11232_v32 = vld [vmem:[#allocation68_spill] sm:$0xff] }
 0x27f   :  { %v1524_v12 = vrot.slane %v1523_v13, 4  ;;  %v1579_v45 = vadd.f32 %v1257_v3, %v1255_v23  ;;  %5380 = vrcp.f32 %v3082_v44  ;;  %v3106_v4 = vadd.f32 1e-08, %v7642_v52 }
 0x280   :  { %v3108_v26 = vadd.f32 1e-08, %v7644_v14  ;;  %v1597_v49 = vadd.f32 %v1596_v27, %v11229_v10  ;;  %5382 = vrcp.f32 %v3084_v6  ;;  %v1357_v18 = vadd.f32 %v1356_v58, %v1355_v21 }
 0x281   :  { %v1413_v16 = vadd.f32 %v1412_v30, %v1411_v59  ;;  %v1580_v62 = vrot.slane %v1579_v45, 4  ;;  %5384 = vrsqrt.f32 %v3102_v60  ;;  %v1271_v36 = vmul.f32 %v7589_v61, %v11231_v41  ;;  %v11245_v41 = vld [vmem:[#allocation143_spill] sm:$0xff] }
 0x282   :  { %v1273_v9 = vmul.f32 %v7592_v28, %v11232_v32  ;;  %v1469_v31 = vadd.f32 %v1468_v57, %v1467_v11  ;;  %5386 = vrsqrt.f32 %v3104_v25  ;;  %v1525_v23 = vadd.f32 %v1524_v12, %v1523_v13 }
 0x283   :  { %v1570_v3 = vrot.slane %v1569_v5, 1  ;;  %v1611_v44 = vadd.f32 %v1610_v63, %v11230_v50  ;;  %5388 = vrsqrt.f32 %v3106_v4  ;;  %v11233_v10 = vrot.slane %v7576_v47, 1  ;;  %v11238_v63 = vld [vmem:[#allocation183_spill] sm:$0xff] }
 0x284   :  { %v11235_v59 = vrot.slane %v7586_v38, 1  ;;  %v1581_v6 = vadd.f32 %v1580_v62, %v1579_v45  ;;  %5390 = vrsqrt.f32 %v3108_v26  ;;  %v1358_v60 = vrot.slane %v1357_v18, 2  ;;  %v11243_v62 = vld [vmem:[#allocation99_spill] sm:$0xff] }
 0x285   :  { %v7666_v27 = vadd.f32 %v11233_v10, %v7576_v47  ;;  %v1414_v11 = vrot.slane %v1413_v16, 2  ;;  %v7674_v13 = vadd.f32 %v1556_v15, %v7614_v56  ;;  %v1470_v58 = vrot.slane %v1469_v31, 2  ;;  %v11244_v15 = vld [vmem:[#allocation103_spill] sm:$0xff] }
 0x286   :  { %v7671_v21 = vadd.f32 %v11235_v59, %v7586_v38  ;;  %v1598_v50 = vrot.slane %v1597_v49, 1  ;;  %v11239_v30 = vrot.slane %v11238_v63, 4  ;;  %v1635_v47 = vadd.f32 %v1273_v9, %v1271_v36  ;;  %v11241_v38 = vld [vmem:[#allocation160_spill] sm:$0xff]  ;;  %v11247_v9 = vld [vmem:[#allocation182_spill] sm:$0xff] }
 0x287   :  { %11234 = vst [vmem:[#allocation209_spill] sm:$0xff] %v7666_v27  ;;  %11237 = vst [vmem:[#allocation211_spill] sm:$0xff] %v7674_v13  ;;  %v1526_v25 = vrot.slane %v1525_v23, 2  ;;  %v7679_v12 = vadd.f32 %v1570_v3, %v1569_v5  ;;  %v1612_v4 = vrot.slane %v1611_v44, 1  ;;  %v11242_v45 = vrot.slane %v11241_v38, 4  ;;  %v11251_v27 = vld [vmem:[#allocation169_spill] sm:$0xff] }
 0x288   :  { %11236 = vst [vmem:[#allocation210_spill] sm:$0xff] %v7671_v21  ;;  %v1623_v57 = vadd.f32 %v11239_v30, %v11238_v63  ;;  %v1287_v10 = vmul.f32 %v7589_v61, %v11243_v62  ;;  %v1289_v56 = vmul.f32 %v7592_v28, %v11244_v15  ;;  %v1582_v59 = vrot.slane %v1581_v6, 2 }
 0x289   :  { %11240 = vst [vmem:[#allocation212_spill] sm:$0xff] %v7679_v12  ;;  %v1651_v26 = vadd.f32 %v11242_v45, %v11241_v38  ;;  %v1636_v32 = vrot.slane %v1635_v47, 4  ;;  %v7690_v63 = vmul.f32 %v7589_v61, %v11245_v41  ;;  %v7694_v5 = vmul.f32 %v7592_v28, %v11247_v9  ;;  %v11253_v28 = vld [vmem:[#allocation188_spill] sm:$0xff] }
 0x28a   :  { %v1359_v36 = vadd.f32 %v1358_v60, %v1357_v18  ;;  %v1415_v3 = vadd.f32 %v1414_v11, %v1413_v16  ;;  %v1471_v30 = vadd.f32 %v1470_v58, %v1469_v31  ;;  %v7696_v38 = vadd.f32 %v1598_v50, %v1597_v49  ;;  %v5377_v12 = vpop.eup %5376  ;;  %v11254_v16 = vld [vmem:[#allocation202_spill] sm:$0xff] }
 0x28b   :  { %11246 = vst [vmem:[#allocation213_spill] sm:$0xff] %v7690_v63  ;;  %11248 = vst [vmem:[#allocation214_spill] sm:$0xff] %v7694_v5  ;;  %v1624_v45 = vrot.slane %v1623_v57, 2  ;;  %v1652_v62 = vrot.slane %v1651_v26, 2  ;;  %v1527_v21 = vadd.f32 %v1526_v25, %v1525_v23  ;;  %v7698_v15 = vadd.f32 %v1612_v4, %v1611_v44  ;;  %v5379_v55 = vpop.eup %5378  ;;  %v11255_v31 = vld [vmem:[#allocation142_spill] sm:$0xff] }
 0x28c   :  { %11249 = vst [vmem:[#allocation215_spill] sm:$0xff] %v7696_v38  ;;  %v1637_v13 = vadd.f32 %v1636_v32, %v1635_v47  ;;  %v11252_v61 = vrot.slane %v11251_v27, 4  ;;  %v1583_v37 = vadd.f32 %v1582_v59, %v1581_v6  ;;  %v1678_v9 = vrot.slane %v11253_v28, 4  ;;  %v5381_v60 = vpop.eup %5380  ;;  %v11314_v5 = vld [vmem:[#allocation22_spill] sm:$0xff] }
 0x28d   :  { %11250 = vst [vmem:[#allocation216_spill] sm:$0xff] %v7698_v15  ;;  %v1691_v18 = vadd.f32 %v1289_v56, %v1287_v10  ;;  %v1705_v49 = vadd.f32 %v11255_v31, %v11254_v16  ;;  %v3094_v11 = vmul.f32 %v5377_v12, %v7638_v0  ;;  %v3096_v23 = vmul.f32 %v5379_v55, %v7640_v40  ;;  %v5383_v32 = vpop.eup %5382  ;;  %v11316_v63 = vld [vmem:[#allocation26_spill] sm:$0xff] }
 0x28e   :  { %v1665_v41 = vadd.f32 %v11252_v61, %v11251_v27  ;;  %v1360_v44 = vrot.slane %v1359_v36, 1  ;;  %v1416_v58 = vrot.slane %v1415_v3, 1  ;;  %v3098_v50 = vmul.f32 %v5381_v60, %v7642_v52  ;;  %v5385_v6 = vpop.eup %5384 }
 0x28f   :  { %v1472_v47 = vrot.slane %v1471_v30, 1  ;;  %v1625_v27 = vadd.f32 %v1624_v45, %v1623_v57  ;;  %v1653_v25 = vadd.f32 %v1652_v62, %v1651_v26  ;;  %v3100_v4 = vmul.f32 %v5383_v32, %v7644_v14  ;;  %v5387_v61 = vpop.eup %5386 }
 0x290   :  { %v1528_v10 = vrot.slane %v1527_v21, 1  ;;  %v1638_v56 = vrot.slane %v1637_v13, 2  ;;  %v1666_v59 = vrot.slane %v1665_v41, 2  ;;  %v1584_v16 = vrot.slane %v1583_v37, 1  ;;  %v5389_v40 = vpop.eup %5388 }
 0x291   :  { %v1679_v0 = vadd.f32 %v1678_v9, %v11253_v28  ;;  %v1692_v12 = vrot.slane %v1691_v18, 4  ;;  %v1706_v55 = vrot.slane %v1705_v49, 4  ;;  %v3118_v31 = vmul.f32 %v5385_v6, %v3094_v11  ;;  %v5391_v57 = vpop.eup %5390 }
 0x292   :  { %v3120_v38 = vmul.f32 %v5387_v61, %v3096_v23  ;;  %v7711_v15 = vadd.f32 %v1360_v44, %v1359_v36  ;;  %v7713_v52 = vadd.f32 %v1416_v58, %v1415_v3  ;;  %v3122_v26 = vmul.f32 %v5389_v40, %v3098_v50  ;;  %v11268_v44 = vld [vmem:[#allocation155_spill] sm:$0xff]  ;;  %v11269_v58 = vld [vmem:[#allocation156_spill] sm:$0xff]  ;;  %v11276_v61 = vld [vmem:[#allocation25_spill] sm:$0xff] }
 0x293   :  { %v7715_v62 = vadd.f32 %v1472_v47, %v1471_v30  ;;  %v1626_v14 = vrot.slane %v1625_v27, 1  ;;  %v1654_v45 = vrot.slane %v1653_v25, 1  ;;  %v3124_v60 = vmul.f32 %v5391_v57, %v3100_v4  ;;  %v11271_v47 = vld [vmem:[#allocation5_spill] sm:$0xff] }
 0x294   :  { %11256 = vst [vmem:[#allocation217_spill] sm:$0xff] %v7711_v15  ;;  %11257 = vst [vmem:[#allocation218_spill] sm:$0xff] %v7713_v52  ;;  %v7717_v32 = vadd.f32 %v1528_v10, %v1527_v21  ;;  %v7719_v53 = vadd.f32 %v1638_v56, %v1637_v13  ;;  %v7721_v9 = vadd.f32 %v1666_v59, %v1665_v41  ;;  %v1680_v11 = vrot.slane %v1679_v0, 2  ;;  %v11274_v4 = vld [vmem:[#allocation17_spill] sm:$0xff] }
 0x295   :  { %11258 = vst [vmem:[#allocation219_spill] sm:$0xff] %v7715_v62  ;;  %v7723_v28 = vadd.f32 %v1584_v16, %v1583_v37  ;;  %v7725_v36 = vadd.f32 %v1692_v12, %v1691_v18  ;;  %v7727_v3 = vadd.f32 %v1706_v55, %v1705_v49  ;;  %v7730_v23 = vmul.f32 %v3118_v31, %v7532_v43  ;;  %v11275_v56 = vld [vmem:[#allocation21_spill] sm:$0xff] }
 0x296   :  { %11259 = vst [vmem:[#allocation220_spill] sm:$0xff] %v7717_v32  ;;  %11260 = vst [vmem:[#allocation203_spill] sm:$0xff] %v7719_v53  ;;  %v7733_v30 = vmul.f32 %v3118_v31, %v7535_v46  ;;  %v7736_v21 = vmul.f32 %v3120_v38, %v7538_v24  ;;  %v7739_v13 = vmul.f32 %v3120_v38, %v7541_v8  ;;  %v11278_v55 = vld [vmem:[#allocation41_spill] sm:$0xff]  ;;  %v11328_v53 = vld [vmem:[#allocation50_spill] sm:$0xff] }
 0x297   :  { %11261 = vst [vmem:[#allocation204_spill] sm:$0xff] %v7721_v9  ;;  %11262 = vst [vmem:[#allocation181_spill] sm:$0xff] %v7723_v28  ;;  %v7742_v37 = vmul.f32 %v3122_v26, %v7544_v48  ;;  %v7745_v41 = vmul.f32 %v3122_v26, %v7547_v35  ;;  %v7747_v18 = vadd.f32 %v1626_v14, %v1625_v27  ;;  %v11272_v27 = vld [vmem:[#allocation9_spill] sm:$0xff]  ;;  %v11326_v9 = vld [vmem:[#allocation46_spill] sm:$0xff] }
 0x298   :  { %11263 = vst [vmem:[#allocation164_spill] sm:$0xff] %v7725_v36  ;;  %11264 = vst [vmem:[#allocation161_spill] sm:$0xff] %v7727_v3  ;;  %v7749_v49 = vadd.f32 %v1654_v45, %v1653_v25  ;;  %v7752_v43 = vmul.f32 %v3124_v60, %v7550_v7  ;;  %v7755_v46 = vmul.f32 %v3124_v60, %v7553_v17  ;;  %v11273_v25 = vld [vmem:[#allocation13_spill] sm:$0xff]  ;;  %v11322_v3 = vld [vmem:[#allocation38_spill] sm:$0xff] }
 0x299   :  { %11265 = vst [vmem:[#allocation147_spill] sm:$0xff] %v7747_v18  ;;  %v7759_v38 = vadd.f32 %v1680_v11, %v1679_v0  ;;  %v7765_v50 = vadd.f32 %v11269_v58, %v11268_v44  ;;  %v3142_v7 = vmul.f32 %v7730_v23, %v11271_v47  ;;  %v3144_v17 = vmul.f32 %v7733_v30, %v11272_v27  ;;  %v11277_v0 = vld [vmem:[#allocation37_spill] sm:$0xff]  ;;  %v11310_v27 = vld [vmem:[#allocation14_spill] sm:$0xff] }
 0x29a   :  { %11266 = vst [vmem:[#allocation146_spill] sm:$0xff] %v7749_v49  ;;  %v3146_v6 = vmul.f32 %v7736_v21, %v11273_v25  ;;  %v3148_v10 = vmul.f32 %v7739_v13, %v11274_v4  ;;  %v3150_v59 = vmul.f32 %v7742_v37, %v11275_v56  ;;  %v3152_v16 = vmul.f32 %v7745_v41, %v11276_v61  ;;  %v11279_v31 = vld [vmem:[#allocation29_spill] sm:$0xff]  ;;  %v11306_v4 = vld [vmem:[#allocation6_spill] sm:$0xff] }
 0x29b   :  { %11267 = vst [vmem:[#allocation140_spill] sm:$0xff] %v7759_v38  ;;  %11270 = vst [vmem:[#allocation152_spill] sm:$0xff] %v7765_v50  ;;  %v3158_v12 = vmul.f32 %v7730_v23, %v11277_v0  ;;  %v3160_v40 = vmul.f32 %v7733_v30, %v11278_v55  ;;  %v3154_v57 = vmul.f32 %v7752_v43, %v11279_v31  ;;  %v11280_v26 = vld [vmem:[#allocation33_spill] sm:$0xff]  ;;  %v11297_v55 = vld [vmem:[#allocation112_spill] sm:$0xff] }
 0x29c   :  { %v3156_v14 = vmul.f32 %v7755_v46, %v11280_v26  ;;  %v11281_v45 = vld [vmem:[#allocation45_spill] sm:$0xff]  ;;  %v7809_v2 = vmul.f32 %v7736_v21, %v11289_v29  ;;  %v7813_v1 = vmul.f32 %v7739_v13, %v11290_v39  ;;  %v11298_v0 = vld [vmem:[#allocation116_spill] sm:$0xff]  ;;  %v11308_v25 = vld [vmem:[#allocation10_spill] sm:$0xff] }
 0x29d   :  { %v3162_v60 = vmul.f32 %v7736_v21, %v11281_v45  ;;  %v11282_v11 = vld [vmem:[#allocation49_spill] sm:$0xff]  ;;  %v11296_v45 = vld [vmem:[#allocation108_spill] sm:$0xff]  ;;  %v11312_v47 = vld [vmem:[#allocation18_spill] sm:$0xff] }
 0x29e   :  { %v3164_v44 = vmul.f32 %v7739_v13, %v11282_v11  ;;  %v11283_v58 = vld [vmem:[#allocation53_spill] sm:$0xff]  ;;  %v11295_v11 = vld [vmem:[#allocation104_spill] sm:$0xff]  ;;  %v11318_v50 = vld [vmem:[#allocation30_spill] sm:$0xff] }
 0x29f   :  { %v3166_v35 = vmul.f32 %v7742_v37, %v11283_v58  ;;  %v11284_v48 = vld [vmem:[#allocation57_spill] sm:$0xff]  ;;  %v11294_v58 = vld [vmem:[#allocation100_spill] sm:$0xff]  ;;  %v7833_v39 = vmul.f32 %v7730_v23, %v11295_v11  ;;  %v11320_v38 = vld [vmem:[#allocation34_spill] sm:$0xff] }
 0x2a0   :  { %v3168_v8 = vmul.f32 %v7745_v41, %v11284_v48  ;;  %v11285_v24 = vld [vmem:[#allocation61_spill] sm:$0xff]  ;;  %v11293_v48 = vld [vmem:[#allocation95_spill] sm:$0xff]  ;;  %v7829_v29 = vmul.f32 %v7755_v46, %v11294_v58  ;;  %v11299_v26 = vld [vmem:[#allocation120_spill] sm:$0xff] }
 0x2a1   :  { %v3170_v18 = vmul.f32 %v7752_v43, %v11285_v24  ;;  %v11286_v28 = vld [vmem:[#allocation65_spill] sm:$0xff]  ;;  %v7817_v24 = vmul.f32 %v7742_v37, %v11291_v19  ;;  %v7837_v19 = vmul.f32 %v7733_v30, %v11296_v45  ;;  %v7849_v58 = vmul.f32 %v7742_v37, %v11299_v26  ;;  %v11300_v31 = vld [vmem:[#allocation124_spill] sm:$0xff]  ;;  %v11324_v36 = vld [vmem:[#allocation42_spill] sm:$0xff] }
 0x2a2   :  { %v3172_v49 = vmul.f32 %v7755_v46, %v11286_v28  ;;  %v11287_v32 = vld [vmem:[#allocation69_spill] sm:$0xff]  ;;  %v7853_v11 = vmul.f32 %v7745_v41, %v11300_v31  ;;  %v7869_v26 = vmul.f32 %v7733_v30, %v11308_v25  ;;  %v7873_v31 = vmul.f32 %v7736_v21, %v11310_v27 }
 0x2a3   :  { %v7801_v62 = vmul.f32 %v7730_v23, %v11287_v32  ;;  %v11288_v52 = vld [vmem:[#allocation73_spill] sm:$0xff]  ;;  %v7889_v25 = vmul.f32 %v7752_v43, %v11318_v50  ;;  %v7893_v27 = vmul.f32 %v7755_v46, %v11320_v38  ;;  %v7909_v50 = vmul.f32 %v7739_v13, %v11328_v53 }
 0x2a4   :  { %v7805_v15 = vmul.f32 %v7733_v30, %v11288_v52  ;;  %v11292_v28 = vld [vmem:[#allocation89_spill] sm:$0xff]  ;;  %v7825_v52 = vmul.f32 %v7752_v43, %v11293_v48  ;;  %v7845_v48 = vmul.f32 %v7739_v13, %v11298_v0  ;;  %11301 = vst [vmem:[#allocation165_spill] sm:$0xff] %v7853_v11  ;;  %v7865_v0 = vmul.f32 %v7730_v23, %v11306_v4 }
 0x2a5   :  { %v7821_v32 = vmul.f32 %v7745_v41, %v11292_v28  ;;  %v7841_v28 = vmul.f32 %v7736_v21, %v11297_v55  ;;  %v11302_v61 = vld [vmem:[#allocation129_spill] sm:$0xff]  ;;  %11309 = vst [vmem:[#allocation174_spill] sm:$0xff] %v7869_v26  ;;  %11311 = vst [vmem:[#allocation183_spill] sm:$0xff] %v7873_v31  ;;  %v7885_v4 = vmul.f32 %v7745_v41, %v11316_v63 }
 0x2a6   :  { %v7857_v45 = vmul.f32 %v7752_v43, %v11302_v61  ;;  %v11304_v56 = vld [vmem:[#allocation137_spill] sm:$0xff]  ;;  %11307 = vst [vmem:[#allocation163_spill] sm:$0xff] %v7865_v0  ;;  %v7877_v61 = vmul.f32 %v7739_v13, %v11312_v47  ;;  %11319 = vst [vmem:[#allocation202_spill] sm:$0xff] %v7889_v25  ;;  %v7897_v47 = vmul.f32 %v7730_v23, %v11322_v3  ;;  %v11330_v25 = vld [vmem:[#allocation54_spill] sm:$0xff] }
 0x2a7   :  { %v7861_v55 = vmul.f32 %v7755_v46, %v11304_v56  ;;  %v7881_v56 = vmul.f32 %v7742_v37, %v11314_v5  ;;  %11317 = vst [vmem:[#allocation188_spill] sm:$0xff] %v7885_v4  ;;  %11321 = vst [vmem:[#allocation142_spill] sm:$0xff] %v7893_v27  ;;  %v7901_v5 = vmul.f32 %v7733_v30, %v11324_v36  ;;  %v11332_v27 = vld [vmem:[#allocation58_spill] sm:$0xff] }
 0x2a8   :  { %11303 = vst [vmem:[#allocation172_spill] sm:$0xff] %v7857_v45  ;;  %11313 = vst [vmem:[#allocation160_spill] sm:$0xff] %v7877_v61  ;;  %v7905_v63 = vmul.f32 %v7736_v21, %v11326_v9  ;;  %v7913_v38 = vmul.f32 %v7742_v37, %v11330_v25  ;;  %v7917_v3 = vmul.f32 %v7745_v41, %v11332_v27 }
 0x2a9   :  { %11305 = vst [vmem:[#allocation187_spill] sm:$0xff] %v7861_v55  ;;  %11315 = vst [vmem:[#allocation169_spill] sm:$0xff] %v7881_v56  ;;  %v3284_v4 = vadd.f32 %v3148_v10, %v3146_v6  ;;  %v3298_v53 = vadd.f32 %v3152_v16, %v3150_v59  ;;  %v3326_v56 = vadd.f32 %v3160_v40, %v3158_v12  ;;  %v11338_v59 = vld [vmem:[#allocation70_spill] sm:$0xff] }
 0x2aa   :  { %11323 = vst [vmem:[#allocation155_spill] sm:$0xff] %v7897_v47  ;;  %11325 = vst [vmem:[#allocation156_spill] sm:$0xff] %v7901_v5  ;;  %v11334_v47 = vld [vmem:[#allocation62_spill] sm:$0xff]  ;;  %v3340_v61 = vadd.f32 %v3164_v44, %v3162_v60  ;;  %v3354_v25 = vadd.f32 %v3168_v8, %v3166_v35  ;;  %v7929_v8 = vmul.f32 %v7730_v23, %v11338_v59 }
 0x2ab   :  { %11327 = vst [vmem:[#allocation221_spill] sm:$0xff] %v7905_v63  ;;  %11329 = vst [vmem:[#allocation222_spill] sm:$0xff] %v7909_v50  ;;  %v7921_v36 = vmul.f32 %v7752_v43, %v11334_v47  ;;  %v11336_v5 = vld [vmem:[#allocation66_spill] sm:$0xff]  ;;  %v3270_v63 = vadd.f32 %v3144_v17, %v3142_v7  ;;  %v3312_v50 = vadd.f32 %v3156_v14, %v3154_v57  ;;  %v3285_v26 = vrot.slane %v3284_v4, 4 }
 0x2ac   :  { %11331 = vst [vmem:[#allocation223_spill] sm:$0xff] %v7913_v38  ;;  %11333 = vst [vmem:[#allocation224_spill] sm:$0xff] %v7917_v3  ;;  %v7925_v9 = vmul.f32 %v7755_v46, %v11336_v5  ;;  %v3368_v38 = vadd.f32 %v3172_v49, %v3170_v18  ;;  %v3299_v27 = vrot.slane %v3298_v53, 4  ;;  %v3327_v0 = vrot.slane %v3326_v56, 4  ;;  %v11339_v18 = vld [vmem:[#allocation74_spill] sm:$0xff] }
 0x2ad   :  { %11335 = vst [vmem:[#allocation225_spill] sm:$0xff] %v7921_v36  ;;  %v3271_v31 = vrot.slane %v3270_v63, 4  ;;  %v3313_v3 = vrot.slane %v3312_v50, 4  ;;  %v3341_v55 = vrot.slane %v3340_v61, 4  ;;  %v3355_v47 = vrot.slane %v3354_v25, 4  ;;  %v11340_v35 = vld [vmem:[#allocation78_spill] sm:$0xff] }
 0x2ae   :  { %11337 = vst [vmem:[#allocation226_spill] sm:$0xff] %v7925_v9  ;;  %v3369_v36 = vrot.slane %v3368_v38, 4  ;;  %v3286_v11 = vadd.f32 %v3285_v26, %v3284_v4  ;;  %v3300_v5 = vadd.f32 %v3299_v27, %v3298_v53  ;;  %v3328_v7 = vadd.f32 %v3327_v0, %v3326_v56  ;;  %v11344_v60 = vld [vmem:[#allocation126_spill] sm:$0xff] }
 0x2af   :  { %v3272_v45 = vadd.f32 %v3271_v31, %v3270_v63  ;;  %v3314_v9 = vadd.f32 %v3313_v3, %v3312_v50  ;;  %v3342_v17 = vadd.f32 %v3341_v55, %v3340_v61  ;;  %v3356_v6 = vadd.f32 %v3355_v47, %v3354_v25  ;;  %v11341_v63 = vld [vmem:[#allocation82_spill] sm:$0xff] }
 0x2b0   :  { %v3370_v10 = vadd.f32 %v3369_v36, %v3368_v38  ;;  %v7933_v49 = vmul.f32 %v7733_v30, %v11339_v18  ;;  %v7937_v16 = vmul.f32 %v7736_v21, %v11340_v35  ;;  %v7941_v53 = vmul.f32 %v7739_v13, %v11341_v63  ;;  %v11342_v3 = vld [vmem:[#allocation86_spill] sm:$0xff]  ;;  %v11343_v38 = vld [vmem:[#allocation96_spill] sm:$0xff] }
 0x2b1   :  { %v7945_v50 = vmul.f32 %v7742_v37, %v11342_v3  ;;  %v7949_v36 = vmul.f32 %v7745_v41, %v11162_v54  ;;  %v7953_v47 = vmul.f32 %v7752_v43, %v11343_v38  ;;  %v7957_v27 = vmul.f32 %v7755_v46, %v11164_v51 }
 0x2b2   :  { %v3273_v25 = vrot.slane %v3272_v45, 2  ;;  %v3287_v4 = vrot.slane %v3286_v11, 2  ;;  %v3301_v56 = vrot.slane %v3300_v5, 2  ;;  %v3315_v61 = vrot.slane %v3314_v9, 2 }
 0x2b3   :  { %v3329_v0 = vrot.slane %v3328_v7, 2  ;;  %v3343_v12 = vrot.slane %v3342_v17, 2  ;;  %v3357_v55 = vrot.slane %v3356_v6, 2  ;;  %v3371_v40 = vrot.slane %v3370_v10, 2 }
 0x2b4   :  { %v7961_v31 = vmul.f32 %v7730_v23, %v11165_v42  ;;  %v7965_v57 = vmul.f32 %v7733_v30, %v11166_v20  ;;  %v7969_v26 = vmul.f32 %v7736_v21, %v11167_v33  ;;  %v7973_v14 = vmul.f32 %v7739_v13, %v11168_v22  ;;  %v11345_v42 = vld [vmem:[#allocation139_spill] sm:$0xff]  ;;  %v11346_v20 = vld [vmem:[#allocation144_spill] sm:$0xff] }
 0x2b5   :  { %v7977_v44 = vmul.f32 %v7742_v37, %v11344_v60  ;;  %v7981_v23 = vmul.f32 %v7745_v41, %v11170_v34  ;;  %v7985_v30 = vmul.f32 %v7752_v43, %v11345_v42  ;;  %v7989_v21 = vmul.f32 %v7755_v46, %v11346_v20 }
 0x2b6   :  { %v3274_v33 = vadd.f32 %v3273_v25, %v3272_v45  ;;  %v3288_v51 = vadd.f32 %v3287_v4, %v3286_v11  ;;  %v3302_v13 = vadd.f32 %v3301_v56, %v3300_v5  ;;  %v3316_v22 = vadd.f32 %v3315_v61, %v3314_v9  ;;  %v11347_v45 = vld [vmem:[#allocation165_spill] sm:$0xff] }
 0x2b7   :  { %v3330_v38 = vadd.f32 %v3329_v0, %v3328_v7  ;;  %v3344_v54 = vadd.f32 %v3343_v12, %v3342_v17  ;;  %v3358_v37 = vadd.f32 %v3357_v55, %v3356_v6  ;;  %v3372_v60 = vadd.f32 %v3371_v40, %v3370_v10  ;;  %v11348_v7 = vld [vmem:[#allocation172_spill] sm:$0xff] }
 0x2b8   :  { %v3382_v41 = vadd.f32 %v7805_v15, %v7801_v62  ;;  %v3396_v34 = vadd.f32 %v7813_v1, %v7809_v2  ;;  %v3410_v43 = vadd.f32 %v7821_v32, %v7817_v24  ;;  %v3424_v46 = vadd.f32 %v7829_v29, %v7825_v52  ;;  %v11349_v15 = vld [vmem:[#allocation187_spill] sm:$0xff] }
 0x2b9   :  { %v3438_v5 = vadd.f32 %v7837_v19, %v7833_v39  ;;  %v3452_v9 = vadd.f32 %v7845_v48, %v7841_v28  ;;  %v3466_v11 = vadd.f32 %v11347_v45, %v7849_v58  ;;  %v3480_v62 = vadd.f32 %v11349_v15, %v11348_v7 }
 0x2ba   :  { %v3383_v17 = vrot.slane %v3382_v41, 4  ;;  %v3397_v1 = vrot.slane %v3396_v34, 4  ;;  %v3411_v2 = vrot.slane %v3410_v43, 4  ;;  %v3425_v6 = vrot.slane %v3424_v46, 4 }
 0x2bb   :  { %v3439_v32 = vrot.slane %v3438_v5, 4  ;;  %v3453_v24 = vrot.slane %v3452_v9, 4  ;;  %v3467_v10 = vrot.slane %v3466_v11, 4  ;;  %v3481_v29 = vrot.slane %v3480_v62, 4 }
 0x2bc   :  { %v3384_v52 = vadd.f32 %v3383_v17, %v3382_v41  ;;  %v3398_v25 = vadd.f32 %v3397_v1, %v3396_v34  ;;  %v3412_v19 = vadd.f32 %v3411_v2, %v3410_v43  ;;  %v3426_v39 = vadd.f32 %v3425_v6, %v3424_v46 }
 0x2bd   :  { %v3440_v4 = vadd.f32 %v3439_v32, %v3438_v5  ;;  %v3454_v28 = vadd.f32 %v3453_v24, %v3452_v9  ;;  %v3468_v48 = vadd.f32 %v3467_v10, %v3466_v11  ;;  %v3482_v56 = vadd.f32 %v3481_v29, %v3480_v62 }
 0x2be   :  { %v3275_v58 = vrot.slane %v3274_v33, 1  ;;  %v3289_v61 = vrot.slane %v3288_v51, 1  ;;  %v3303_v0 = vrot.slane %v3302_v13, 1  ;;  %v3317_v12 = vrot.slane %v3316_v22, 1 }
 0x2bf   :  { %v3331_v55 = vrot.slane %v3330_v38, 1  ;;  %v3345_v40 = vrot.slane %v3344_v54, 1  ;;  %v3359_v45 = vrot.slane %v3358_v37, 1  ;;  %v3373_v7 = vrot.slane %v3372_v60, 1 }
 0x2c0   :  { %v3385_v15 = vrot.slane %v3384_v52, 2  ;;  %v3399_v20 = vrot.slane %v3398_v25, 2  ;;  %v3413_v42 = vrot.slane %v3412_v19, 2  ;;  %v3427_v3 = vrot.slane %v3426_v39, 2 }
 0x2c1   :  { %v3441_v41 = vrot.slane %v3440_v4, 2  ;;  %v3455_v34 = vrot.slane %v3454_v28, 2  ;;  %v3469_v43 = vrot.slane %v3468_v48, 2  ;;  %v3483_v46 = vrot.slane %v3482_v56, 2 }
 0x2c2   :  { %v8007_v5 = vadd.f32 %v3275_v58, %v3274_v33  ;;  %v8009_v9 = vadd.f32 %v3289_v61, %v3288_v51  ;;  %v8011_v11 = vadd.f32 %v3303_v0, %v3302_v13  ;;  %v8013_v62 = vadd.f32 %v3317_v12, %v3316_v22  ;;  %v11354_v13 = vld [vmem:[#allocation163_spill] sm:$0xff]  ;;  %v11355_v0 = vld [vmem:[#allocation174_spill] sm:$0xff] }
 0x2c3   :  { %v8015_v17 = vadd.f32 %v3331_v55, %v3330_v38  ;;  %v8017_v1 = vadd.f32 %v3345_v40, %v3344_v54  ;;  %v8019_v2 = vadd.f32 %v3359_v45, %v3358_v37  ;;  %v8021_v6 = vadd.f32 %v3373_v7, %v3372_v60  ;;  %v11356_v12 = vld [vmem:[#allocation183_spill] sm:$0xff]  ;;  %v11357_v38 = vld [vmem:[#allocation160_spill] sm:$0xff]  ;;  %v11358_v54 = vld [vmem:[#allocation169_spill] sm:$0xff] }
 0x2c4   :  { %11350 = vst [vmem:[#allocation165_spill] sm:$0xff] %v8011_v11  ;;  %11351 = vst [vmem:[#allocation172_spill] sm:$0xff] %v8013_v62  ;;  %v3386_v32 = vadd.f32 %v3385_v15, %v3384_v52  ;;  %v3400_v24 = vadd.f32 %v3399_v20, %v3398_v25  ;;  %v3414_v10 = vadd.f32 %v3413_v42, %v3412_v19  ;;  %v11359_v40 = vld [vmem:[#allocation188_spill] sm:$0xff]  ;;  %v11360_v45 = vld [vmem:[#allocation202_spill] sm:$0xff] }
 0x2c5   :  { %11352 = vst [vmem:[#allocation187_spill] sm:$0xff] %v8019_v2  ;;  %11353 = vst [vmem:[#allocation227_spill] sm:$0xff] %v8021_v6  ;;  %v3428_v29 = vadd.f32 %v3427_v3, %v3426_v39  ;;  %v3442_v33 = vadd.f32 %v3441_v41, %v3440_v4  ;;  %v3456_v58 = vadd.f32 %v3455_v34, %v3454_v28  ;;  %v11361_v60 = vld [vmem:[#allocation142_spill] sm:$0xff]  ;;  %v11362_v52 = vld [vmem:[#allocation155_spill] sm:$0xff] }
 0x2c6   :  { %v3470_v51 = vadd.f32 %v3469_v43, %v3468_v48  ;;  %v3484_v61 = vadd.f32 %v3483_v46, %v3482_v56  ;;  %v3494_v22 = vadd.f32 %v11355_v0, %v11354_v13  ;;  %v3508_v55 = vadd.f32 %v11357_v38, %v11356_v12  ;;  %v11363_v20 = vld [vmem:[#allocation156_spill] sm:$0xff]  ;;  %v11364_v3 = vld [vmem:[#allocation221_spill] sm:$0xff]  ;;  %v11365_v25 = vld [vmem:[#allocation222_spill] sm:$0xff] }
 0x2c7   :  { %v3522_v37 = vadd.f32 %v11359_v40, %v11358_v54  ;;  %v3536_v7 = vadd.f32 %v11361_v60, %v11360_v45  ;;  %v3550_v42 = vadd.f32 %v11363_v20, %v11362_v52  ;;  %v3564_v19 = vadd.f32 %v11365_v25, %v11364_v3  ;;  %v11366_v39 = vld [vmem:[#allocation223_spill] sm:$0xff]  ;;  %v11367_v4 = vld [vmem:[#allocation224_spill] sm:$0xff]  ;;  %v11368_v48 = vld [vmem:[#allocation225_spill] sm:$0xff] }
 0x2c8   :  { %v3578_v28 = vadd.f32 %v11367_v4, %v11366_v39  ;;  %v11369_v56 = vld [vmem:[#allocation226_spill] sm:$0xff]  ;;  %v3495_v41 = vrot.slane %v3494_v22, 4  ;;  %v3509_v34 = vrot.slane %v3508_v55, 4  ;;  %v3387_v39 = vrot.slane %v3386_v32, 1 }
 0x2c9   :  { %v3592_v15 = vadd.f32 %v11369_v56, %v11368_v48  ;;  %v3523_v43 = vrot.slane %v3522_v37, 4  ;;  %v3537_v46 = vrot.slane %v3536_v7, 4  ;;  %v3551_v13 = vrot.slane %v3550_v42, 4 }
 0x2ca   :  { %v3565_v0 = vrot.slane %v3564_v19, 4  ;;  %v3579_v12 = vrot.slane %v3578_v28, 4  ;;  %v3496_v54 = vadd.f32 %v3495_v41, %v3494_v22  ;;  %v3510_v40 = vadd.f32 %v3509_v34, %v3508_v55 }
 0x2cb   :  { %v3593_v38 = vrot.slane %v3592_v15, 4  ;;  %v3524_v45 = vadd.f32 %v3523_v43, %v3522_v37  ;;  %v3538_v60 = vadd.f32 %v3537_v46, %v3536_v7  ;;  %v3552_v52 = vadd.f32 %v3551_v13, %v3550_v42 }
 0x2cc   :  { %v3566_v20 = vadd.f32 %v3565_v0, %v3564_v19  ;;  %v3580_v3 = vadd.f32 %v3579_v12, %v3578_v28  ;;  %v3401_v4 = vrot.slane %v3400_v24, 1  ;;  %v3415_v63 = vrot.slane %v3414_v10, 1 }
 0x2cd   :  { %v3594_v25 = vadd.f32 %v3593_v38, %v3592_v15  ;;  %v3429_v48 = vrot.slane %v3428_v29, 1  ;;  %v3443_v56 = vrot.slane %v3442_v33, 1  ;;  %v3457_v35 = vrot.slane %v3456_v58, 1 }
 0x2ce   :  { %v3471_v18 = vrot.slane %v3470_v51, 1  ;;  %v3485_v59 = vrot.slane %v3484_v61, 1  ;;  %v3497_v6 = vrot.slane %v3496_v54, 2  ;;  %v3511_v62 = vrot.slane %v3510_v40, 2 }
 0x2cf   :  { %v3525_v2 = vrot.slane %v3524_v45, 2  ;;  %v3539_v11 = vrot.slane %v3538_v60, 2  ;;  %v3553_v22 = vrot.slane %v3552_v52, 2  ;;  %v3567_v55 = vrot.slane %v3566_v20, 2 }
 0x2d0   :  { %v3581_v37 = vrot.slane %v3580_v3, 2  ;;  %v3595_v7 = vrot.slane %v3594_v25, 2  ;;  %v8039_v42 = vadd.f32 %v3387_v39, %v3386_v32  ;;  %v8041_v19 = vadd.f32 %v3401_v4, %v3400_v24 }
 0x2d1   :  { %v8043_v28 = vadd.f32 %v3415_v63, %v3414_v10  ;;  %v8045_v15 = vadd.f32 %v3429_v48, %v3428_v29  ;;  %v8047_v41 = vadd.f32 %v3443_v56, %v3442_v33  ;;  %v8049_v34 = vadd.f32 %v3457_v35, %v3456_v58 }
 0x2d2   :  { %v8051_v43 = vadd.f32 %v3471_v18, %v3470_v51  ;;  %v8053_v46 = vadd.f32 %v3485_v59, %v3484_v61  ;;  %v3498_v13 = vadd.f32 %v3497_v6, %v3496_v54  ;;  %v3512_v0 = vadd.f32 %v3511_v62, %v3510_v40 }
 0x2d3   :  { %v3526_v12 = vadd.f32 %v3525_v2, %v3524_v45  ;;  %v3540_v38 = vadd.f32 %v3539_v11, %v3538_v60  ;;  %v3554_v32 = vadd.f32 %v3553_v22, %v3552_v52  ;;  %v3568_v39 = vadd.f32 %v3567_v55, %v3566_v20 }
 0x2d4   :  { %v3582_v24 = vadd.f32 %v3581_v37, %v3580_v3  ;;  %v3596_v4 = vadd.f32 %v3595_v7, %v3594_v25  ;;  %v3606_v63 = vadd.f32 %v7933_v49, %v7929_v8  ;;  %v3620_v10 = vadd.f32 %v7941_v53, %v7937_v16 }
 0x2d5   :  { %v3634_v18 = vadd.f32 %v7949_v36, %v7945_v50  ;;  %v3648_v59 = vadd.f32 %v7957_v27, %v7953_v47  ;;  %v3662_v35 = vadd.f32 %v7965_v57, %v7961_v31  ;;  %v3676_v11 = vadd.f32 %v7973_v14, %v7969_v26 }
 0x2d6   :  { %v3690_v62 = vadd.f32 %v7981_v23, %v7977_v44  ;;  %v3704_v8 = vadd.f32 %v7989_v21, %v7985_v30  ;;  %v3607_v49 = vrot.slane %v3606_v63, 4  ;;  %v3621_v16 = vrot.slane %v3620_v10, 4 }
 0x2d7   :  { %v3635_v53 = vrot.slane %v3634_v18, 4  ;;  %v3649_v2 = vrot.slane %v3648_v59, 4  ;;  %v3663_v50 = vrot.slane %v3662_v35, 4  ;;  %v3677_v36 = vrot.slane %v3676_v11, 4 }
 0x2d8   :  { %v3691_v6 = vrot.slane %v3690_v62, 4  ;;  %v3705_v47 = vrot.slane %v3704_v8, 4  ;;  %v3608_v27 = vadd.f32 %v3607_v49, %v3606_v63  ;;  %v3622_v29 = vadd.f32 %v3621_v16, %v3620_v10 }
 0x2d9   :  { %v3636_v31 = vadd.f32 %v3635_v53, %v3634_v18  ;;  %v3650_v57 = vadd.f32 %v3649_v2, %v3648_v59  ;;  %v3664_v33 = vadd.f32 %v3663_v50, %v3662_v35  ;;  %v3678_v26 = vadd.f32 %v3677_v36, %v3676_v11 }
 0x2da   :  { %v3692_v14 = vadd.f32 %v3691_v6, %v3690_v62  ;;  %v3706_v58 = vadd.f32 %v3705_v47, %v3704_v8  ;;  %v3609_v44 = vrot.slane %v3608_v27, 2  ;;  %v3623_v23 = vrot.slane %v3622_v29, 2 }
 0x2db   :  { %v3637_v51 = vrot.slane %v3636_v31, 2  ;;  %v3651_v30 = vrot.slane %v3650_v57, 2  ;;  %v3665_v21 = vrot.slane %v3664_v33, 2  ;;  %v3679_v61 = vrot.slane %v3678_v26, 2 }
 0x2dc   :  { %v3693_v54 = vrot.slane %v3692_v14, 2  ;;  %v3707_v40 = vrot.slane %v3706_v58, 2  ;;  %v3499_v45 = vrot.slane %v3498_v13, 1  ;;  %v3513_v60 = vrot.slane %v3512_v0, 1 }
 0x2dd   :  { %v3610_v52 = vadd.f32 %v3609_v44, %v3608_v27  ;;  %v3624_v20 = vadd.f32 %v3623_v23, %v3622_v29  ;;  %v3527_v3 = vrot.slane %v3526_v12, 1  ;;  %v3541_v25 = vrot.slane %v3540_v38, 1  ;;  %v11370_v44 = vld [vmem:[#allocation153_spill] sm:$0xff] }
 0x2de   :  { %v3666_v48 = vadd.f32 %v3665_v21, %v3664_v33  ;;  %v3680_v56 = vadd.f32 %v3679_v61, %v3678_v26  ;;  %v3555_v22 = vrot.slane %v3554_v32, 1  ;;  %v3569_v55 = vrot.slane %v3568_v39, 1  ;;  %v11377_v21 = vld [vmem:[#allocation173_spill] sm:$0xff]  ;;  %v11378_v61 = vld [vmem:[#allocation134_spill] sm:$0xff] }
 0x2df   :  { %v3583_v37 = vrot.slane %v3582_v24, 1  ;;  %v3597_v7 = vrot.slane %v3596_v4, 1  ;;  %v3638_v63 = vadd.f32 %v3637_v51, %v3636_v31  ;;  %v3652_v10 = vadd.f32 %v3651_v30, %v3650_v57  ;;  %v11375_v51 = vld [vmem:[#allocation171_spill] sm:$0xff]  ;;  %v11376_v30 = vld [vmem:[#allocation162_spill] sm:$0xff] }
 0x2e0   :  { %v3694_v18 = vadd.f32 %v3693_v54, %v3692_v14  ;;  %v3708_v59 = vadd.f32 %v3707_v40, %v3706_v58  ;;  %v3611_v35 = vrot.slane %v3610_v52, 1  ;;  %v3625_v11 = vrot.slane %v3624_v20, 1 }
 0x2e1   :  { %v3667_v62 = vrot.slane %v3666_v48, 1  ;;  %v3681_v8 = vrot.slane %v3680_v56, 1  ;;  %v3500_v49 = vadd.f32 %v3499_v45, %v3498_v13  ;;  %v3514_v16 = vadd.f32 %v3513_v60, %v3512_v0  ;;  %v11371_v13 = vld [vmem:[#allocation166_spill] sm:$0xff]  ;;  %v11381_v60 = vld [vmem:[#allocation176_spill] sm:$0xff] }
 0x2e2   :  { %v3528_v53 = vadd.f32 %v3527_v3, %v3526_v12  ;;  %v3542_v2 = vadd.f32 %v3541_v25, %v3540_v38  ;;  %v3556_v50 = vadd.f32 %v3555_v22, %v3554_v32  ;;  %v3570_v36 = vadd.f32 %v3569_v55, %v3568_v39  ;;  %v11372_v12 = vld [vmem:[#allocation157_spill] sm:$0xff]  ;;  %v11373_v32 = vld [vmem:[#allocation168_spill] sm:$0xff]  ;;  %v11383_v25 = vld [vmem:[#allocation178_spill] sm:$0xff] }
 0x2e3   :  { %v3584_v6 = vadd.f32 %v3583_v37, %v3582_v24  ;;  %v3598_v47 = vadd.f32 %v3597_v7, %v3596_v4  ;;  %v3639_v27 = vrot.slane %v3638_v63, 1  ;;  %v3653_v29 = vrot.slane %v3652_v10, 1  ;;  %v11374_v24 = vld [vmem:[#allocation159_spill] sm:$0xff]  ;;  %v11385_v37 = vld [vmem:[#allocation180_spill] sm:$0xff] }
 0x2e4   :  { %v3695_v33 = vrot.slane %v3694_v18, 1  ;;  %v3709_v26 = vrot.slane %v3708_v59, 1  ;;  %v3612_v31 = vadd.f32 %v3611_v35, %v3610_v52  ;;  %v3626_v57 = vadd.f32 %v3625_v11, %v3624_v20  ;;  %v11384_v22 = vld [vmem:[#allocation179_spill] sm:$0xff]  ;;  %v11386_v35 = vld [vmem:[#allocation184_spill] sm:$0xff]  ;;  %v11387_v11 = vld [vmem:[#allocation165_spill] sm:$0xff] }
 0x2e5   :  { %v3668_v14 = vadd.f32 %v3667_v62, %v3666_v48  ;;  %v3682_v58 = vadd.f32 %v3681_v8, %v3680_v56  ;;  %v8073_v23 = vadd.f32 %v8007_v5, %v11370_v44  ;;  %v8077_v0 = vadd.f32 %v8009_v9, %v11371_v13  ;;  %v11393_v44 = vld [vmem:[#allocation193_spill] sm:$0xff] }
 0x2e6   :  { %v8081_v38 = vadd.f32 %v8015_v17, %v11372_v12  ;;  %v8085_v39 = vadd.f32 %v8017_v1, %v11373_v32  ;;  %v8089_v4 = vadd.f32 %v8039_v42, %v11374_v24  ;;  %v8093_v5 = vadd.f32 %v8041_v19, %v11375_v51  ;;  %v11379_v1 = vld [vmem:[#allocation136_spill] sm:$0xff]  ;;  %v11380_v42 = vld [vmem:[#allocation175_spill] sm:$0xff]  ;;  %v11394_v32 = vld [vmem:[#allocation190_spill] sm:$0xff] }
 0x2e7   :  { %v8097_v9 = vadd.f32 %v8047_v41, %v11376_v30  ;;  %v8101_v17 = vadd.f32 %v8049_v34, %v11377_v21  ;;  %v8104_v54 = vadd.f32 %v3500_v49, %v11378_v61  ;;  %v8107_v40 = vadd.f32 %v3514_v16, %v11379_v1  ;;  %v11382_v41 = vld [vmem:[#allocation177_spill] sm:$0xff]  ;;  %v11395_v24 = vld [vmem:[#allocation172_spill] sm:$0xff]  ;;  %v11397_v30 = vld [vmem:[#allocation227_spill] sm:$0xff] }
 0x2e8   :  { %v8110_v45 = vadd.f32 %v3556_v50, %v11380_v42  ;;  %v8113_v19 = vadd.f32 %v3570_v36, %v11381_v60  ;;  %v3640_v52 = vadd.f32 %v3639_v27, %v3638_v63  ;;  %v3654_v20 = vadd.f32 %v3653_v29, %v3652_v10  ;;  %v11390_v27 = vld [vmem:[#allocation186_spill] sm:$0xff]  ;;  %v11398_v61 = vld [vmem:[#allocation195_spill] sm:$0xff]  ;;  %v11399_v42 = vld [vmem:[#allocation196_spill] sm:$0xff] }
 0x2e9   :  { %v8116_v3 = vadd.f32 %v3612_v31, %v11382_v41  ;;  %v8119_v34 = vadd.f32 %v3626_v57, %v11383_v25  ;;  %v3696_v48 = vadd.f32 %v3695_v33, %v3694_v18  ;;  %v3710_v56 = vadd.f32 %v3709_v26, %v3708_v59  ;;  %v11388_v18 = vld [vmem:[#allocation185_spill] sm:$0xff]  ;;  %v11389_v59 = vld [vmem:[#allocation187_spill] sm:$0xff] }
 0x2ea   :  { %v8122_v55 = vadd.f32 %v3668_v14, %v11384_v22  ;;  %v8125_v7 = vadd.f32 %v3682_v58, %v11385_v37  ;;  %v3722_v62 = vadd.f32 %v11387_v11, %v11386_v35  ;;  %v3782_v63 = vmax.f32 %v8073_v23, %v8077_v0  ;;  %v11391_v33 = vld [vmem:[#allocation189_spill] sm:$0xff]  ;;  %v11392_v14 = vld [vmem:[#allocation192_spill] sm:$0xff]  ;;  %v11400_v22 = vld [vmem:[#allocation194_spill] sm:$0xff] }
 0x2eb   :  { %v3788_v10 = vmax.f32 %v8081_v38, %v8085_v39  ;;  %v3794_v8 = vmax.f32 %v8089_v4, %v8093_v5  ;;  %v8137_v49 = vadd.f32 %v11389_v59, %v11388_v18  ;;  %v3800_v16 = vmax.f32 %v8097_v9, %v8101_v17  ;;  %v11401_v35 = vld [vmem:[#allocation197_spill] sm:$0xff] }
 0x2ec   :  { %v3806_v50 = vmax.f32 %v8104_v54, %v8107_v40  ;;  %v3812_v36 = vmax.f32 %v8110_v45, %v8113_v19  ;;  %v8147_v29 = vadd.f32 %v8043_v28, %v11390_v27  ;;  %v8151_v26 = vadd.f32 %v8051_v43, %v11391_v33  ;;  %v11396_v43 = vld [vmem:[#allocation191_spill] sm:$0xff] }
 0x2ed   :  { %v3783_v31 = vmax.f32 %v3782_v63, %v3722_v62  ;;  %v3818_v57 = vmax.f32 %v8116_v3, %v8119_v34  ;;  %v8156_v58 = vadd.f32 %v3528_v53, %v11392_v14  ;;  %v8159_v13 = vadd.f32 %v3584_v6, %v11393_v44  ;;  %v11405_v27 = vld [vmem:[#allocation203_spill] sm:$0xff] }
 0x2ee   :  { %v3789_v12 = vmax.f32 %v3788_v10, %v8137_v49  ;;  %v3824_v28 = vmax.f32 %v8122_v55, %v8125_v7  ;;  %v3724_v51 = vadd.f32 %v11395_v24, %v11394_v32  ;;  %v3732_v21 = vadd.f32 %v11397_v30, %v11396_v43  ;;  %v11402_v10 = vld [vmem:[#allocation198_spill] sm:$0xff] }
 0x2ef   :  { %v8169_v1 = vadd.f32 %v3640_v52, %v11398_v61  ;;  %v3795_v53 = vmax.f32 %v3794_v8, %v8147_v29  ;;  %v8173_v60 = vadd.f32 %v3696_v48, %v11399_v42  ;;  %v3801_v6 = vmax.f32 %v3800_v16, %v8151_v26  ;;  %v11403_v8 = vld [vmem:[#allocation199_spill] sm:$0xff] }
 0x2f0   :  { %v3807_v41 = vmax.f32 %v3806_v50, %v8156_v58  ;;  %v3813_v25 = vmax.f32 %v3812_v36, %v8159_v13  ;;  %v8180_v37 = vadd.f32 %v8045_v15, %v11400_v22  ;;  %v8184_v11 = vadd.f32 %v8053_v46, %v11401_v35  ;;  %v11404_v50 = vld [vmem:[#allocation150_spill] sm:$0xff] }
 0x2f1   :  { %v3784_v52 = vmax.f32 %v3783_v31, %v3724_v51  ;;  %v3819_v63 = vmax.f32 %v3818_v57, %v8169_v1  ;;  %v8188_v48 = vadd.f32 %v3542_v2, %v11402_v10  ;;  %v8191_v18 = vadd.f32 %v3598_v47, %v11403_v8  ;;  %v11408_v31 = vld [vmem:[#allocation204_spill] sm:$0xff] }
 0x2f2   :  { %v3790_v59 = vmax.f32 %v3789_v12, %v3732_v21  ;;  %v3825_v16 = vmax.f32 %v3824_v28, %v8173_v60  ;;  %v8195_v36 = vadd.f32 %v3654_v20, %v11404_v50  ;;  %v3796_v15 = vmax.f32 %v3795_v53, %v8180_v37  ;;  %v11411_v47 = vld [vmem:[#allocation200_spill] sm:$0xff] }
 0x2f3   :  { %v11406_v46 = vrot.slane %v11405_v27, 1  ;;  %v11409_v2 = vrot.slane %v11408_v31, 1  ;;  %v8209_v14 = vadd.f32 %v3710_v56, %v11411_v47  ;;  %v8212_v44 = vmax.f32 %v3801_v6, %v8184_v11 }
 0x2f4   :  { %v8215_v20 = vmax.f32 %v3807_v41, %v8188_v48  ;;  %v8218_v12 = vmax.f32 %v3813_v25, %v8191_v18  ;;  %v8221_v28 = vmax.f32 %v3819_v63, %v8195_v36  ;;  %v3830_v32 = vsub.f32 %v8073_v23, %v3784_v52 }
 0x2f5   :  { %v8201_v33 = vadd.f32 %v11406_v46, %v11405_v27  ;;  %v8206_v57 = vadd.f32 %v11409_v2, %v11408_v31  ;;  %v3832_v24 = vsub.f32 %v8077_v0, %v3784_v52  ;;  %v3834_v43 = vsub.f32 %v3722_v62, %v3784_v52 }
 0x2f6   :  { %v8226_v56 = vmax.f32 %v3825_v16, %v8209_v14  ;;  %v3836_v30 = vsub.f32 %v3724_v51, %v3784_v52  ;;  %v3838_v61 = vsub.f32 %v8081_v38, %v3790_v59  ;;  %v3840_v53 = vsub.f32 %v8085_v39, %v3790_v59  ;;  %v11412_v16 = vld [vmem:[#allocation164_spill] sm:$0xff] }
 0x2f7   :  { %11407 = vst [vmem:[#allocation163_spill] sm:$0xff] %v8201_v33  ;;  %11410 = vst [vmem:[#allocation174_spill] sm:$0xff] %v8206_v57  ;;  %v3842_v42 = vsub.f32 %v8137_v49, %v3790_v59  ;;  %v3844_v6 = vsub.f32 %v3732_v21, %v3790_v59  ;;  %v3846_v41 = vsub.f32 %v8089_v4, %v3796_v15  ;;  %v3894_v39 = vmul.f32 1.442695, %v3830_v32  ;;  %v11462_v57 = vld [vmem:[#allocation108_spill] sm:$0xff] }
 0x2f8   :  { %v3848_v25 = vsub.f32 %v8093_v5, %v3796_v15  ;;  %v3850_v23 = vsub.f32 %v8147_v29, %v3796_v15  ;;  %v3852_v0 = vsub.f32 %v8180_v37, %v3796_v15  ;;  %v3854_v62 = vsub.f32 %v8097_v9, %v8212_v44 }
 0x2f9   :  { %v3856_v51 = vsub.f32 %v8101_v17, %v8212_v44  ;;  %v3858_v38 = vsub.f32 %v8151_v26, %v8212_v44  ;;  %v3898_v49 = vmul.f32 1.442695, %v3832_v24  ;;  %v3902_v21 = vmul.f32 1.442695, %v3834_v43 }
 0x2fa   :  { %v3860_v4 = vsub.f32 %v8184_v11, %v8212_v44  ;;  %v3862_v5 = vsub.f32 %v8104_v54, %v8215_v20  ;;  %v3864_v29 = vsub.f32 %v8107_v40, %v8215_v20  ;;  %v3906_v22 = vmul.f32 1.442695, %v3836_v30 }
 0x2fb   :  { %v3866_v9 = vsub.f32 %v8156_v58, %v8215_v20  ;;  %v3868_v17 = vsub.f32 %v8188_v48, %v8215_v20  ;;  %5392 = vpow2.f32 %v3894_v39  ;;  %v3910_v26 = vmul.f32 1.442695, %v3838_v61  ;;  %v11418_v39 = vld [vmem:[#allocation152_spill] sm:$0xff] }
 0x2fc   :  { %v3870_v37 = vsub.f32 %v8110_v45, %v8218_v12  ;;  %v3872_v35 = vsub.f32 %v8113_v19, %v8218_v12  ;;  %5394 = vpow2.f32 %v3898_v49  ;;  %v3914_v54 = vmul.f32 1.442695, %v3840_v53 }
 0x2fd   :  { %v3874_v40 = vsub.f32 %v8159_v13, %v8218_v12  ;;  %v3876_v11 = vsub.f32 %v8191_v18, %v8218_v12  ;;  %5396 = vpow2.f32 %v3902_v21  ;;  %v3918_v58 = vmul.f32 1.442695, %v3842_v42  ;;  %v11417_v42 = vld [vmem:[#allocation140_spill] sm:$0xff] }
 0x2fe   :  { %v3878_v52 = vsub.f32 %v8116_v3, %v8221_v28  ;;  %v3880_v63 = vsub.f32 %v8119_v34, %v8221_v28  ;;  %5398 = vpow2.f32 %v3906_v22  ;;  %v3922_v45 = vmul.f32 1.442695, %v3844_v6  ;;  %v11420_v22 = vld [vmem:[#allocation135_spill] sm:$0xff] }
 0x2ff   :  { %v3882_v19 = vsub.f32 %v8169_v1, %v8221_v28  ;;  %v3884_v10 = vsub.f32 %v8195_v36, %v8221_v28  ;;  %5400 = vpow2.f32 %v3910_v26  ;;  %v3926_v13 = vmul.f32 1.442695, %v3846_v41 }
 0x300   :  { %v3886_v48 = vsub.f32 %v8122_v55, %v8226_v56  ;;  %v3888_v8 = vsub.f32 %v8125_v7, %v8226_v56  ;;  %5402 = vpow2.f32 %v3914_v54  ;;  %v3930_v3 = vmul.f32 1.442695, %v3848_v25  ;;  %v11414_v55 = vld [vmem:[#allocation161_spill] sm:$0xff] }
 0x301   :  { %v3890_v34 = vsub.f32 %v8173_v60, %v8226_v56  ;;  %v3892_v18 = vsub.f32 %v8209_v14, %v8226_v56  ;;  %5404 = vpow2.f32 %v3918_v58  ;;  %v3934_v1 = vmul.f32 1.442695, %v3850_v23  ;;  %v11423_v58 = vld [vmem:[#allocation213_spill] sm:$0xff] }
 0x302   :  { %5406 = vpow2.f32 %v3922_v45  ;;  %v3938_v59 = vmul.f32 1.442695, %v3852_v0  ;;  %v11413_v50 = vrot.slane %v11412_v16, 2  ;;  %v11415_v15 = vrot.slane %v11414_v55, 2 }
 0x303   :  { %5408 = vpow2.f32 %v3926_v13  ;;  %v3942_v27 = vmul.f32 1.442695, %v3854_v62  ;;  %v3946_v46 = vmul.f32 1.442695, %v3856_v51  ;;  %v3950_v60 = vmul.f32 1.442695, %v3858_v38 }
 0x304   :  { %v1695_v36 = vadd.f32 %v11413_v50, %v11412_v16  ;;  %v8281_v7 = vadd.f32 %v11415_v15, %v11414_v55  ;;  %5410 = vpow2.f32 %v3930_v3  ;;  %v3954_v31 = vmul.f32 1.442695, %v3860_v4  ;;  %v11466_v15 = vld [vmem:[#allocation116_spill] sm:$0xff] }
 0x305   :  { %v3958_v2 = vmul.f32 1.442695, %v3862_v5  ;;  %v3962_v47 = vmul.f32 1.442695, %v3864_v29  ;;  %5412 = vpow2.f32 %v3934_v1  ;;  %v3966_v14 = vmul.f32 1.442695, %v3866_v9 }
 0x306   :  { %11416 = vst [vmem:[#allocation183_spill] sm:$0xff] %v8281_v7  ;;  %v3970_v44 = vmul.f32 1.442695, %v3868_v17  ;;  %v3974_v20 = vmul.f32 1.442695, %v3870_v37  ;;  %5414 = vpow2.f32 %v3938_v59  ;;  %v1682_v6 = vrot.slane %v11417_v42, 1 }
 0x307   :  { %v3978_v12 = vmul.f32 1.442695, %v3872_v35  ;;  %v3982_v28 = vmul.f32 1.442695, %v3874_v40  ;;  %v3986_v32 = vmul.f32 1.442695, %v3876_v11  ;;  %5416 = vpow2.f32 %v3942_v27 }
 0x308   :  { %v3990_v24 = vmul.f32 1.442695, %v3878_v52  ;;  %v3994_v43 = vmul.f32 1.442695, %v3880_v63  ;;  %v8283_v56 = vmul.f32 1.442695, %v3882_v19  ;;  %v8285_v30 = vpop.eup %5392  ;;  %5418 = vpow2.f32 %v3946_v46 }
 0x309   :  { %v8287_v61 = vmul.f32 1.442695, %v3884_v10  ;;  %v8289_v53 = vmul.f32 1.442695, %v3886_v48  ;;  %v8292_v41 = vpop.eup %5394  ;;  %5420 = vpow2.f32 %v3950_v60  ;;  %v8294_v25 = vmul.f32 1.442695, %v3888_v8 }
 0x30a   :  { %v8296_v23 = vmul.f32 1.442695, %v3890_v34  ;;  %v1696_v0 = vrot.slane %v1695_v36, 1  ;;  %v8298_v62 = vpop.eup %5396  ;;  %5422 = vpow2.f32 %v3954_v31  ;;  %v8300_v51 = vmul.f32 1.442695, %v3892_v18  ;;  %v11419_v29 = vld [vmem:[#allocation131_spill] sm:$0xff] }
 0x30b   :  { %v4086_v38 = vrot.slane %v8292_v41, 7  ;;  %v1720_v49 = vrot.slane %v11418_v39, 4  ;;  %v8304_v21 = vpop.eup %5398  ;;  %5424 = vpow2.f32 %v3958_v2  ;;  %v4088_v4 = vrot.slane %v8298_v62, 6  ;;  %v11424_v52 = vld [vmem:[#allocation214_spill] sm:$0xff] }
 0x30c   :  { %v1733_v9 = vadd.f32 %v11420_v22, %v11419_v29  ;;  %v8310_v17 = vpop.eup %5400  ;;  %5426 = vpow2.f32 %v3962_v47  ;;  %v4090_v37 = vrot.slane %v8304_v21, 5  ;;  %v8316_v35 = vadd.f32 %v1682_v6, %v11417_v42 }
 0x30d   :  { %v4087_v26 = vsel %vm2123_vm1, %v4086_v38, %v8285_v30  ;;  %v8318_v54 = vpop.eup %5402  ;;  %5428 = vpow2.f32 %v3966_v14  ;;  %v8321_v11 = vadd.f32 %v1696_v0, %v1695_v36  ;;  %v8325_v63 = vadd.f32 %v11424_v52, %v11423_v58 }
 0x30e   :  { %11421 = vst [vmem:[#allocation160_spill] sm:$0xff] %v8316_v35  ;;  %v4089_v40 = vsel %vm2126_vm2, %v4088_v4, %v4087_v26  ;;  %v8327_v45 = vpop.eup %5404  ;;  %5430 = vpow2.f32 %v3970_v44  ;;  %v4098_v10 = vrot.slane %v8318_v54, 7  ;;  %v8332_v13 = vadd.f32 %v1720_v49, %v11418_v39 }
 0x30f   :  { %11422 = vst [vmem:[#allocation169_spill] sm:$0xff] %v8321_v11  ;;  %v4091_v19 = vsel %vm2129_vm3, %v4090_v37, %v4089_v40  ;;  %v8334_v48 = vpop.eup %5406  ;;  %5432 = vpow2.f32 %v3974_v20  ;;  %v4100_v8 = vrot.slane %v8327_v45, 6  ;;  %v1734_v34 = vrot.slane %v1733_v9, 4 }
 0x310   :  { %v4198_v3 = vsel %vm2237_vm4, %v4091_v19, 0.0  ;;  %v8338_v18 = vpop.eup %5408  ;;  %5434 = vpow2.f32 %v3978_v12  ;;  %v4099_v1 = vsel %vm2123_vm1, %v4098_v10, %v8310_v17  ;;  %v4102_v59 = vrot.slane %v8334_v48, 5 }
 0x311   :  { %v4199_v16 = vrot.slane %v4198_v3, 4  ;;  %v8343_v50 = vpop.eup %5410  ;;  %5436 = vpow2.f32 %v3982_v28  ;;  %v4101_v36 = vsel %vm2126_vm2, %v4100_v8, %v4099_v1  ;;  %v1748_v55 = vrot.slane %v8325_v63, 4 }
 0x312   :  { %v8349_v60 = vpop.eup %5412  ;;  %5438 = vpow2.f32 %v3986_v32  ;;  %v4103_v31 = vsel %vm2129_vm3, %v4102_v59, %v4101_v36  ;;  %v4110_v2 = vrot.slane %v8343_v50, 7  ;;  %v8367_v39 = vadd.f32 %v1734_v34, %v1733_v9 }
 0x313   :  { %v4200_v47 = vadd.f32 %v4199_v16, %v4198_v3  ;;  %v8353_v14 = vpop.eup %5414  ;;  %5440 = vpow2.f32 %v3990_v24  ;;  %v4112_v44 = vrot.slane %v8349_v60, 6  ;;  %v4212_v20 = vsel %vm2237_vm4, %v4103_v31, 0.0 }
 0x314   :  { %v8358_v28 = vpop.eup %5416  ;;  %5442 = vpow2.f32 %v3994_v43  ;;  %v4111_v32 = vsel %vm2123_vm1, %v4110_v2, %v8338_v18  ;;  %v4114_v42 = vrot.slane %v8353_v14, 5  ;;  %v4213_v38 = vrot.slane %v4212_v20, 4 }
 0x315   :  { %v4201_v6 = vrot.slane %v4200_v47, 2  ;;  %v8363_v0 = vpop.eup %5418  ;;  %5444 = vpow2.f32 %v8283_v56  ;;  %v4113_v24 = vsel %vm2126_vm2, %v4112_v44, %v4111_v32  ;;  %v11427_v44 = vld [vmem:[#allocation201_spill] sm:$0xff] }
 0x316   :  { %v8369_v49 = vpop.eup %5420  ;;  %5446 = vpow2.f32 %v8287_v61  ;;  %v4115_v43 = vsel %vm2129_vm3, %v4114_v42, %v4113_v24  ;;  %v4122_v4 = vrot.slane %v8363_v0, 7  ;;  %v4214_v26 = vadd.f32 %v4213_v38, %v4212_v20 }
 0x317   :  { %v4202_v29 = vadd.f32 %v4201_v6, %v4200_v47  ;;  %v8374_v22 = vpop.eup %5422  ;;  %5448 = vpow2.f32 %v8289_v53  ;;  %v4124_v56 = vrot.slane %v8369_v49, 6  ;;  %v4226_v37 = vsel %vm2237_vm4, %v4115_v43, 0.0 }
 0x318   :  { %v8379_v9 = vpop.eup %5424  ;;  %5450 = vpow2.f32 %v8294_v25  ;;  %v4123_v61 = vsel %vm2123_vm1, %v4122_v4, %v8358_v28  ;;  %v4126_v40 = vrot.slane %v8374_v22, 5  ;;  %v4215_v19 = vrot.slane %v4214_v26, 2 }
 0x319   :  { %v4203_v58 = vrot.slane %v4202_v29, 1  ;;  %v8385_v52 = vpop.eup %5426  ;;  %5452 = vpow2.f32 %v8296_v23  ;;  %v4125_v53 = vsel %vm2126_vm2, %v4124_v56, %v4123_v61  ;;  %v4227_v10 = vrot.slane %v4226_v37, 4 }
 0x31a   :  { %v8389_v8 = vpop.eup %5428  ;;  %5454 = vpow2.f32 %v8300_v51  ;;  %v4127_v25 = vsel %vm2129_vm3, %v4126_v40, %v4125_v53  ;;  %v4134_v3 = vrot.slane %v8385_v52, 7  ;;  %v4216_v16 = vadd.f32 %v4215_v19, %v4214_v26 }
 0x31b   :  { %v4204_v34 = vadd.f32 %v4203_v58, %v4202_v29  ;;  %v8394_v1 = vpop.eup %5430  ;;  %v4136_v59 = vrot.slane %v8389_v8, 6  ;;  %v4228_v36 = vadd.f32 %v4227_v10, %v4226_v37  ;;  %v4240_v23 = vsel %vm2237_vm4, %v4127_v25, 0.0 }
 0x31c   :  { %v8398_v31 = vpop.eup %5432  ;;  %v4135_v2 = vsel %vm2123_vm1, %v4134_v3, %v8379_v9  ;;  %v4138_v51 = vrot.slane %v8394_v1, 5  ;;  %v4241_v47 = vrot.slane %v4240_v23, 4  ;;  %v4217_v6 = vrot.slane %v4216_v16, 1 }
 0x31d   :  { %v4313_v20 = vrot.slane %v4204_v34, %v11427_v44  ;;  %v8404_v32 = vpop.eup %5434  ;;  %v4137_v42 = vsel %vm2126_vm2, %v4136_v59, %v4135_v2  ;;  %v4229_v24 = vrot.slane %v4228_v36, 2  ;;  %v8408_v38 = vadd.f32 %v1748_v55, %v8325_v63 }
 0x31e   :  { %v8410_v43 = vpop.eup %5436  ;;  %v4139_v4 = vsel %vm2129_vm3, %v4138_v51, %v4137_v42  ;;  %v4146_v29 = vrot.slane %v8404_v32, 7  ;;  %v4242_v56 = vadd.f32 %v4241_v47, %v4240_v23  ;;  %v4218_v61 = vadd.f32 %v4217_v6, %v4216_v16 }
 0x31f   :  { %5456 = vrcp.f32 %v4313_v20  ;;  %v8414_v26 = vpop.eup %5438  ;;  %v4148_v37 = vrot.slane %v8410_v43, 6  ;;  %v4230_v40 = vadd.f32 %v4229_v24, %v4228_v36  ;;  %v4254_v58 = vsel %vm2237_vm4, %v4139_v4, 0.0 }
 0x320   :  { %v8418_v53 = vpop.eup %5440  ;;  %v4147_v63 = vsel %vm2123_vm1, %v4146_v29, %v8398_v31  ;;  %v4150_v55 = vrot.slane %v8414_v26, 5  ;;  %v4243_v19 = vrot.slane %v4242_v56, 2  ;;  %v4255_v10 = vrot.slane %v4254_v58, 4 }
 0x321   :  { %v8423_v25 = vpop.eup %5442  ;;  %v4149_v3 = vsel %vm2126_vm2, %v4148_v37, %v4147_v63  ;;  %v4231_v34 = vrot.slane %v4230_v40, 1  ;;  %v4321_v59 = vrot.slane %v4218_v61, %v11427_v44  ;;  %v1736_v16 = vrot.slane %v8367_v39, 2 }
 0x322   :  { %v8428_v36 = vpop.eup %5444  ;;  %v4151_v23 = vsel %vm2129_vm3, %v4150_v55, %v4149_v3  ;;  %v4158_v2 = vrot.slane %v8423_v25, 7  ;;  %v4244_v51 = vadd.f32 %v4243_v19, %v4242_v56  ;;  %v4256_v47 = vadd.f32 %v4255_v10, %v4254_v58 }
 0x323   :  { %v8432_v20 = vpop.eup %5446  ;;  %v4160_v42 = vrot.slane %v8428_v36, 6  ;;  %v4232_v6 = vadd.f32 %v4231_v34, %v4230_v40  ;;  %v4268_v24 = vsel %vm2237_vm4, %v4151_v23, 0.0  ;;  %5458 = vrcp.f32 %v4321_v59 }
 0x324   :  { %v8436_v4 = vpop.eup %5448  ;;  %v4159_v29 = vsel %vm2123_vm1, %v4158_v2, %v8418_v53  ;;  %v4162_v37 = vrot.slane %v8432_v20, 5  ;;  %v4245_v61 = vrot.slane %v4244_v51, 1  ;;  %v4257_v63 = vrot.slane %v4256_v47, 2 }
 0x325   :  { %v8441_v55 = vpop.eup %5450  ;;  %v4161_v56 = vsel %vm2126_vm2, %v4160_v42, %v4159_v29  ;;  %v4269_v58 = vrot.slane %v4268_v24, 4  ;;  %v4329_v19 = vrot.slane %v4232_v6, %v11427_v44  ;;  %v1750_v40 = vrot.slane %v8408_v38, 2 }
 0x326   :  { %v8446_v10 = vpop.eup %5452  ;;  %v4163_v3 = vsel %vm2129_vm3, %v4162_v37, %v4161_v56  ;;  %v4170_v34 = vrot.slane %v8441_v55, 7  ;;  %v4246_v59 = vadd.f32 %v4245_v61, %v4244_v51  ;;  %v4258_v23 = vadd.f32 %v4257_v63, %v4256_v47 }
 0x327   :  { %v8450_v2 = vpop.eup %5454  ;;  %v4172_v46 = vrot.slane %v8446_v10, 6  ;;  %v4270_v5 = vadd.f32 %v4269_v58, %v4268_v24  ;;  %v4282_v42 = vsel %vm2237_vm4, %v4163_v3, 0.0  ;;  %5460 = vrcp.f32 %v4329_v19 }
 0x328   :  { %v4171_v6 = vsel %vm2123_vm1, %v4170_v34, %v8436_v4  ;;  %v4174_v29 = vrot.slane %v8450_v2, 5  ;;  %v4259_v12 = vrot.slane %v4258_v23, 1  ;;  %v4283_v11 = vrot.slane %v4282_v42, 4 }
 0x329   :  { %v4173_v37 = vsel %vm2126_vm2, %v4172_v46, %v4171_v6  ;;  %v4271_v56 = vrot.slane %v4270_v5, 2  ;;  %v4337_v51 = vrot.slane %v4246_v59, %v11427_v44  ;;  %v11428_v47 = vrot.slane %v8332_v13, 2 }
 0x32a   :  { %v4175_v24 = vsel %vm2129_vm3, %v4174_v29, %v4173_v37  ;;  %v4260_v63 = vadd.f32 %v4259_v12, %v4258_v23  ;;  %v4284_v58 = vadd.f32 %v4283_v11, %v4282_v42  ;;  %v8466_v19 = vadd.f32 %v1736_v16, %v8367_v39 }
 0x32b   :  { %v8462_v61 = vadd.f32 %v11428_v47, %v8332_v13  ;;  %v4272_v34 = vadd.f32 %v4271_v56, %v4270_v5  ;;  %v4296_v33 = vsel %vm2237_vm4, %v4175_v24, 0.0  ;;  %5462 = vrcp.f32 %v4337_v51 }
 0x32c   :  { %11430 = vst [vmem:[#allocation202_spill] sm:$0xff] %v8466_v19  ;;  %v5457_v3 = vpop.eup %5456  ;;  %v8470_v46 = vadd.f32 %v1750_v40, %v8408_v38  ;;  %v4285_v59 = vrot.slane %v4284_v58, 2  ;;  %v4297_v6 = vrot.slane %v4296_v33, 4  ;;  %v4345_v13 = vrot.slane %v4260_v63, %v11427_v44  ;;  %v11484_v19 = vld [vmem:[#allocation22_spill] sm:$0xff] }
 0x32d   :  { %11429 = vst [vmem:[#allocation188_spill] sm:$0xff] %v8462_v61  ;;  %v4375_v47 = vmul.f32 %v5457_v3, %v8285_v30  ;;  %v4273_v29 = vrot.slane %v4272_v34, 1  ;;  %v4378_v11 = vmul.f32 %v5457_v3, %v8292_v41  ;;  %v4380_v12 = vmul.f32 %v5457_v3, %v8298_v62  ;;  %v11432_v41 = vld [vmem:[#allocation5_spill] sm:$0xff]  ;;  %v11485_v61 = vld [vmem:[#allocation26_spill] sm:$0xff] }
 0x32e   :  { %11431 = vst [vmem:[#allocation142_spill] sm:$0xff] %v8470_v46  ;;  %v4382_v39 = vmul.f32 %v5457_v3, %v8304_v21  ;;  %v4286_v5 = vadd.f32 %v4285_v59, %v4284_v58  ;;  %v4298_v16 = vadd.f32 %v4297_v6, %v4296_v33  ;;  %5464 = vrcp.f32 %v4345_v13  ;;  %v11433_v62 = vld [vmem:[#allocation9_spill] sm:$0xff] }
 0x32f   :  { %v4457_v23 = vrot.slane %v4375_v47, %v11427_v44  ;;  %v4274_v38 = vadd.f32 %v4273_v29, %v4272_v34  ;;  %v4465_v40 = vrot.slane %v4378_v11, %v11427_v44  ;;  %v4473_v42 = vrot.slane %v4380_v12, %v11427_v44  ;;  %v11434_v13 = vld [vmem:[#allocation13_spill] sm:$0xff] }
 0x330   :  { %v4481_v37 = vrot.slane %v4382_v39, %v11427_v44  ;;  %v5459_v30 = vpop.eup %5458  ;;  %v4287_v56 = vrot.slane %v4286_v5, 1  ;;  %v4299_v51 = vrot.slane %v4298_v16, 2 }
 0x331   :  { %v8482_v24 = vmul.f32 %v4457_v23, %v11432_v41  ;;  %v8485_v21 = vmul.f32 %v4457_v23, %v11433_v62  ;;  %v4353_v33 = vrot.slane %v4274_v38, %v11427_v44  ;;  %v4385_v63 = vmul.f32 %v5459_v30, %v8310_v17  ;;  %v11437_v62 = vld [vmem:[#allocation25_spill] sm:$0xff] }
 0x332   :  { %v4388_v58 = vmul.f32 %v5459_v30, %v8318_v54  ;;  %v4390_v3 = vmul.f32 %v5459_v30, %v8327_v45  ;;  %v4288_v34 = vadd.f32 %v4287_v56, %v4286_v5  ;;  %v4300_v59 = vadd.f32 %v4299_v51, %v4298_v16  ;;  %v11435_v5 = vld [vmem:[#allocation17_spill] sm:$0xff] }
 0x333   :  { %v4392_v6 = vmul.f32 %v5459_v30, %v8334_v48  ;;  %v8493_v47 = vmul.f32 %v4465_v40, %v11434_v13  ;;  %5466 = vrcp.f32 %v4353_v33  ;;  %v4489_v29 = vrot.slane %v4385_v63, %v11427_v44  ;;  %v11436_v51 = vld [vmem:[#allocation21_spill] sm:$0xff] }
 0x334   :  { %v4497_v11 = vrot.slane %v4388_v58, %v11427_v44  ;;  %v4505_v12 = vrot.slane %v4390_v3, %v11427_v44  ;;  %v5461_v39 = vpop.eup %5460  ;;  %v4301_v17 = vrot.slane %v4300_v59, 1  ;;  %v4361_v54 = vrot.slane %v4288_v34, %v11427_v44  ;;  %v11439_v34 = vld [vmem:[#allocation33_spill] sm:$0xff] }
 0x335   :  { %v4513_v45 = vrot.slane %v4392_v6, %v11427_v44  ;;  %v8501_v16 = vmul.f32 %v4465_v40, %v11435_v5  ;;  %v4395_v48 = vmul.f32 %v5461_v39, %v8338_v18  ;;  %v4398_v23 = vmul.f32 %v5461_v39, %v8343_v50  ;;  %v11440_v6 = vld [vmem:[#allocation37_spill] sm:$0xff] }
 0x336   :  { %v4400_v38 = vmul.f32 %v5461_v39, %v8349_v60  ;;  %v4402_v30 = vmul.f32 %v5461_v39, %v8353_v14  ;;  %v4302_v56 = vadd.f32 %v4301_v17, %v4300_v59  ;;  %5468 = vrcp.f32 %v4361_v54  ;;  %v11438_v14 = vld [vmem:[#allocation29_spill] sm:$0xff] }
 0x337   :  { %v8508_v41 = vmul.f32 %v4473_v42, %v11436_v51  ;;  %v8511_v33 = vmul.f32 %v4473_v42, %v11437_v62  ;;  %v4521_v63 = vrot.slane %v4395_v48, %v11427_v44  ;;  %v4529_v40 = vrot.slane %v4398_v23, %v11427_v44  ;;  %v11441_v5 = vld [vmem:[#allocation41_spill] sm:$0xff] }
 0x338   :  { %v4537_v18 = vrot.slane %v4400_v38, %v11427_v44  ;;  %v4545_v50 = vrot.slane %v4402_v30, %v11427_v44  ;;  %v5463_v58 = vpop.eup %5462  ;;  %v4369_v60 = vrot.slane %v4302_v56, %v11427_v44  ;;  %v8519_v3 = vmul.f32 %v4481_v37, %v11438_v14  ;;  %v11442_v23 = vld [vmem:[#allocation45_spill] sm:$0xff] }
 0x339   :  { %v8522_v59 = vmul.f32 %v4481_v37, %v11439_v34  ;;  %v8525_v42 = vmul.f32 %v4489_v29, %v11440_v6  ;;  %v4405_v13 = vmul.f32 %v5463_v58, %v8358_v28  ;;  %v4408_v39 = vmul.f32 %v5463_v58, %v8363_v0  ;;  %v11443_v37 = vld [vmem:[#allocation49_spill] sm:$0xff] }
 0x33a   :  { %v4410_v17 = vmul.f32 %v5463_v58, %v8369_v49  ;;  %v4412_v54 = vmul.f32 %v5463_v58, %v8374_v22  ;;  %5470 = vrcp.f32 %v4369_v60  ;;  %v8532_v48 = vmul.f32 %v4489_v29, %v11441_v5  ;;  %v11444_v60 = vld [vmem:[#allocation53_spill] sm:$0xff] }
 0x33b   :  { %v8535_v38 = vmul.f32 %v4497_v11, %v11442_v23  ;;  %v8538_v30 = vmul.f32 %v4497_v11, %v11443_v37  ;;  %v5465_v56 = vpop.eup %5464  ;;  %v4553_v51 = vrot.slane %v4405_v13, %v11427_v44  ;;  %v4561_v28 = vrot.slane %v4408_v39, %v11427_v44  ;;  %v11445_v14 = vld [vmem:[#allocation57_spill] sm:$0xff] }
 0x33c   :  { %v4569_v0 = vrot.slane %v4410_v17, %v11427_v44  ;;  %v4577_v49 = vrot.slane %v4412_v54, %v11427_v44  ;;  %v4415_v22 = vmul.f32 %v5465_v56, %v8379_v9  ;;  %v4418_v29 = vmul.f32 %v5465_v56, %v8385_v52  ;;  %v11446_v6 = vld [vmem:[#allocation61_spill] sm:$0xff] }
 0x33d   :  { %v4420_v62 = vmul.f32 %v5465_v56, %v8389_v8  ;;  %v4422_v58 = vmul.f32 %v5465_v56, %v8394_v1  ;;  %v8549_v11 = vmul.f32 %v4505_v12, %v11444_v60  ;;  %v8552_v34 = vmul.f32 %v4505_v12, %v11445_v14  ;;  %v11447_v39 = vld [vmem:[#allocation65_spill] sm:$0xff] }
 0x33e   :  { %v8555_v13 = vmul.f32 %v4513_v45, %v11446_v6  ;;  %v8558_v17 = vmul.f32 %v4513_v45, %v11447_v39  ;;  %v4585_v9 = vrot.slane %v4415_v22, %v11427_v44  ;;  %v4593_v52 = vrot.slane %v4418_v29, %v11427_v44  ;;  %v11448_v54 = vld [vmem:[#allocation69_spill] sm:$0xff] }
 0x33f   :  { %v4601_v8 = vrot.slane %v4420_v62, %v11427_v44  ;;  %v4609_v1 = vrot.slane %v4422_v58, %v11427_v44  ;;  %v8565_v5 = vmul.f32 %v4521_v63, %v11448_v54  ;;  %v11449_v23 = vld [vmem:[#allocation73_spill] sm:$0xff]  ;;  %v11456_v58 = vld [vmem:[#allocation95_spill] sm:$0xff]  ;;  %v11458_v54 = vld [vmem:[#allocation100_spill] sm:$0xff] }
 0x340   :  { %v8568_v12 = vmul.f32 %v4521_v63, %v11449_v23  ;;  %v11450_v37 = vld [vmem:[#allocation77_spill] sm:$0xff]  ;;  %v5467_v14 = vpop.eup %5466  ;;  %v8583_v39 = vmul.f32 %v4545_v50, %v11456_v58  ;;  %v8586_v35 = vmul.f32 %v4545_v50, %v11458_v54  ;;  %v8602_v50 = vmul.f32 %v4561_v28, %v11466_v15 }
 0x341   :  { %v8571_v56 = vmul.f32 %v4529_v40, %v11450_v37  ;;  %v11451_v60 = vld [vmem:[#allocation81_spill] sm:$0xff]  ;;  %v4425_v63 = vmul.f32 %v5467_v14, %v8398_v31  ;;  %v4428_v23 = vmul.f32 %v5467_v14, %v8404_v32  ;;  %v4432_v37 = vmul.f32 %v5467_v14, %v8414_v26 }
 0x342   :  { %v8574_v45 = vmul.f32 %v4529_v40, %v11451_v60  ;;  %v11452_v22 = vld [vmem:[#allocation85_spill] sm:$0xff]  ;;  %11457 = vst [vmem:[#allocation221_spill] sm:$0xff] %v8583_v39  ;;  %11459 = vst [vmem:[#allocation222_spill] sm:$0xff] %v8586_v35  ;;  %v4430_v40 = vmul.f32 %v5467_v14, %v8410_v43  ;;  %v11460_v60 = vld [vmem:[#allocation104_spill] sm:$0xff] }
 0x343   :  { %v8577_v6 = vmul.f32 %v4537_v18, %v11452_v22  ;;  %v11454_v29 = vld [vmem:[#allocation89_spill] sm:$0xff]  ;;  %v8593_v22 = vmul.f32 %v4553_v51, %v11460_v60  ;;  %11467 = vst [vmem:[#allocation226_spill] sm:$0xff] %v8602_v50  ;;  %v5469_v54 = vpop.eup %5468  ;;  %v4617_v31 = vrot.slane %v4425_v63, %v11427_v44  ;;  %v4625_v32 = vrot.slane %v4428_v23, %v11427_v44  ;;  %v11497_v50 = vld [vmem:[#allocation74_spill] sm:$0xff] }
 0x344   :  { %v8580_v62 = vmul.f32 %v4537_v18, %v11454_v29  ;;  %v8596_v18 = vmul.f32 %v4553_v51, %v11462_v57  ;;  %v11464_v29 = vld [vmem:[#allocation112_spill] sm:$0xff]  ;;  %v4633_v43 = vrot.slane %v4430_v40, %v11427_v44  ;;  %v4641_v26 = vrot.slane %v4432_v37, %v11427_v44  ;;  %v11472_v63 = vld [vmem:[#allocation129_spill] sm:$0xff] }
 0x345   :  { %11453 = vst [vmem:[#allocation155_spill] sm:$0xff] %v8577_v6  ;;  %11461 = vst [vmem:[#allocation223_spill] sm:$0xff] %v8593_v22  ;;  %v8599_v58 = vmul.f32 %v4561_v28, %v11464_v29  ;;  %v4435_v14 = vmul.f32 %v5469_v54, %v8418_v53  ;;  %v4438_v57 = vmul.f32 %v5469_v54, %v8423_v25  ;;  %v11468_v29 = vld [vmem:[#allocation120_spill] sm:$0xff]  ;;  %v11474_v40 = vld [vmem:[#allocation137_spill] sm:$0xff] }
 0x346   :  { %11455 = vst [vmem:[#allocation156_spill] sm:$0xff] %v8580_v62  ;;  %11463 = vst [vmem:[#allocation224_spill] sm:$0xff] %v8596_v18  ;;  %v4440_v51 = vmul.f32 %v5469_v54, %v8428_v36  ;;  %v4442_v60 = vmul.f32 %v5469_v54, %v8432_v20  ;;  %v8613_v15 = vmul.f32 %v4569_v0, %v11468_v29  ;;  %v11470_v28 = vld [vmem:[#allocation124_spill] sm:$0xff]  ;;  %v11476_v54 = vld [vmem:[#allocation6_spill] sm:$0xff] }
 0x347   :  { %11465 = vst [vmem:[#allocation225_spill] sm:$0xff] %v8599_v58  ;;  %v8616_v27 = vmul.f32 %v4569_v0, %v11470_v28  ;;  %v8619_v23 = vmul.f32 %v4577_v49, %v11472_v63  ;;  %v8622_v7 = vmul.f32 %v4577_v49, %v11474_v40  ;;  %v4649_v53 = vrot.slane %v4435_v14, %v11427_v44  ;;  %v5471_v37 = vpop.eup %5470  ;;  %v11478_v0 = vld [vmem:[#allocation10_spill] sm:$0xff]  ;;  %v11503_v22 = vld [vmem:[#allocation101_spill] sm:$0xff]  ;;  %v11511_v6 = vld [vmem:[#allocation144_spill] sm:$0xff] }
 0x348   :  { %11469 = vst [vmem:[#allocation153_spill] sm:$0xff] %v8613_v15  ;;  %v4657_v25 = vrot.slane %v4438_v57, %v11427_v44  ;;  %v4665_v36 = vrot.slane %v4440_v51, %v11427_v44  ;;  %v4673_v20 = vrot.slane %v4442_v60, %v11427_v44  ;;  %v8629_v29 = vmul.f32 %v4585_v9, %v11476_v54  ;;  %v11480_v63 = vld [vmem:[#allocation14_spill] sm:$0xff]  ;;  %v11505_v35 = vld [vmem:[#allocation109_spill] sm:$0xff] }
 0x349   :  { %11471 = vst [vmem:[#allocation166_spill] sm:$0xff] %v8616_v27  ;;  %11473 = vst [vmem:[#allocation157_spill] sm:$0xff] %v8619_v23  ;;  %v8632_v28 = vmul.f32 %v4585_v9, %v11478_v0  ;;  %v8635_v46 = vmul.f32 %v4593_v52, %v11480_v63  ;;  %v11482_v49 = vld [vmem:[#allocation18_spill] sm:$0xff]  ;;  %v4445_v14 = vmul.f32 %v5471_v37, %v8436_v4  ;;  %v11507_v39 = vld [vmem:[#allocation121_spill] sm:$0xff] }
 0x34a   :  { %11475 = vst [vmem:[#allocation168_spill] sm:$0xff] %v8622_v7  ;;  %11477 = vst [vmem:[#allocation159_spill] sm:$0xff] %v8629_v29  ;;  %v8638_v40 = vmul.f32 %v4593_v52, %v11482_v49  ;;  %v4448_v57 = vmul.f32 %v5471_v37, %v8441_v55  ;;  %v4450_v51 = vmul.f32 %v5471_v37, %v8446_v10  ;;  %v11486_v9 = vld [vmem:[#allocation30_spill] sm:$0xff]  ;;  %v11509_v62 = vld [vmem:[#allocation97_spill] sm:$0xff] }
 0x34b   :  { %11479 = vst [vmem:[#allocation171_spill] sm:$0xff] %v8632_v28  ;;  %11481 = vst [vmem:[#allocation162_spill] sm:$0xff] %v8635_v46  ;;  %v4452_v60 = vmul.f32 %v5471_v37, %v8450_v2  ;;  %v4782_v54 = vmul.f32 %v4601_v8, %v11484_v19  ;;  %v4784_v29 = vmul.f32 %v4601_v8, %v11485_v61  ;;  %v11487_v28 = vld [vmem:[#allocation34_spill] sm:$0xff] }
 0x34c   :  { %11483 = vst [vmem:[#allocation173_spill] sm:$0xff] %v8638_v40  ;;  %v4786_v0 = vmul.f32 %v4609_v1, %v11486_v9  ;;  %v4788_v63 = vmul.f32 %v4609_v1, %v11487_v28  ;;  %v4681_v46 = vrot.slane %v4445_v14, %v11427_v44  ;;  %v4689_v52 = vrot.slane %v4448_v57, %v11427_v44  ;;  %v11488_v49 = vld [vmem:[#allocation38_spill] sm:$0xff] }
 0x34d   :  { %v4697_v4 = vrot.slane %v4450_v51, %v11427_v44  ;;  %v4705_v55 = vrot.slane %v4452_v60, %v11427_v44  ;;  %v4790_v10 = vmul.f32 %v4617_v31, %v11488_v49  ;;  %v11489_v40 = vld [vmem:[#allocation42_spill] sm:$0xff]  ;;  %v4808_v60 = vmul.f32 %v4649_v53, %v11497_v50 }
 0x34e   :  { %v4792_v2 = vmul.f32 %v4617_v31, %v11489_v40  ;;  %v11490_v37 = vld [vmem:[#allocation46_spill] sm:$0xff]  ;;  %v4828_v50 = vmul.f32 %v4689_v52, %v11507_v39  ;;  %v4894_v39 = vadd.f32 %v8549_v11, %v8508_v41  ;;  %v11513_v41 = vld [vmem:[#allocation156_spill] sm:$0xff]  ;;  %v11514_v11 = vld [vmem:[#allocation221_spill] sm:$0xff] }
 0x34f   :  { %v4794_v19 = vmul.f32 %v4625_v32, %v11490_v37  ;;  %v11491_v7 = vld [vmem:[#allocation50_spill] sm:$0xff] }
 0x350   :  { %v4796_v61 = vmul.f32 %v4625_v32, %v11491_v7  ;;  %v11492_v8 = vld [vmem:[#allocation54_spill] sm:$0xff]  ;;  %v11502_v32 = vld [vmem:[#allocation96_spill] sm:$0xff] }
 0x351   :  { %v4798_v9 = vmul.f32 %v4633_v43, %v11492_v8  ;;  %v11493_v23 = vld [vmem:[#allocation58_spill] sm:$0xff]  ;;  %v4818_v8 = vmul.f32 %v4673_v20, %v11502_v32 }
 0x352   :  { %v4800_v1 = vmul.f32 %v4633_v43, %v11493_v23  ;;  %v11494_v28 = vld [vmem:[#allocation62_spill] sm:$0xff]  ;;  %v4820_v43 = vmul.f32 %v4673_v20, %v11503_v22  ;;  %v11504_v23 = vld [vmem:[#allocation105_spill] sm:$0xff]  ;;  %v4852_v22 = vadd.f32 %v8532_v48, %v8485_v21  ;;  %v11512_v48 = vld [vmem:[#allocation155_spill] sm:$0xff] }
 0x353   :  { %v4802_v14 = vmul.f32 %v4641_v26, %v11494_v28  ;;  %v11495_v27 = vld [vmem:[#allocation66_spill] sm:$0xff]  ;;  %v4822_v28 = vmul.f32 %v4681_v46, %v11504_v23  ;;  %v11522_v23 = vld [vmem:[#allocation157_spill] sm:$0xff] }
 0x354   :  { %v4804_v57 = vmul.f32 %v4641_v26, %v11495_v27  ;;  %v11496_v15 = vld [vmem:[#allocation70_spill] sm:$0xff]  ;;  %v4824_v27 = vmul.f32 %v4681_v46, %v11505_v35  ;;  %v4866_v35 = vadd.f32 %v8535_v38, %v8493_v47  ;;  %v4880_v46 = vadd.f32 %v8538_v30, %v8501_v16 }
 0x355   :  { %v4806_v51 = vmul.f32 %v4649_v53, %v11496_v15  ;;  %v11498_v44 = vld [vmem:[#allocation78_spill] sm:$0xff]  ;;  %v4895_v38 = vadd.f32 %v4894_v39, %v11512_v48 }
 0x356   :  { %v4810_v49 = vmul.f32 %v4657_v25, %v11498_v44  ;;  %v11499_v58 = vld [vmem:[#allocation82_spill] sm:$0xff]  ;;  %v4867_v47 = vadd.f32 %v4866_v35, %v8571_v56  ;;  %v4881_v16 = vadd.f32 %v4880_v46, %v8574_v45  ;;  %v11525_v35 = vld [vmem:[#allocation171_spill] sm:$0xff] }
 0x357   :  { %v4812_v31 = vmul.f32 %v4657_v25, %v11499_v58  ;;  %v11500_v40 = vld [vmem:[#allocation86_spill] sm:$0xff]  ;;  %v4832_v58 = vmul.f32 %v4697_v4, %v11509_v62  ;;  %v11510_v25 = vld [vmem:[#allocation139_spill] sm:$0xff]  ;;  %v4908_v62 = vadd.f32 %v8552_v34, %v8511_v33 }
 0x358   :  { %v4814_v37 = vmul.f32 %v4665_v36, %v11500_v40  ;;  %v11501_v18 = vld [vmem:[#allocation90_spill] sm:$0xff]  ;;  %v4834_v40 = vmul.f32 %v4705_v55, %v11510_v25 }
 0x359   :  { %v4816_v7 = vmul.f32 %v4665_v36, %v11501_v18  ;;  %v11506_v26 = vld [vmem:[#allocation114_spill] sm:$0xff]  ;;  %v4836_v18 = vmul.f32 %v4705_v55, %v11511_v6  ;;  %v4838_v36 = vadd.f32 %v8525_v42, %v8482_v24  ;;  %v4922_v6 = vadd.f32 %v8555_v13, %v8519_v3  ;;  %v11516_v3 = vld [vmem:[#allocation223_spill] sm:$0xff]  ;;  %v11520_v55 = vld [vmem:[#allocation153_spill] sm:$0xff] }
 0x35a   :  { %v4826_v15 = vmul.f32 %v4689_v52, %v11506_v26  ;;  %v11508_v53 = vld [vmem:[#allocation126_spill] sm:$0xff]  ;;  %v4936_v24 = vadd.f32 %v8558_v17, %v8522_v59  ;;  %v4853_v42 = vadd.f32 %v4852_v22, %v8568_v12  ;;  %v4909_v30 = vadd.f32 %v4908_v62, %v11513_v41  ;;  %v11517_v52 = vld [vmem:[#allocation224_spill] sm:$0xff]  ;;  %v11518_v17 = vld [vmem:[#allocation225_spill] sm:$0xff] }
 0x35b   :  { %v4830_v44 = vmul.f32 %v4697_v4, %v11508_v53  ;;  %v4839_v21 = vadd.f32 %v4838_v36, %v8565_v5  ;;  %v4923_v33 = vadd.f32 %v4922_v6, %v11514_v11  ;;  %v11515_v34 = vld [vmem:[#allocation222_spill] sm:$0xff]  ;;  %v4868_v5 = vadd.f32 %v4867_v47, %v11518_v17  ;;  %v11523_v53 = vld [vmem:[#allocation168_spill] sm:$0xff]  ;;  %v11524_v36 = vld [vmem:[#allocation159_spill] sm:$0xff] }
 0x35c   :  { %v4937_v20 = vadd.f32 %v4936_v24, %v11515_v34  ;;  %v4854_v59 = vadd.f32 %v4853_v42, %v11517_v52  ;;  %v11519_v4 = vld [vmem:[#allocation226_spill] sm:$0xff]  ;;  %v4896_v56 = vadd.f32 %v4895_v38, %v11520_v55  ;;  %v11527_v6 = vld [vmem:[#allocation173_spill] sm:$0xff] }
 0x35d   :  { %v4840_v13 = vadd.f32 %v4839_v21, %v11516_v3  ;;  %v4882_v12 = vadd.f32 %v4881_v16, %v11519_v4  ;;  %v11521_v32 = vld [vmem:[#allocation166_spill] sm:$0xff]  ;;  %v4924_v26 = vadd.f32 %v4923_v33, %v11522_v23 }
 0x35e   :  { %v4910_v45 = vadd.f32 %v4909_v30, %v11521_v32  ;;  %v4938_v25 = vadd.f32 %v4937_v20, %v11523_v53  ;;  %v4855_v46 = vadd.f32 %v4854_v59, %v11525_v35  ;;  %v11526_v39 = vld [vmem:[#allocation162_spill] sm:$0xff]  ;;  %v4897_v21 = vadd.f32 %v4896_v56, %v4782_v54  ;;  %v11536_v53 = vld [vmem:[#allocation188_spill] sm:$0xff] }
 0x35f   :  { %v4841_v22 = vadd.f32 %v4840_v13, %v11524_v36  ;;  %v4869_v62 = vadd.f32 %v4868_v5, %v11526_v39  ;;  %v4883_v24 = vadd.f32 %v4882_v12, %v11527_v6  ;;  %v4925_v47 = vadd.f32 %v4924_v26, %v4786_v0  ;;  %v11537_v36 = vld [vmem:[#allocation202_spill] sm:$0xff] }
 0x360   :  { %v4911_v42 = vadd.f32 %v4910_v45, %v4784_v29  ;;  %v4939_v16 = vadd.f32 %v4938_v25, %v4788_v63  ;;  %v4856_v38 = vadd.f32 %v4855_v46, %v4792_v2  ;;  %v4898_v11 = vadd.f32 %v4897_v21, %v4798_v9  ;;  %v11528_v9 = vld [vmem:[#allocation113_spill] sm:$0xff]  ;;  %v11538_v39 = vld [vmem:[#allocation142_spill] sm:$0xff] }
 0x361   :  { %v4842_v48 = vadd.f32 %v4841_v22, %v4790_v10  ;;  %v4870_v41 = vadd.f32 %v4869_v62, %v4794_v19  ;;  %v4884_v30 = vadd.f32 %v4883_v24, %v4796_v61  ;;  %v4926_v34 = vadd.f32 %v4925_v47, %v4802_v14  ;;  %v11529_v14 = vld [vmem:[#allocation119_spill] sm:$0xff]  ;;  %v11539_v6 = vld [vmem:[#allocation170_spill] sm:$0xff] }
 0x362   :  { %v4912_v33 = vadd.f32 %v4911_v42, %v4800_v1  ;;  %v4940_v20 = vadd.f32 %v4939_v16, %v4804_v57  ;;  %v4857_v13 = vadd.f32 %v4856_v38, %v4808_v60  ;;  %v4899_v17 = vadd.f32 %v4898_v11, %v4814_v37  ;;  %v11532_v37 = vld [vmem:[#allocation132_spill] sm:$0xff]  ;;  %v11540_v24 = vld [vmem:[#allocation158_spill] sm:$0xff]  ;;  %v11541_v16 = vld [vmem:[#allocation183_spill] sm:$0xff] }
 0x363   :  { %v4843_v3 = vadd.f32 %v4842_v48, %v4806_v51  ;;  %v4871_v52 = vadd.f32 %v4870_v41, %v4810_v49  ;;  %v4885_v59 = vadd.f32 %v4884_v30, %v4812_v31  ;;  %v4927_v4 = vadd.f32 %v4926_v34, %v4818_v8  ;;  %v11530_v51 = vld [vmem:[#allocation122_spill] sm:$0xff]  ;;  %v11544_v41 = vld [vmem:[#allocation205_spill] sm:$0xff]  ;;  %v11545_v30 = vld [vmem:[#allocation151_spill] sm:$0xff] }
 0x364   :  { %v4913_v5 = vadd.f32 %v4912_v33, %v4816_v7  ;;  %v4941_v12 = vadd.f32 %v4940_v20, %v4820_v43  ;;  %v4858_v29 = vadd.f32 %v4857_v13, %v4824_v27  ;;  %v4900_v10 = vadd.f32 %v4899_v17, %v4830_v44  ;;  %v11531_v49 = vld [vmem:[#allocation94_spill] sm:$0xff]  ;;  %v11548_v13 = vld [vmem:[#allocation167_spill] sm:$0xff]  ;;  %v11550_v17 = vld [vmem:[#allocation148_spill] sm:$0xff] }
 0x365   :  { %v4844_v54 = vadd.f32 %v4843_v3, %v4822_v28  ;;  %v4872_v0 = vadd.f32 %v4871_v52, %v4826_v15  ;;  %v4886_v63 = vadd.f32 %v4885_v59, %v4828_v50  ;;  %v4928_v19 = vadd.f32 %v4927_v4, %v4834_v40  ;;  %v11533_v8 = vld [vmem:[#allocation130_spill] sm:$0xff]  ;;  %v11534_v28 = vld [vmem:[#allocation145_spill] sm:$0xff] }
 0x366   :  { %v4914_v2 = vadd.f32 %v4913_v5, %v4832_v58  ;;  %v4942_v61 = vadd.f32 %v4941_v12, %v4836_v18  ;;  %v8716_v57 = vadd.f32 %v4858_v29, %v11529_v14  ;;  %v8725_v7 = vadd.f32 %v4900_v10, %v11532_v37  ;;  %v11535_v15 = vld [vmem:[#allocation149_spill] sm:$0xff]  ;;  %v11546_v20 = vld [vmem:[#allocation138_spill] sm:$0xff] }
 0x367   :  { %v8713_v1 = vadd.f32 %v4844_v54, %v11528_v9  ;;  %v8719_v60 = vadd.f32 %v4872_v0, %v11530_v51  ;;  %v8722_v31 = vadd.f32 %v4886_v63, %v11531_v49  ;;  %v8731_v27 = vadd.f32 %v4928_v19, %v11534_v28  ;;  %v11547_v3 = vld [vmem:[#allocation154_spill] sm:$0xff]  ;;  %v11555_v19 = vld [vmem:[#allocation207_spill] sm:$0xff]  ;;  %v11569_v28 = vld [vmem:[#allocation181_spill] sm:$0xff] }
 0x368   :  { %v8728_v43 = vadd.f32 %v4914_v2, %v11533_v8  ;;  %v8734_v50 = vadd.f32 %v4942_v61, %v11535_v15  ;;  %v4968_v58 = vmul.f32 %v8716_v57, %v8716_v57  ;;  %v4974_v55 = vmul.f32 %v8725_v7, %v8725_v7  ;;  %v11554_v2 = vld [vmem:[#allocation208_spill] sm:$0xff] }
 0x369   :  { %v4966_v44 = vmul.f32 %v8713_v1, %v8713_v1  ;;  %v4970_v40 = vmul.f32 %v8719_v60, %v8719_v60  ;;  %v4972_v18 = vmul.f32 %v8722_v31, %v8722_v31  ;;  %v4978_v32 = vmul.f32 %v8731_v27, %v8731_v27  ;;  %v11640_v9 = vld [vmem:[#allocation28_spill] sm:$0xff] }
 0x36a   :  { %v4976_v56 = vmul.f32 %v8728_v43, %v8728_v43  ;;  %v4980_v45 = vmul.f32 %v8734_v50, %v8734_v50  ;;  %v1724_v25 = vrot.slane %v11536_v53, 1  ;;  %v1738_v22 = vrot.slane %v11537_v36, 1 }
 0x36b   :  { %v4982_v23 = vadd.f32 %v4968_v58, %v4966_v44  ;;  %v4996_v26 = vadd.f32 %v4972_v18, %v4970_v40  ;;  %v1752_v62 = vrot.slane %v11538_v39, 1  ;;  %v1827_v21 = vmax.f32 %v11540_v24, %v11539_v6  ;;  %v11556_v40 = vld [vmem:[#allocation217_spill] sm:$0xff] }
 0x36c   :  { %v5010_v35 = vadd.f32 %v4976_v56, %v4974_v55  ;;  %v5024_v46 = vadd.f32 %v4980_v45, %v4978_v32  ;;  %v11542_v48 = vrot.slane %v11541_v16, 1  ;;  %v1833_v11 = vmax.f32 %v11545_v30, %v11544_v41  ;;  %v11557_v55 = vld [vmem:[#allocation206_spill] sm:$0xff] }
 0x36d   :  { %v4983_v42 = vrot.slane %v4982_v23, 4  ;;  %v4997_v47 = vrot.slane %v4996_v26, 4  ;;  %v11549_v52 = vmax.f32 %v11547_v3, %v11548_v13  ;;  %v1828_v5 = vmax.f32 %v1827_v21, %v11550_v17 }
 0x36e   :  { %v8760_v38 = vadd.f32 %v11542_v48, %v11541_v16  ;;  %v5011_v33 = vrot.slane %v5010_v35, 4  ;;  %v5025_v34 = vrot.slane %v5024_v46, 4  ;;  %v8770_v54 = vadd.f32 %v1724_v25, %v11536_v53  ;;  %v11559_v53 = vld [vmem:[#allocation211_spill] sm:$0xff]  ;;  %v11560_v25 = vld [vmem:[#allocation210_spill] sm:$0xff]  ;;  %v11563_v16 = vld [vmem:[#allocation220_spill] sm:$0xff] }
 0x36f   :  { %v1822_v59 = vmax.f32 %v11549_v52, %v11546_v20  ;;  %v4984_v4 = vadd.f32 %v4983_v42, %v4982_v23  ;;  %v4998_v12 = vadd.f32 %v4997_v47, %v4996_v26  ;;  %v8773_v29 = vadd.f32 %v1738_v22, %v11537_v36  ;;  %v11558_v23 = vld [vmem:[#allocation209_spill] sm:$0xff] }
 0x370   :  { %11543 = vst [vmem:[#allocation134_spill] sm:$0xff] %v8760_v38  ;;  %11551 = vst [vmem:[#allocation136_spill] sm:$0xff] %v8770_v54  ;;  %v5012_v0 = vadd.f32 %v5011_v33, %v5010_v35  ;;  %v5026_v63 = vadd.f32 %v5025_v34, %v5024_v46  ;;  %v8776_v10 = vadd.f32 %v1752_v62, %v11538_v39  ;;  %v11561_v46 = vld [vmem:[#allocation218_spill] sm:$0xff]  ;;  %v11562_v62 = vld [vmem:[#allocation219_spill] sm:$0xff] }
 0x371   :  { %11552 = vst [vmem:[#allocation175_spill] sm:$0xff] %v8773_v29  ;;  %v1839_v61 = vmax.f32 %v11555_v19, %v11554_v2  ;;  %v4985_v44 = vrot.slane %v4984_v4, 2  ;;  %v4999_v58 = vrot.slane %v4998_v12, 2  ;;  %v8781_v18 = vmax.f32 %v1822_v59, %v11556_v40  ;;  %v11565_v59 = vld [vmem:[#allocation216_spill] sm:$0xff] }
 0x372   :  { %11553 = vst [vmem:[#allocation176_spill] sm:$0xff] %v8776_v10  ;;  %v1834_v56 = vmax.f32 %v1833_v11, %v11557_v55  ;;  %v5013_v32 = vrot.slane %v5012_v0, 2  ;;  %v5027_v45 = vrot.slane %v5026_v63, 2  ;;  %v1845_v36 = vmax.f32 %v11560_v25, %v11559_v53  ;;  %v11564_v11 = vld [vmem:[#allocation212_spill] sm:$0xff] }
 0x373   :  { %v1840_v26 = vmax.f32 %v1839_v61, %v11558_v23  ;;  %v4986_v22 = vadd.f32 %v4985_v44, %v4984_v4  ;;  %v5000_v35 = vadd.f32 %v4999_v58, %v4998_v12  ;;  %v8788_v39 = vmax.f32 %v1828_v5, %v11561_v46  ;;  %v11566_v61 = vld [vmem:[#allocation215_spill] sm:$0xff]  ;;  %v11567_v4 = vld [vmem:[#allocation174_spill] sm:$0xff] }
 0x374   :  { %v8791_v21 = vmax.f32 %v1834_v56, %v11562_v62  ;;  %v5014_v42 = vadd.f32 %v5013_v32, %v5012_v0  ;;  %v5028_v47 = vadd.f32 %v5027_v45, %v5026_v63  ;;  %v1846_v33 = vmax.f32 %v1845_v36, %v11564_v11  ;;  %v11568_v12 = vld [vmem:[#allocation146_spill] sm:$0xff]  ;;  %v11570_v45 = vld [vmem:[#allocation147_spill] sm:$0xff]  ;;  %v11571_v36 = vld [vmem:[#allocation160_spill] sm:$0xff] }
 0x375   :  { %v8794_v48 = vmax.f32 %v1840_v26, %v11563_v16  ;;  %v4987_v34 = vrot.slane %v4986_v22, 1  ;;  %v5001_v52 = vrot.slane %v5000_v35, 1  ;;  %v1851_v15 = vmax.f32 %v11566_v61, %v11565_v59 }
 0x376   :  { %v1857_v44 = vmax.f32 %v11568_v12, %v11567_v4  ;;  %v5015_v5 = vrot.slane %v5014_v42, 1  ;;  %v5029_v58 = vrot.slane %v5028_v47, 1  ;;  %v8802_v56 = vmax.f32 %v1846_v33, %v11569_v28 }
 0x377   :  { %v1863_v0 = vmax.f32 %v8760_v38, %v8770_v54  ;;  %v8806_v63 = vadd.f32 %v4987_v34, %v4986_v22  ;;  %v8808_v32 = vadd.f32 %v5001_v52, %v5000_v35  ;;  %v1852_v26 = vmax.f32 %v1851_v15, %v11570_v45  ;;  %v11572_v34 = vld [vmem:[#allocation163_spill] sm:$0xff]  ;;  %v11573_v52 = vld [vmem:[#allocation169_spill] sm:$0xff] }
 0x378   :  { %v1858_v8 = vmax.f32 %v1857_v44, %v11571_v36  ;;  %v8812_v37 = vadd.f32 %v5015_v5, %v5014_v42  ;;  %v8814_v49 = vadd.f32 %v5029_v58, %v5028_v47  ;;  %v1867_v33 = vsub.f32 %v11547_v3, %v8781_v18 }
 0x379   :  { %v1864_v51 = vmax.f32 %v1863_v0, %v8773_v29  ;;  %v5038_v14 = vadd.f32 1.0, %v8806_v63  ;;  %v5040_v22 = vadd.f32 1.0, %v8808_v32  ;;  %v8822_v35 = vmax.f32 %v1852_v26, %v11572_v34 }
 0x37a   :  { %v8825_v15 = vmax.f32 %v1858_v8, %v11573_v52  ;;  %v5042_v42 = vadd.f32 1.0, %v8812_v37  ;;  %v5044_v47 = vadd.f32 1.0, %v8814_v49  ;;  %v1869_v5 = vsub.f32 %v11548_v13, %v8781_v18 }
 0x37b   :  { %v8830_v44 = vmax.f32 %v1864_v51, %v8776_v10  ;;  %5472 = vrcp.f32 %v5038_v14  ;;  %v5062_v58 = vadd.f32 1e-08, %v8806_v63  ;;  %v1871_v0 = vsub.f32 %v11546_v20, %v8781_v18 }
 0x37c   :  { %v1873_v8 = vsub.f32 %v11556_v40, %v8781_v18  ;;  %5474 = vrcp.f32 %v5040_v22  ;;  %v5064_v26 = vadd.f32 1e-08, %v8808_v32  ;;  %v1875_v3 = vsub.f32 %v11540_v24, %v8788_v39  ;;  %v11600_v24 = vld [vmem:[#allocation59_spill] sm:$0xff] }
 0x37d   :  { %v1877_v51 = vsub.f32 %v11539_v6, %v8788_v39  ;;  %5476 = vrcp.f32 %v5042_v42  ;;  %v5066_v14 = vadd.f32 1e-08, %v8812_v37  ;;  %v1879_v13 = vsub.f32 %v11550_v17, %v8788_v39 }
 0x37e   :  { %v1881_v20 = vsub.f32 %v11561_v46, %v8788_v39  ;;  %5478 = vrcp.f32 %v5044_v47  ;;  %v5068_v18 = vadd.f32 1e-08, %v8814_v49  ;;  %v1883_v22 = vsub.f32 %v11545_v30, %v8791_v21  ;;  %v11599_v30 = vld [vmem:[#allocation55_spill] sm:$0xff] }
 0x37f   :  { %v1885_v40 = vsub.f32 %v11544_v41, %v8791_v21  ;;  %5480 = vrsqrt.f32 %v5062_v58  ;;  %v1887_v42 = vsub.f32 %v11557_v55, %v8791_v21  ;;  %v1889_v6 = vsub.f32 %v11562_v62, %v8791_v21 }
 0x380   :  { %v1891_v17 = vsub.f32 %v11555_v19, %v8794_v48  ;;  %5482 = vrsqrt.f32 %v5064_v26  ;;  %v1893_v39 = vsub.f32 %v11554_v2, %v8794_v48  ;;  %v1932_v47 = vmul.f32 1.442695, %v1867_v33 }
 0x381   :  { %v1936_v46 = vmul.f32 1.442695, %v1869_v5  ;;  %5484 = vrsqrt.f32 %v5066_v14  ;;  %v1895_v41 = vsub.f32 %v11558_v23, %v8794_v48  ;;  %v1897_v58 = vsub.f32 %v11563_v16, %v8794_v48 }
 0x382   :  { %v1940_v55 = vmul.f32 1.442695, %v1871_v0  ;;  %5486 = vrsqrt.f32 %v5068_v18  ;;  %v1899_v21 = vsub.f32 %v11560_v25, %v8802_v56  ;;  %v1901_v26 = vsub.f32 %v11559_v53, %v8802_v56  ;;  %v11597_v53 = vld [vmem:[#allocation47_spill] sm:$0xff] }
 0x383   :  { %v1944_v62 = vmul.f32 1.442695, %v1873_v8  ;;  %v1903_v33 = vsub.f32 %v11564_v11, %v8802_v56  ;;  %v1905_v5 = vsub.f32 %v11569_v28, %v8802_v56  ;;  %5488 = vpow2.f32 %v1932_v47 }
 0x384   :  { %v1948_v14 = vmul.f32 1.442695, %v1875_v3  ;;  %5490 = vpow2.f32 %v1936_v46  ;;  %v1952_v18 = vmul.f32 1.442695, %v1877_v51  ;;  %v1956_v11 = vmul.f32 1.442695, %v1879_v13 }
 0x385   :  { %5492 = vpow2.f32 %v1940_v55  ;;  %v1960_v47 = vmul.f32 1.442695, %v1881_v20  ;;  %v1964_v16 = vmul.f32 1.442695, %v1883_v22  ;;  %v1968_v56 = vmul.f32 1.442695, %v1885_v40 }
 0x386   :  { %5494 = vpow2.f32 %v1944_v62  ;;  %v1972_v46 = vmul.f32 1.442695, %v1887_v42  ;;  %v1976_v13 = vmul.f32 1.442695, %v1889_v6  ;;  %v1980_v40 = vmul.f32 1.442695, %v1891_v17 }
 0x387   :  { %5496 = vpow2.f32 %v1948_v14  ;;  %v1984_v55 = vmul.f32 1.442695, %v1893_v39  ;;  %v1992_v42 = vmul.f32 1.442695, %v1897_v58  ;;  %v2004_v6 = vmul.f32 1.442695, %v1903_v33 }
 0x388   :  { %v5473_v0 = vpop.eup %5472  ;;  %5498 = vpow2.f32 %v1952_v18  ;;  %v2008_v28 = vmul.f32 1.442695, %v1905_v5 }
 0x389   :  { %v5475_v3 = vpop.eup %5474  ;;  %v5054_v20 = vmul.f32 %v5473_v0, %v8806_v63  ;;  %5500 = vpow2.f32 %v1956_v11  ;;  %v1988_v11 = vmul.f32 1.442695, %v1895_v41 }
 0x38a   :  { %v5477_v51 = vpop.eup %5476  ;;  %v5056_v22 = vmul.f32 %v5475_v3, %v8808_v32  ;;  %5502 = vpow2.f32 %v1960_v47  ;;  %v1996_v32 = vmul.f32 1.442695, %v1899_v21  ;;  %v2000_v3 = vmul.f32 1.442695, %v1901_v26 }
 0x38b   :  { %v5479_v8 = vpop.eup %5478  ;;  %v5058_v18 = vmul.f32 %v5477_v51, %v8812_v37  ;;  %5504 = vpow2.f32 %v1964_v16 }
 0x38c   :  { %v5481_v63 = vpop.eup %5480  ;;  %v5060_v0 = vmul.f32 %v5479_v8, %v8814_v49  ;;  %5506 = vpow2.f32 %v1968_v56 }
 0x38d   :  { %v5483_v62 = vpop.eup %5482  ;;  %v5078_v48 = vmul.f32 %v5481_v63, %v5054_v20  ;;  %5508 = vpow2.f32 %v1972_v46  ;;  %v11576_v46 = vsub.f32 %v11570_v45, %v8822_v35 }
 0x38e   :  { %v5485_v14 = vpop.eup %5484  ;;  %v5080_v47 = vmul.f32 %v5483_v62, %v5056_v22  ;;  %5510 = vpow2.f32 %v1976_v13  ;;  %v11577_v13 = vsub.f32 %v11572_v34, %v8822_v35 }
 0x38f   :  { %v5487_v37 = vpop.eup %5486  ;;  %v5082_v16 = vmul.f32 %v5485_v14, %v5058_v18  ;;  %v5086_v17 = vmul.f32 %v5078_v48, %v8713_v1  ;;  %v5088_v39 = vmul.f32 %v5078_v48, %v8716_v57  ;;  %5512 = vpow2.f32 %v1980_v40 }
 0x390   :  { %v8904_v49 = vpop.eup %5488  ;;  %v5084_v41 = vmul.f32 %v5487_v37, %v5060_v0  ;;  %v5090_v58 = vmul.f32 %v5080_v47, %v8719_v60  ;;  %v5092_v21 = vmul.f32 %v5080_v47, %v8722_v31  ;;  %5514 = vpow2.f32 %v1984_v55 }
 0x391   :  { %v8908_v26 = vpop.eup %5490  ;;  %v5094_v33 = vmul.f32 %v5082_v16, %v8725_v7  ;;  %v5096_v5 = vmul.f32 %v5082_v16, %v8728_v43  ;;  %5102 = vst [vmem:[#allocation2] sm:$0xff] %v5086_v17  ;;  %5104 = vst [vmem:[#allocation2 + $0x10] sm:$0xff] %v5088_v39  ;;  %5516 = vpow2.f32 %v1988_v11  ;;  %v11574_v1 = vsub.f32 %v11566_v61, %v8822_v35 }
 0x392   :  { %v8915_v48 = vpop.eup %5492  ;;  %v5098_v60 = vmul.f32 %v5084_v41, %v8731_v27  ;;  %v5100_v31 = vmul.f32 %v5084_v41, %v8734_v50  ;;  %5106 = vst [vmem:[#allocation2 + $0x20] sm:$0xff] %v5090_v58  ;;  %5108 = vst [vmem:[#allocation2 + $0x30] sm:$0xff] %v5092_v21  ;;  %5518 = vpow2.f32 %v1992_v42  ;;  %v2131_v7 = vrot.slane %v8908_v26, 7 }
 0x393   :  { %v2012_v57 = vmul.f32 1.442695, %v11574_v1  ;;  %v8920_v8 = vpop.eup %5494  ;;  %5110 = vst [vmem:[#allocation2 + $0x40] sm:$0xff] %v5094_v33  ;;  %5112 = vst [vmem:[#allocation2 + $0x50] sm:$0xff] %v5096_v5  ;;  %5520 = vpow2.f32 %v1996_v32  ;;  %v11575_v43 = vsub.f32 %v11565_v59, %v8822_v35  ;;  %v2020_v27 = vmul.f32 1.442695, %v11576_v46 }
 0x394   :  { %v2133_v50 = vrot.slane %v8915_v48, 6  ;;  %v8929_v51 = vpop.eup %5496  ;;  %5114 = vst [vmem:[#allocation2 + $0x60] sm:$0xff] %v5098_v60  ;;  %5116 = vst [vmem:[#allocation2 + $0x70] sm:$0xff] %v5100_v31  ;;  %5522 = vpow2.f32 %v2000_v3  ;;  %v2024_v55 = vmul.f32 1.442695, %v11577_v13  ;;  %v2132_v20 = vsel %vm2123_vm1, %v2131_v7, %v8904_v49 }
 0x395   :  { %v2016_v56 = vmul.f32 1.442695, %v11575_v43  ;;  %v2135_v62 = vrot.slane %v8920_v8, 5  ;;  %v8937_v22 = vpop.eup %5498  ;;  %5524 = vpow2.f32 %v2004_v6  ;;  %v11578_v14 = vsub.f32 %v11568_v12, %v8825_v15 }
 0x396   :  { %v11579_v40 = vsub.f32 %v11567_v4, %v8825_v15  ;;  %v2134_v0 = vsel %vm2126_vm2, %v2133_v50, %v2132_v20  ;;  %v8946_v35 = vpop.eup %5500  ;;  %5526 = vpow2.f32 %v2008_v28  ;;  %v11580_v11 = vsub.f32 %v11571_v36, %v8825_v15 }
 0x397   :  { %v2028_v18 = vmul.f32 1.442695, %v11578_v14  ;;  %v2136_v32 = vsel %vm2129_vm3, %v2135_v62, %v2134_v0  ;;  %v2143_v3 = vrot.slane %v8937_v22, 7  ;;  %v8953_v47 = vpop.eup %5502  ;;  %5528 = vpow2.f32 %v2012_v57 }
 0x398   :  { %v2032_v63 = vmul.f32 1.442695, %v11579_v40  ;;  %v2036_v42 = vmul.f32 1.442695, %v11580_v11  ;;  %v11581_v6 = vsub.f32 %v11573_v52, %v8825_v15  ;;  %v2145_v16 = vrot.slane %v8946_v35, 6  ;;  %v8960_v28 = vpop.eup %5504 }
 0x399   :  { %v2245_v17 = vsel %vm2237_vm4, %v2136_v32, 0.0  ;;  %5530 = vpow2.f32 %v2016_v56  ;;  %v2144_v39 = vsel %vm2123_vm1, %v2143_v3, %v8929_v51  ;;  %v2147_v41 = vrot.slane %v8953_v47, 5  ;;  %v8965_v21 = vpop.eup %5506 }
 0x39a   :  { %v2040_v37 = vmul.f32 1.442695, %v11581_v6  ;;  %v2246_v58 = vrot.slane %v2245_v17, 4  ;;  %5532 = vpow2.f32 %v2020_v27  ;;  %v11582_v15 = vsub.f32 %v8760_v38, %v8830_v44  ;;  %v8974_v60 = vpop.eup %5508 }
 0x39b   :  { %v11583_v5 = vsub.f32 %v8770_v54, %v8830_v44  ;;  %v2146_v57 = vsel %vm2126_vm2, %v2145_v16, %v2144_v39  ;;  %5534 = vpow2.f32 %v2024_v55  ;;  %v2155_v7 = vrot.slane %v8965_v21, 7  ;;  %v8978_v56 = vpop.eup %5510 }
 0x39c   :  { %v2044_v33 = vmul.f32 1.442695, %v11582_v15  ;;  %v2148_v31 = vsel %vm2129_vm3, %v2147_v41, %v2146_v57  ;;  %v2247_v43 = vadd.f32 %v2246_v58, %v2245_v17  ;;  %5536 = vpow2.f32 %v2028_v18  ;;  %v8985_v20 = vpop.eup %5512 }
 0x39d   :  { %v2048_v1 = vmul.f32 1.442695, %v11583_v5  ;;  %v11584_v46 = vsub.f32 %v8773_v29, %v8830_v44  ;;  %v2157_v50 = vrot.slane %v8974_v60, 6  ;;  %v2259_v13 = vsel %vm2237_vm4, %v2148_v31, 0.0  ;;  %v8990_v40 = vpop.eup %5514 }
 0x39e   :  { %5538 = vpow2.f32 %v2032_v63  ;;  %v2156_v55 = vsel %vm2123_vm1, %v2155_v7, %v8960_v28  ;;  %v2159_v62 = vrot.slane %v8978_v56, 5  ;;  %v2248_v14 = vrot.slane %v2247_v43, 2  ;;  %v8996_v3 = vpop.eup %5516 }
 0x39f   :  { %v2052_v27 = vmul.f32 1.442695, %v11584_v46  ;;  %5540 = vpow2.f32 %v2036_v42  ;;  %v11585_v18 = vsub.f32 %v8776_v10, %v8830_v44  ;;  %v2158_v11 = vsel %vm2126_vm2, %v2157_v50, %v2156_v55  ;;  %v9000_v17 = vpop.eup %5518 }
 0x3a0   :  { %v2260_v32 = vrot.slane %v2259_v13, 4  ;;  %5542 = vpow2.f32 %v2040_v37  ;;  %v2160_v63 = vsel %vm2129_vm3, %v2159_v62, %v2158_v11  ;;  %v2167_v6 = vrot.slane %v8990_v40, 7  ;;  %v9004_v41 = vpop.eup %5520 }
 0x3a1   :  { %v2056_v0 = vmul.f32 1.442695, %v11585_v18  ;;  %v2249_v16 = vadd.f32 %v2248_v14, %v2247_v43  ;;  %5544 = vpow2.f32 %v2044_v33  ;;  %v2169_v42 = vrot.slane %v8996_v3, 6  ;;  %v9009_v5 = vpop.eup %5522 }
 0x3a2   :  { %v2261_v39 = vadd.f32 %v2260_v32, %v2259_v13  ;;  %v2273_v44 = vsel %vm2237_vm4, %v2160_v63, 0.0  ;;  %5546 = vpow2.f32 %v2048_v1  ;;  %v2168_v58 = vsel %vm2123_vm1, %v2167_v6, %v8985_v20  ;;  %v9012_v7 = vpop.eup %5524  ;;  %v11586_v32 = vld [vmem:[#allocation201_spill] sm:$0xff] }
 0x3a3   :  { %v2171_v37 = vrot.slane %v9000_v17, 5  ;;  %v2250_v15 = vrot.slane %v2249_v16, 1  ;;  %5548 = vpow2.f32 %v2052_v27  ;;  %v2170_v57 = vsel %vm2126_vm2, %v2169_v42, %v2168_v58  ;;  %v9016_v50 = vpop.eup %5526 }
 0x3a4   :  { %v2262_v33 = vrot.slane %v2261_v39, 2  ;;  %v2274_v31 = vrot.slane %v2273_v44, 4  ;;  %5550 = vpow2.f32 %v2056_v0  ;;  %v2179_v1 = vrot.slane %v9009_v5, 7  ;;  %v9020_v14 = vpop.eup %5528 }
 0x3a5   :  { %v2172_v43 = vsel %vm2129_vm3, %v2171_v37, %v2170_v57  ;;  %v2251_v46 = vadd.f32 %v2250_v15, %v2249_v16  ;;  %v2181_v13 = vrot.slane %v9012_v7, 6  ;;  %v2183_v0 = vrot.slane %v9016_v50, 5 }
 0x3a6   :  { %v2263_v55 = vadd.f32 %v2262_v33, %v2261_v39  ;;  %v2275_v62 = vadd.f32 %v2274_v31, %v2273_v44  ;;  %v2287_v27 = vsel %vm2237_vm4, %v2172_v43, 0.0  ;;  %v2180_v18 = vsel %vm2123_vm1, %v2179_v1, %v9004_v41  ;;  %v9026_v6 = vpop.eup %5530 }
 0x3a7   :  { %v2288_v11 = vrot.slane %v2287_v27, 4  ;;  %v2357_v63 = vrot.slane %v2251_v46, %v11586_v32  ;;  %v2182_v16 = vsel %vm2126_vm2, %v2181_v13, %v2180_v18  ;;  %v9029_v39 = vpop.eup %5532  ;;  %v2191_v37 = vrot.slane %v9026_v6, 7 }
 0x3a8   :  { %v2264_v42 = vrot.slane %v2263_v55, 1  ;;  %v2276_v58 = vrot.slane %v2275_v62, 2  ;;  %v2184_v44 = vsel %vm2129_vm3, %v2183_v0, %v2182_v16  ;;  %v9033_v57 = vpop.eup %5534  ;;  %v2193_v33 = vrot.slane %v9029_v39, 6 }
 0x3a9   :  { %v2289_v15 = vadd.f32 %v2288_v11, %v2287_v27  ;;  %5552 = vrcp.f32 %v2357_v63  ;;  %v2301_v1 = vsel %vm2237_vm4, %v2184_v44, 0.0  ;;  %v9037_v46 = vpop.eup %5536  ;;  %v2192_v13 = vsel %vm2123_vm1, %v2191_v37, %v9020_v14 }
 0x3aa   :  { %v2265_v31 = vadd.f32 %v2264_v42, %v2263_v55  ;;  %v2277_v43 = vadd.f32 %v2276_v58, %v2275_v62  ;;  %v2195_v18 = vrot.slane %v9033_v57, 5  ;;  %v2302_v16 = vrot.slane %v2301_v1, 4 }
 0x3ab   :  { %v2290_v0 = vrot.slane %v2289_v15, 2  ;;  %v9042_v10 = vpop.eup %5538  ;;  %v2194_v27 = vsel %vm2126_vm2, %v2193_v33, %v2192_v13 }
 0x3ac   :  { %v2278_v11 = vrot.slane %v2277_v43, 1  ;;  %v2365_v63 = vrot.slane %v2265_v31, %v11586_v32  ;;  %v9046_v55 = vpop.eup %5540  ;;  %v2196_v62 = vsel %vm2129_vm3, %v2195_v18, %v2194_v27  ;;  %v2203_v42 = vrot.slane %v9042_v10, 7 }
 0x3ad   :  { %v2291_v58 = vadd.f32 %v2290_v0, %v2289_v15  ;;  %v2303_v44 = vadd.f32 %v2302_v16, %v2301_v1  ;;  %v9050_v37 = vpop.eup %5542  ;;  %v2205_v29 = vrot.slane %v9046_v55, 6  ;;  %v2315_v36 = vsel %vm2237_vm4, %v2196_v62, 0.0 }
 0x3ae   :  { %v2279_v52 = vadd.f32 %v2278_v11, %v2277_v43  ;;  %5554 = vrcp.f32 %v2365_v63  ;;  %v9054_v33 = vpop.eup %5544  ;;  %v2204_v31 = vsel %vm2123_vm1, %v2203_v42, %v9037_v46  ;;  %v2207_v13 = vrot.slane %v9050_v37, 5 }
 0x3af   :  { %v2292_v18 = vrot.slane %v2291_v58, 1  ;;  %v2304_v27 = vrot.slane %v2303_v44, 2  ;;  %v9059_v54 = vpop.eup %5546  ;;  %v2206_v15 = vsel %vm2126_vm2, %v2205_v29, %v2204_v31  ;;  %v2316_v1 = vrot.slane %v2315_v36, 4 }
 0x3b0   :  { %v2373_v0 = vrot.slane %v2279_v52, %v11586_v32  ;;  %v9063_v43 = vpop.eup %5548  ;;  %v2208_v16 = vsel %vm2129_vm3, %v2207_v13, %v2206_v15  ;;  %v2215_v11 = vrot.slane %v9059_v54, 7 }
 0x3b1   :  { %v2293_v63 = vadd.f32 %v2292_v18, %v2291_v58  ;;  %v2305_v62 = vadd.f32 %v2304_v27, %v2303_v44  ;;  %v9067_v42 = vpop.eup %5550  ;;  %v2217_v38 = vrot.slane %v9063_v43, 6  ;;  %v2317_v34 = vadd.f32 %v2316_v1, %v2315_v36 }
 0x3b2   :  { %v2329_v45 = vsel %vm2237_vm4, %v2208_v16, 0.0  ;;  %5556 = vrcp.f32 %v2373_v0  ;;  %v2216_v29 = vsel %vm2123_vm1, %v2215_v11, %v9054_v33  ;;  %v2219_v52 = vrot.slane %v9067_v42, 5 }
 0x3b3   :  { %v2306_v31 = vrot.slane %v2305_v62, 1  ;;  %v2330_v4 = vrot.slane %v2329_v45, 4  ;;  %v2218_v13 = vsel %vm2126_vm2, %v2217_v38, %v2216_v29  ;;  %v2318_v15 = vrot.slane %v2317_v34, 2 }
 0x3b4   :  { %v2381_v58 = vrot.slane %v2293_v63, %v11586_v32  ;;  %v2220_v44 = vsel %vm2129_vm3, %v2219_v52, %v2218_v13 }
 0x3b5   :  { %v2307_v18 = vadd.f32 %v2306_v31, %v2305_v62  ;;  %v2331_v27 = vadd.f32 %v2330_v4, %v2329_v45  ;;  %v2319_v1 = vadd.f32 %v2318_v15, %v2317_v34  ;;  %v2343_v0 = vsel %vm2237_vm4, %v2220_v44, 0.0 }
 0x3b6   :  { %v5553_v36 = vpop.eup %5552  ;;  %5558 = vrcp.f32 %v2381_v58  ;;  %v2344_v11 = vrot.slane %v2343_v0, 4 }
 0x3b7   :  { %v2332_v16 = vrot.slane %v2331_v27, 2  ;;  %v2389_v12 = vrot.slane %v2307_v18, %v11586_v32  ;;  %v2417_v59 = vmul.f32 %v5553_v36, %v8904_v49  ;;  %v2320_v61 = vrot.slane %v2319_v1, 1 }
 0x3b8   :  { %v2419_v38 = vmul.f32 %v5553_v36, %v8908_v26  ;;  %v2421_v63 = vmul.f32 %v5553_v36, %v8915_v48  ;;  %v2423_v29 = vmul.f32 %v5553_v36, %v8920_v8  ;;  %v2345_v4 = vadd.f32 %v2344_v11, %v2343_v0  ;;  %v11587_v26 = vld [vmem:[#allocation7_spill] sm:$0xff] }
 0x3b9   :  { %v2333_v62 = vadd.f32 %v2332_v16, %v2331_v27  ;;  %5560 = vrcp.f32 %v2389_v12  ;;  %v2501_v45 = vrot.slane %v2417_v59, %v11586_v32  ;;  %v2321_v34 = vadd.f32 %v2320_v61, %v2319_v1  ;;  %v11588_v48 = vld [vmem:[#allocation11_spill] sm:$0xff] }
 0x3ba   :  { %v2509_v52 = vrot.slane %v2419_v38, %v11586_v32  ;;  %v2517_v31 = vrot.slane %v2421_v63, %v11586_v32  ;;  %v2525_v13 = vrot.slane %v2423_v29, %v11586_v32  ;;  %v2346_v58 = vrot.slane %v2345_v4, 2  ;;  %v11589_v0 = vld [vmem:[#allocation15_spill] sm:$0xff] }
 0x3bb   :  { %v5555_v49 = vpop.eup %5554  ;;  %v2334_v15 = vrot.slane %v2333_v62, 1  ;;  %v9088_v44 = vmul.f32 %v2501_v45, %v11587_v26  ;;  %v9091_v8 = vmul.f32 %v2501_v45, %v11588_v48  ;;  %v2397_v12 = vrot.slane %v2321_v34, %v11586_v32  ;;  %v11639_v26 = vld [vmem:[#allocation24_spill] sm:$0xff] }
 0x3bc   :  { %v2427_v59 = vmul.f32 %v5555_v49, %v8929_v51  ;;  %v2429_v61 = vmul.f32 %v5555_v49, %v8937_v22  ;;  %v2431_v18 = vmul.f32 %v5555_v49, %v8946_v35  ;;  %v2347_v36 = vadd.f32 %v2346_v58, %v2345_v4  ;;  %v11591_v58 = vld [vmem:[#allocation23_spill] sm:$0xff] }
 0x3bd   :  { %v2335_v27 = vadd.f32 %v2334_v15, %v2333_v62  ;;  %v2433_v1 = vmul.f32 %v5555_v49, %v8953_v47  ;;  %v9099_v16 = vmul.f32 %v2509_v52, %v11589_v0  ;;  %5562 = vrcp.f32 %v2397_v12  ;;  %v11590_v62 = vld [vmem:[#allocation19_spill] sm:$0xff] }
 0x3be   :  { %v2533_v11 = vrot.slane %v2427_v59, %v11586_v32  ;;  %v2541_v38 = vrot.slane %v2429_v61, %v11586_v32  ;;  %v2549_v63 = vrot.slane %v2431_v18, %v11586_v32  ;;  %v2348_v51 = vrot.slane %v2347_v36, 1  ;;  %v11592_v59 = vld [vmem:[#allocation27_spill] sm:$0xff] }
 0x3bf   :  { %v5557_v29 = vpop.eup %5556  ;;  %v2405_v22 = vrot.slane %v2335_v27, %v11586_v32  ;;  %v2557_v35 = vrot.slane %v2433_v1, %v11586_v32  ;;  %v9107_v4 = vmul.f32 %v2509_v52, %v11590_v62  ;;  %v9114_v12 = vmul.f32 %v2517_v31, %v11591_v58  ;;  %v11594_v1 = vld [vmem:[#allocation35_spill] sm:$0xff]  ;;  %v11621_v58 = vld [vmem:[#allocation118_spill] sm:$0xff] }
 0x3c0   :  { %v2437_v47 = vmul.f32 %v5557_v29, %v8960_v28  ;;  %v2439_v45 = vmul.f32 %v5557_v29, %v8965_v21  ;;  %v2441_v34 = vmul.f32 %v5557_v29, %v8974_v60  ;;  %v2443_v49 = vmul.f32 %v5557_v29, %v8978_v56  ;;  %v11593_v56 = vld [vmem:[#allocation31_spill] sm:$0xff] }
 0x3c1   :  { %v2349_v15 = vadd.f32 %v2348_v51, %v2347_v36  ;;  %5564 = vrcp.f32 %v2405_v22  ;;  %v9117_v61 = vmul.f32 %v2517_v31, %v11592_v59  ;;  %v9125_v36 = vmul.f32 %v2525_v13, %v11593_v56  ;;  %v11595_v51 = vld [vmem:[#allocation39_spill] sm:$0xff]  ;;  %v11617_v59 = vld [vmem:[#allocation110_spill] sm:$0xff] }
 0x3c2   :  { %v2565_v18 = vrot.slane %v2437_v47, %v11586_v32  ;;  %v2573_v52 = vrot.slane %v2439_v45, %v11586_v32  ;;  %v2581_v28 = vrot.slane %v2441_v34, %v11586_v32  ;;  %v2589_v21 = vrot.slane %v2443_v49, %v11586_v32  ;;  %v11596_v49 = vld [vmem:[#allocation43_spill] sm:$0xff] }
 0x3c3   :  { %v5559_v27 = vpop.eup %5558  ;;  %v2413_v60 = vrot.slane %v2349_v15, %v11586_v32  ;;  %v9128_v29 = vmul.f32 %v2525_v13, %v11594_v1  ;;  %v9131_v31 = vmul.f32 %v2533_v11, %v11595_v51  ;;  %v9138_v15 = vmul.f32 %v2533_v11, %v11596_v49  ;;  %v11598_v13 = vld [vmem:[#allocation51_spill] sm:$0xff] }
 0x3c4   :  { %v2447_v22 = vmul.f32 %v5559_v27, %v8985_v20  ;;  %v2449_v47 = vmul.f32 %v5559_v27, %v8990_v40  ;;  %v2451_v45 = vmul.f32 %v5559_v27, %v8996_v3  ;;  %v2453_v34 = vmul.f32 %v5559_v27, %v9000_v17  ;;  %v11606_v49 = vld [vmem:[#allocation83_spill] sm:$0xff] }
 0x3c5   :  { %5566 = vrcp.f32 %v2413_v60  ;;  %v9141_v25 = vmul.f32 %v2541_v38, %v11597_v53  ;;  %v9144_v23 = vmul.f32 %v2541_v38, %v11598_v13  ;;  %v9155_v38 = vmul.f32 %v2549_v63, %v11599_v30  ;;  %v11604_v30 = vld [vmem:[#allocation75_spill] sm:$0xff] }
 0x3c6   :  { %v5561_v2 = vpop.eup %5560  ;;  %v2597_v19 = vrot.slane %v2447_v22, %v11586_v32  ;;  %v2605_v20 = vrot.slane %v2449_v47, %v11586_v32  ;;  %v2613_v40 = vrot.slane %v2451_v45, %v11586_v32  ;;  %v2621_v3 = vrot.slane %v2453_v34, %v11586_v32  ;;  %v11601_v22 = vld [vmem:[#allocation63_spill] sm:$0xff] }
 0x3c7   :  { %v2457_v17 = vmul.f32 %v5561_v2, %v9004_v41  ;;  %v2459_v11 = vmul.f32 %v5561_v2, %v9009_v5  ;;  %v2461_v27 = vmul.f32 %v5561_v2, %v9012_v7  ;;  %v2463_v60 = vmul.f32 %v5561_v2, %v9016_v50  ;;  %v11602_v45 = vld [vmem:[#allocation67_spill] sm:$0xff] }
 0x3c8   :  { %v9158_v13 = vmul.f32 %v2549_v63, %v11600_v24  ;;  %v9161_v47 = vmul.f32 %v2557_v35, %v11601_v22  ;;  %v9164_v53 = vmul.f32 %v2557_v35, %v11602_v45  ;;  %v11603_v50 = vld [vmem:[#allocation71_spill] sm:$0xff]  ;;  %v9174_v63 = vmul.f32 %v2565_v18, %v11604_v30  ;;  %v11615_v30 = vld [vmem:[#allocation106_spill] sm:$0xff] }
 0x3c9   :  { %v2629_v41 = vrot.slane %v2457_v17, %v11586_v32  ;;  %v2637_v5 = vrot.slane %v2459_v11, %v11586_v32  ;;  %v2645_v7 = vrot.slane %v2461_v27, %v11586_v32  ;;  %v2653_v2 = vrot.slane %v2463_v60, %v11586_v32  ;;  %v11605_v24 = vld [vmem:[#allocation79_spill] sm:$0xff]  ;;  %v11609_v11 = vld [vmem:[#allocation92_spill] sm:$0xff]  ;;  %v11611_v60 = vld [vmem:[#allocation98_spill] sm:$0xff] }
 0x3ca   :  { %v9171_v34 = vmul.f32 %v2565_v18, %v11603_v50  ;;  %v9177_v22 = vmul.f32 %v2573_v52, %v11605_v24  ;;  %v9180_v35 = vmul.f32 %v2573_v52, %v11606_v49  ;;  %v5563_v45 = vpop.eup %5562  ;;  %v11607_v17 = vld [vmem:[#allocation87_spill] sm:$0xff]  ;;  %v9186_v27 = vmul.f32 %v2581_v28, %v11609_v11  ;;  %v11613_v50 = vld [vmem:[#allocation102_spill] sm:$0xff] }
 0x3cb   :  { %v9183_v51 = vmul.f32 %v2581_v28, %v11607_v17  ;;  %v9189_v1 = vmul.f32 %v2589_v21, %v11611_v60  ;;  %v9192_v56 = vmul.f32 %v2589_v21, %v11613_v50  ;;  %v2467_v18 = vmul.f32 %v5563_v45, %v9020_v14  ;;  %v11619_v11 = vld [vmem:[#allocation115_spill] sm:$0xff] }
 0x3cc   :  { %11610 = vst [vmem:[#allocation178_spill] sm:$0xff] %v9186_v27  ;;  %v2469_v24 = vmul.f32 %v5563_v45, %v9026_v6  ;;  %v2471_v52 = vmul.f32 %v5563_v45, %v9029_v39  ;;  %v2473_v49 = vmul.f32 %v5563_v45, %v9033_v57  ;;  %v9199_v17 = vmul.f32 %v2597_v19, %v11615_v30  ;;  %v11623_v30 = vld [vmem:[#allocation91_spill] sm:$0xff]  ;;  %v11664_v27 = vld [vmem:[#allocation128_spill] sm:$0xff] }
 0x3cd   :  { %11608 = vst [vmem:[#allocation177_spill] sm:$0xff] %v9183_v51  ;;  %11612 = vst [vmem:[#allocation179_spill] sm:$0xff] %v9189_v1  ;;  %v9202_v28 = vmul.f32 %v2597_v19, %v11617_v59  ;;  %v9205_v60 = vmul.f32 %v2605_v20, %v11619_v11  ;;  %v9208_v21 = vmul.f32 %v2605_v20, %v11621_v58  ;;  %v11625_v58 = vld [vmem:[#allocation125_spill] sm:$0xff]  ;;  %v11662_v1 = vld [vmem:[#allocation123_spill] sm:$0xff] }
 0x3ce   :  { %11614 = vst [vmem:[#allocation180_spill] sm:$0xff] %v9192_v56  ;;  %11616 = vst [vmem:[#allocation184_spill] sm:$0xff] %v9199_v17  ;;  %v5565_v50 = vpop.eup %5564  ;;  %v2661_v14 = vrot.slane %v2467_v18, %v11586_v32  ;;  %v2669_v6 = vrot.slane %v2469_v24, %v11586_v32  ;;  %v2677_v39 = vrot.slane %v2471_v52, %v11586_v32  ;;  %v11627_v18 = vld [vmem:[#allocation133_spill] sm:$0xff]  ;;  %v11658_v17 = vld [vmem:[#allocation103_spill] sm:$0xff] }
 0x3cf   :  { %11618 = vst [vmem:[#allocation165_spill] sm:$0xff] %v9202_v28  ;;  %11620 = vst [vmem:[#allocation185_spill] sm:$0xff] %v9205_v60  ;;  %v2685_v57 = vrot.slane %v2473_v49, %v11586_v32  ;;  %v2477_v45 = vmul.f32 %v5565_v50, %v9037_v46  ;;  %v2479_v19 = vmul.f32 %v5565_v50, %v9042_v10  ;;  %v11629_v52 = vld [vmem:[#allocation141_spill] sm:$0xff]  ;;  %v11654_v60 = vld [vmem:[#allocation84_spill] sm:$0xff] }
 0x3d0   :  { %11622 = vst [vmem:[#allocation187_spill] sm:$0xff] %v9208_v21  ;;  %v2481_v59 = vmul.f32 %v5565_v50, %v9046_v55  ;;  %v2483_v11 = vmul.f32 %v5565_v50, %v9050_v37  ;;  %v9219_v20 = vmul.f32 %v2613_v40, %v11623_v30  ;;  %v9222_v62 = vmul.f32 %v2613_v40, %v11625_v58  ;;  %v11631_v50 = vld [vmem:[#allocation8_spill] sm:$0xff]  ;;  %v11656_v28 = vld [vmem:[#allocation93_spill] sm:$0xff]  ;;  %v11660_v56 = vld [vmem:[#allocation111_spill] sm:$0xff] }
 0x3d1   :  { %v9225_v24 = vmul.f32 %v2621_v3, %v11627_v18  ;;  %v9228_v0 = vmul.f32 %v2621_v3, %v11629_v52  ;;  %v2693_v46 = vrot.slane %v2477_v45, %v11586_v32  ;;  %v2701_v10 = vrot.slane %v2479_v19, %v11586_v32  ;;  %v11633_v40 = vld [vmem:[#allocation12_spill] sm:$0xff]  ;;  %v11666_v51 = vld [vmem:[#allocation182_spill] sm:$0xff] }
 0x3d2   :  { %11624 = vst [vmem:[#allocation186_spill] sm:$0xff] %v9219_v20  ;;  %11626 = vst [vmem:[#allocation189_spill] sm:$0xff] %v9222_v62  ;;  %v2709_v55 = vrot.slane %v2481_v59, %v11586_v32  ;;  %v2717_v37 = vrot.slane %v2483_v11, %v11586_v32  ;;  %v5567_v49 = vpop.eup %5566  ;;  %v9235_v30 = vmul.f32 %v2629_v41, %v11631_v50  ;;  %v11635_v18 = vld [vmem:[#allocation16_spill] sm:$0xff] }
 0x3d3   :  { %11628 = vst [vmem:[#allocation192_spill] sm:$0xff] %v9225_v24  ;;  %11630 = vst [vmem:[#allocation193_spill] sm:$0xff] %v9228_v0  ;;  %v9238_v58 = vmul.f32 %v2629_v41, %v11633_v40  ;;  %v9241_v48 = vmul.f32 %v2637_v5, %v11635_v18  ;;  %v11637_v3 = vld [vmem:[#allocation20_spill] sm:$0xff]  ;;  %v2487_v45 = vmul.f32 %v5567_v49, %v9054_v33 }
 0x3d4   :  { %11632 = vst [vmem:[#allocation190_spill] sm:$0xff] %v9235_v30  ;;  %v9244_v52 = vmul.f32 %v2637_v5, %v11637_v3  ;;  %v2489_v19 = vmul.f32 %v5567_v49, %v9059_v54  ;;  %v2491_v59 = vmul.f32 %v5567_v49, %v9063_v43  ;;  %v2493_v11 = vmul.f32 %v5567_v49, %v9067_v42  ;;  %v11641_v41 = vld [vmem:[#allocation32_spill] sm:$0xff] }
 0x3d5   :  { %11634 = vst [vmem:[#allocation172_spill] sm:$0xff] %v9238_v58  ;;  %11636 = vst [vmem:[#allocation191_spill] sm:$0xff] %v9241_v48  ;;  %v2823_v50 = vmul.f32 %v2645_v7, %v11639_v26  ;;  %v2825_v30 = vmul.f32 %v2645_v7, %v11640_v9  ;;  %v2827_v40 = vmul.f32 %v2653_v2, %v11641_v41  ;;  %v11642_v58 = vld [vmem:[#allocation36_spill] sm:$0xff] }
 0x3d6   :  { %11638 = vst [vmem:[#allocation227_spill] sm:$0xff] %v9244_v52  ;;  %v2829_v18 = vmul.f32 %v2653_v2, %v11642_v58  ;;  %v2725_v48 = vrot.slane %v2487_v45, %v11586_v32  ;;  %v2733_v5 = vrot.slane %v2489_v19, %v11586_v32  ;;  %v2741_v33 = vrot.slane %v2491_v59, %v11586_v32  ;;  %v11643_v3 = vld [vmem:[#allocation40_spill] sm:$0xff] }
 0x3d7   :  { %v2749_v54 = vrot.slane %v2493_v11, %v11586_v32  ;;  %v2831_v43 = vmul.f32 %v2661_v14, %v11643_v3  ;;  %v11644_v52 = vld [vmem:[#allocation44_spill] sm:$0xff] }
 0x3d8   :  { %v2833_v42 = vmul.f32 %v2661_v14, %v11644_v52  ;;  %v11645_v49 = vld [vmem:[#allocation48_spill] sm:$0xff]  ;;  %v2853_v14 = vmul.f32 %v2701_v10, %v11654_v60  ;;  %v11665_v60 = vld [vmem:[#allocation143_spill] sm:$0xff] }
 0x3d9   :  { %v2835_v26 = vmul.f32 %v2669_v6, %v11645_v49  ;;  %v11646_v0 = vld [vmem:[#allocation52_spill] sm:$0xff] }
 0x3da   :  { %v2837_v7 = vmul.f32 %v2669_v6, %v11646_v0  ;;  %v11647_v9 = vld [vmem:[#allocation56_spill] sm:$0xff]  ;;  %v2857_v6 = vmul.f32 %v2709_v55, %v11656_v28  ;;  %v11657_v0 = vld [vmem:[#allocation99_spill] sm:$0xff] }
 0x3db   :  { %v2839_v41 = vmul.f32 %v2677_v39, %v11647_v9  ;;  %v11648_v24 = vld [vmem:[#allocation60_spill] sm:$0xff]  ;;  %v2859_v9 = vmul.f32 %v2717_v37, %v11657_v0  ;;  %v2885_v0 = vadd.f32 %v9131_v31, %v9088_v44  ;;  %v2983_v44 = vadd.f32 %v9164_v53, %v9128_v29  ;;  %v11673_v29 = vld [vmem:[#allocation185_spill] sm:$0xff] }
 0x3dc   :  { %v2841_v2 = vmul.f32 %v2677_v39, %v11648_v24  ;;  %v11649_v58 = vld [vmem:[#allocation64_spill] sm:$0xff]  ;;  %v2861_v39 = vmul.f32 %v2717_v37, %v11658_v17  ;;  %v11659_v24 = vld [vmem:[#allocation107_spill] sm:$0xff]  ;;  %v2899_v37 = vadd.f32 %v9138_v15, %v9091_v8 }
 0x3dd   :  { %v2843_v45 = vmul.f32 %v2685_v57, %v11649_v58  ;;  %v11650_v62 = vld [vmem:[#allocation68_spill] sm:$0xff]  ;;  %v2863_v58 = vmul.f32 %v2725_v48, %v11659_v24  ;;  %v2886_v8 = vadd.f32 %v2885_v0, %v9171_v34  ;;  %v11674_v34 = vld [vmem:[#allocation187_spill] sm:$0xff] }
 0x3de   :  { %v2845_v19 = vmul.f32 %v2685_v57, %v11650_v62  ;;  %v11651_v20 = vld [vmem:[#allocation72_spill] sm:$0xff]  ;;  %v2865_v57 = vmul.f32 %v2725_v48, %v11660_v56  ;;  %v11661_v62 = vld [vmem:[#allocation117_spill] sm:$0xff]  ;;  %v2913_v48 = vadd.f32 %v9141_v25, %v9099_v16  ;;  %v2900_v31 = vadd.f32 %v2899_v37, %v9174_v63  ;;  %v11675_v37 = vld [vmem:[#allocation186_spill] sm:$0xff] }
 0x3df   :  { %v2847_v59 = vmul.f32 %v2693_v46, %v11651_v20  ;;  %v11652_v21 = vld [vmem:[#allocation76_spill] sm:$0xff]  ;;  %v2867_v20 = vmul.f32 %v2733_v5, %v11661_v62  ;;  %v11667_v16 = vld [vmem:[#allocation177_spill] sm:$0xff] }
 0x3e0   :  { %v2849_v11 = vmul.f32 %v2693_v46, %v11652_v21  ;;  %v11653_v32 = vld [vmem:[#allocation80_spill] sm:$0xff]  ;;  %v2869_v46 = vmul.f32 %v2733_v5, %v11662_v1  ;;  %v11663_v21 = vld [vmem:[#allocation127_spill] sm:$0xff]  ;;  %v2927_v5 = vadd.f32 %v9144_v23, %v9107_v4  ;;  %v2914_v25 = vadd.f32 %v2913_v48, %v9177_v22  ;;  %v11676_v48 = vld [vmem:[#allocation189_spill] sm:$0xff] }
 0x3e1   :  { %v2851_v3 = vmul.f32 %v2701_v10, %v11653_v32  ;;  %v11655_v52 = vld [vmem:[#allocation88_spill] sm:$0xff]  ;;  %v2871_v32 = vmul.f32 %v2741_v33, %v11663_v21  ;;  %v2873_v10 = vmul.f32 %v2741_v33, %v11664_v27  ;;  %v2941_v21 = vadd.f32 %v9155_v38, %v9114_v12  ;;  %v11668_v12 = vld [vmem:[#allocation178_spill] sm:$0xff]  ;;  %v11669_v38 = vld [vmem:[#allocation179_spill] sm:$0xff] }
 0x3e2   :  { %v2855_v49 = vmul.f32 %v2709_v55, %v11655_v52  ;;  %v2875_v52 = vmul.f32 %v2749_v54, %v11665_v60  ;;  %v2877_v55 = vmul.f32 %v2749_v54, %v11666_v51  ;;  %v2955_v33 = vadd.f32 %v9158_v13, %v9117_v61  ;;  %v11670_v13 = vld [vmem:[#allocation180_spill] sm:$0xff]  ;;  %v11672_v60 = vld [vmem:[#allocation165_spill] sm:$0xff] }
 0x3e3   :  { %v2969_v54 = vadd.f32 %v9161_v47, %v9125_v36  ;;  %v2928_v23 = vadd.f32 %v2927_v5, %v9180_v35  ;;  %v2942_v4 = vadd.f32 %v2941_v21, %v11667_v16  ;;  %v2984_v51 = vadd.f32 %v2983_v44, %v11670_v13  ;;  %v11671_v36 = vld [vmem:[#allocation184_spill] sm:$0xff]  ;;  %v11678_v16 = vld [vmem:[#allocation193_spill] sm:$0xff]  ;;  %v11681_v13 = vld [vmem:[#allocation191_spill] sm:$0xff] }
 0x3e4   :  { %v2956_v15 = vadd.f32 %v2955_v33, %v11668_v12  ;;  %v2887_v47 = vadd.f32 %v2886_v8, %v11671_v36  ;;  %v2901_v53 = vadd.f32 %v2900_v31, %v11672_v60  ;;  %v2915_v0 = vadd.f32 %v2914_v25, %v11673_v29  ;;  %v11677_v5 = vld [vmem:[#allocation192_spill] sm:$0xff]  ;;  %v11679_v12 = vld [vmem:[#allocation190_spill] sm:$0xff]  ;;  %v11682_v36 = vld [vmem:[#allocation227_spill] sm:$0xff] }
 0x3e5   :  { %v2970_v61 = vadd.f32 %v2969_v54, %v11669_v38  ;;  %v2929_v63 = vadd.f32 %v2928_v23, %v11674_v34  ;;  %v2943_v22 = vadd.f32 %v2942_v4, %v11675_v37  ;;  %v2985_v33 = vadd.f32 %v2984_v51, %v11678_v16  ;;  %v11680_v38 = vld [vmem:[#allocation172_spill] sm:$0xff] }
 0x3e6   :  { %v2957_v35 = vadd.f32 %v2956_v15, %v11676_v48  ;;  %v2888_v54 = vadd.f32 %v2887_v47, %v11679_v12  ;;  %v2902_v44 = vadd.f32 %v2901_v53, %v11680_v38  ;;  %v2916_v8 = vadd.f32 %v2915_v0, %v11681_v13 }
 0x3e7   :  { %v2971_v21 = vadd.f32 %v2970_v61, %v11677_v5  ;;  %v2930_v60 = vadd.f32 %v2929_v63, %v11682_v36  ;;  %v2944_v31 = vadd.f32 %v2943_v22, %v2823_v50  ;;  %v2986_v23 = vadd.f32 %v2985_v33, %v2829_v18 }
 0x3e8   :  { %v2958_v25 = vadd.f32 %v2957_v35, %v2825_v30  ;;  %v2889_v34 = vadd.f32 %v2888_v54, %v2831_v43  ;;  %v2903_v4 = vadd.f32 %v2902_v44, %v2833_v42  ;;  %v2917_v37 = vadd.f32 %v2916_v8, %v2835_v26 }
 0x3e9   :  { %v2972_v29 = vadd.f32 %v2971_v21, %v2827_v40  ;;  %v2931_v15 = vadd.f32 %v2930_v60, %v2837_v7  ;;  %v2945_v48 = vadd.f32 %v2944_v31, %v2839_v41  ;;  %v2987_v51 = vadd.f32 %v2986_v23, %v2845_v19  ;;  %v11683_v41 = vld [vmem:[#allocation113_spill] sm:$0xff] }
 0x3ea   :  { %v2959_v61 = vadd.f32 %v2958_v25, %v2841_v2  ;;  %v2890_v16 = vadd.f32 %v2889_v34, %v2847_v59  ;;  %v2904_v47 = vadd.f32 %v2903_v4, %v2849_v11  ;;  %v2918_v12 = vadd.f32 %v2917_v37, %v2851_v3  ;;  %v11685_v3 = vld [vmem:[#allocation122_spill] sm:$0xff] }
 0x3eb   :  { %v2973_v5 = vadd.f32 %v2972_v29, %v2843_v45  ;;  %v2932_v53 = vadd.f32 %v2931_v15, %v2853_v14  ;;  %v2946_v38 = vadd.f32 %v2945_v48, %v2855_v49  ;;  %v2988_v63 = vadd.f32 %v2987_v51, %v2861_v39  ;;  %v11684_v45 = vld [vmem:[#allocation119_spill] sm:$0xff]  ;;  %v11686_v49 = vld [vmem:[#allocation94_spill] sm:$0xff] }
 0x3ec   :  { %v2960_v0 = vadd.f32 %v2959_v61, %v2857_v6  ;;  %v2891_v50 = vadd.f32 %v2890_v16, %v2863_v58  ;;  %v2905_v30 = vadd.f32 %v2904_v47, %v2865_v57  ;;  %v2919_v40 = vadd.f32 %v2918_v12, %v2867_v20  ;;  %v11687_v58 = vld [vmem:[#allocation132_spill] sm:$0xff]  ;;  %v11688_v20 = vld [vmem:[#allocation130_spill] sm:$0xff]  ;;  %v11690_v6 = vld [vmem:[#allocation149_spill] sm:$0xff] }
 0x3ed   :  { %v2974_v13 = vadd.f32 %v2973_v5, %v2859_v9  ;;  %v2933_v18 = vadd.f32 %v2932_v53, %v2869_v46  ;;  %v2947_v43 = vadd.f32 %v2946_v38, %v2871_v32  ;;  %v2989_v7 = vadd.f32 %v2988_v63, %v2877_v55 }
 0x3ee   :  { %v2961_v42 = vadd.f32 %v2960_v0, %v2873_v10  ;;  %v9319_v2 = vadd.f32 %v2891_v50, %v11683_v41  ;;  %v9322_v19 = vadd.f32 %v2905_v30, %v11684_v45  ;;  %v9325_v59 = vadd.f32 %v2919_v40, %v11685_v3  ;;  %v11714_v3 = vld [vmem:[#allocation102_spill] sm:$0xff] }
 0x3ef   :  { %v2975_v26 = vadd.f32 %v2974_v13, %v2875_v52  ;;  %v9328_v9 = vadd.f32 %v2933_v18, %v11686_v49  ;;  %v9331_v11 = vadd.f32 %v2947_v43, %v11687_v58  ;;  %v11689_v52 = vld [vmem:[#allocation145_spill] sm:$0xff]  ;;  %v9340_v39 = vadd.f32 %v2989_v7, %v11690_v6  ;;  %v11713_v58 = vld [vmem:[#allocation98_spill] sm:$0xff] }
 0x3f0   :  { %v9334_v32 = vadd.f32 %v2961_v42, %v11688_v20  ;;  %v3007_v57 = vmul.f32 %v9319_v2, %v9319_v2  ;;  %v3009_v46 = vmul.f32 %v9322_v19, %v9322_v19  ;;  %v3011_v10 = vmul.f32 %v9325_v59, %v9325_v59  ;;  %v11715_v41 = vld [vmem:[#allocation106_spill] sm:$0xff] }
 0x3f1   :  { %v9337_v14 = vadd.f32 %v2975_v26, %v11689_v52  ;;  %v3013_v55 = vmul.f32 %v9328_v9, %v9328_v9  ;;  %v3015_v22 = vmul.f32 %v9331_v11, %v9331_v11  ;;  %v3021_v33 = vmul.f32 %v9340_v39, %v9340_v39  ;;  %v11712_v52 = vld [vmem:[#allocation92_spill] sm:$0xff] }
 0x3f2   :  { %v3017_v35 = vmul.f32 %v9334_v32, %v9334_v32  ;;  %v3029_v54 = vadd.f32 %v3009_v46, %v3007_v57 }
 0x3f3   :  { %v3019_v21 = vmul.f32 %v9337_v14, %v9337_v14  ;;  %v3043_v44 = vadd.f32 %v3013_v55, %v3011_v10 }
 0x3f4   :  { %v3057_v8 = vadd.f32 %v3017_v35, %v3015_v22  ;;  %v3030_v60 = vrot.slane %v3029_v54, 4 }
 0x3f5   :  { %v3071_v36 = vadd.f32 %v3021_v33, %v3019_v21  ;;  %v3044_v31 = vrot.slane %v3043_v44, 4 }
 0x3f6   :  { %v3058_v25 = vrot.slane %v3057_v8, 4  ;;  %v3031_v23 = vadd.f32 %v3030_v60, %v3029_v54 }
 0x3f7   :  { %v3072_v29 = vrot.slane %v3071_v36, 4  ;;  %v3045_v34 = vadd.f32 %v3044_v31, %v3043_v44 }
 0x3f8   :  { %v3059_v4 = vadd.f32 %v3058_v25, %v3057_v8  ;;  %v3032_v15 = vrot.slane %v3031_v23, 2 }
 0x3f9   :  { %v3073_v37 = vadd.f32 %v3072_v29, %v3071_v36  ;;  %v3046_v48 = vrot.slane %v3045_v34, 2 }
 0x3fa   :  { %v3060_v61 = vrot.slane %v3059_v4, 2  ;;  %v3033_v51 = vadd.f32 %v3032_v15, %v3031_v23 }
 0x3fb   :  { %v3074_v5 = vrot.slane %v3073_v37, 2  ;;  %v3047_v16 = vadd.f32 %v3046_v48, %v3045_v34 }
 0x3fc   :  { %v3061_v47 = vadd.f32 %v3060_v61, %v3059_v4  ;;  %v3034_v53 = vrot.slane %v3033_v51, 1 }
 0x3fd   :  { %v3075_v12 = vadd.f32 %v3074_v5, %v3073_v37  ;;  %v3048_v38 = vrot.slane %v3047_v16, 1 }
 0x3fe   :  { %v3062_v0 = vrot.slane %v3061_v47, 1  ;;  %v3035_v63 = vadd.f32 %v3034_v53, %v3033_v51 }
 0x3ff   :  { %v3076_v13 = vrot.slane %v3075_v12, 1  ;;  %v3049_v50 = vadd.f32 %v3048_v38, %v3047_v16 }
 0x400   :  { %v3063_v30 = vadd.f32 %v3062_v0, %v3061_v47  ;;  %v3079_v18 = vadd.f32 1.0, %v3035_v63  ;;  %v3103_v7 = vadd.f32 1e-08, %v3035_v63 }
 0x401   :  { %v3077_v40 = vadd.f32 %v3076_v13, %v3075_v12  ;;  %v3081_v43 = vadd.f32 1.0, %v3049_v50  ;;  %v3105_v57 = vadd.f32 1e-08, %v3049_v50 }
 0x402   :  { %v3083_v42 = vadd.f32 1.0, %v3063_v30  ;;  %5568 = vrcp.f32 %v3079_v18  ;;  %v3107_v46 = vadd.f32 1e-08, %v3063_v30 }
 0x403   :  { %v3085_v26 = vadd.f32 1.0, %v3077_v40  ;;  %5570 = vrcp.f32 %v3081_v43  ;;  %v3109_v10 = vadd.f32 1e-08, %v3077_v40  ;;  %v11700_v43 = vld [vmem:[#allocation43_spill] sm:$0xff] }
 0x404   :  { %5572 = vrcp.f32 %v3083_v42 }
 0x405   :  { %5574 = vrcp.f32 %v3085_v26  ;;  %v11701_v26 = vld [vmem:[#allocation47_spill] sm:$0xff] }
 0x406   :  { %5576 = vrsqrt.f32 %v3103_v7 }
 0x407   :  { %5578 = vrsqrt.f32 %v3105_v57  ;;  %v11702_v57 = vld [vmem:[#allocation51_spill] sm:$0xff] }
 0x408   :  { %5580 = vrsqrt.f32 %v3107_v46 }
 0x409   :  { %5582 = vrsqrt.f32 %v3109_v10  ;;  %v11703_v10 = vld [vmem:[#allocation55_spill] sm:$0xff] }
 0x40f   :  { %v5569_v55 = vpop.eup %5568 }
 0x410   :  { %v5571_v22 = vpop.eup %5570  ;;  %v3095_v33 = vmul.f32 %v5569_v55, %v3035_v63 }
 0x411   :  { %v5573_v35 = vpop.eup %5572  ;;  %v3097_v54 = vmul.f32 %v5571_v22, %v3049_v50  ;;  %v11698_v50 = vld [vmem:[#allocation35_spill] sm:$0xff] }
 0x412   :  { %v5575_v21 = vpop.eup %5574  ;;  %v3099_v44 = vmul.f32 %v5573_v35, %v3063_v30  ;;  %v11704_v22 = vld [vmem:[#allocation59_spill] sm:$0xff] }
 0x413   :  { %v5577_v8 = vpop.eup %5576  ;;  %v3101_v36 = vmul.f32 %v5575_v21, %v3077_v40  ;;  %v11699_v40 = vld [vmem:[#allocation39_spill] sm:$0xff] }
 0x414   :  { %v5579_v60 = vpop.eup %5578  ;;  %v3119_v25 = vmul.f32 %v5577_v8, %v3095_v33  ;;  %v11705_v21 = vld [vmem:[#allocation63_spill] sm:$0xff] }
 0x415   :  { %v5581_v31 = vpop.eup %5580  ;;  %v3121_v23 = vmul.f32 %v5579_v60, %v3097_v54  ;;  %v11706_v54 = vld [vmem:[#allocation67_spill] sm:$0xff] }
 0x416   :  { %v5583_v29 = vpop.eup %5582  ;;  %v3123_v34 = vmul.f32 %v5581_v31, %v3099_v44  ;;  %v9359_v37 = vmul.f32 %v3119_v25, %v9319_v2  ;;  %v9362_v15 = vmul.f32 %v3119_v25, %v9322_v19  ;;  %v11691_v19 = vld [vmem:[#allocation7_spill] sm:$0xff] }
 0x417   :  { %v3125_v4 = vmul.f32 %v5583_v29, %v3101_v36  ;;  %v9365_v48 = vmul.f32 %v3121_v23, %v9325_v59  ;;  %v9368_v61 = vmul.f32 %v3121_v23, %v9328_v9  ;;  %v11692_v59 = vld [vmem:[#allocation11_spill] sm:$0xff] }
 0x418   :  { %v9371_v5 = vmul.f32 %v3123_v34, %v9331_v11  ;;  %v9374_v51 = vmul.f32 %v3123_v34, %v9334_v32  ;;  %v3143_v47 = vmul.f32 %v9359_v37, %v11691_v19  ;;  %v3145_v12 = vmul.f32 %v9362_v15, %v11692_v59  ;;  %v11693_v9 = vld [vmem:[#allocation15_spill] sm:$0xff]  ;;  %v11740_v59 = vld [vmem:[#allocation48_spill] sm:$0xff] }
 0x419   :  { %v9377_v16 = vmul.f32 %v3125_v4, %v9337_v14  ;;  %v9380_v2 = vmul.f32 %v3125_v4, %v9340_v39  ;;  %v3147_v53 = vmul.f32 %v9365_v48, %v11693_v9  ;;  %v11694_v11 = vld [vmem:[#allocation19_spill] sm:$0xff]  ;;  %v3159_v18 = vmul.f32 %v9359_v37, %v11699_v40  ;;  %v11738_v9 = vld [vmem:[#allocation44_spill] sm:$0xff] }
 0x41a   :  { %v3149_v38 = vmul.f32 %v9368_v61, %v11694_v11  ;;  %v11695_v32 = vld [vmem:[#allocation23_spill] sm:$0xff]  ;;  %v3161_v42 = vmul.f32 %v9362_v15, %v11700_v43  ;;  %v3163_v7 = vmul.f32 %v9365_v48, %v11701_v26  ;;  %v3165_v46 = vmul.f32 %v9368_v61, %v11702_v57  ;;  %v11723_v57 = vld [vmem:[#allocation8_spill] sm:$0xff] }
 0x41b   :  { %v3151_v0 = vmul.f32 %v9371_v5, %v11695_v32  ;;  %v11696_v14 = vld [vmem:[#allocation27_spill] sm:$0xff]  ;;  %v3157_v30 = vmul.f32 %v9380_v2, %v11698_v50  ;;  %v3167_v55 = vmul.f32 %v9371_v5, %v11703_v10  ;;  %v3169_v35 = vmul.f32 %v9374_v51, %v11704_v22  ;;  %v11721_v22 = vld [vmem:[#allocation133_spill] sm:$0xff]  ;;  %v11734_v32 = vld [vmem:[#allocation36_spill] sm:$0xff] }
 0x41c   :  { %v3153_v13 = vmul.f32 %v9374_v51, %v11696_v14  ;;  %v11697_v39 = vld [vmem:[#allocation31_spill] sm:$0xff]  ;;  %v3171_v33 = vmul.f32 %v9377_v16, %v11705_v21  ;;  %v3173_v44 = vmul.f32 %v9380_v2, %v11706_v54  ;;  %v9436_v20 = vmul.f32 %v9374_v51, %v11712_v52  ;;  %v11720_v21 = vld [vmem:[#allocation125_spill] sm:$0xff]  ;;  %v11732_v14 = vld [vmem:[#allocation32_spill] sm:$0xff] }
 0x41d   :  { %v3155_v63 = vmul.f32 %v9377_v16, %v11697_v39  ;;  %v11707_v8 = vld [vmem:[#allocation71_spill] sm:$0xff]  ;;  %v9440_v49 = vmul.f32 %v9377_v16, %v11713_v58  ;;  %v9444_v45 = vmul.f32 %v9380_v2, %v11714_v3  ;;  %v11722_v10 = vld [vmem:[#allocation141_spill] sm:$0xff]  ;;  %v9478_v26 = vmul.f32 %v9359_v37, %v11723_v57  ;;  %v11736_v11 = vld [vmem:[#allocation40_spill] sm:$0xff] }
 0x41e   :  { %v9416_v36 = vmul.f32 %v9359_v37, %v11707_v8  ;;  %v11708_v60 = vld [vmem:[#allocation75_spill] sm:$0xff]  ;;  %v11718_v8 = vld [vmem:[#allocation118_spill] sm:$0xff]  ;;  %v11742_v19 = vld [vmem:[#allocation52_spill] sm:$0xff] }
 0x41f   :  { %v9420_v31 = vmul.f32 %v9362_v15, %v11708_v60  ;;  %v11709_v25 = vld [vmem:[#allocation79_spill] sm:$0xff]  ;;  %v9460_v58 = vmul.f32 %v9368_v61, %v11718_v8  ;;  %v11724_v8 = vld [vmem:[#allocation12_spill] sm:$0xff] }
 0x420   :  { %v9424_v29 = vmul.f32 %v9365_v48, %v11709_v25  ;;  %v11710_v23 = vld [vmem:[#allocation83_spill] sm:$0xff]  ;;  %v11716_v25 = vld [vmem:[#allocation110_spill] sm:$0xff]  ;;  %v9482_v43 = vmul.f32 %v9362_v15, %v11724_v8  ;;  %v9502_v8 = vmul.f32 %v9377_v16, %v11732_v14  ;;  %v9522_v14 = vmul.f32 %v9368_v61, %v11742_v19 }
 0x421   :  { %v9428_v34 = vmul.f32 %v9368_v61, %v11710_v23  ;;  %v11711_v4 = vld [vmem:[#allocation87_spill] sm:$0xff]  ;;  %v9448_v23 = vmul.f32 %v9359_v37, %v11715_v41  ;;  %v9468_v41 = vmul.f32 %v9374_v51, %v11720_v21  ;;  %v11726_v21 = vld [vmem:[#allocation20_spill] sm:$0xff]  ;;  %v3305_v19 = vadd.f32 %v3153_v13, %v3151_v0 }
 0x422   :  { %v9432_v6 = vmul.f32 %v9371_v5, %v11711_v4  ;;  %v9452_v4 = vmul.f32 %v9362_v15, %v11716_v25  ;;  %v11717_v60 = vld [vmem:[#allocation115_spill] sm:$0xff]  ;;  %v9472_v25 = vmul.f32 %v9377_v16, %v11721_v22  ;;  %v9490_v50 = vmul.f32 %v9368_v61, %v11726_v21  ;;  %v11728_v22 = vld [vmem:[#allocation24_spill] sm:$0xff]  ;;  %11733 = vst [vmem:[#allocation197_spill] sm:$0xff] %v9502_v8 }
 0x423   :  { %v9456_v52 = vmul.f32 %v9365_v48, %v11717_v60  ;;  %v11719_v54 = vld [vmem:[#allocation91_spill] sm:$0xff]  ;;  %v3205_v60 = vmul.f32 %v9380_v2, %v11722_v10  ;;  %v9494_v39 = vmul.f32 %v9371_v5, %v11728_v22  ;;  %v11730_v10 = vld [vmem:[#allocation28_spill] sm:$0xff]  ;;  %v9510_v21 = vmul.f32 %v9359_v37, %v11736_v11  ;;  %11743 = vst [vmem:[#allocation204_spill] sm:$0xff] %v9522_v14 }
 0x424   :  { %v9464_v3 = vmul.f32 %v9371_v5, %v11719_v54  ;;  %v11725_v54 = vld [vmem:[#allocation16_spill] sm:$0xff]  ;;  %11727 = vst [vmem:[#allocation195_spill] sm:$0xff] %v9490_v50  ;;  %v9498_v57 = vmul.f32 %v9374_v51, %v11730_v10  ;;  %v9514_v22 = vmul.f32 %v9362_v15, %v11738_v9  ;;  %v9518_v10 = vmul.f32 %v9365_v48, %v11740_v59  ;;  %v11756_v0 = vld [vmem:[#allocation99_spill] sm:$0xff] }
 0x425   :  { %v9486_v40 = vmul.f32 %v9365_v48, %v11725_v54  ;;  %11729 = vst [vmem:[#allocation196_spill] sm:$0xff] %v9494_v39  ;;  %v9506_v54 = vmul.f32 %v9380_v2, %v11734_v32  ;;  %11737 = vst [vmem:[#allocation199_spill] sm:$0xff] %v9510_v21  ;;  %v11744_v8 = vld [vmem:[#allocation56_spill] sm:$0xff]  ;;  %v3319_v14 = vadd.f32 %v3157_v30, %v3155_v63 }
 0x426   :  { %11731 = vst [vmem:[#allocation194_spill] sm:$0xff] %v9498_v57  ;;  %11739 = vst [vmem:[#allocation150_spill] sm:$0xff] %v9514_v22  ;;  %v9526_v32 = vmul.f32 %v9371_v5, %v11744_v8  ;;  %v11748_v21 = vld [vmem:[#allocation64_spill] sm:$0xff]  ;;  %v3291_v57 = vadd.f32 %v3149_v38, %v3147_v53  ;;  %v3333_v39 = vadd.f32 %v3161_v42, %v3159_v18 }
 0x427   :  { %11735 = vst [vmem:[#allocation198_spill] sm:$0xff] %v9506_v54  ;;  %11741 = vst [vmem:[#allocation203_spill] sm:$0xff] %v9518_v10  ;;  %v11746_v54 = vld [vmem:[#allocation60_spill] sm:$0xff]  ;;  %v9534_v9 = vmul.f32 %v9377_v16, %v11748_v21  ;;  %v3277_v10 = vadd.f32 %v3145_v12, %v3143_v47  ;;  %v3347_v50 = vadd.f32 %v3165_v46, %v3163_v7  ;;  %v3306_v46 = vrot.slane %v3305_v19, 4 }
 0x428   :  { %11745 = vst [vmem:[#allocation200_spill] sm:$0xff] %v9526_v32  ;;  %v9530_v11 = vmul.f32 %v9374_v51, %v11746_v54  ;;  %v11750_v22 = vld [vmem:[#allocation68_spill] sm:$0xff]  ;;  %v9562_v38 = vmul.f32 %v9374_v51, %v11656_v28  ;;  %v9566_v13 = vmul.f32 %v9377_v16, %v11756_v0  ;;  %v9570_v63 = vmul.f32 %v9380_v2, %v11658_v17 }
 0x429   :  { %11749 = vst [vmem:[#allocation161_spill] sm:$0xff] %v9534_v9  ;;  %v9538_v59 = vmul.f32 %v9380_v2, %v11750_v22  ;;  %v11751_v8 = vld [vmem:[#allocation72_spill] sm:$0xff]  ;;  %v3278_v30 = vrot.slane %v3277_v10, 4  ;;  %v3292_v18 = vrot.slane %v3291_v57, 4  ;;  %v3361_v42 = vadd.f32 %v3169_v35, %v3167_v55  ;;  %v11759_v35 = vld [vmem:[#allocation127_spill] sm:$0xff] }
 0x42a   :  { %11747 = vst [vmem:[#allocation164_spill] sm:$0xff] %v9530_v11  ;;  %v9542_v32 = vmul.f32 %v9359_v37, %v11751_v8  ;;  %v11752_v54 = vld [vmem:[#allocation76_spill] sm:$0xff]  ;;  %v3375_v7 = vadd.f32 %v3173_v44, %v3171_v33  ;;  %v9574_v28 = vmul.f32 %v9359_v37, %v11659_v24  ;;  %v9578_v0 = vmul.f32 %v9362_v15, %v11660_v56  ;;  %v11762_v44 = vld [vmem:[#allocation143_spill] sm:$0xff]  ;;  %v11764_v56 = vld [vmem:[#allocation182_spill] sm:$0xff] }
 0x42b   :  { %v9546_v11 = vmul.f32 %v9362_v15, %v11752_v54  ;;  %v11753_v21 = vld [vmem:[#allocation80_spill] sm:$0xff]  ;;  %v9582_v17 = vmul.f32 %v9365_v48, %v11661_v62  ;;  %v9586_v55 = vmul.f32 %v9368_v61, %v11662_v1  ;;  %v9590_v33 = vmul.f32 %v9371_v5, %v11759_v35 }
 0x42c   :  { %v9550_v9 = vmul.f32 %v9365_v48, %v11753_v21  ;;  %v11754_v22 = vld [vmem:[#allocation84_spill] sm:$0xff]  ;;  %v3348_v21 = vrot.slane %v3347_v50, 4  ;;  %v9594_v37 = vmul.f32 %v9374_v51, %v11664_v27  ;;  %v9598_v15 = vmul.f32 %v9377_v16, %v11762_v44 }
 0x42d   :  { %v9554_v47 = vmul.f32 %v9368_v61, %v11754_v22  ;;  %v11755_v12 = vld [vmem:[#allocation88_spill] sm:$0xff]  ;;  %v3320_v22 = vrot.slane %v3319_v14, 4  ;;  %11757 = vst [vmem:[#allocation140_spill] sm:$0xff] %v9582_v17  ;;  %11758 = vst [vmem:[#allocation152_spill] sm:$0xff] %v9586_v55  ;;  %v9602_v48 = vmul.f32 %v9380_v2, %v11764_v56  ;;  %v3279_v62 = vadd.f32 %v3278_v30, %v3277_v10 }
 0x42e   :  { %v9558_v53 = vmul.f32 %v9371_v5, %v11755_v12  ;;  %v3334_v12 = vrot.slane %v3333_v39, 4  ;;  %11760 = vst [vmem:[#allocation131_spill] sm:$0xff] %v9590_v33  ;;  %11761 = vst [vmem:[#allocation135_spill] sm:$0xff] %v9594_v37  ;;  %v3293_v24 = vadd.f32 %v3292_v18, %v3291_v57  ;;  %v3362_v61 = vrot.slane %v3361_v42, 4 }
 0x42f   :  { %11763 = vst [vmem:[#allocation213_spill] sm:$0xff] %v9598_v15  ;;  %11765 = vst [vmem:[#allocation214_spill] sm:$0xff] %v9602_v48  ;;  %v3376_v1 = vrot.slane %v3375_v7, 4  ;;  %v3307_v54 = vadd.f32 %v3306_v46, %v3305_v19  ;;  %v3321_v8 = vadd.f32 %v3320_v22, %v3319_v14  ;;  %v3349_v35 = vadd.f32 %v3348_v21, %v3347_v50 }
 0x430   :  { %v3335_v5 = vadd.f32 %v3334_v12, %v3333_v39  ;;  %v3389_v51 = vadd.f32 %v9420_v31, %v9416_v36  ;;  %v3403_v27 = vadd.f32 %v9428_v34, %v9424_v29  ;;  %v3417_v16 = vadd.f32 %v9436_v20, %v9432_v6 }
 0x431   :  { %v3431_v2 = vadd.f32 %v9444_v45, %v9440_v49  ;;  %v3445_v57 = vadd.f32 %v9452_v4, %v9448_v23  ;;  %v3459_v19 = vadd.f32 %v9460_v58, %v9456_v52  ;;  %v3473_v14 = vadd.f32 %v9468_v41, %v9464_v3 }
 0x432   :  { %v3487_v39 = vadd.f32 %v3205_v60, %v9472_v25  ;;  %v3280_v50 = vrot.slane %v3279_v62, 2  ;;  %v3294_v10 = vrot.slane %v3293_v24, 2  ;;  %v3363_v22 = vadd.f32 %v3362_v61, %v3361_v42 }
 0x433   :  { %v3377_v21 = vadd.f32 %v3376_v1, %v3375_v7  ;;  %v3308_v36 = vrot.slane %v3307_v54, 2  ;;  %v3322_v20 = vrot.slane %v3321_v8, 2  ;;  %v3336_v6 = vrot.slane %v3335_v5, 2 }
 0x434   :  { %v3350_v31 = vrot.slane %v3349_v35, 2  ;;  %v3390_v45 = vrot.slane %v3389_v51, 4  ;;  %v3404_v49 = vrot.slane %v3403_v27, 4  ;;  %v3418_v29 = vrot.slane %v3417_v16, 4 }
 0x435   :  { %v3432_v23 = vrot.slane %v3431_v2, 4  ;;  %v3446_v34 = vrot.slane %v3445_v57, 4  ;;  %v3460_v4 = vrot.slane %v3459_v19, 4  ;;  %v3474_v58 = vrot.slane %v3473_v14, 4 }
 0x436   :  { %v3488_v52 = vrot.slane %v3487_v39, 4  ;;  %v3281_v12 = vadd.f32 %v3280_v50, %v3279_v62  ;;  %v3295_v41 = vadd.f32 %v3294_v10, %v3293_v24  ;;  %v3364_v3 = vrot.slane %v3363_v22, 2 }
 0x437   :  { %v3378_v60 = vrot.slane %v3377_v21, 2  ;;  %v3309_v25 = vadd.f32 %v3308_v36, %v3307_v54  ;;  %v3323_v30 = vadd.f32 %v3322_v20, %v3321_v8  ;;  %v3337_v18 = vadd.f32 %v3336_v6, %v3335_v5 }
 0x438   :  { %v3351_v1 = vadd.f32 %v3350_v31, %v3349_v35  ;;  %v3391_v42 = vadd.f32 %v3390_v45, %v3389_v51  ;;  %v3405_v7 = vadd.f32 %v3404_v49, %v3403_v27  ;;  %v3419_v46 = vadd.f32 %v3418_v29, %v3417_v16 }
 0x439   :  { %v3433_v61 = vadd.f32 %v3432_v23, %v3431_v2  ;;  %v3447_v56 = vadd.f32 %v3446_v34, %v3445_v57  ;;  %v3461_v44 = vadd.f32 %v3460_v4, %v3459_v19  ;;  %v3475_v48 = vadd.f32 %v3474_v58, %v3473_v14 }
 0x43a   :  { %v3489_v15 = vadd.f32 %v3488_v52, %v3487_v39  ;;  %v3282_v37 = vrot.slane %v3281_v12, 1  ;;  %v3296_v33 = vrot.slane %v3295_v41, 1  ;;  %v3365_v55 = vadd.f32 %v3364_v3, %v3363_v22  ;;  %v11766_v52 = vld [vmem:[#allocation195_spill] sm:$0xff]  ;;  %v11768_v3 = vld [vmem:[#allocation194_spill] sm:$0xff] }
 0x43b   :  { %v3379_v17 = vadd.f32 %v3378_v60, %v3377_v21  ;;  %v3310_v62 = vrot.slane %v3309_v25, 1  ;;  %v3324_v24 = vrot.slane %v3323_v30, 1  ;;  %v3338_v50 = vrot.slane %v3337_v18, 1 }
 0x43c   :  { %v3352_v10 = vrot.slane %v3351_v1, 1  ;;  %v3392_v54 = vrot.slane %v3391_v42, 2  ;;  %v3406_v8 = vrot.slane %v3405_v7, 2  ;;  %v3420_v5 = vrot.slane %v3419_v46, 2 }
 0x43d   :  { %v3434_v35 = vrot.slane %v3433_v61, 2  ;;  %v3448_v51 = vrot.slane %v3447_v56, 2  ;;  %v3462_v27 = vrot.slane %v3461_v44, 2  ;;  %v3476_v16 = vrot.slane %v3475_v48, 2 }
 0x43e   :  { %v3490_v2 = vrot.slane %v3489_v15, 2  ;;  %v9619_v57 = vadd.f32 %v3282_v37, %v3281_v12  ;;  %v9621_v19 = vadd.f32 %v3296_v33, %v3295_v41  ;;  %v3366_v14 = vrot.slane %v3365_v55, 1  ;;  %v11767_v41 = vld [vmem:[#allocation196_spill] sm:$0xff] }
 0x43f   :  { %v3380_v39 = vrot.slane %v3379_v17, 1  ;;  %v9623_v22 = vadd.f32 %v3310_v62, %v3309_v25  ;;  %v9625_v21 = vadd.f32 %v3324_v24, %v3323_v30  ;;  %v9627_v36 = vadd.f32 %v3338_v50, %v3337_v18  ;;  %v11769_v25 = vld [vmem:[#allocation197_spill] sm:$0xff]  ;;  %v11770_v30 = vld [vmem:[#allocation198_spill] sm:$0xff]  ;;  %v11775_v50 = vld [vmem:[#allocation200_spill] sm:$0xff] }
 0x440   :  { %v9629_v20 = vadd.f32 %v3352_v10, %v3351_v1  ;;  %v3393_v6 = vadd.f32 %v3392_v54, %v3391_v42  ;;  %v3407_v31 = vadd.f32 %v3406_v8, %v3405_v7  ;;  %v3421_v45 = vadd.f32 %v3420_v5, %v3419_v46  ;;  %v11776_v10 = vld [vmem:[#allocation164_spill] sm:$0xff]  ;;  %v11777_v8 = vld [vmem:[#allocation161_spill] sm:$0xff] }
 0x441   :  { %v3435_v49 = vadd.f32 %v3434_v35, %v3433_v61  ;;  %v3449_v29 = vadd.f32 %v3448_v51, %v3447_v56  ;;  %v3463_v23 = vadd.f32 %v3462_v27, %v3461_v44  ;;  %v3477_v37 = vadd.f32 %v3476_v16, %v3475_v48  ;;  %v11771_v56 = vld [vmem:[#allocation199_spill] sm:$0xff]  ;;  %v11772_v44 = vld [vmem:[#allocation150_spill] sm:$0xff] }
 0x442   :  { %v3491_v34 = vadd.f32 %v3490_v2, %v3489_v15  ;;  %v9631_v33 = vadd.f32 %v3366_v14, %v3365_v55  ;;  %v9633_v4 = vadd.f32 %v3380_v39, %v3379_v17  ;;  %v3501_v58 = vadd.f32 %v9482_v43, %v9478_v26  ;;  %v11773_v15 = vld [vmem:[#allocation203_spill] sm:$0xff]  ;;  %v11774_v55 = vld [vmem:[#allocation204_spill] sm:$0xff] }
 0x443   :  { %v3515_v12 = vadd.f32 %v11766_v52, %v9486_v40  ;;  %v3529_v60 = vadd.f32 %v11768_v3, %v11767_v41  ;;  %v3543_v18 = vadd.f32 %v11770_v30, %v11769_v25  ;;  %v3557_v48 = vadd.f32 %v11772_v44, %v11771_v56 }
 0x444   :  { %v3571_v1 = vadd.f32 %v11774_v55, %v11773_v15  ;;  %v3394_v17 = vrot.slane %v3393_v6, 1  ;;  %v3408_v42 = vrot.slane %v3407_v31, 1  ;;  %v3422_v7 = vrot.slane %v3421_v45, 1 }
 0x445   :  { %v3436_v46 = vrot.slane %v3435_v49, 1  ;;  %v3450_v43 = vrot.slane %v3449_v29, 1  ;;  %v3464_v26 = vrot.slane %v3463_v23, 1  ;;  %v3478_v61 = vrot.slane %v3477_v37, 1 }
 0x446   :  { %v3492_v40 = vrot.slane %v3491_v34, 1  ;;  %v3502_v62 = vrot.slane %v3501_v58, 4  ;;  %v3516_v24 = vrot.slane %v3515_v12, 4  ;;  %v3585_v54 = vadd.f32 %v11776_v10, %v11775_v50 }
 0x447   :  { %v3599_v5 = vadd.f32 %v9538_v59, %v11777_v8  ;;  %v3530_v35 = vrot.slane %v3529_v60, 4  ;;  %v3544_v51 = vrot.slane %v3543_v18, 4  ;;  %v3558_v27 = vrot.slane %v3557_v48, 4 }
 0x448   :  { %v3572_v16 = vrot.slane %v3571_v1, 4  ;;  %v9651_v2 = vadd.f32 %v3394_v17, %v3393_v6  ;;  %v9653_v14 = vadd.f32 %v3408_v42, %v3407_v31  ;;  %v9655_v39 = vadd.f32 %v3422_v7, %v3421_v45 }
 0x449   :  { %v9657_v52 = vadd.f32 %v3436_v46, %v3435_v49  ;;  %v9659_v41 = vadd.f32 %v3450_v43, %v3449_v29  ;;  %v9661_v3 = vadd.f32 %v3464_v26, %v3463_v23  ;;  %v9663_v25 = vadd.f32 %v3478_v61, %v3477_v37 }
 0x44a   :  { %v9665_v30 = vadd.f32 %v3492_v40, %v3491_v34  ;;  %v3503_v59 = vadd.f32 %v3502_v62, %v3501_v58  ;;  %v3517_v56 = vadd.f32 %v3516_v24, %v3515_v12  ;;  %v3586_v44 = vrot.slane %v3585_v54, 4  ;;  %v11780_v34 = vld [vmem:[#allocation140_spill] sm:$0xff] }
 0x44b   :  { %11778 = vst [vmem:[#allocation5_spill] sm:$0xff] %v9663_v25  ;;  %v3600_v15 = vrot.slane %v3599_v5, 4  ;;  %v3531_v6 = vadd.f32 %v3530_v35, %v3529_v60  ;;  %v3545_v55 = vadd.f32 %v3544_v51, %v3543_v18  ;;  %v3559_v31 = vadd.f32 %v3558_v27, %v3557_v48  ;;  %v11781_v58 = vld [vmem:[#allocation152_spill] sm:$0xff]  ;;  %v11782_v60 = vld [vmem:[#allocation131_spill] sm:$0xff] }
 0x44c   :  { %11779 = vst [vmem:[#allocation9_spill] sm:$0xff] %v9665_v30  ;;  %v3573_v17 = vadd.f32 %v3572_v16, %v3571_v1  ;;  %v3613_v45 = vadd.f32 %v9546_v11, %v9542_v32  ;;  %v3627_v49 = vadd.f32 %v9554_v47, %v9550_v9  ;;  %v3641_v29 = vadd.f32 %v9562_v38, %v9558_v53  ;;  %v11783_v18 = vld [vmem:[#allocation135_spill] sm:$0xff]  ;;  %v11784_v1 = vld [vmem:[#allocation213_spill] sm:$0xff]  ;;  %v11785_v11 = vld [vmem:[#allocation214_spill] sm:$0xff] }
 0x44d   :  { %v3655_v23 = vadd.f32 %v9570_v63, %v9566_v13  ;;  %v3669_v37 = vadd.f32 %v9578_v0, %v9574_v28  ;;  %v3683_v12 = vadd.f32 %v11781_v58, %v11780_v34  ;;  %v3697_v48 = vadd.f32 %v11783_v18, %v11782_v60 }
 0x44e   :  { %v3711_v32 = vadd.f32 %v11785_v11, %v11784_v1  ;;  %v3504_v42 = vrot.slane %v3503_v59, 2  ;;  %v3587_v9 = vadd.f32 %v3586_v44, %v3585_v54  ;;  %v3601_v47 = vadd.f32 %v3600_v15, %v3599_v5 }
 0x44f   :  { %v3614_v7 = vrot.slane %v3613_v45, 4  ;;  %v3628_v53 = vrot.slane %v3627_v49, 4  ;;  %v3642_v38 = vrot.slane %v3641_v29, 4  ;;  %v3656_v46 = vrot.slane %v3655_v23, 4 }
 0x450   :  { %v3670_v13 = vrot.slane %v3669_v37, 4  ;;  %v3518_v63 = vrot.slane %v3517_v56, 2  ;;  %v3532_v43 = vrot.slane %v3531_v6, 2  ;;  %v3684_v28 = vrot.slane %v3683_v12, 4 }
 0x451   :  { %v3698_v0 = vrot.slane %v3697_v48, 4  ;;  %v3546_v26 = vrot.slane %v3545_v55, 2  ;;  %v3560_v61 = vrot.slane %v3559_v31, 2  ;;  %v3615_v40 = vadd.f32 %v3614_v7, %v3613_v45 }
 0x452   :  { %v3712_v62 = vrot.slane %v3711_v32, 4  ;;  %v3505_v24 = vadd.f32 %v3504_v42, %v3503_v59  ;;  %v3574_v50 = vrot.slane %v3573_v17, 2  ;;  %v3588_v10 = vrot.slane %v3587_v9, 2 }
 0x453   :  { %v3602_v8 = vrot.slane %v3601_v47, 2  ;;  %v3629_v35 = vadd.f32 %v3628_v53, %v3627_v49  ;;  %v3643_v54 = vadd.f32 %v3642_v38, %v3641_v29  ;;  %v3657_v5 = vadd.f32 %v3656_v46, %v3655_v23 }
 0x454   :  { %v3671_v51 = vadd.f32 %v3670_v13, %v3669_v37  ;;  %v3519_v27 = vadd.f32 %v3518_v63, %v3517_v56  ;;  %v3533_v16 = vadd.f32 %v3532_v43, %v3531_v6  ;;  %v3685_v44 = vadd.f32 %v3684_v28, %v3683_v12 }
 0x455   :  { %v3699_v15 = vadd.f32 %v3698_v0, %v3697_v48  ;;  %v3547_v34 = vadd.f32 %v3546_v26, %v3545_v55  ;;  %v3561_v58 = vadd.f32 %v3560_v61, %v3559_v31  ;;  %v3616_v60 = vrot.slane %v3615_v40, 2 }
 0x456   :  { %v3713_v18 = vadd.f32 %v3712_v62, %v3711_v32  ;;  %v3506_v1 = vrot.slane %v3505_v24, 1  ;;  %v3575_v11 = vadd.f32 %v3574_v50, %v3573_v17  ;;  %v3589_v45 = vadd.f32 %v3588_v10, %v3587_v9  ;;  %v11786_v62 = vld [vmem:[#allocation154_spill] sm:$0xff] }
 0x457   :  { %v3603_v7 = vadd.f32 %v3602_v8, %v3601_v47  ;;  %v3630_v59 = vrot.slane %v3629_v35, 2  ;;  %v3644_v42 = vrot.slane %v3643_v54, 2  ;;  %v3658_v30 = vrot.slane %v3657_v5, 2  ;;  %v11788_v10 = vld [vmem:[#allocation158_spill] sm:$0xff] }
 0x458   :  { %v3672_v25 = vrot.slane %v3671_v51, 2  ;;  %v3520_v49 = vrot.slane %v3519_v27, 1  ;;  %v3534_v29 = vrot.slane %v3533_v16, 1  ;;  %v3686_v23 = vrot.slane %v3685_v44, 2 }
 0x459   :  { %v3700_v37 = vrot.slane %v3699_v15, 2  ;;  %v3548_v56 = vrot.slane %v3547_v34, 1  ;;  %v3562_v6 = vrot.slane %v3561_v58, 1  ;;  %v3617_v12 = vadd.f32 %v3616_v60, %v3615_v40 }
 0x45a   :  { %v3714_v48 = vrot.slane %v3713_v18, 2  ;;  %v3507_v55 = vadd.f32 %v3506_v1, %v3505_v24  ;;  %v3576_v31 = vrot.slane %v3575_v11, 1  ;;  %v3590_v53 = vrot.slane %v3589_v45, 1  ;;  %v11787_v24 = vld [vmem:[#allocation167_spill] sm:$0xff] }
 0x45b   :  { %v3604_v32 = vrot.slane %v3603_v7, 1  ;;  %v3631_v38 = vadd.f32 %v3630_v59, %v3629_v35  ;;  %v3645_v17 = vadd.f32 %v3644_v42, %v3643_v54  ;;  %v3659_v9 = vadd.f32 %v3658_v30, %v3657_v5 }
 0x45c   :  { %v3673_v47 = vadd.f32 %v3672_v25, %v3671_v51  ;;  %v3521_v46 = vadd.f32 %v3520_v49, %v3519_v27  ;;  %v3535_v13 = vadd.f32 %v3534_v29, %v3533_v16  ;;  %v3687_v63 = vadd.f32 %v3686_v23, %v3685_v44  ;;  %v11789_v25 = vld [vmem:[#allocation170_spill] sm:$0xff]  ;;  %v11793_v23 = vld [vmem:[#allocation148_spill] sm:$0xff] }
 0x45d   :  { %v3701_v43 = vadd.f32 %v3700_v37, %v3699_v15  ;;  %v3549_v28 = vadd.f32 %v3548_v56, %v3547_v34  ;;  %v3563_v0 = vadd.f32 %v3562_v6, %v3561_v58  ;;  %v3618_v26 = vrot.slane %v3617_v12, 1  ;;  %v11790_v58 = vld [vmem:[#allocation138_spill] sm:$0xff] }
 0x45e   :  { %v3715_v61 = vadd.f32 %v3714_v48, %v3713_v18  ;;  %v9685_v40 = vadd.f32 %v9619_v57, %v11786_v62  ;;  %v9689_v50 = vadd.f32 %v9621_v19, %v11787_v24  ;;  %v9693_v30 = vadd.f32 %v9627_v36, %v11788_v10  ;;  %v11791_v36 = vld [vmem:[#allocation151_spill] sm:$0xff]  ;;  %v11805_v24 = vld [vmem:[#allocation9_spill] sm:$0xff] }
 0x45f   :  { %v9697_v8 = vadd.f32 %v9629_v20, %v11789_v25  ;;  %v3632_v35 = vrot.slane %v3631_v38, 1  ;;  %v3646_v54 = vrot.slane %v3645_v17, 1  ;;  %v3660_v5 = vrot.slane %v3659_v9, 1  ;;  %v11792_v20 = vld [vmem:[#allocation205_spill] sm:$0xff]  ;;  %v11806_v25 = vld [vmem:[#allocation212_spill] sm:$0xff] }
 0x460   :  { %v3674_v51 = vrot.slane %v3673_v47, 1  ;;  %v3577_v27 = vadd.f32 %v3576_v31, %v3575_v11  ;;  %v3591_v16 = vadd.f32 %v3590_v53, %v3589_v45  ;;  %v3688_v57 = vrot.slane %v3687_v63, 1  ;;  %v11796_v31 = vld [vmem:[#allocation206_spill] sm:$0xff] }
 0x461   :  { %v3702_v44 = vrot.slane %v3701_v43, 1  ;;  %v3605_v15 = vadd.f32 %v3604_v32, %v3603_v7  ;;  %v3619_v34 = vadd.f32 %v3618_v26, %v3617_v12  ;;  %v3716_v19 = vrot.slane %v3715_v61, 1  ;;  %v11795_v12 = vld [vmem:[#allocation218_spill] sm:$0xff]  ;;  %v11797_v32 = vld [vmem:[#allocation207_spill] sm:$0xff] }
 0x462   :  { %v3723_v60 = vadd.f32 %v9623_v22, %v11790_v58  ;;  %v9703_v18 = vadd.f32 %v9651_v2, %v11791_v36  ;;  %v9707_v1 = vadd.f32 %v9653_v14, %v11792_v20  ;;  %v3785_v11 = vmax.f32 %v9685_v40, %v9689_v50  ;;  %v11794_v14 = vld [vmem:[#allocation217_spill] sm:$0xff]  ;;  %v11802_v26 = vld [vmem:[#allocation210_spill] sm:$0xff]  ;;  %v11812_v20 = vld [vmem:[#allocation147_spill] sm:$0xff] }
 0x463   :  { %v3791_v45 = vmax.f32 %v9693_v30, %v9697_v8  ;;  %v3633_v7 = vadd.f32 %v3632_v35, %v3631_v38  ;;  %v3647_v59 = vadd.f32 %v3646_v54, %v3645_v17  ;;  %v3661_v42 = vadd.f32 %v3660_v5, %v3659_v9  ;;  %v11798_v17 = vld [vmem:[#allocation208_spill] sm:$0xff]  ;;  %v11807_v54 = vld [vmem:[#allocation181_spill] sm:$0xff]  ;;  %v11811_v58 = vld [vmem:[#allocation174_spill] sm:$0xff] }
 0x464   :  { %v3675_v49 = vadd.f32 %v3674_v51, %v3673_v47  ;;  %v3689_v29 = vadd.f32 %v3688_v57, %v3687_v63  ;;  %v3703_v22 = vadd.f32 %v3702_v44, %v3701_v43  ;;  %v9715_v2 = vadd.f32 %v9631_v33, %v11793_v23  ;;  %v11799_v47 = vld [vmem:[#allocation219_spill] sm:$0xff]  ;;  %v11800_v63 = vld [vmem:[#allocation209_spill] sm:$0xff]  ;;  %v11809_v44 = vld [vmem:[#allocation216_spill] sm:$0xff] }
 0x465   :  { %v3786_v37 = vmax.f32 %v3785_v11, %v3723_v60  ;;  %v3717_v56 = vadd.f32 %v3716_v19, %v3715_v61  ;;  %v3725_v6 = vadd.f32 %v9625_v21, %v11794_v14  ;;  %v9721_v48 = vadd.f32 %v9633_v4, %v11795_v12  ;;  %v11803_v61 = vld [vmem:[#allocation211_spill] sm:$0xff]  ;;  %v11810_v19 = vld [vmem:[#allocation146_spill] sm:$0xff] }
 0x466   :  { %v9725_v53 = vadd.f32 %v9655_v39, %v11796_v31  ;;  %v9729_v38 = vadd.f32 %v9659_v41, %v11797_v32  ;;  %v9733_v33 = vadd.f32 %v9661_v3, %v11798_v17  ;;  %v3792_v9 = vmax.f32 %v3791_v45, %v9715_v2  ;;  %v11801_v39 = vld [vmem:[#allocation5_spill] sm:$0xff]  ;;  %v11804_v3 = vld [vmem:[#allocation220_spill] sm:$0xff]  ;;  %v11808_v51 = vld [vmem:[#allocation215_spill] sm:$0xff] }
 0x467   :  { %v3797_v21 = vmax.f32 %v9703_v18, %v9707_v1  ;;  %v9740_v4 = vadd.f32 %v9657_v52, %v11799_v47  ;;  %v9744_v43 = vadd.f32 %v11801_v39, %v11800_v63  ;;  %v9747_v41 = vadd.f32 %v3507_v55, %v11802_v26  ;;  %v11813_v45 = vld [vmem:[#allocation163_spill] sm:$0xff] }
 0x468   :  { %v9750_v62 = vadd.f32 %v3521_v46, %v11803_v61  ;;  %v9754_v10 = vadd.f32 %v11805_v24, %v11804_v3  ;;  %v9757_v35 = vadd.f32 %v3535_v13, %v11806_v25  ;;  %v9760_v52 = vadd.f32 %v3549_v28, %v11807_v54  ;;  %v11818_v47 = vld [vmem:[#allocation175_spill] sm:$0xff] }
 0x469   :  { %v3787_v5 = vmax.f32 %v3786_v37, %v3725_v6  ;;  %v9763_v57 = vadd.f32 %v3563_v0, %v11808_v51  ;;  %v9766_v55 = vadd.f32 %v3577_v27, %v11809_v44  ;;  %v9769_v46 = vadd.f32 %v3619_v34, %v11810_v19  ;;  %v11814_v27 = vld [vmem:[#allocation134_spill] sm:$0xff]  ;;  %v11815_v34 = vld [vmem:[#allocation136_spill] sm:$0xff] }
 0x46a   :  { %v9772_v36 = vadd.f32 %v3633_v7, %v11811_v58  ;;  %v9775_v11 = vadd.f32 %v3591_v16, %v11812_v20  ;;  %v3793_v13 = vmax.f32 %v3792_v9, %v9721_v48  ;;  %v3798_v28 = vmax.f32 %v3797_v21, %v9725_v53  ;;  %v11816_v7 = vld [vmem:[#allocation160_spill] sm:$0xff]  ;;  %v11817_v9 = vld [vmem:[#allocation169_spill] sm:$0xff] }
 0x46b   :  { %v3803_v0 = vmax.f32 %v9729_v38, %v9733_v33  ;;  %v9782_v23 = vadd.f32 %v3605_v15, %v11813_v45  ;;  %v9785_v37 = vadd.f32 %v3675_v49, %v11814_v27  ;;  %v9788_v14 = vadd.f32 %v3689_v29, %v11815_v34 }
 0x46c   :  { %v3809_v16 = vmax.f32 %v9747_v41, %v9750_v62  ;;  %v9793_v12 = vadd.f32 %v3647_v59, %v11816_v7  ;;  %v3831_v31 = vsub.f32 %v9685_v40, %v3787_v5  ;;  %v3833_v32 = vsub.f32 %v9689_v50, %v3787_v5 }
 0x46d   :  { %v3835_v17 = vsub.f32 %v3723_v60, %v3787_v5  ;;  %v9798_v15 = vadd.f32 %v3661_v42, %v11817_v9  ;;  %v3815_v49 = vmax.f32 %v9763_v57, %v9766_v55  ;;  %v3821_v29 = vmax.f32 %v9769_v46, %v9772_v36  ;;  %v11819_v60 = vld [vmem:[#allocation176_spill] sm:$0xff] }
 0x46e   :  { %v3837_v21 = vsub.f32 %v3725_v6, %v3787_v5  ;;  %v9805_v63 = vadd.f32 %v3703_v22, %v11818_v47  ;;  %v3799_v59 = vmax.f32 %v3798_v28, %v9740_v4  ;;  %v3804_v40 = vmax.f32 %v3803_v0, %v9744_v43 }
 0x46f   :  { %v3839_v50 = vsub.f32 %v9693_v30, %v3793_v13  ;;  %v9811_v39 = vadd.f32 %v3717_v56, %v11819_v60  ;;  %v3810_v42 = vmax.f32 %v3809_v16, %v9757_v35  ;;  %v3827_v26 = vmax.f32 %v9785_v37, %v9788_v14 }
 0x470   :  { %v3841_v61 = vsub.f32 %v9697_v8, %v3793_v13  ;;  %v3843_v6 = vsub.f32 %v9715_v2, %v3793_v13  ;;  %v3896_v22 = vmul.f32 1.442695, %v3831_v31  ;;  %v3900_v3 = vmul.f32 1.442695, %v3833_v32 }
 0x471   :  { %v3904_v24 = vmul.f32 1.442695, %v3835_v17  ;;  %v3816_v25 = vmax.f32 %v3815_v49, %v9775_v11  ;;  %v3822_v54 = vmax.f32 %v3821_v29, %v9793_v12  ;;  %v3845_v30 = vsub.f32 %v9721_v48, %v3793_v13 }
 0x472   :  { %v3908_v56 = vmul.f32 1.442695, %v3837_v21  ;;  %v3805_v5 = vmax.f32 %v3804_v40, %v9754_v10  ;;  %v3847_v51 = vsub.f32 %v9703_v18, %v3799_v59  ;;  %5584 = vpow2.f32 %v3896_v22 }
 0x473   :  { %v3912_v44 = vmul.f32 1.442695, %v3839_v50  ;;  %v3828_v8 = vmax.f32 %v3827_v26, %v9805_v63  ;;  %v3849_v2 = vsub.f32 %v9707_v1, %v3799_v59  ;;  %5586 = vpow2.f32 %v3900_v3 }
 0x474   :  { %v3916_v19 = vmul.f32 1.442695, %v3841_v61  ;;  %v3811_v58 = vmax.f32 %v3810_v42, %v9760_v52  ;;  %v3851_v20 = vsub.f32 %v9725_v53, %v3799_v59  ;;  %5588 = vpow2.f32 %v3904_v24 }
 0x475   :  { %v3920_v28 = vmul.f32 1.442695, %v3843_v6  ;;  %v3817_v48 = vmax.f32 %v3816_v25, %v9782_v23  ;;  %v3853_v13 = vsub.f32 %v9740_v4, %v3799_v59  ;;  %5590 = vpow2.f32 %v3908_v56 }
 0x476   :  { %v3924_v18 = vmul.f32 1.442695, %v3845_v30  ;;  %v9830_v0 = vmax.f32 %v3822_v54, %v9798_v15  ;;  %v3855_v45 = vsub.f32 %v9729_v38, %v3805_v5  ;;  %5592 = vpow2.f32 %v3912_v44 }
 0x477   :  { %v3928_v1 = vmul.f32 1.442695, %v3847_v51  ;;  %v9834_v27 = vmax.f32 %v3828_v8, %v9811_v39  ;;  %v3857_v53 = vsub.f32 %v9733_v33, %v3805_v5  ;;  %5594 = vpow2.f32 %v3916_v19 }
 0x478   :  { %v3932_v34 = vmul.f32 1.442695, %v3849_v2  ;;  %v3859_v16 = vsub.f32 %v9744_v43, %v3805_v5  ;;  %v3861_v4 = vsub.f32 %v9754_v10, %v3805_v5  ;;  %5596 = vpow2.f32 %v3920_v28 }
 0x479   :  { %v3936_v7 = vmul.f32 1.442695, %v3851_v20  ;;  %v3863_v31 = vsub.f32 %v9747_v41, %v3811_v58  ;;  %v3865_v32 = vsub.f32 %v9750_v62, %v3811_v58  ;;  %5598 = vpow2.f32 %v3924_v18 }
 0x47a   :  { %v3940_v38 = vmul.f32 1.442695, %v3853_v13  ;;  %v3867_v17 = vsub.f32 %v9757_v35, %v3811_v58  ;;  %v3869_v9 = vsub.f32 %v9760_v52, %v3811_v58  ;;  %5600 = vpow2.f32 %v3928_v1 }
 0x47b   :  { %v3944_v33 = vmul.f32 1.442695, %v3855_v45  ;;  %v3871_v49 = vsub.f32 %v9763_v57, %v3817_v48  ;;  %v3873_v43 = vsub.f32 %v9766_v55, %v3817_v48  ;;  %5602 = vpow2.f32 %v3932_v34 }
 0x47c   :  { %v3948_v10 = vmul.f32 1.442695, %v3857_v53  ;;  %v3875_v29 = vsub.f32 %v9775_v11, %v3817_v48  ;;  %v3877_v41 = vsub.f32 %v9782_v23, %v3817_v48  ;;  %5604 = vpow2.f32 %v3936_v7 }
 0x47d   :  { %v3952_v62 = vmul.f32 1.442695, %v3859_v16  ;;  %v3879_v21 = vsub.f32 %v9769_v46, %v9830_v0  ;;  %v3881_v35 = vsub.f32 %v9772_v36, %v9830_v0  ;;  %5606 = vpow2.f32 %v3940_v38 }
 0x47e   :  { %v3956_v52 = vmul.f32 1.442695, %v3861_v4  ;;  %v3883_v57 = vsub.f32 %v9793_v12, %v9830_v0  ;;  %v3885_v55 = vsub.f32 %v9798_v15, %v9830_v0  ;;  %5608 = vpow2.f32 %v3944_v33 }
 0x47f   :  { %v3960_v11 = vmul.f32 1.442695, %v3863_v31  ;;  %v9855_v47 = vpop.eup %5584  ;;  %v3887_v23 = vsub.f32 %v9785_v37, %v9834_v27  ;;  %v3889_v46 = vsub.f32 %v9788_v14, %v9834_v27  ;;  %5610 = vpow2.f32 %v3948_v10 }
 0x480   :  { %v3964_v36 = vmul.f32 1.442695, %v3865_v32  ;;  %v9861_v59 = vpop.eup %5586  ;;  %v3891_v12 = vsub.f32 %v9805_v63, %v9834_v27  ;;  %v3893_v15 = vsub.f32 %v9811_v39, %v9834_v27  ;;  %5612 = vpow2.f32 %v3952_v62 }
 0x481   :  { %v3968_v40 = vmul.f32 1.442695, %v3867_v17  ;;  %v9867_v50 = vpop.eup %5588  ;;  %5614 = vpow2.f32 %v3956_v52  ;;  %v3972_v60 = vmul.f32 1.442695, %v3869_v9  ;;  %v3976_v37 = vmul.f32 1.442695, %v3871_v49 }
 0x482   :  { %v4092_v42 = vrot.slane %v9861_v59, 7  ;;  %v9870_v14 = vpop.eup %5590  ;;  %5616 = vpow2.f32 %v3960_v11  ;;  %v3980_v26 = vmul.f32 1.442695, %v3873_v43  ;;  %v3984_v61 = vmul.f32 1.442695, %v3875_v29 }
 0x483   :  { %v4094_v6 = vrot.slane %v9867_v50, 6  ;;  %v9873_v63 = vpop.eup %5592  ;;  %5618 = vpow2.f32 %v3964_v36  ;;  %v3988_v39 = vmul.f32 1.442695, %v3877_v41  ;;  %v4096_v3 = vrot.slane %v9870_v14, 5 }
 0x484   :  { %v4093_v22 = vsel %vm2123_vm1, %v4092_v42, %v9855_v47  ;;  %v9878_v24 = vpop.eup %5594  ;;  %5620 = vpow2.f32 %v3968_v40  ;;  %v3992_v25 = vmul.f32 1.442695, %v3879_v21  ;;  %v3996_v54 = vmul.f32 1.442695, %v3881_v35 }
 0x485   :  { %v4095_v30 = vsel %vm2126_vm2, %v4094_v6, %v4093_v22  ;;  %v9881_v56 = vpop.eup %5596  ;;  %5622 = vpow2.f32 %v3972_v60  ;;  %v4000_v5 = vmul.f32 1.442695, %v3883_v57  ;;  %v4104_v44 = vrot.slane %v9878_v24, 7 }
 0x486   :  { %v4097_v51 = vsel %vm2129_vm3, %v4096_v3, %v4095_v30  ;;  %v9885_v8 = vpop.eup %5598  ;;  %5624 = vpow2.f32 %v3976_v37  ;;  %v4004_v2 = vmul.f32 1.442695, %v3885_v55  ;;  %v4106_v19 = vrot.slane %v9881_v56, 6 }
 0x487   :  { %v4205_v58 = vsel %vm2237_vm4, %v4097_v51, 0.0  ;;  %v9889_v20 = vpop.eup %5600  ;;  %5626 = vpow2.f32 %v3980_v26  ;;  %v4105_v28 = vsel %vm2123_vm1, %v4104_v44, %v9873_v63  ;;  %v4108_v48 = vrot.slane %v9885_v8, 5 }
 0x488   :  { %v4206_v13 = vrot.slane %v4205_v58, 4  ;;  %v9894_v18 = vpop.eup %5602  ;;  %5628 = vpow2.f32 %v3984_v61  ;;  %v4008_v0 = vmul.f32 1.442695, %v3887_v23  ;;  %v4012_v45 = vmul.f32 1.442695, %v3889_v46 }
 0x489   :  { %v4107_v1 = vsel %vm2126_vm2, %v4106_v19, %v4105_v28  ;;  %v9897_v27 = vpop.eup %5604  ;;  %5630 = vpow2.f32 %v3988_v39  ;;  %v4116_v34 = vrot.slane %v9894_v18, 7  ;;  %v4016_v7 = vmul.f32 1.442695, %v3891_v12 }
 0x48a   :  { %v4109_v53 = vsel %vm2129_vm3, %v4108_v48, %v4107_v1  ;;  %v4207_v16 = vadd.f32 %v4206_v13, %v4205_v58  ;;  %v9901_v4 = vpop.eup %5606  ;;  %5632 = vpow2.f32 %v3992_v25  ;;  %v4118_v31 = vrot.slane %v9897_v27, 6 }
 0x48b   :  { %v4219_v32 = vsel %vm2237_vm4, %v4109_v53, 0.0  ;;  %v9905_v38 = vpop.eup %5608  ;;  %5634 = vpow2.f32 %v3996_v54  ;;  %v4117_v17 = vsel %vm2123_vm1, %v4116_v34, %v9889_v20  ;;  %v4120_v9 = vrot.slane %v9901_v4, 5 }
 0x48c   :  { %v4208_v33 = vrot.slane %v4207_v16, 2  ;;  %v9910_v49 = vpop.eup %5610  ;;  %5636 = vpow2.f32 %v4000_v5  ;;  %v4020_v43 = vmul.f32 1.442695, %v3893_v15  ;;  %v4119_v10 = vsel %vm2126_vm2, %v4118_v31, %v4117_v17 }
 0x48d   :  { %v4220_v29 = vrot.slane %v4219_v32, 4  ;;  %v9913_v41 = vpop.eup %5612  ;;  %5638 = vpow2.f32 %v4004_v2  ;;  %v4121_v62 = vsel %vm2129_vm3, %v4120_v9, %v4119_v10  ;;  %v4128_v21 = vrot.slane %v9910_v49, 7  ;;  %v11820_v2 = vld [vmem:[#allocation201_spill] sm:$0xff] }
 0x48e   :  { %v4209_v35 = vadd.f32 %v4208_v33, %v4207_v16  ;;  %v9917_v52 = vpop.eup %5614  ;;  %5640 = vpow2.f32 %v4008_v0  ;;  %v4130_v57 = vrot.slane %v9913_v41, 6  ;;  %v4233_v11 = vsel %vm2237_vm4, %v4121_v62, 0.0 }
 0x48f   :  { %v4221_v55 = vadd.f32 %v4220_v29, %v4219_v32  ;;  %v9921_v23 = vpop.eup %5616  ;;  %5642 = vpow2.f32 %v4012_v45  ;;  %v4129_v46 = vsel %vm2123_vm1, %v4128_v21, %v9905_v38  ;;  %v4132_v36 = vrot.slane %v9917_v52, 5 }
 0x490   :  { %v4210_v12 = vrot.slane %v4209_v35, 1  ;;  %v9926_v15 = vpop.eup %5618  ;;  %5644 = vpow2.f32 %v4016_v7  ;;  %v4131_v40 = vsel %vm2126_vm2, %v4130_v57, %v4129_v46  ;;  %v4234_v37 = vrot.slane %v4233_v11, 4 }
 0x491   :  { %v4222_v60 = vrot.slane %v4221_v55, 2  ;;  %v9929_v42 = vpop.eup %5620  ;;  %5646 = vpow2.f32 %v4020_v43  ;;  %v4133_v26 = vsel %vm2129_vm3, %v4132_v36, %v4131_v40  ;;  %v4140_v61 = vrot.slane %v9926_v15, 7 }
 0x492   :  { %v4211_v6 = vadd.f32 %v4210_v12, %v4209_v35  ;;  %v9933_v39 = vpop.eup %5622  ;;  %v4142_v22 = vrot.slane %v9929_v42, 6  ;;  %v4235_v25 = vadd.f32 %v4234_v37, %v4233_v11  ;;  %v4247_v54 = vsel %vm2237_vm4, %v4133_v26, 0.0 }
 0x493   :  { %v4223_v3 = vadd.f32 %v4222_v60, %v4221_v55  ;;  %v9937_v30 = vpop.eup %5624  ;;  %v4141_v5 = vsel %vm2123_vm1, %v4140_v61, %v9921_v23  ;;  %v4144_v51 = vrot.slane %v9933_v39, 5  ;;  %v4248_v44 = vrot.slane %v4247_v54, 4 }
 0x494   :  { %v4317_v19 = vrot.slane %v4211_v6, %v11820_v2  ;;  %v9943_v58 = vpop.eup %5626  ;;  %v4143_v28 = vsel %vm2126_vm2, %v4142_v22, %v4141_v5  ;;  %v4236_v13 = vrot.slane %v4235_v25, 2 }
 0x495   :  { %v4224_v48 = vrot.slane %v4223_v3, 1  ;;  %v9946_v0 = vpop.eup %5628  ;;  %v4145_v45 = vsel %vm2129_vm3, %v4144_v51, %v4143_v28  ;;  %v4152_v1 = vrot.slane %v9943_v58, 7  ;;  %v4249_v53 = vadd.f32 %v4248_v44, %v4247_v54 }
 0x496   :  { %5648 = vrcp.f32 %v4317_v19  ;;  %v9950_v34 = vpop.eup %5630  ;;  %v4154_v16 = vrot.slane %v9946_v0, 6  ;;  %v4237_v31 = vadd.f32 %v4236_v13, %v4235_v25  ;;  %v4261_v32 = vsel %vm2237_vm4, %v4145_v45, 0.0 }
 0x497   :  { %v4225_v7 = vadd.f32 %v4224_v48, %v4223_v3  ;;  %v9954_v17 = vpop.eup %5632  ;;  %v4153_v9 = vsel %vm2123_vm1, %v4152_v1, %v9937_v30  ;;  %v4156_v33 = vrot.slane %v9950_v34, 5  ;;  %v4250_v43 = vrot.slane %v4249_v53, 2 }
 0x498   :  { %v4262_v10 = vrot.slane %v4261_v32, 4  ;;  %v9959_v29 = vpop.eup %5634  ;;  %v4155_v62 = vsel %vm2126_vm2, %v4154_v16, %v4153_v9  ;;  %v4238_v21 = vrot.slane %v4237_v31, 1 }
 0x499   :  { %v4325_v35 = vrot.slane %v4225_v7, %v11820_v2  ;;  %v9963_v57 = vpop.eup %5636  ;;  %v4157_v55 = vsel %vm2129_vm3, %v4156_v33, %v4155_v62  ;;  %v4164_v11 = vrot.slane %v9959_v29, 7  ;;  %v4251_v46 = vadd.f32 %v4250_v43, %v4249_v53 }
 0x49a   :  { %v4263_v36 = vadd.f32 %v4262_v10, %v4261_v32  ;;  %v9967_v12 = vpop.eup %5638  ;;  %v4166_v40 = vrot.slane %v9963_v57, 6  ;;  %v4239_v60 = vadd.f32 %v4238_v21, %v4237_v31  ;;  %v4275_v37 = vsel %vm2237_vm4, %v4157_v55, 0.0 }
 0x49b   :  { %5650 = vrcp.f32 %v4325_v35  ;;  %v9971_v26 = vpop.eup %5640  ;;  %v4165_v61 = vsel %vm2123_vm1, %v4164_v11, %v9954_v17  ;;  %v4168_v6 = vrot.slane %v9967_v12, 5  ;;  %v4252_v22 = vrot.slane %v4251_v46, 1 }
 0x49c   :  { %v4264_v3 = vrot.slane %v4263_v36, 2  ;;  %v9976_v25 = vpop.eup %5642  ;;  %v4167_v54 = vsel %vm2126_vm2, %v4166_v40, %v4165_v61  ;;  %v4276_v5 = vrot.slane %v4275_v37, 4  ;;  %v4333_v51 = vrot.slane %v4239_v60, %v11820_v2 }
 0x49d   :  { %v9980_v44 = vpop.eup %5644  ;;  %v4169_v19 = vsel %vm2129_vm3, %v4168_v6, %v4167_v54  ;;  %v4176_v28 = vrot.slane %v9976_v25, 7  ;;  %v4253_v48 = vadd.f32 %v4252_v22, %v4251_v46 }
 0x49e   :  { %v4265_v13 = vadd.f32 %v4264_v3, %v4263_v36  ;;  %v9984_v45 = vpop.eup %5646  ;;  %v4178_v1 = vrot.slane %v9980_v44, 6  ;;  %v4277_v53 = vadd.f32 %v4276_v5, %v4275_v37  ;;  %v4289_v16 = vsel %vm2237_vm4, %v4169_v19, 0.0 }
 0x49f   :  { %5652 = vrcp.f32 %v4333_v51  ;;  %v4177_v7 = vsel %vm2123_vm1, %v4176_v28, %v9971_v26  ;;  %v4180_v31 = vrot.slane %v9984_v45, 5  ;;  %v4290_v9 = vrot.slane %v4289_v16, 4 }
 0x4a0   :  { %v4266_v32 = vrot.slane %v4265_v13, 1  ;;  %v4179_v33 = vsel %vm2126_vm2, %v4178_v1, %v4177_v7  ;;  %v4278_v43 = vrot.slane %v4277_v53, 2  ;;  %v4341_v10 = vrot.slane %v4253_v48, %v11820_v2 }
 0x4a1   :  { %v4181_v62 = vsel %vm2129_vm3, %v4180_v31, %v4179_v33  ;;  %v4291_v35 = vadd.f32 %v4290_v9, %v4289_v16 }
 0x4a2   :  { %v4267_v21 = vadd.f32 %v4266_v32, %v4265_v13  ;;  %v4279_v11 = vadd.f32 %v4278_v43, %v4277_v53  ;;  %v4303_v46 = vsel %vm2237_vm4, %v4181_v62, 0.0  ;;  %5654 = vrcp.f32 %v4341_v10  ;;  %v11823_v62 = vld [vmem:[#allocation15_spill] sm:$0xff] }
 0x4a3   :  { %v5649_v55 = vpop.eup %5648  ;;  %v4292_v36 = vrot.slane %v4291_v35, 2  ;;  %v4304_v40 = vrot.slane %v4303_v46, 4 }
 0x4a4   :  { %v4349_v60 = vrot.slane %v4267_v21, %v11820_v2  ;;  %v4377_v37 = vmul.f32 %v5649_v55, %v9855_v47  ;;  %v4280_v61 = vrot.slane %v4279_v11, 1  ;;  %v4379_v6 = vmul.f32 %v5649_v55, %v9861_v59  ;;  %v11821_v59 = vld [vmem:[#allocation7_spill] sm:$0xff] }
 0x4a5   :  { %v4381_v22 = vmul.f32 %v5649_v55, %v9867_v50  ;;  %v4383_v3 = vmul.f32 %v5649_v55, %v9870_v14  ;;  %v4293_v54 = vadd.f32 %v4292_v36, %v4291_v35  ;;  %v4305_v5 = vadd.f32 %v4304_v40, %v4303_v46  ;;  %v11822_v50 = vld [vmem:[#allocation11_spill] sm:$0xff] }
 0x4a6   :  { %5656 = vrcp.f32 %v4349_v60  ;;  %v4461_v51 = vrot.slane %v4377_v37, %v11820_v2  ;;  %v4281_v19 = vadd.f32 %v4280_v61, %v4279_v11  ;;  %v4469_v28 = vrot.slane %v4379_v6, %v11820_v2  ;;  %v11824_v36 = vld [vmem:[#allocation19_spill] sm:$0xff] }
 0x4a7   :  { %v4477_v48 = vrot.slane %v4381_v22, %v11820_v2  ;;  %v4485_v13 = vrot.slane %v4383_v3, %v11820_v2  ;;  %v4294_v1 = vrot.slane %v4293_v54, 1  ;;  %v4306_v53 = vrot.slane %v4305_v5, 2  ;;  %v11825_v22 = vld [vmem:[#allocation23_spill] sm:$0xff] }
 0x4a8   :  { %v5651_v47 = vpop.eup %5650  ;;  %v10005_v16 = vmul.f32 %v4461_v51, %v11821_v59  ;;  %v10008_v14 = vmul.f32 %v4461_v51, %v11822_v50  ;;  %v4357_v7 = vrot.slane %v4281_v19, %v11820_v2  ;;  %v10016_v21 = vmul.f32 %v4469_v28, %v11823_v62  ;;  %v11829_v59 = vld [vmem:[#allocation39_spill] sm:$0xff] }
 0x4a9   :  { %v4387_v31 = vmul.f32 %v5651_v47, %v9873_v63  ;;  %v4389_v32 = vmul.f32 %v5651_v47, %v9878_v24  ;;  %v4391_v9 = vmul.f32 %v5651_v47, %v9881_v56  ;;  %v4295_v33 = vadd.f32 %v4294_v1, %v4293_v54  ;;  %v11826_v54 = vld [vmem:[#allocation27_spill] sm:$0xff] }
 0x4aa   :  { %v4307_v43 = vadd.f32 %v4306_v53, %v4305_v5  ;;  %v4393_v10 = vmul.f32 %v5651_v47, %v9885_v8  ;;  %5658 = vrcp.f32 %v4357_v7  ;;  %v10024_v40 = vmul.f32 %v4469_v28, %v11824_v36  ;;  %v11828_v1 = vld [vmem:[#allocation35_spill] sm:$0xff] }
 0x4ab   :  { %v4493_v35 = vrot.slane %v4387_v31, %v11820_v2  ;;  %v4501_v55 = vrot.slane %v4389_v32, %v11820_v2  ;;  %v4509_v11 = vrot.slane %v4391_v9, %v11820_v2  ;;  %v4365_v24 = vrot.slane %v4295_v33, %v11820_v2  ;;  %v11830_v9 = vld [vmem:[#allocation43_spill] sm:$0xff] }
 0x4ac   :  { %v5653_v46 = vpop.eup %5652  ;;  %v4308_v63 = vrot.slane %v4307_v43, 1  ;;  %v4517_v56 = vrot.slane %v4393_v10, %v11820_v2  ;;  %v10031_v3 = vmul.f32 %v4477_v48, %v11825_v22  ;;  %v10034_v5 = vmul.f32 %v4477_v48, %v11826_v54  ;;  %v11836_v22 = vld [vmem:[#allocation67_spill] sm:$0xff] }
 0x4ad   :  { %v4397_v8 = vmul.f32 %v5653_v46, %v9889_v20  ;;  %v4399_v60 = vmul.f32 %v5653_v46, %v9894_v18  ;;  %v4401_v37 = vmul.f32 %v5653_v46, %v9897_v27  ;;  %v4403_v61 = vmul.f32 %v5653_v46, %v9901_v4  ;;  %v11827_v4 = vld [vmem:[#allocation31_spill] sm:$0xff] }
 0x4ae   :  { %v4309_v6 = vadd.f32 %v4308_v63, %v4307_v43  ;;  %5660 = vrcp.f32 %v4365_v24  ;;  %v10042_v47 = vmul.f32 %v4485_v13, %v11827_v4  ;;  %v10045_v53 = vmul.f32 %v4485_v13, %v11828_v1  ;;  %v11831_v43 = vld [vmem:[#allocation47_spill] sm:$0xff] }
 0x4af   :  { %v4525_v51 = vrot.slane %v4397_v8, %v11820_v2  ;;  %v4533_v19 = vrot.slane %v4399_v60, %v11820_v2  ;;  %v4541_v20 = vrot.slane %v4401_v37, %v11820_v2  ;;  %v4549_v18 = vrot.slane %v4403_v61, %v11820_v2  ;;  %v5655_v28 = vpop.eup %5654  ;;  %v11832_v13 = vld [vmem:[#allocation51_spill] sm:$0xff] }
 0x4b0   :  { %v4373_v27 = vrot.slane %v4309_v6, %v11820_v2  ;;  %v10048_v48 = vmul.f32 %v4493_v35, %v11829_v59  ;;  %v4407_v50 = vmul.f32 %v5655_v28, %v9905_v38  ;;  %v4409_v7 = vmul.f32 %v5655_v28, %v9910_v49  ;;  %v11833_v8 = vld [vmem:[#allocation55_spill] sm:$0xff] }
 0x4b1   :  { %v4411_v31 = vmul.f32 %v5655_v28, %v9913_v41  ;;  %v4413_v32 = vmul.f32 %v5655_v28, %v9917_v52  ;;  %v10055_v33 = vmul.f32 %v4493_v35, %v11830_v9  ;;  %v10058_v10 = vmul.f32 %v4501_v55, %v11831_v43  ;;  %v11834_v60 = vld [vmem:[#allocation59_spill] sm:$0xff]  ;;  %v11843_v9 = vld [vmem:[#allocation92_spill] sm:$0xff] }
 0x4b2   :  { %5662 = vrcp.f32 %v4373_v27  ;;  %v10061_v62 = vmul.f32 %v4501_v55, %v11832_v13  ;;  %v4557_v63 = vrot.slane %v4407_v50, %v11820_v2  ;;  %v4565_v38 = vrot.slane %v4409_v7, %v11820_v2  ;;  %v11835_v61 = vld [vmem:[#allocation63_spill] sm:$0xff]  ;;  %v11845_v13 = vld [vmem:[#allocation98_spill] sm:$0xff] }
 0x4b3   :  { %v5657_v46 = vpop.eup %5656  ;;  %v4573_v49 = vrot.slane %v4411_v31, %v11820_v2  ;;  %v4581_v41 = vrot.slane %v4413_v32, %v11820_v2  ;;  %v10072_v55 = vmul.f32 %v4509_v11, %v11833_v8  ;;  %v10075_v37 = vmul.f32 %v4509_v11, %v11834_v60  ;;  %v11837_v28 = vld [vmem:[#allocation71_spill] sm:$0xff]  ;;  %v11849_v8 = vld [vmem:[#allocation106_spill] sm:$0xff] }
 0x4b4   :  { %v4417_v52 = vmul.f32 %v5657_v46, %v9921_v23  ;;  %v4419_v35 = vmul.f32 %v5657_v46, %v9926_v15  ;;  %v4421_v24 = vmul.f32 %v5657_v46, %v9929_v42  ;;  %v4423_v36 = vmul.f32 %v5657_v46, %v9933_v39  ;;  %v11838_v4 = vld [vmem:[#allocation75_spill] sm:$0xff] }
 0x4b5   :  { %v10078_v6 = vmul.f32 %v4517_v56, %v11835_v61  ;;  %v10081_v54 = vmul.f32 %v4517_v56, %v11836_v22  ;;  %v10088_v27 = vmul.f32 %v4525_v51, %v11837_v28  ;;  %v10091_v11 = vmul.f32 %v4525_v51, %v11838_v4  ;;  %v11839_v1 = vld [vmem:[#allocation79_spill] sm:$0xff]  ;;  %v11851_v61 = vld [vmem:[#allocation110_spill] sm:$0xff] }
 0x4b6   :  { %v4589_v23 = vrot.slane %v4417_v52, %v11820_v2  ;;  %v4597_v15 = vrot.slane %v4419_v35, %v11820_v2  ;;  %v4605_v42 = vrot.slane %v4421_v24, %v11820_v2  ;;  %v4613_v39 = vrot.slane %v4423_v36, %v11820_v2  ;;  %v11840_v50 = vld [vmem:[#allocation83_spill] sm:$0xff]  ;;  %v11847_v52 = vld [vmem:[#allocation102_spill] sm:$0xff] }
 0x4b7   :  { %v10094_v59 = vmul.f32 %v4533_v19, %v11839_v1  ;;  %v10097_v56 = vmul.f32 %v4533_v19, %v11840_v50  ;;  %v5659_v7 = vpop.eup %5658  ;;  %v11841_v31 = vld [vmem:[#allocation87_spill] sm:$0xff]  ;;  %v10103_v43 = vmul.f32 %v4541_v20, %v11843_v9  ;;  %v10106_v46 = vmul.f32 %v4549_v18, %v11845_v13  ;;  %v11855_v4 = vld [vmem:[#allocation118_spill] sm:$0xff]  ;;  %v11859_v13 = vld [vmem:[#allocation125_spill] sm:$0xff] }
 0x4b8   :  { %v10100_v32 = vmul.f32 %v4541_v20, %v11841_v31  ;;  %v10109_v35 = vmul.f32 %v4549_v18, %v11847_v52  ;;  %v4427_v51 = vmul.f32 %v5659_v7, %v9937_v30  ;;  %v4429_v24 = vmul.f32 %v5659_v7, %v9943_v58  ;;  %v11853_v22 = vld [vmem:[#allocation115_spill] sm:$0xff] }
 0x4b9   :  { %11844 = vst [vmem:[#allocation17_spill] sm:$0xff] %v10103_v43  ;;  %11846 = vst [vmem:[#allocation21_spill] sm:$0xff] %v10106_v46  ;;  %v4431_v19 = vmul.f32 %v5659_v7, %v9946_v0  ;;  %v4433_v36 = vmul.f32 %v5659_v7, %v9950_v34  ;;  %v10116_v60 = vmul.f32 %v4557_v63, %v11849_v8  ;;  %v11857_v9 = vld [vmem:[#allocation91_spill] sm:$0xff]  ;;  %v11898_v43 = vld [vmem:[#allocation128_spill] sm:$0xff] }
 0x4ba   :  { %11842 = vst [vmem:[#allocation13_spill] sm:$0xff] %v10100_v32  ;;  %11848 = vst [vmem:[#allocation25_spill] sm:$0xff] %v10109_v35  ;;  %v10119_v20 = vmul.f32 %v4557_v63, %v11851_v61  ;;  %v10122_v28 = vmul.f32 %v4565_v38, %v11853_v22  ;;  %v10125_v18 = vmul.f32 %v4565_v38, %v11855_v4  ;;  %v11865_v61 = vld [vmem:[#allocation8_spill] sm:$0xff]  ;;  %v11894_v35 = vld [vmem:[#allocation111_spill] sm:$0xff] }
 0x4bb   :  { %11850 = vst [vmem:[#allocation29_spill] sm:$0xff] %v10116_v60  ;;  %v5661_v1 = vpop.eup %5660  ;;  %v4621_v30 = vrot.slane %v4427_v51, %v11820_v2  ;;  %v4629_v58 = vrot.slane %v4429_v24, %v11820_v2  ;;  %v4637_v0 = vrot.slane %v4431_v19, %v11820_v2  ;;  %v4645_v34 = vrot.slane %v4433_v36, %v11820_v2  ;;  %v11861_v51 = vld [vmem:[#allocation133_spill] sm:$0xff]  ;;  %v11892_v60 = vld [vmem:[#allocation103_spill] sm:$0xff]  ;;  %v11900_v32 = vld [vmem:[#allocation182_spill] sm:$0xff] }
 0x4bc   :  { %11852 = vst [vmem:[#allocation33_spill] sm:$0xff] %v10119_v20  ;;  %11854 = vst [vmem:[#allocation37_spill] sm:$0xff] %v10122_v28  ;;  %v4437_v50 = vmul.f32 %v5661_v1, %v9954_v17  ;;  %v4439_v63 = vmul.f32 %v5661_v1, %v9959_v29  ;;  %v4441_v7 = vmul.f32 %v5661_v1, %v9963_v57  ;;  %v11863_v19 = vld [vmem:[#allocation141_spill] sm:$0xff]  ;;  %v11888_v28 = vld [vmem:[#allocation84_spill] sm:$0xff] }
 0x4bd   :  { %11856 = vst [vmem:[#allocation41_spill] sm:$0xff] %v10125_v18  ;;  %v4443_v31 = vmul.f32 %v5661_v1, %v9967_v12  ;;  %v10136_v38 = vmul.f32 %v4573_v49, %v11857_v9  ;;  %v10139_v52 = vmul.f32 %v4573_v49, %v11859_v13  ;;  %v10142_v24 = vmul.f32 %v4581_v41, %v11861_v51  ;;  %v11867_v49 = vld [vmem:[#allocation12_spill] sm:$0xff]  ;;  %v11890_v20 = vld [vmem:[#allocation93_spill] sm:$0xff]  ;;  %v11896_v46 = vld [vmem:[#allocation123_spill] sm:$0xff] }
 0x4be   :  { %v10145_v8 = vmul.f32 %v4581_v41, %v11863_v19  ;;  %v4653_v17 = vrot.slane %v4437_v50, %v11820_v2  ;;  %v4661_v29 = vrot.slane %v4439_v63, %v11820_v2  ;;  %v4669_v57 = vrot.slane %v4441_v7, %v11820_v2  ;;  %v11869_v1 = vld [vmem:[#allocation16_spill] sm:$0xff] }
 0x4bf   :  { %11858 = vst [vmem:[#allocation45_spill] sm:$0xff] %v10136_v38  ;;  %11860 = vst [vmem:[#allocation49_spill] sm:$0xff] %v10139_v52  ;;  %v4677_v12 = vrot.slane %v4443_v31, %v11820_v2  ;;  %v5663_v36 = vpop.eup %5662  ;;  %v10152_v22 = vmul.f32 %v4589_v23, %v11865_v61  ;;  %v10155_v4 = vmul.f32 %v4589_v23, %v11867_v49  ;;  %v11871_v41 = vld [vmem:[#allocation20_spill] sm:$0xff] }
 0x4c0   :  { %11862 = vst [vmem:[#allocation53_spill] sm:$0xff] %v10142_v24  ;;  %11864 = vst [vmem:[#allocation57_spill] sm:$0xff] %v10145_v8  ;;  %v10158_v9 = vmul.f32 %v4597_v15, %v11869_v1  ;;  %v10161_v13 = vmul.f32 %v4597_v15, %v11871_v41  ;;  %v4447_v50 = vmul.f32 %v5663_v36, %v9971_v26  ;;  %v11873_v51 = vld [vmem:[#allocation24_spill] sm:$0xff] }
 0x4c1   :  { %11866 = vst [vmem:[#allocation61_spill] sm:$0xff] %v10152_v22  ;;  %11868 = vst [vmem:[#allocation65_spill] sm:$0xff] %v10155_v4  ;;  %v4449_v63 = vmul.f32 %v5663_v36, %v9976_v25  ;;  %v4451_v7 = vmul.f32 %v5663_v36, %v9980_v44  ;;  %v4453_v31 = vmul.f32 %v5663_v36, %v9984_v45  ;;  %v11874_v61 = vld [vmem:[#allocation28_spill] sm:$0xff] }
 0x4c2   :  { %11870 = vst [vmem:[#allocation69_spill] sm:$0xff] %v10158_v9  ;;  %11872 = vst [vmem:[#allocation73_spill] sm:$0xff] %v10161_v13  ;;  %v4783_v19 = vmul.f32 %v4605_v42, %v11873_v51  ;;  %v4785_v22 = vmul.f32 %v4605_v42, %v11874_v61  ;;  %v11875_v23 = vld [vmem:[#allocation32_spill] sm:$0xff]  ;;  %v4685_v9 = vrot.slane %v4447_v50, %v11820_v2 }
 0x4c3   :  { %v4787_v49 = vmul.f32 %v4613_v39, %v11875_v23  ;;  %v11876_v4 = vld [vmem:[#allocation36_spill] sm:$0xff]  ;;  %v4693_v15 = vrot.slane %v4449_v63, %v11820_v2  ;;  %v4701_v26 = vrot.slane %v4451_v7, %v11820_v2  ;;  %v4709_v25 = vrot.slane %v4453_v31, %v11820_v2 }
 0x4c4   :  { %v4789_v1 = vmul.f32 %v4613_v39, %v11876_v4  ;;  %v11877_v41 = vld [vmem:[#allocation40_spill] sm:$0xff] }
 0x4c5   :  { %v4791_v44 = vmul.f32 %v4621_v30, %v11877_v41  ;;  %v11878_v13 = vld [vmem:[#allocation44_spill] sm:$0xff] }
 0x4c6   :  { %v4793_v45 = vmul.f32 %v4621_v30, %v11878_v13  ;;  %v11879_v36 = vld [vmem:[#allocation48_spill] sm:$0xff]  ;;  %v4813_v30 = vmul.f32 %v4661_v29, %v11888_v28  ;;  %v4833_v28 = vmul.f32 %v4701_v26, %v11898_v43  ;;  %v4915_v43 = vadd.f32 %v10075_v37, %v10034_v5  ;;  %v11904_v37 = vld [vmem:[#allocation25_spill] sm:$0xff] }
 0x4c7   :  { %v4795_v51 = vmul.f32 %v4629_v58, %v11879_v36  ;;  %v11880_v8 = vld [vmem:[#allocation52_spill] sm:$0xff] }
 0x4c8   :  { %v4797_v42 = vmul.f32 %v4629_v58, %v11880_v8  ;;  %v11881_v61 = vld [vmem:[#allocation56_spill] sm:$0xff]  ;;  %v4817_v58 = vmul.f32 %v4669_v57, %v11890_v20  ;;  %v11891_v8 = vld [vmem:[#allocation99_spill] sm:$0xff]  ;;  %v4837_v20 = vmul.f32 %v4709_v25, %v11900_v32  ;;  %v4929_v32 = vadd.f32 %v10078_v6, %v10042_v47  ;;  %v11905_v47 = vld [vmem:[#allocation29_spill] sm:$0xff] }
 0x4c9   :  { %v4799_v23 = vmul.f32 %v4637_v0, %v11881_v61  ;;  %v11882_v24 = vld [vmem:[#allocation60_spill] sm:$0xff]  ;;  %v4819_v61 = vmul.f32 %v4677_v12, %v11891_v8  ;;  %v11910_v8 = vld [vmem:[#allocation49_spill] sm:$0xff] }
 0x4ca   :  { %v4801_v39 = vmul.f32 %v4637_v0, %v11882_v24  ;;  %v11883_v4 = vld [vmem:[#allocation64_spill] sm:$0xff]  ;;  %v4821_v0 = vmul.f32 %v4677_v12, %v11892_v60  ;;  %v11893_v24 = vld [vmem:[#allocation107_spill] sm:$0xff]  ;;  %v4859_v60 = vadd.f32 %v10055_v33, %v10008_v14  ;;  %v4901_v12 = vadd.f32 %v10072_v55, %v10031_v3  ;;  %v11901_v33 = vld [vmem:[#allocation13_spill] sm:$0xff] }
 0x4cb   :  { %v4803_v50 = vmul.f32 %v4645_v34, %v11883_v4  ;;  %v11884_v52 = vld [vmem:[#allocation68_spill] sm:$0xff]  ;;  %v4823_v4 = vmul.f32 %v4685_v9, %v11893_v24  ;;  %v11902_v3 = vld [vmem:[#allocation17_spill] sm:$0xff] }
 0x4cc   :  { %v4805_v63 = vmul.f32 %v4645_v34, %v11884_v52  ;;  %v11885_v38 = vld [vmem:[#allocation72_spill] sm:$0xff]  ;;  %v4825_v34 = vmul.f32 %v4685_v9, %v11894_v35  ;;  %v11895_v52 = vld [vmem:[#allocation117_spill] sm:$0xff]  ;;  %v4873_v35 = vadd.f32 %v10058_v10, %v10016_v21  ;;  %v4902_v10 = vadd.f32 %v4901_v12, %v11901_v33 }
 0x4cd   :  { %v4807_v7 = vmul.f32 %v4653_v17, %v11885_v38  ;;  %v11886_v18 = vld [vmem:[#allocation76_spill] sm:$0xff]  ;;  %v4827_v38 = vmul.f32 %v4693_v15, %v11895_v52  ;;  %v11903_v55 = vld [vmem:[#allocation21_spill] sm:$0xff] }
 0x4ce   :  { %v4809_v2 = vmul.f32 %v4653_v17, %v11886_v18  ;;  %v11887_v31 = vld [vmem:[#allocation80_spill] sm:$0xff]  ;;  %v4829_v18 = vmul.f32 %v4693_v15, %v11896_v46  ;;  %v11897_v17 = vld [vmem:[#allocation127_spill] sm:$0xff]  ;;  %v4887_v46 = vadd.f32 %v10061_v62, %v10024_v40  ;;  %v4874_v21 = vadd.f32 %v4873_v35, %v10094_v59  ;;  %v11906_v15 = vld [vmem:[#allocation33_spill] sm:$0xff] }
 0x4cf   :  { %v4811_v41 = vmul.f32 %v4661_v29, %v11887_v31  ;;  %v11889_v13 = vld [vmem:[#allocation88_spill] sm:$0xff]  ;;  %v4831_v31 = vmul.f32 %v4701_v26, %v11897_v17  ;;  %v11899_v29 = vld [vmem:[#allocation143_spill] sm:$0xff]  ;;  %v4916_v62 = vadd.f32 %v4915_v43, %v11902_v3  ;;  %v4930_v5 = vadd.f32 %v4929_v32, %v11903_v55  ;;  %v11908_v26 = vld [vmem:[#allocation41_spill] sm:$0xff] }
 0x4d0   :  { %v4815_v36 = vmul.f32 %v4669_v57, %v11889_v13  ;;  %v4835_v13 = vmul.f32 %v4709_v25, %v11899_v29  ;;  %v4845_v57 = vadd.f32 %v10048_v48, %v10005_v16  ;;  %v4943_v16 = vadd.f32 %v10081_v54, %v10045_v53  ;;  %v11907_v54 = vld [vmem:[#allocation37_spill] sm:$0xff] }
 0x4d1   :  { %v4860_v48 = vadd.f32 %v4859_v60, %v10091_v11  ;;  %v4888_v40 = vadd.f32 %v4887_v46, %v10097_v56  ;;  %v11909_v25 = vld [vmem:[#allocation45_spill] sm:$0xff]  ;;  %v4917_v56 = vadd.f32 %v4916_v62, %v11910_v8 }
 0x4d2   :  { %v4846_v14 = vadd.f32 %v4845_v57, %v10088_v27  ;;  %v4944_v9 = vadd.f32 %v4943_v16, %v11904_v37  ;;  %v4875_v27 = vadd.f32 %v4874_v21, %v11907_v54  ;;  %v4903_v59 = vadd.f32 %v4902_v10, %v11909_v25  ;;  %v11911_v24 = vld [vmem:[#allocation53_spill] sm:$0xff] }
 0x4d3   :  { %v4861_v53 = vadd.f32 %v4860_v48, %v11906_v15  ;;  %v4889_v11 = vadd.f32 %v4888_v40, %v11908_v26  ;;  %v4931_v52 = vadd.f32 %v4930_v5, %v11911_v24  ;;  %v11912_v17 = vld [vmem:[#allocation57_spill] sm:$0xff]  ;;  %v4918_v48 = vadd.f32 %v4917_v56, %v4785_v22 }
 0x4d4   :  { %v4847_v6 = vadd.f32 %v4846_v14, %v11905_v47  ;;  %v4945_v29 = vadd.f32 %v4944_v9, %v11912_v17  ;;  %v11913_v57 = vld [vmem:[#allocation61_spill] sm:$0xff]  ;;  %v4904_v14 = vadd.f32 %v4903_v59, %v4783_v19 }
 0x4d5   :  { %v11914_v35 = vld [vmem:[#allocation65_spill] sm:$0xff]  ;;  %v4932_v21 = vadd.f32 %v4931_v52, %v4787_v49  ;;  %v4919_v5 = vadd.f32 %v4918_v48, %v4801_v39 }
 0x4d6   :  { %v4848_v60 = vadd.f32 %v4847_v6, %v11913_v57  ;;  %v4862_v46 = vadd.f32 %v4861_v53, %v11914_v35  ;;  %v11915_v12 = vld [vmem:[#allocation69_spill] sm:$0xff]  ;;  %v4946_v40 = vadd.f32 %v4945_v29, %v4789_v1  ;;  %v4905_v55 = vadd.f32 %v4904_v14, %v4799_v23 }
 0x4d7   :  { %v4876_v43 = vadd.f32 %v4875_v27, %v11915_v12  ;;  %v11916_v32 = vld [vmem:[#allocation73_spill] sm:$0xff]  ;;  %v4933_v37 = vadd.f32 %v4932_v21, %v4803_v50  ;;  %v4920_v27 = vadd.f32 %v4919_v5, %v4817_v58  ;;  %v11918_v50 = vld [vmem:[#allocation119_spill] sm:$0xff] }
 0x4d8   :  { %v4890_v16 = vadd.f32 %v4889_v11, %v11916_v32  ;;  %v4849_v33 = vadd.f32 %v4848_v60, %v4791_v44  ;;  %v4863_v10 = vadd.f32 %v4862_v46, %v4793_v45  ;;  %v4947_v9 = vadd.f32 %v4946_v40, %v4805_v63  ;;  %v11917_v23 = vld [vmem:[#allocation113_spill] sm:$0xff] }
 0x4d9   :  { %v4877_v3 = vadd.f32 %v4876_v43, %v4795_v51  ;;  %v4906_v54 = vadd.f32 %v4905_v55, %v4815_v36  ;;  %v4934_v26 = vadd.f32 %v4933_v37, %v4819_v61  ;;  %v4921_v45 = vadd.f32 %v4920_v27, %v4833_v28  ;;  %v11921_v36 = vld [vmem:[#allocation132_spill] sm:$0xff]  ;;  %v11922_v61 = vld [vmem:[#allocation130_spill] sm:$0xff] }
 0x4da   :  { %v4891_v62 = vadd.f32 %v4890_v16, %v4797_v42  ;;  %v4850_v47 = vadd.f32 %v4849_v33, %v4807_v7  ;;  %v4864_v6 = vadd.f32 %v4863_v10, %v4809_v2  ;;  %v4948_v11 = vadd.f32 %v4947_v9, %v4821_v0  ;;  %v11919_v7 = vld [vmem:[#allocation122_spill] sm:$0xff] }
 0x4db   :  { %v4878_v15 = vadd.f32 %v4877_v3, %v4811_v41  ;;  %v4907_v44 = vadd.f32 %v4906_v54, %v4831_v31  ;;  %v4935_v51 = vadd.f32 %v4934_v26, %v4835_v13  ;;  %v11920_v41 = vld [vmem:[#allocation94_spill] sm:$0xff]  ;;  %v10251_v0 = vadd.f32 %v4921_v45, %v11922_v61 }
 0x4dc   :  { %v4892_v53 = vadd.f32 %v4891_v62, %v4813_v30  ;;  %v4851_v19 = vadd.f32 %v4850_v47, %v4823_v4  ;;  %v4865_v22 = vadd.f32 %v4864_v6, %v4825_v34  ;;  %v4949_v42 = vadd.f32 %v4948_v11, %v4837_v20  ;;  %v11923_v4 = vld [vmem:[#allocation145_spill] sm:$0xff] }
 0x4dd   :  { %v4879_v49 = vadd.f32 %v4878_v15, %v4827_v38  ;;  %v10248_v58 = vadd.f32 %v4907_v44, %v11921_v36  ;;  %v10254_v34 = vadd.f32 %v4935_v51, %v11923_v4  ;;  %v11924_v38 = vld [vmem:[#allocation149_spill] sm:$0xff]  ;;  %v4977_v59 = vmul.f32 %v10251_v0, %v10251_v0 }
 0x4de   :  { %v4893_v1 = vadd.f32 %v4892_v53, %v4829_v18  ;;  %v10236_v39 = vadd.f32 %v4851_v19, %v11917_v23  ;;  %v10239_v63 = vadd.f32 %v4865_v22, %v11918_v50  ;;  %v10257_v18 = vadd.f32 %v4949_v42, %v11924_v38 }
 0x4df   :  { %v10242_v2 = vadd.f32 %v4879_v49, %v11919_v7  ;;  %v4975_v25 = vmul.f32 %v10248_v58, %v10248_v58  ;;  %v4979_v8 = vmul.f32 %v10254_v34, %v10254_v34 }
 0x4e0   :  { %v10245_v30 = vadd.f32 %v4893_v1, %v11920_v41  ;;  %v4967_v31 = vmul.f32 %v10236_v39, %v10236_v39  ;;  %v4969_v28 = vmul.f32 %v10239_v63, %v10239_v63  ;;  %v4981_v56 = vmul.f32 %v10257_v18, %v10257_v18 }
 0x4e1   :  { %v4971_v13 = vmul.f32 %v10242_v2, %v10242_v2  ;;  %v5017_v17 = vadd.f32 %v4977_v59, %v4975_v25 }
 0x4e2   :  { %v4973_v20 = vmul.f32 %v10245_v30, %v10245_v30  ;;  %v4989_v24 = vadd.f32 %v4969_v28, %v4967_v31  ;;  %v5031_v29 = vadd.f32 %v4981_v56, %v4979_v8 }
 0x4e3   :  { %v5018_v35 = vrot.slane %v5017_v17, 4 }
 0x4e4   :  { %v5003_v52 = vadd.f32 %v4973_v20, %v4971_v13  ;;  %v4990_v57 = vrot.slane %v4989_v24, 4  ;;  %v5032_v46 = vrot.slane %v5031_v29, 4 }
 0x4e5   :  { %v5019_v32 = vadd.f32 %v5018_v35, %v5017_v17 }
 0x4e6   :  { %v5004_v60 = vrot.slane %v5003_v52, 4  ;;  %v4991_v12 = vadd.f32 %v4990_v57, %v4989_v24  ;;  %v5033_v16 = vadd.f32 %v5032_v46, %v5031_v29 }
 0x4e7   :  { %v5020_v21 = vrot.slane %v5019_v32, 2 }
 0x4e8   :  { %v5005_v43 = vadd.f32 %v5004_v60, %v5003_v52  ;;  %v4992_v14 = vrot.slane %v4991_v12, 2  ;;  %v5034_v40 = vrot.slane %v5033_v16, 2 }
 0x4e9   :  { %v5021_v3 = vadd.f32 %v5020_v21, %v5019_v32 }
 0x4ea   :  { %v5006_v48 = vrot.slane %v5005_v43, 2  ;;  %v4993_v33 = vadd.f32 %v4992_v14, %v4991_v12  ;;  %v5035_v62 = vadd.f32 %v5034_v40, %v5033_v16 }
 0x4eb   :  { %v5022_v37 = vrot.slane %v5021_v3, 1 }
 0x4ec   :  { %v5007_v10 = vadd.f32 %v5006_v48, %v5005_v43  ;;  %v4994_v55 = vrot.slane %v4993_v33, 1  ;;  %v5036_v9 = vrot.slane %v5035_v62, 1 }
 0x4ed   :  { %v5023_v15 = vadd.f32 %v5022_v37, %v5021_v3 }
 0x4ee   :  { %v5008_v5 = vrot.slane %v5007_v10, 1  ;;  %v4995_v47 = vadd.f32 %v4994_v55, %v4993_v33  ;;  %v5037_v53 = vadd.f32 %v5036_v9, %v5035_v62 }
 0x4ef   :  { %v5043_v26 = vadd.f32 1.0, %v5023_v15  ;;  %v5067_v49 = vadd.f32 1e-08, %v5023_v15 }
 0x4f0   :  { %v5009_v6 = vadd.f32 %v5008_v5, %v5007_v10  ;;  %v5039_v54 = vadd.f32 1.0, %v4995_v47  ;;  %v5045_v11 = vadd.f32 1.0, %v5037_v53  ;;  %v5063_v19 = vadd.f32 1e-08, %v4995_v47 }
 0x4f1   :  { %v5069_v1 = vadd.f32 1e-08, %v5037_v53 }
 0x4f2   :  { %v5041_v27 = vadd.f32 1.0, %v5009_v6  ;;  %5664 = vrcp.f32 %v5039_v54  ;;  %v5065_v22 = vadd.f32 1e-08, %v5009_v6 }
 0x4f4   :  { %5666 = vrcp.f32 %v5041_v27 }
 0x4f5   :  { %5668 = vrcp.f32 %v5043_v26 }
 0x4f6   :  { %5670 = vrcp.f32 %v5045_v11 }
 0x4f7   :  { %5672 = vrsqrt.f32 %v5063_v19 }
 0x4f8   :  { %5674 = vrsqrt.f32 %v5065_v22 }
 0x4f9   :  { %5676 = vrsqrt.f32 %v5067_v49 }
 0x4fa   :  { %5678 = vrsqrt.f32 %v5069_v1 }
 0x4ff   :  { %v5665_v44 = vpop.eup %5664 }
 0x500   :  { %v5055_v51 = vmul.f32 %v5665_v44, %v4995_v47 }
 0x501   :  { %v5667_v45 = vpop.eup %5666 }
 0x502   :  { %v5669_v42 = vpop.eup %5668  ;;  %v5057_v23 = vmul.f32 %v5667_v45, %v5009_v6 }
 0x503   :  { %v5671_v50 = vpop.eup %5670  ;;  %v5059_v7 = vmul.f32 %v5669_v42, %v5023_v15 }
 0x504   :  { %v5673_v41 = vpop.eup %5672  ;;  %v5061_v36 = vmul.f32 %v5671_v50, %v5037_v53 }
 0x505   :  { %v5675_v61 = vpop.eup %5674  ;;  %v5079_v4 = vmul.f32 %v5673_v41, %v5055_v51 }
 0x506   :  { %v5677_v38 = vpop.eup %5676  ;;  %v5081_v31 = vmul.f32 %v5675_v61, %v5057_v23 }
 0x507   :  { %v5679_v28 = vpop.eup %5678  ;;  %v5083_v13 = vmul.f32 %v5677_v38, %v5059_v7  ;;  %v5087_v20 = vmul.f32 %v5079_v4, %v10236_v39  ;;  %v5089_v25 = vmul.f32 %v5079_v4, %v10239_v63 }
 0x508   :  { %v5085_v59 = vmul.f32 %v5679_v28, %v5061_v36  ;;  %v5091_v8 = vmul.f32 %v5081_v31, %v10242_v2  ;;  %v5093_v56 = vmul.f32 %v5081_v31, %v10245_v30 }
 0x509   :  { %v5095_v24 = vmul.f32 %v5083_v13, %v10248_v58  ;;  %v5097_v52 = vmul.f32 %v5083_v13, %v10251_v0  ;;  %5103 = vst [vmem:[#allocation2 + $0x8] sm:$0xff] %v5087_v20  ;;  %5105 = vst [vmem:[#allocation2 + $0x18] sm:$0xff] %v5089_v25 }
 0x50a   :  { %v5099_v17 = vmul.f32 %v5085_v59, %v10254_v34  ;;  %v5101_v29 = vmul.f32 %v5085_v59, %v10257_v18  ;;  %5107 = vst [vmem:[#allocation2 + $0x28] sm:$0xff] %v5091_v8  ;;  %5109 = vst [vmem:[#allocation2 + $0x38] sm:$0xff] %v5093_v56 }
 0x50b   :  { %5111 = vst [vmem:[#allocation2 + $0x48] sm:$0xff] %v5095_v24  ;;  %5113 = vst [vmem:[#allocation2 + $0x58] sm:$0xff] %v5097_v52 }
 0x50c   :  { %5115 = vst [vmem:[#allocation2 + $0x68] sm:$0xff] %v5099_v17  ;;  %5117 = vst [vmem:[#allocation2 + $0x78] sm:$0xff] %v5101_v29 }
 0x50d   :  { %5691 = shalt.err (!%p5688_p4)
}
 0x50e   :  { %s5704_s25 = smov 256   ;;  %s5705_s26 = smov 16  }
 0x50f   :  { %5129 = dma.vmem_to_hbm [thread:$0]  %s5124_s23, 2048, %s10289_s3, [#allocation3], %s5704_s25, %s5704_s25, %s5705_s26  }
 0x510   :  { %5700 = dma.done.wait [#allocation3], 2048  }
 0x511   :  { %5701 = vsyncadd [#allocation3], 4294965248 }
 0x512   :  { %5133 = vsyncpa [#allocation3], 1 }

</bundles_post_ra>
